<compile_context>
chip_gen: v7x
topology: tpu7x:2x2x1
jax: 0.10.0
libtpu: 0.0.40
codegen_flags: <defaults>
</compile_context>

<pallas_src>
import functools

import jax
import jax.numpy as jnp
from jax import lax
from jax.experimental import pallas as pl
from jax.experimental.pallas import tpu as pltpu


# -----------------------------------------------------------------------------
# Kernel 1: global pooling prologue ('avg' mean or GeM p=3), emits bf16 (B, C).
# -----------------------------------------------------------------------------
def _pool_kernel(x_ref, o_ref, *, avg_type):
    """x_ref: (B, C, S) bf16 feature map (S = H*W); o_ref: (B, C) bf16."""
    x = x_ref[...].astype(jnp.float32)                          # (B, C, S)
    if avg_type == 'avg':
        # AvgPool2d((H, W), 1) over the full map == spatial mean.
        pooled = jnp.mean(x, axis=-1)                           # (B, C)
    else:
        # GeM (p fixed at 3 as in the module): avg(clamp(x, eps)^3)^(1/3).
        # Cube via VPU multiplies; float-exponent pow only on the (B, C) result.
        xc = jnp.maximum(x, 1e-6)
        pooled = jnp.mean(xc * xc * xc, axis=-1) ** (1.0 / 3.0)  # (B, C)
    # `.half()` + view(B, -1): 16-bit feature; bf16 is the MXU-native dtype.
    o_ref[...] = pooled.astype(jnp.bfloat16)


# -----------------------------------------------------------------------------
# Kernel 2: Linear tile with BN scale pre-folded into the weight + bias + ReLU.
# -----------------------------------------------------------------------------
def _head_kernel(feat_ref, w_ref, b_ref, o_ref):
    """feat_ref: (B, C) bf16 resident; w_ref: (C, tn) bf16 streamed;
    b_ref: (1, tn) fp32 folded BN/Linear bias; o_ref: (B, tn) fp16."""
    y = jnp.dot(feat_ref[...], w_ref[...],
                preferred_element_type=jnp.float32)             # (B, tn) fp32
    y = jnp.maximum(y + b_ref[...], 0.0)                        # bias + ReLU
    # Dropout is identity in eval mode; emit fp16 to match the `.half()` path.
    o_ref[...] = y.astype(jnp.float16)


# -----------------------------------------------------------------------------
# One-time parameter preprocessing (do NOT run per call).
# -----------------------------------------------------------------------------
def prepare_params(params, bn_eps=1e-5):
    """Fold inference-mode BatchNorm1d into the Linear:
         y = relu( feat @ (w * scale) + (beta + (b - mu) * scale) )
       with scale = gamma * rsqrt(var + eps).  Returns bf16 scaled weight and
       a (1, D) fp32 bias ready for the kernel."""
    gamma = params['gamma'].astype(jnp.float32)
    beta = params['beta'].astype(jnp.float32)
    mu = params['running_mean'].astype(jnp.float32)
    var = params['running_var'].astype(jnp.float32)
    b = params['b'].astype(jnp.float32)
    scale = gamma * lax.rsqrt(var + bn_eps)                      # (D,)
    bias = beta + (b - mu) * scale                               # (D,)
    w_scaled = (params['w'].astype(jnp.float32) * scale[None, :]).astype(jnp.bfloat16)
    return {'w': w_scaled, 'bias': bias.reshape(1, -1).astype(jnp.float32)}


# -----------------------------------------------------------------------------
# Forward wrapper.
# -----------------------------------------------------------------------------
def feature_extractor_forward(feat_map_nchw, prepared, *, avg_type='gem', tn=512):
    """feat_map_nchw : (B, C, H, W) backbone output (NCHW, PyTorch convention)
       prepared      : output of prepare_params (bf16 folded weight + fp32 bias)
       returns       : (B, D) fp16"""
    B, C, H, W = feat_map_nchw.shape
    D = prepared['w'].shape[1]
    S = H * W

    tn = min(tn, D)
    assert D % tn == 0, "output dim must be divisible by the tile width tn"

    # NCHW -> (B, C, S): pure reshape (no HBM transpose).  bf16 halves the
    # feature-map DMA; pooling math stays fp32 inside the kernel.
    x = feat_map_nchw.reshape(B, C, S).astype(jnp.bfloat16)

    # --- prologue: pooled (B, C) bf16 feature, computed once --------------
    # TODO(synk): for very large crop batches, tile this prologue over B.
    pooled = pl.pallas_call(
        functools.partial(_pool_kernel, avg_type=avg_type),
        out_shape=jax.ShapeDtypeStruct((B, C), jnp.bfloat16),
        grid_spec=pltpu.PrefetchScalarGridSpec(
            num_scalar_prefetch=0,
            grid=(1,),
            in_specs=[pl.BlockSpec((B, C, S), lambda i: (0, 0, 0))],
            out_specs=pl.BlockSpec((B, C), lambda i: (0, 0)),
        ),
    )(x)

    # --- head: stream (C, tn) weight tiles along a parallel D grid --------
    out = pl.pallas_call(
        _head_kernel,
        out_shape=jax.ShapeDtypeStruct((B, D), jnp.float16),
        grid_spec=pltpu.PrefetchScalarGridSpec(
            num_scalar_prefetch=0,
            grid=(D // tn,),
            in_specs=[
                # Pooled feature: constant block index -> resident, tiny.
                pl.BlockSpec((B, C), lambda j: (0, 0)),
                # Weight: streamed (C, tn) tiles, double-buffered by the pipeline.
                pl.BlockSpec((C, tn), lambda j: (0, j)),
                # Folded bias tile.
                pl.BlockSpec((1, tn), lambda j: (0, j)),
            ],
            out_specs=pl.BlockSpec((B, tn), lambda j: (0, j)),
        ),
        compiler_params=pltpu.CompilerParams(
            # Independent output tiles: shard across TensorCores on v7x.
            dimension_semantics=("parallel",),
            # v5e default scoped VMEM is 16 MiB; the double-buffered (C, 512)
            # bf16 weight tile at C=5120 is ~10 MiB, so raise the limit.
            vmem_limit_bytes=32 * 1024 * 1024,
        ),
    )(pooled, prepared['w'], prepared['bias'])
    return out


if __name__ == "__main__":
    # Small shapes consistent with the module: the real backbone produces a
    # (B, 5120, 8, 4) map -> pool -> 5120-dim feature -> Linear(5120, 2048).
    # Scaled down: C=512, spatial=(8, 4), D=512, tn=128 (grid of 4 weight tiles).
    B, C, H, W = 2, 512, 8, 4
    D, tn = 512, 128

    key = jax.random.PRNGKey(0)
    k_x, k_w, k_b, k_g, k_bt, k_m, k_v = jax.random.split(key, 7)

    # synthetic backbone output feature map (NCHW, like the PyTorch backbone)
    feat_map = jax.random.normal(k_x, (B, C, H, W), jnp.float32)
    params = {
        'w': jax.random.normal(k_w, (C, D), jnp.float32) * 0.02,
        'b': jax.random.normal(k_b, (D,), jnp.float32) * 0.01,
        'gamma': jnp.abs(jax.random.normal(k_g, (D,), jnp.float32) * 0.1) + 1.0,
        'beta': jax.random.normal(k_bt, (D,), jnp.float32) * 0.05,
        'running_mean': jax.random.normal(k_m, (D,), jnp.float32) * 0.05,
        'running_var': jnp.abs(jax.random.normal(k_v, (D,), jnp.float32) * 0.1) + 1.0,
    }

    # One-time preprocessing (weight cast + BN fold happen here, not per call).
    prepared = prepare_params(params)

    def ref_forward(fm, avg_type):
        """Pure-JAX reference mirroring the kernel's dtype choices."""
        xr = fm.reshape(B, C, H * W).astype(jnp.bfloat16).astype(jnp.float32)
        if avg_type == 'avg':
            p = jnp.mean(xr, axis=-1)
        else:
            xc = jnp.maximum(xr, 1e-6)
            p = jnp.mean(xc * xc * xc, axis=-1) ** (1.0 / 3.0)
        feat = p.astype(jnp.bfloat16).astype(jnp.float32)
        y = feat @ prepared['w'].astype(jnp.float32) + prepared['bias']
        return jnp.maximum(y, 0.0).astype(jnp.float16)

    for avg_type in ('gem', 'avg'):
        out = jax.block_until_ready(
            feature_extractor_forward(feat_map, prepared, avg_type=avg_type, tn=tn))
        assert out.shape == (B, D) and out.dtype == jnp.float16
        ref = ref_forward(feat_map, avg_type)
        assert jnp.allclose(out.astype(jnp.float32), ref.astype(jnp.float32),
                            rtol=2e-2, atol=2e-2), f"mismatch vs reference ({avg_type})"

    print("KERNEL_OK")
</pallas_src>

<mosaic_0001>
module attributes {stable_mosaic.version = 11 : i64} {
  func.func @_pool_kernel(%arg0: i32, %arg1: memref<2x512x32xbf16, #tpu.memory_space<vmem>>, %arg2: memref<2x512xbf16, #tpu.memory_space<vmem>>) attributes {dimension_semantics = [#tpu.dimension_semantics<arbitrary>], iteration_bounds = array<i64: 1>, scalar_prefetch = 0 : i64, scratch_operands = 0 : i64, tpu.core_type = #tpu.core_type<tc>, window_params = [{pipeline_mode = #tpu.pipeline_mode<synchronous>, transform_indices = @transform_0, window_bounds = array<i64: 2, 512, 32>}, {pipeline_mode = #tpu.pipeline_mode<synchronous>, transform_indices = @transform_1, window_bounds = array<i64: 2, 512>}]} {
    %c0 = arith.constant 0 : index
    %c0_0 = arith.constant 0 : index
    %c0_1 = arith.constant 0 : index
    %0 = vector.load %arg1[%c0, %c0_0, %c0_1] : memref<2x512x32xbf16, #tpu.memory_space<vmem>>, vector<2x512x32xbf16>
    %1 = arith.extf %0 : vector<2x512x32xbf16> to vector<2x512x32xf32>
    %cst = arith.constant 9.99999997E-7 : f32
    %2 = vector.broadcast %cst : f32 to vector<2x512x32xf32>
    %3 = arith.maximumf %1, %2 : vector<2x512x32xf32>
    %4 = arith.mulf %3, %3 : vector<2x512x32xf32>
    %5 = arith.mulf %4, %3 : vector<2x512x32xf32>
    %cst_2 = arith.constant dense<0.000000e+00> : vector<2x512xf32>
    %6 = vector.multi_reduction <add>, %5, %cst_2 [2] : vector<2x512x32xf32> to vector<2x512xf32>
    %cst_3 = arith.constant 3.200000e+01 : f32
    %7 = vector.broadcast %cst_3 : f32 to vector<2x512xf32>
    %8 = arith.divf %6, %7 : vector<2x512xf32>
    %cst_4 = arith.constant 0.333333343 : f32
    %9 = vector.broadcast %cst_4 : f32 to vector<2x512xf32>
    %10 = math.powf %8, %9 : vector<2x512xf32>
    %11 = arith.truncf %10 : vector<2x512xf32> to vector<2x512xbf16>
    %c0_5 = arith.constant 0 : index
    %c0_6 = arith.constant 0 : index
    %12 = vector.load %arg2[%c0_5, %c0_6] : memref<2x512xbf16, #tpu.memory_space<vmem>>, vector<2x512xbf16>
    tpu.vector_store %arg2[%c0_5, %c0_6], %11 {strides = array<i32>} : memref<2x512xbf16, #tpu.memory_space<vmem>>, vector<2x512xbf16>,
    return
  }
  func.func @transform_0(%arg0: i32) -> (i32, i32, i32) {
    %c0_i32 = arith.constant 0 : i32
    %c0_i32_0 = arith.constant 0 : i32
    %c0_i32_1 = arith.constant 0 : i32
    %c0_i32_2 = arith.constant 0 : i32
    return %c0_i32, %c0_i32_0, %c0_i32_1 : i32, i32, i32
  }
  func.func @transform_1(%arg0: i32) -> (i32, i32) {
    %c0_i32 = arith.constant 0 : i32
    %c0_i32_0 = arith.constant 0 : i32
    %c0_i32_1 = arith.constant 0 : i32
    return %c0_i32, %c0_i32_0 : i32, i32
  }
}

</mosaic_0001>

<bundles_post_ra>
// kernel: tpu_custom_call.1
= control target key start
LH: loop header
LB: loop body
LE: loop exit
PB: predicated region body
PF: predicated region fallthrough
CT: control target
= control target key end

     0   :  { %vm16848_vm0 = vcmask 261120   ;;  %s16846_s0 = inlined_call_operand.vmem [shape: bf16[2,512,32], index: 0, kind: input, shape index: {}]   ;;  %s16847_s1 = inlined_call_operand.hbm [shape: bf16[2,512], index: 1, kind: output, shape index: {}]  }
   0x1   :  { %v8017_v0 = vld [vmem:[%s16846_s0 + $0x8] sm:$0xff]   ;;  %v7762_v1 = vld [vmem:[%s16846_s0] sm:$0xff]   ;;  %v8018_v2 = vld [vmem:[%s16846_s0 + $0x10] sm:$0xff]  }
   0x2   :  { %v7767_v3 = vunpack.c.l.bf16 %v8017_v0  ;;  %v7763_v4 = vunpack.c.l.bf16 %v7762_v1  ;;  %v7768_v5 = vunpack.c.h.bf16 %v8017_v0  ;;  %v7764_v6 = vunpack.c.h.bf16 %v7762_v1  ;;  %v8019_v7 = vld [vmem:[%s16846_s0 + $0x18] sm:$0xff]   ;;  %v8020_v8 = vld [vmem:[%s16846_s0 + $0x20] sm:$0xff]   ;;  %v8021_v33 = vld [vmem:[%s16846_s0 + $0x28] sm:$0xff]  }
   0x3   :  { %v7772_v9 = vunpack.c.h.bf16 %v8018_v2  ;;  %v7771_v10 = vunpack.c.l.bf16 %v8018_v2  ;;  %v7776_v11 = vunpack.c.h.bf16 %v8019_v7  ;;  %v7775_v12 = vunpack.c.l.bf16 %v8019_v7  ;;  %v8022_v41 = vld [vmem:[%s16846_s0 + $0x30] sm:$0xff]   ;;  %v8023_v53 = vld [vmem:[%s16846_s0 + $0x38] sm:$0xff]  }
   0x4   :  { %v267_v13 = vmax.f32 %v7767_v3, 1e-06  ;;  %v265_v14 = vmax.f32 %v7763_v4, 1e-06  ;;  %v268_v15 = vmax.f32 %v7768_v5, 1e-06  ;;  %v7780_v19 = vunpack.c.h.bf16 %v8020_v8 }
   0x5   :  { %v266_v16 = vmax.f32 %v7764_v6, 1e-06  ;;  %v270_v17 = vmax.f32 %v7772_v9, 1e-06  ;;  %v269_v18 = vmax.f32 %v7771_v10, 1e-06  ;;  %v7779_v31 = vunpack.c.l.bf16 %v8020_v8 }
   0x6   :  { %v395_v20 = vmul.f32 %v267_v13, %v267_v13  ;;  %v393_v21 = vmul.f32 %v265_v14, %v265_v14  ;;  %v396_v22 = vmul.f32 %v268_v15, %v268_v15  ;;  %v272_v23 = vmax.f32 %v7776_v11, 1e-06 }
   0x7   :  { %v394_v24 = vmul.f32 %v266_v16, %v266_v16  ;;  %v398_v25 = vmul.f32 %v270_v17, %v270_v17  ;;  %v397_v26 = vmul.f32 %v269_v18, %v269_v18  ;;  %v271_v27 = vmax.f32 %v7775_v12, 1e-06 }
   0x8   :  { %v523_v28 = vmul.f32 %v395_v20, %v267_v13  ;;  %v521_v29 = vmul.f32 %v393_v21, %v265_v14  ;;  %v524_v30 = vmul.f32 %v396_v22, %v268_v15  ;;  %v400_v36 = vmul.f32 %v272_v23, %v272_v23 }
   0x9   :  { %v522_v32 = vmul.f32 %v394_v24, %v266_v16  ;;  %v526_v38 = vmul.f32 %v398_v25, %v270_v17  ;;  %v525_v39 = vmul.f32 %v397_v26, %v269_v18  ;;  %v399_v40 = vmul.f32 %v271_v27, %v271_v27 }
   0xa   :  { %v656_v34 = vsel %vm16848_vm0, %v523_v28, 0.0  ;;  %v650_v35 = vsel %vm16848_vm0, %v521_v29, 0.0  ;;  %v659_v37 = vsel %vm16848_vm0, %v524_v30, 0.0  ;;  %v274_v43 = vmax.f32 %v7780_v19, 1e-06 }
   0xb   :  { %657 = vadd.xlane.f32.xlu1 %v656_v34  ;;  %651 = vadd.xlane.f32.xlu0 %v650_v35  ;;  %v653_v42 = vsel %vm16848_vm0, %v522_v32, 0.0  ;;  %v273_v44 = vmax.f32 %v7779_v31, 1e-06  ;;  %v7784_v45 = vunpack.c.h.bf16 %v8021_v33  ;;  %v7783_v46 = vunpack.c.l.bf16 %v8021_v33 }
   0xc   :  { %v528_v47 = vmul.f32 %v400_v36, %v272_v23  ;;  %v7788_v48 = vunpack.c.h.bf16 %v8022_v41  ;;  %v665_v49 = vsel %vm16848_vm0, %v526_v38, 0.0  ;;  %v662_v50 = vsel %vm16848_vm0, %v525_v39, 0.0 }
   0xd   :  { %v276_v51 = vmax.f32 %v7784_v45, 1e-06  ;;  %v7787_v52 = vunpack.c.l.bf16 %v8022_v41  ;;  %v527_v54 = vmul.f32 %v399_v40, %v271_v27  ;;  %v402_v55 = vmul.f32 %v274_v43, %v274_v43 }
   0xe   :  { %v401_v56 = vmul.f32 %v273_v44, %v273_v44  ;;  %v275_v57 = vmax.f32 %v7783_v46, 1e-06 }
   0xf   :  { %660 = vadd.xlane.f32.xlu1 %v659_v37  ;;  %654 = vadd.xlane.f32.xlu0 %v653_v42 }
  0x10   :  { %6 = vsyncpa [#allocation3], 0  ;;  %v278_v58 = vmax.f32 %v7788_v48, 1e-06  ;;  %v7792_v59 = vunpack.c.h.bf16 %v8023_v53  ;;  %v671_v60 = vsel %vm16848_vm0, %v528_v47, 0.0  ;;  %v404_v61 = vmul.f32 %v276_v51, %v276_v51  ;;  %v8024_v4 = vld [vmem:[%s16846_s0 + $0x40] sm:$0xff]  }
  0x11   :  { %v277_v62 = vmax.f32 %v7787_v52, 1e-06  ;;  %v7791_v63 = vunpack.c.l.bf16 %v8023_v53  ;;  %v668_v0 = vsel %vm16848_vm0, %v527_v54, 0.0  ;;  %v530_v1 = vmul.f32 %v402_v55, %v274_v43  ;;  %v8025_v15 = vld [vmem:[%s16846_s0 + $0x48] sm:$0xff]   ;;  %v8026_v22 = vld [vmem:[%s16846_s0 + $0x50] sm:$0xff]   ;;  %v8027_v33 = vld [vmem:[%s16846_s0 + $0x58] sm:$0xff]  }
  0x12   :  { %v529_v2 = vmul.f32 %v401_v56, %v273_v44  ;;  %v403_v3 = vmul.f32 %v275_v57, %v275_v57  ;;  %v406_v5 = vmul.f32 %v278_v58, %v278_v58  ;;  %v280_v6 = vmax.f32 %v7792_v59, 1e-06  ;;  %v8028_v48 = vld [vmem:[%s16846_s0 + $0x60] sm:$0xff]   ;;  %v8029_v59 = vld [vmem:[%s16846_s0 + $0x68] sm:$0xff]  }
  0x13   :  { %666 = vadd.xlane.f32.xlu1 %v665_v49  ;;  %663 = vadd.xlane.f32.xlu0 %v662_v50  ;;  %v532_v7 = vmul.f32 %v404_v61, %v276_v51  ;;  %v405_v8 = vmul.f32 %v277_v62, %v277_v62  ;;  %v279_v9 = vmax.f32 %v7791_v63, 1e-06  ;;  %v7796_v10 = vunpack.c.h.bf16 %v8024_v4 }
  0x14   :  { %v677_v11 = vsel %vm16848_vm0, %v530_v1, 0.0  ;;  %v674_v12 = vsel %vm16848_vm0, %v529_v2, 0.0  ;;  %v531_v13 = vmul.f32 %v403_v3, %v275_v57  ;;  %v7795_v14 = vunpack.c.l.bf16 %v8024_v4  ;;  %v8030_v2 = vld [vmem:[%s16846_s0 + $0x70] sm:$0xff]  }
  0x15   :  { %v534_v16 = vmul.f32 %v406_v5, %v278_v58  ;;  %v408_v17 = vmul.f32 %v280_v6, %v280_v6  ;;  %v683_v18 = vsel %vm16848_vm0, %v532_v7, 0.0  ;;  %v533_v19 = vmul.f32 %v405_v8, %v277_v62 }
  0x16   :  { %v282_v20 = vmax.f32 %v7796_v10, 1e-06  ;;  %v7800_v21 = vunpack.c.h.bf16 %v8025_v15  ;;  %v680_v23 = vsel %vm16848_vm0, %v531_v13, 0.0  ;;  %v407_v24 = vmul.f32 %v279_v9, %v279_v9  ;;  %v8031_v13 = vld [vmem:[%s16846_s0 + $0x78] sm:$0xff]  }
  0x17   :  { %672 = vadd.xlane.f32.xlu1 %v671_v60  ;;  %669 = vadd.xlane.f32.xlu0 %v668_v0  ;;  %v281_v25 = vmax.f32 %v7795_v14, 1e-06  ;;  %v7799_v26 = vunpack.c.l.bf16 %v8025_v15  ;;  %v536_v27 = vmul.f32 %v408_v17, %v280_v6  ;;  %v7804_v28 = vunpack.c.h.bf16 %v8026_v22 }
  0x18   :  { %v689_v29 = vsel %vm16848_vm0, %v534_v16, 0.0  ;;  %v410_v30 = vmul.f32 %v282_v20, %v282_v20  ;;  %v284_v31 = vmax.f32 %v7800_v21, 1e-06  ;;  %v7803_v32 = vunpack.c.l.bf16 %v8026_v22 }
  0x19   :  { %v686_v34 = vsel %vm16848_vm0, %v533_v19, 0.0  ;;  %v535_v35 = vmul.f32 %v407_v24, %v279_v9  ;;  %v409_v36 = vmul.f32 %v281_v25, %v281_v25  ;;  %v283_v37 = vmax.f32 %v7799_v26, 1e-06 }
  0x1a   :  { %v286_v38 = vmax.f32 %v7804_v28, 1e-06  ;;  %v7808_v39 = vunpack.c.h.bf16 %v8027_v33  ;;  %v695_v40 = vsel %vm16848_vm0, %v536_v27, 0.0  ;;  %v538_v41 = vmul.f32 %v410_v30, %v282_v20  ;;  %v8032_v28 = vld [vmem:[%s16846_s0 + $0x80] sm:$0xff]  }
  0x1b   :  { %678 = vadd.xlane.f32.xlu1 %v677_v11  ;;  %675 = vadd.xlane.f32.xlu0 %v674_v12  ;;  %v412_v42 = vmul.f32 %v284_v31, %v284_v31  ;;  %v285_v43 = vmax.f32 %v7803_v32, 1e-06  ;;  %v692_v44 = vsel %vm16848_vm0, %v535_v35, 0.0  ;;  %v537_v45 = vmul.f32 %v409_v36, %v281_v25 }
  0x1c   :  { %v411_v46 = vmul.f32 %v283_v37, %v283_v37  ;;  %v7807_v47 = vunpack.c.l.bf16 %v8027_v33  ;;  %v414_v49 = vmul.f32 %v286_v38, %v286_v38  ;;  %v288_v50 = vmax.f32 %v7808_v39, 1e-06  ;;  %v8033_v39 = vld [vmem:[%s16846_s0 + $0x88] sm:$0xff]  }
  0x1d   :  { %v701_v51 = vsel %vm16848_vm0, %v538_v41, 0.0  ;;  %v540_v52 = vmul.f32 %v412_v42, %v284_v31  ;;  %v413_v53 = vmul.f32 %v285_v43, %v285_v43  ;;  %v7812_v54 = vunpack.c.h.bf16 %v8028_v48 }
  0x1e   :  { %v698_v55 = vsel %vm16848_vm0, %v537_v45, 0.0  ;;  %v539_v56 = vmul.f32 %v411_v46, %v283_v37  ;;  %v287_v57 = vmax.f32 %v7807_v47, 1e-06  ;;  %v7811_v58 = vunpack.c.l.bf16 %v8028_v48  ;;  %v8034_v46 = vld [vmem:[%s16846_s0 + $0x90] sm:$0xff]  }
  0x1f   :  { %684 = vadd.xlane.f32.xlu1 %v683_v18  ;;  %681 = vadd.xlane.f32.xlu0 %v680_v23  ;;  %v542_v60 = vmul.f32 %v414_v49, %v286_v38  ;;  %v416_v61 = vmul.f32 %v288_v50, %v288_v50  ;;  %v707_v62 = vsel %vm16848_vm0, %v540_v52, 0.0  ;;  %v541_v63 = vmul.f32 %v413_v53, %v285_v43 }
  0x20   :  { %v290_v0 = vmax.f32 %v7812_v54, 1e-06  ;;  %v7816_v1 = vunpack.c.h.bf16 %v8029_v59  ;;  %v704_v3 = vsel %vm16848_vm0, %v539_v56, 0.0  ;;  %v415_v4 = vmul.f32 %v287_v57, %v287_v57 }
  0x21   :  { %v289_v5 = vmax.f32 %v7811_v58, 1e-06  ;;  %v7815_v6 = vunpack.c.l.bf16 %v8029_v59  ;;  %v544_v7 = vmul.f32 %v416_v61, %v288_v50  ;;  %v7820_v8 = vunpack.c.h.bf16 %v8030_v2 }
  0x22   :  { %v713_v9 = vsel %vm16848_vm0, %v542_v60, 0.0  ;;  %v418_v10 = vmul.f32 %v290_v0, %v290_v0  ;;  %v292_v11 = vmax.f32 %v7816_v1, 1e-06  ;;  %v7819_v12 = vunpack.c.l.bf16 %v8030_v2 }
  0x23   :  { %690 = vadd.xlane.f32.xlu1 %v689_v29  ;;  %687 = vadd.xlane.f32.xlu0 %v686_v34  ;;  %v710_v14 = vsel %vm16848_vm0, %v541_v63, 0.0  ;;  %v543_v15 = vmul.f32 %v415_v4, %v287_v57  ;;  %v417_v16 = vmul.f32 %v289_v5, %v289_v5  ;;  %v291_v17 = vmax.f32 %v7815_v6, 1e-06  ;;  %v8035_v57 = vld [vmem:[%s16846_s0 + $0x98] sm:$0xff]  }
  0x24   :  { %v294_v18 = vmax.f32 %v7820_v8, 1e-06  ;;  %v7824_v19 = vunpack.c.h.bf16 %v8031_v13  ;;  %v719_v20 = vsel %vm16848_vm0, %v544_v7, 0.0  ;;  %v546_v21 = vmul.f32 %v418_v10, %v290_v0  ;;  %v8036_v8 = vld [vmem:[%s16846_s0 + $0xa0] sm:$0xff]  }
  0x25   :  { %v420_v22 = vmul.f32 %v292_v11, %v292_v11  ;;  %v293_v23 = vmax.f32 %v7819_v12, 1e-06  ;;  %v716_v24 = vsel %vm16848_vm0, %v543_v15, 0.0  ;;  %v545_v25 = vmul.f32 %v417_v16, %v289_v5 }
  0x26   :  { %v419_v26 = vmul.f32 %v291_v17, %v291_v17  ;;  %v7823_v27 = vunpack.c.l.bf16 %v8031_v13  ;;  %v422_v29 = vmul.f32 %v294_v18, %v294_v18  ;;  %v296_v30 = vmax.f32 %v7824_v19, 1e-06  ;;  %v8037_v19 = vld [vmem:[%s16846_s0 + $0xa8] sm:$0xff]  }
  0x27   :  { %696 = vadd.xlane.f32.xlu1 %v695_v40  ;;  %693 = vadd.xlane.f32.xlu0 %v692_v44  ;;  %v725_v31 = vsel %vm16848_vm0, %v546_v21, 0.0  ;;  %v548_v32 = vmul.f32 %v420_v22, %v292_v11  ;;  %v421_v33 = vmul.f32 %v293_v23, %v293_v23  ;;  %v7828_v34 = vunpack.c.h.bf16 %v8032_v28 }
  0x28   :  { %v722_v35 = vsel %vm16848_vm0, %v545_v25, 0.0  ;;  %v547_v36 = vmul.f32 %v419_v26, %v291_v17  ;;  %v295_v37 = vmax.f32 %v7823_v27, 1e-06  ;;  %v7827_v38 = vunpack.c.l.bf16 %v8032_v28  ;;  %v8038_v26 = vld [vmem:[%s16846_s0 + $0xb0] sm:$0xff]  }
  0x29   :  { %v550_v40 = vmul.f32 %v422_v29, %v294_v18  ;;  %v424_v41 = vmul.f32 %v296_v30, %v296_v30  ;;  %v731_v42 = vsel %vm16848_vm0, %v548_v32, 0.0  ;;  %v549_v43 = vmul.f32 %v421_v33, %v293_v23 }
  0x2a   :  { %v298_v44 = vmax.f32 %v7828_v34, 1e-06  ;;  %v7832_v45 = vunpack.c.h.bf16 %v8033_v39  ;;  %v728_v47 = vsel %vm16848_vm0, %v547_v36, 0.0  ;;  %v423_v48 = vmul.f32 %v295_v37, %v295_v37 }
  0x2b   :  { %702 = vadd.xlane.f32.xlu1 %v701_v51  ;;  %699 = vadd.xlane.f32.xlu0 %v698_v55  ;;  %v297_v49 = vmax.f32 %v7827_v38, 1e-06  ;;  %v7831_v50 = vunpack.c.l.bf16 %v8033_v39  ;;  %v552_v51 = vmul.f32 %v424_v41, %v296_v30  ;;  %v7836_v52 = vunpack.c.h.bf16 %v8034_v46 }
  0x2c   :  { %v737_v53 = vsel %vm16848_vm0, %v550_v40, 0.0  ;;  %v426_v54 = vmul.f32 %v298_v44, %v298_v44  ;;  %v300_v55 = vmax.f32 %v7832_v45, 1e-06  ;;  %v7835_v56 = vunpack.c.l.bf16 %v8034_v46 }
  0x2d   :  { %v734_v58 = vsel %vm16848_vm0, %v549_v43, 0.0  ;;  %v551_v59 = vmul.f32 %v423_v48, %v295_v37  ;;  %v425_v60 = vmul.f32 %v297_v49, %v297_v49  ;;  %v299_v61 = vmax.f32 %v7831_v50, 1e-06  ;;  %v8039_v37 = vld [vmem:[%s16846_s0 + $0xb8] sm:$0xff]  }
  0x2e   :  { %v7840_v63 = vunpack.c.h.bf16 %v8035_v57  ;;  %v743_v0 = vsel %vm16848_vm0, %v552_v51, 0.0  ;;  %v554_v1 = vmul.f32 %v426_v54, %v298_v44  ;;  %v428_v2 = vmul.f32 %v300_v55, %v300_v55 }
  0x2f   :  { %708 = vadd.xlane.f32.xlu1 %v707_v62  ;;  %705 = vadd.xlane.f32.xlu0 %v704_v3  ;;  %v302_v62 = vmax.f32 %v7836_v52, 1e-06  ;;  %v301_v3 = vmax.f32 %v7835_v56, 1e-06  ;;  %v740_v4 = vsel %vm16848_vm0, %v551_v59, 0.0  ;;  %v553_v5 = vmul.f32 %v425_v60, %v297_v49  ;;  %v8040_v52 = vld [vmem:[%s16846_s0 + $0xc0] sm:$0xff]  }
  0x30   :  { %v427_v6 = vmul.f32 %v299_v61, %v299_v61  ;;  %v7839_v7 = vunpack.c.l.bf16 %v8035_v57  ;;  %v304_v10 = vmax.f32 %v7840_v63, 1e-06  ;;  %v749_v11 = vsel %vm16848_vm0, %v554_v1, 0.0  ;;  %v8041_v63 = vld [vmem:[%s16846_s0 + $0xc8] sm:$0xff]  }
  0x31   :  { %v556_v12 = vmul.f32 %v428_v2, %v300_v55  ;;  %v429_v13 = vmul.f32 %v301_v3, %v301_v3  ;;  %v746_v15 = vsel %vm16848_vm0, %v553_v5, 0.0  ;;  %v7843_v18 = vunpack.c.l.bf16 %v8036_v8 }
  0x32   :  { %v555_v16 = vmul.f32 %v427_v6, %v299_v61  ;;  %v303_v17 = vmax.f32 %v7839_v7, 1e-06  ;;  %v432_v21 = vmul.f32 %v304_v10, %v304_v10  ;;  %v7848_v25 = vunpack.c.h.bf16 %v8037_v19  ;;  %v8042_v6 = vld [vmem:[%s16846_s0 + $0xd0] sm:$0xff]  }
  0x33   :  { %714 = vadd.xlane.f32.xlu1 %v713_v9  ;;  %711 = vadd.xlane.f32.xlu0 %v710_v14  ;;  %v430_v9 = vmul.f32 %v302_v62, %v302_v62  ;;  %v7844_v14 = vunpack.c.h.bf16 %v8036_v8  ;;  %v755_v22 = vsel %vm16848_vm0, %v556_v12, 0.0  ;;  %v557_v23 = vmul.f32 %v429_v13, %v301_v3 }
  0x34   :  { %v752_v27 = vsel %vm16848_vm0, %v555_v16, 0.0  ;;  %v431_v28 = vmul.f32 %v303_v17, %v303_v17  ;;  %v305_v29 = vmax.f32 %v7843_v18, 1e-06  ;;  %v7847_v30 = vunpack.c.l.bf16 %v8037_v19 }
  0x35   :  { %v7852_v32 = vunpack.c.h.bf16 %v8038_v26  ;;  %v7851_v36 = vunpack.c.l.bf16 %v8038_v26  ;;  %v758_v38 = vsel %vm16848_vm0, %v557_v23, 0.0  ;;  %v7856_v43 = vunpack.c.h.bf16 %v8039_v37 }
  0x36   :  { %v559_v39 = vmul.f32 %v431_v28, %v303_v17  ;;  %v433_v40 = vmul.f32 %v305_v29, %v305_v29  ;;  %v307_v41 = vmax.f32 %v7847_v30, 1e-06  ;;  %v7855_v51 = vunpack.c.l.bf16 %v8039_v37  ;;  %v8043_v17 = vld [vmem:[%s16846_s0 + $0xd8] sm:$0xff]  }
  0x37   :  { %720 = vadd.xlane.f32.xlu1 %v719_v20  ;;  %717 = vadd.xlane.f32.xlu0 %v716_v24  ;;  %v558_v20 = vmul.f32 %v430_v9, %v302_v62  ;;  %v306_v24 = vmax.f32 %v7844_v14, 1e-06  ;;  %v312_v54 = vmax.f32 %v7856_v43, 1e-06  ;;  %v7859_v62 = vunpack.c.l.bf16 %v8040_v52  ;;  %v8045_v43 = vld [vmem:[%s16846_s0 + $0xe8] sm:$0xff]  }
  0x38   :  { %v764_v48 = vsel %vm16848_vm0, %v559_v39, 0.0  ;;  %v561_v49 = vmul.f32 %v433_v40, %v305_v29  ;;  %v435_v50 = vmul.f32 %v307_v41, %v307_v41  ;;  %v311_v61 = vmax.f32 %v7855_v51, 1e-06 }
  0x39   :  { %v761_v33 = vsel %vm16848_vm0, %v558_v20, 0.0  ;;  %v434_v34 = vmul.f32 %v306_v24, %v306_v24  ;;  %v440_v1 = vmul.f32 %v312_v54, %v312_v54  ;;  %v7864_v5 = vunpack.c.h.bf16 %v8041_v63 }
  0x3a   :  { %v770_v59 = vsel %vm16848_vm0, %v561_v49, 0.0  ;;  %v563_v60 = vmul.f32 %v435_v50, %v307_v41  ;;  %v439_v8 = vmul.f32 %v311_v61, %v311_v61  ;;  %v313_v9 = vmax.f32 %v7859_v62, 1e-06  ;;  %v8046_v50 = vld [vmem:[%s16846_s0 + $0xf0] sm:$0xff]  }
  0x3b   :  { %726 = vadd.xlane.f32.xlu1 %v725_v31  ;;  %723 = vadd.xlane.f32.xlu0 %v722_v35  ;;  %v560_v31 = vmul.f32 %v432_v21, %v304_v10  ;;  %v308_v35 = vmax.f32 %v7848_v25, 1e-06  ;;  %v562_v45 = vmul.f32 %v434_v34, %v306_v24  ;;  %v7863_v10 = vunpack.c.l.bf16 %v8041_v63 }
  0x3c   :  { %v776_v7 = vsel %vm16848_vm0, %v563_v60, 0.0  ;;  %v7868_v12 = vunpack.c.h.bf16 %v8042_v6  ;;  %v7867_v16 = vunpack.c.l.bf16 %v8042_v6  ;;  %v567_v19 = vmul.f32 %v439_v8, %v311_v61  ;;  %v8047_v61 = vld [vmem:[%s16846_s0 + $0xf8] sm:$0xff]  }
  0x3d   :  { %v767_v44 = vsel %vm16848_vm0, %v560_v31, 0.0  ;;  %v436_v46 = vmul.f32 %v308_v35, %v308_v35  ;;  %v773_v55 = vsel %vm16848_vm0, %v562_v45, 0.0  ;;  %v441_v20 = vmul.f32 %v313_v9, %v313_v9 }
  0x3e   :  { %v315_v21 = vmax.f32 %v7863_v10, 1e-06  ;;  %v7872_v23 = vunpack.c.h.bf16 %v8043_v17  ;;  %v317_v26 = vmax.f32 %v7867_v16, 1e-06  ;;  %v788_v29 = vsel %vm16848_vm0, %v567_v19, 0.0  ;;  %v8049_v19 = vld [vmem:[%s16846_s0 + $0x108] sm:$0xff]  }
  0x3f   :  { %732 = vadd.xlane.f32.xlu1 %v731_v42  ;;  %729 = vadd.xlane.f32.xlu0 %v728_v47  ;;  %v310_v42 = vmax.f32 %v7852_v32, 1e-06  ;;  %v309_v47 = vmax.f32 %v7851_v36, 1e-06  ;;  %v564_v56 = vmul.f32 %v436_v46, %v308_v35  ;;  %v569_v30 = vmul.f32 %v441_v20, %v313_v9  ;;  %v8044_v32 = vld [vmem:[%s16846_s0 + $0xe0] sm:$0xff]  }
  0x40   :  { %v443_v31 = vmul.f32 %v315_v21, %v315_v21  ;;  %v320_v34 = vmax.f32 %v7872_v23, 1e-06  ;;  %v445_v37 = vmul.f32 %v317_v26, %v317_v26  ;;  %v7876_v41 = vunpack.c.h.bf16 %v8044_v32 }
  0x41   :  { %v437_v57 = vmul.f32 %v309_v47, %v309_v47  ;;  %v779_v2 = vsel %vm16848_vm0, %v564_v56, 0.0  ;;  %v794_v39 = vsel %vm16848_vm0, %v569_v30, 0.0  ;;  %v7880_v49 = vunpack.c.h.bf16 %v8045_v43 }
  0x42   :  { %v571_v40 = vmul.f32 %v443_v31, %v315_v21  ;;  %v448_v45 = vmul.f32 %v320_v34, %v320_v34  ;;  %v7884_v56 = vunpack.c.h.bf16 %v8046_v50  ;;  %v7883_v60 = vunpack.c.l.bf16 %v8046_v50 }
  0x43   :  { %738 = vadd.xlane.f32.xlu1 %v737_v53  ;;  %735 = vadd.xlane.f32.xlu0 %v734_v58  ;;  %v438_v53 = vmul.f32 %v310_v42, %v310_v42  ;;  %v7860_v58 = vunpack.c.h.bf16 %v8040_v52  ;;  %v565_v3 = vmul.f32 %v437_v57, %v309_v47  ;;  %v573_v47 = vmul.f32 %v445_v37, %v317_v26 }
  0x44   :  { %v800_v51 = vsel %vm16848_vm0, %v571_v40, 0.0  ;;  %v322_v52 = vmax.f32 %v7876_v41, 1e-06  ;;  %v325_v6 = vmax.f32 %v7883_v60, 1e-06 }
  0x45   :  { %v782_v18 = vsel %vm16848_vm0, %v565_v3, 0.0  ;;  %v7888_v3 = vunpack.c.h.bf16 %v8047_v61 }
  0x46   :  { %v450_v63 = vmul.f32 %v322_v52, %v322_v52  ;;  %v453_v16 = vmul.f32 %v325_v6, %v325_v6 }
  0x47   :  { %744 = vadd.xlane.f32.xlu1 %v743_v0  ;;  %741 = vadd.xlane.f32.xlu0 %v740_v4  ;;  %v566_v0 = vmul.f32 %v438_v53, %v310_v42  ;;  %v314_v4 = vmax.f32 %v7860_v58, 1e-06  ;;  %v7875_v42 = vunpack.c.l.bf16 %v8044_v32  ;;  %v806_v58 = vsel %vm16848_vm0, %v573_v47, 0.0  ;;  %v8051_v32 = vld [vmem:[%s16846_s0 + $0x118] sm:$0xff]  }
  0x48   :  { %v578_v9 = vmul.f32 %v450_v63, %v322_v52  ;;  %v8054_v63 = vld [vmem:[%s16846_s0 + $0x130] sm:$0xff]  }
  0x49   :  { %v785_v13 = vsel %vm16848_vm0, %v566_v0, 0.0  ;;  %v442_v14 = vmul.f32 %v314_v4, %v314_v4  ;;  %v321_v53 = vmax.f32 %v7875_v42, 1e-06 }
  0x4a   :  { %v821_v20 = vsel %vm16848_vm0, %v578_v9, 0.0  ;;  %v7916_v9 = vunpack.c.h.bf16 %v8054_v63 }
  0x4b   :  { %750 = vadd.xlane.f32.xlu1 %v749_v11  ;;  %747 = vadd.xlane.f32.xlu0 %v746_v15  ;;  %v568_v11 = vmul.f32 %v440_v1, %v312_v54  ;;  %v316_v15 = vmax.f32 %v7864_v5, 1e-06  ;;  %v570_v24 = vmul.f32 %v442_v14, %v314_v4  ;;  %v7879_v54 = vunpack.c.l.bf16 %v8045_v43 }
  0x4c   :  { %v449_v0 = vmul.f32 %v321_v53, %v321_v53  ;;  %v328_v14 = vmax.f32 %v7888_v3, 1e-06 }
  0x4d   :  { %v444_v25 = vmul.f32 %v316_v15, %v316_v15  ;;  %v791_v28 = vsel %vm16848_vm0, %v568_v11, 0.0  ;;  %v797_v35 = vsel %vm16848_vm0, %v570_v24, 0.0  ;;  %v323_v1 = vmax.f32 %v7879_v54, 1e-06  ;;  %v8050_v24 = vld [vmem:[%s16846_s0 + $0x110] sm:$0xff]  }
  0x4e   :  { %v577_v10 = vmul.f32 %v449_v0, %v321_v53  ;;  %v456_v26 = vmul.f32 %v328_v14, %v328_v14  ;;  %v7899_v37 = vunpack.c.l.bf16 %v8050_v24  ;;  %v7903_v54 = vunpack.c.l.bf16 %v8051_v32 }
  0x4f   :  { %756 = vadd.xlane.f32.xlu1 %v755_v22  ;;  %753 = vadd.xlane.f32.xlu0 %v752_v27  ;;  %v318_v22 = vmax.f32 %v7868_v12, 1e-06  ;;  %v7871_v27 = vunpack.c.l.bf16 %v8043_v17  ;;  %v572_v36 = vmul.f32 %v444_v25, %v316_v15  ;;  %v451_v11 = vmul.f32 %v323_v1, %v323_v1  ;;  %v8048_v12 = vld [vmem:[%s16846_s0 + $0x100] sm:$0xff]  }
  0x50   :  { %v818_v21 = vsel %vm16848_vm0, %v577_v10, 0.0  ;;  %v7891_v23 = vunpack.c.l.bf16 %v8048_v12  ;;  %v584_v42 = vmul.f32 %v456_v26, %v328_v14  ;;  %v335_v3 = vmax.f32 %v7903_v54, 1e-06  ;;  %v8055_v10 = vld [vmem:[%s16846_s0 + $0x138] sm:$0xff]  }
  0x51   :  { %v803_v46 = vsel %vm16848_vm0, %v572_v36, 0.0  ;;  %v7900_v36 = vunpack.c.h.bf16 %v8050_v24  ;;  %v7919_v26 = vunpack.c.l.bf16 %v8055_v10 }
  0x52   :  { %v839_v52 = vsel %vm16848_vm0, %v584_v42, 0.0 }
  0x53   :  { %762 = vadd.xlane.f32.xlu1 %v761_v33  ;;  %759 = vadd.xlane.f32.xlu0 %v758_v38  ;;  %v446_v33 = vmul.f32 %v318_v22, %v318_v22  ;;  %v319_v38 = vmax.f32 %v7871_v27, 1e-06  ;;  %v7896_v27 = vunpack.c.h.bf16 %v8049_v19  ;;  %v334_v47 = vmax.f32 %v7900_v36, 1e-06 }
  0x54   :  { %v343_v42 = vmax.f32 %v7919_v26, 1e-06 }
  0x57   :  { %768 = vadd.xlane.f32.xlu1 %v767_v44  ;;  %765 = vadd.xlane.f32.xlu0 %v764_v48  ;;  %v574_v44 = vmul.f32 %v446_v33, %v318_v22  ;;  %v447_v48 = vmul.f32 %v319_v38, %v319_v38  ;;  %v579_v22 = vmul.f32 %v451_v11, %v323_v1 }
  0x59   :  { %v809_v57 = vsel %vm16848_vm0, %v574_v44, 0.0  ;;  %v575_v62 = vmul.f32 %v447_v48, %v319_v38  ;;  %v824_v33 = vsel %vm16848_vm0, %v579_v22, 0.0  ;;  %v332_v38 = vmax.f32 %v7896_v27, 1e-06  ;;  %v8057_v22 = vld [vmem:[%s16846_s0 + $0x148] sm:$0xff]  }
  0x5a   :  { %v333_v48 = vmax.f32 %v7899_v37, 1e-06 }
  0x5b   :  { %774 = vadd.xlane.f32.xlu1 %v773_v55  ;;  %771 = vadd.xlane.f32.xlu0 %v770_v59  ;;  %v576_v55 = vmul.f32 %v448_v45, %v320_v34  ;;  %v324_v59 = vmax.f32 %v7880_v49, 1e-06  ;;  %v812_v8 = vsel %vm16848_vm0, %v575_v62, 0.0  ;;  %v329_v34 = vmax.f32 %v7891_v23, 1e-06 }
  0x5c   :  { %v460_v49 = vmul.f32 %v332_v38, %v332_v38  ;;  %v461_v60 = vmul.f32 %v333_v48, %v333_v48 }
  0x5d   :  { %v815_v4 = vsel %vm16848_vm0, %v576_v55, 0.0  ;;  %v452_v5 = vmul.f32 %v324_v59, %v324_v59  ;;  %v457_v45 = vmul.f32 %v329_v34, %v329_v34 }
  0x5e   :  { %v588_v0 = vmul.f32 %v460_v49, %v332_v38  ;;  %v589_v11 = vmul.f32 %v461_v60, %v333_v48 }
  0x5f   :  { %780 = vadd.xlane.f32.xlu1 %v779_v2  ;;  %777 = vadd.xlane.f32.xlu0 %v776_v7  ;;  %v326_v2 = vmax.f32 %v7884_v56, 1e-06  ;;  %v7887_v7 = vunpack.c.l.bf16 %v8047_v61  ;;  %v580_v15 = vmul.f32 %v452_v5, %v324_v59  ;;  %v585_v56 = vmul.f32 %v457_v45, %v329_v34  ;;  %v8053_v59 = vld [vmem:[%s16846_s0 + $0x128] sm:$0xff]  }
  0x60   :  { %v7911_v5 = vunpack.c.l.bf16 %v8053_v59  ;;  %v851_v14 = vsel %vm16848_vm0, %v588_v0, 0.0  ;;  %v854_v27 = vsel %vm16848_vm0, %v589_v11, 0.0 }
  0x61   :  { %v327_v17 = vmax.f32 %v7887_v7, 1e-06 }
  0x63   :  { %786 = vadd.xlane.f32.xlu1 %v785_v13  ;;  %783 = vadd.xlane.f32.xlu0 %v782_v18  ;;  %v454_v13 = vmul.f32 %v326_v2, %v326_v2  ;;  %v7892_v18 = vunpack.c.h.bf16 %v8048_v12  ;;  %v455_v30 = vmul.f32 %v327_v17, %v327_v17 }
  0x65   :  { %v582_v25 = vmul.f32 %v454_v13, %v326_v2  ;;  %v330_v31 = vmax.f32 %v7892_v18, 1e-06  ;;  %v583_v44 = vmul.f32 %v455_v30, %v327_v17  ;;  %v8056_v17 = vld [vmem:[%s16846_s0 + $0x140] sm:$0xff]   ;;  %v463_v18 = vmul.f32 %v335_v3, %v335_v3 }
  0x66   :  { %v7924_v30 = vunpack.c.h.bf16 %v8056_v17  ;;  %v7923_v34 = vunpack.c.l.bf16 %v8056_v17 }
  0x67   :  { %792 = vadd.xlane.f32.xlu1 %v791_v28  ;;  %789 = vadd.xlane.f32.xlu0 %v788_v29  ;;  %v827_v28 = vsel %vm16848_vm0, %v580_v15, 0.0  ;;  %v581_v29 = vmul.f32 %v453_v16, %v325_v6  ;;  %v833_v40 = vsel %vm16848_vm0, %v582_v25, 0.0  ;;  %v458_v43 = vmul.f32 %v330_v31, %v330_v31 }
  0x68   :  { %v836_v55 = vsel %vm16848_vm0, %v583_v44, 0.0  ;;  %v842_v6 = vsel %vm16848_vm0, %v585_v56, 0.0  ;;  %v7915_v16 = vunpack.c.l.bf16 %v8054_v63  ;;  %v342_v25 = vmax.f32 %v7916_v9, 1e-06 }
  0x69   :  { %v830_v41 = vsel %vm16848_vm0, %v581_v29, 0.0  ;;  %v586_v53 = vmul.f32 %v458_v43, %v330_v31  ;;  %v8058_v31 = vld [vmem:[%s16846_s0 + $0x150] sm:$0xff]   ;;  %v591_v36 = vmul.f32 %v463_v18, %v335_v3  ;;  %v7927_v43 = vunpack.c.l.bf16 %v8057_v22 }
  0x6a   :  { %v7932_v44 = vunpack.c.h.bf16 %v8058_v31  ;;  %v7931_v48 = vunpack.c.l.bf16 %v8058_v31 }
  0x6b   :  { %798 = vadd.xlane.f32.xlu1 %v797_v35  ;;  %795 = vadd.xlane.f32.xlu0 %v794_v39  ;;  %v7895_v35 = vunpack.c.l.bf16 %v8049_v19  ;;  %v7904_v39 = vunpack.c.h.bf16 %v8051_v32  ;;  %v845_v2 = vsel %vm16848_vm0, %v586_v53, 0.0  ;;  %v860_v53 = vsel %vm16848_vm0, %v591_v36, 0.0 }
  0x6c   :  { %v350_v60 = vmax.f32 %v7932_v44, 1e-06  ;;  %v349_v0 = vmax.f32 %v7931_v48, 1e-06 }
  0x6d   :  { %v336_v50 = vmax.f32 %v7904_v39, 1e-06 }
  0x6f   :  { %804 = vadd.xlane.f32.xlu1 %v803_v46  ;;  %801 = vadd.xlane.f32.xlu0 %v800_v51  ;;  %v331_v46 = vmax.f32 %v7895_v35, 1e-06  ;;  %v8052_v51 = vld [vmem:[%s16846_s0 + $0x120] sm:$0xff]   ;;  %v464_v1 = vmul.f32 %v336_v50, %v336_v50  ;;  %v7928_v35 = vunpack.c.h.bf16 %v8057_v22 }
  0x70   :  { %v7908_v61 = vunpack.c.h.bf16 %v8052_v51  ;;  %v7907_v62 = vunpack.c.l.bf16 %v8052_v51 }
  0x71   :  { %v592_v15 = vmul.f32 %v464_v1, %v336_v50  ;;  %v345_v50 = vmax.f32 %v7923_v34, 1e-06  ;;  %v348_v51 = vmax.f32 %v7928_v35, 1e-06 }
  0x72   :  { %v338_v12 = vmax.f32 %v7908_v61, 1e-06  ;;  %v337_v13 = vmax.f32 %v7907_v62, 1e-06 }
  0x73   :  { %810 = vadd.xlane.f32.xlu1 %v809_v57  ;;  %807 = vadd.xlane.f32.xlu0 %v806_v58  ;;  %v459_v57 = vmul.f32 %v331_v46, %v331_v46  ;;  %v462_v58 = vmul.f32 %v334_v47, %v334_v47  ;;  %v863_v32 = vsel %vm16848_vm0, %v592_v15, 0.0  ;;  %v476_v3 = vmul.f32 %v348_v51, %v348_v51  ;;  %v8060_v15 = vld [vmem:[%s16846_s0 + $0x160] sm:$0xff]  }
  0x74   :  { %v465_v29 = vmul.f32 %v337_v13, %v337_v13  ;;  %v7939_v36 = vunpack.c.l.bf16 %v8060_v15 }
  0x75   :  { %v587_v7 = vmul.f32 %v459_v57, %v331_v46  ;;  %v604_v22 = vmul.f32 %v476_v3, %v348_v51  ;;  %v8064_v51 = vld [vmem:[%s16846_s0 + $0x180] sm:$0xff]  }
  0x76   :  { %v593_v46 = vmul.f32 %v465_v29, %v337_v13 }
  0x77   :  { %816 = vadd.xlane.f32.xlu1 %v815_v4  ;;  %813 = vadd.xlane.f32.xlu0 %v812_v8  ;;  %v7912_v4 = vunpack.c.h.bf16 %v8053_v59  ;;  %v590_v8 = vmul.f32 %v462_v58, %v334_v47  ;;  %v848_v23 = vsel %vm16848_vm0, %v587_v7, 0.0  ;;  %v346_v47 = vmax.f32 %v7924_v30, 1e-06 }
  0x78   :  { %v471_v58 = vmul.f32 %v343_v42, %v343_v42  ;;  %v347_v59 = vmax.f32 %v7927_v43, 1e-06  ;;  %v866_v62 = vsel %vm16848_vm0, %v593_v46, 0.0  ;;  %v8063_v46 = vld [vmem:[%s16846_s0 + $0x178] sm:$0xff]  }
  0x79   :  { %v340_v19 = vmax.f32 %v7912_v4, 1e-06  ;;  %v857_v24 = vsel %vm16848_vm0, %v590_v8, 0.0  ;;  %v474_v63 = vmul.f32 %v346_v47, %v346_v47 }
  0x7a   :  { %v475_v13 = vmul.f32 %v347_v59, %v347_v59 }
  0x7b   :  { %822 = vadd.xlane.f32.xlu1 %v821_v20  ;;  %819 = vadd.xlane.f32.xlu0 %v818_v21  ;;  %v339_v20 = vmax.f32 %v7911_v5, 1e-06  ;;  %v7920_v21 = vunpack.c.h.bf16 %v8055_v10  ;;  %v468_v37 = vmul.f32 %v340_v19, %v340_v19  ;;  %v602_v18 = vmul.f32 %v474_v63, %v346_v47 }
  0x7c   :  { %v7956_v63 = vunpack.c.h.bf16 %v8064_v51 }
  0x7d   :  { %v467_v38 = vmul.f32 %v339_v20, %v339_v20  ;;  %v344_v39 = vmax.f32 %v7920_v21, 1e-06  ;;  %v596_v54 = vmul.f32 %v468_v37, %v340_v19  ;;  %v477_v19 = vmul.f32 %v349_v0, %v349_v0  ;;  %v8061_v37 = vld [vmem:[%s16846_s0 + $0x168] sm:$0xff]  }
  0x7e   :  { %v11167_v34 = vsel %vm16848_vm0, %v602_v18, 0.0  ;;  %v362_v18 = vmax.f32 %v7956_v63, 1e-06 }
  0x7f   :  { %828 = vadd.xlane.f32.xlu1 %v827_v28  ;;  %825 = vadd.xlane.f32.xlu0 %v824_v33  ;;  %v466_v28 = vmul.f32 %v338_v12, %v338_v12  ;;  %v341_v33 = vmax.f32 %v7915_v16, 1e-06  ;;  %v472_v56 = vmul.f32 %v344_v39, %v344_v39  ;;  %v875_v5 = vsel %vm16848_vm0, %v596_v54, 0.0 }
  0x80   :  { %v605_v35 = vmul.f32 %v477_v19, %v349_v0  ;;  %v353_v54 = vmax.f32 %v7939_v36, 1e-06  ;;  %v7955_v0 = vunpack.c.l.bf16 %v8064_v51 }
  0x81   :  { %v594_v45 = vmul.f32 %v466_v28, %v338_v12  ;;  %v469_v49 = vmul.f32 %v341_v33, %v341_v33  ;;  %v600_v7 = vmul.f32 %v472_v56, %v344_v39  ;;  %v599_v12 = vmul.f32 %v471_v58, %v343_v42 }
  0x82   :  { %v11177_v39 = vsel %vm16848_vm0, %v604_v22, 0.0  ;;  %v361_v19 = vmax.f32 %v7955_v0, 1e-06 }
  0x83   :  { %834 = vadd.xlane.f32.xlu1 %v833_v40  ;;  %831 = vadd.xlane.f32.xlu0 %v830_v41  ;;  %v8059_v40 = vld [vmem:[%s16846_s0 + $0x158] sm:$0xff]   ;;  %v470_v41 = vmul.f32 %v342_v25, %v342_v25  ;;  %v869_v61 = vsel %vm16848_vm0, %v594_v45, 0.0  ;;  %v597_v1 = vmul.f32 %v469_v49, %v341_v33  ;;  %v884_v31 = vsel %vm16848_vm0, %v599_v12, 0.0 }
  0x84   :  { %v7935_v8 = vunpack.c.l.bf16 %v8059_v40  ;;  %v7944_v49 = vunpack.c.h.bf16 %v8061_v37  ;;  %v489_v36 = vmul.f32 %v361_v19, %v361_v19 }
  0x85   :  { %v598_v57 = vmul.f32 %v470_v41, %v342_v25  ;;  %v887_v25 = vsel %vm16848_vm0, %v600_v7, 0.0  ;;  %v8062_v41 = vld [vmem:[%s16846_s0 + $0x170] sm:$0xff]  }
  0x86   :  { %v351_v26 = vmax.f32 %v7935_v8, 1e-06  ;;  %v8065_v8 = vld [vmem:[%s16846_s0 + $0x188] sm:$0xff]  }
  0x87   :  { %840 = vadd.xlane.f32.xlu1 %v839_v52  ;;  %837 = vadd.xlane.f32.xlu0 %v836_v55  ;;  %v7936_v52 = vunpack.c.h.bf16 %v8059_v40  ;;  %v595_v55 = vmul.f32 %v467_v38, %v339_v20  ;;  %v881_v11 = vsel %vm16848_vm0, %v598_v57, 0.0  ;;  %v878_v20 = vsel %vm16848_vm0, %v597_v1, 0.0 }
  0x88   :  { %v479_v44 = vmul.f32 %v351_v26, %v351_v26 }
  0x89   :  { %v352_v4 = vmax.f32 %v7936_v52, 1e-06 }
  0x8b   :  { %846 = vadd.xlane.f32.xlu1 %v845_v2  ;;  %843 = vadd.xlane.f32.xlu0 %v842_v6  ;;  %v473_v2 = vmul.f32 %v345_v50, %v345_v50  ;;  %v872_v6 = vsel %vm16848_vm0, %v595_v55, 0.0  ;;  %v7948_v55 = vunpack.c.h.bf16 %v8062_v41 }
  0x8d   :  { %v601_v21 = vmul.f32 %v473_v2, %v345_v50  ;;  %v7943_v50 = vunpack.c.l.bf16 %v8061_v37  ;;  %v356_v2 = vmax.f32 %v7944_v49, 1e-06  ;;  %v358_v7 = vmax.f32 %v7948_v55, 1e-06 }
  0x8f   :  { %852 = vadd.xlane.f32.xlu1 %v851_v14  ;;  %849 = vadd.xlane.f32.xlu0 %v848_v23  ;;  %v478_v14 = vmul.f32 %v350_v60, %v350_v60  ;;  %v480_v23 = vmul.f32 %v352_v4, %v352_v4  ;;  %v11174_v38 = vsel %vm16848_vm0, %v601_v21, 0.0  ;;  %v355_v3 = vmax.f32 %v7943_v50, 1e-06 }
  0x91   :  { %v606_v33 = vmul.f32 %v478_v14, %v350_v60  ;;  %v608_v40 = vmul.f32 %v480_v23, %v352_v4  ;;  %v7952_v60 = vunpack.c.h.bf16 %v8063_v46  ;;  %v7960_v23 = vunpack.c.h.bf16 %v8065_v8 }
  0x93   :  { %858 = vadd.xlane.f32.xlu1 %v857_v24  ;;  %855 = vadd.xlane.f32.xlu0 %v854_v27  ;;  %v7940_v27 = vunpack.c.h.bf16 %v8060_v15  ;;  %v11193_v48 = vsel %vm16848_vm0, %v606_v33, 0.0  ;;  %v11210_v1 = vsel %vm16848_vm0, %v608_v40, 0.0  ;;  %v364_v40 = vmax.f32 %v7960_v23, 1e-06 }
  0x95   :  { %v354_v45 = vmax.f32 %v7940_v27, 1e-06  ;;  %v492_v63 = vmul.f32 %v364_v40, %v364_v40 }
  0x97   :  { %864 = vadd.xlane.f32.xlu1 %v863_v32  ;;  %861 = vadd.xlane.f32.xlu0 %v860_v53  ;;  %v603_v32 = vmul.f32 %v475_v13, %v347_v59  ;;  %v11202_v53 = vsel %vm16848_vm0, %v605_v35, 0.0  ;;  %v7947_v59 = vunpack.c.l.bf16 %v8062_v41  ;;  %v490_v35 = vmul.f32 %v362_v18, %v362_v18 }
  0x98   :  { %v658_v9 = vpop.xlane.xlu1 %657  ;;  %v652_v10 = vpop.xlane.xlu0 %651 }
  0x99   :  { %v11152_v16 = vmul.f32 0.03125, %v658_v9  ;;  %v11154_v17 = vmul.f32 0.03125, %v652_v10  ;;  %v11190_v47 = vsel %vm16848_vm0, %v603_v32, 0.0  ;;  %v481_v9 = vmul.f32 %v353_v54, %v353_v54 }
  0x9a   :  { %v357_v10 = vmax.f32 %v7947_v59, 1e-06  ;;  %v486_v32 = vmul.f32 %v358_v7, %v358_v7 }
  0x9b   :  { %v11158_v24 = vand.u32 2147483647, %v11152_v16  ;;  %870 = vadd.xlane.f32.xlu1 %v869_v61  ;;  %867 = vadd.xlane.f32.xlu0 %v866_v62  ;;  %v11162_v28 = vand.u32 2147483647, %v11154_v17  ;;  %v7951_v61 = vunpack.c.l.bf16 %v8063_v46  ;;  %v482_v62 = vmul.f32 %v354_v45, %v354_v45 }
  0x9c   :  { %v661_v29 = vpop.xlane.xlu1 %660  ;;  %v655_v30 = vpop.xlane.xlu0 %654  ;;  %v485_v33 = vmul.f32 %v357_v10, %v357_v10  ;;  %v609_v37 = vmul.f32 %v481_v9, %v353_v54  ;;  %v614_v55 = vmul.f32 %v486_v32, %v358_v7  ;;  %vm8116_vm1 = vcmp.eq.f32.partialorder %v11152_v16, 0.0 }
  0x9d   :  { %10390 = vlog2.f32 %v11158_v24  ;;  %v11182_v42 = vmul.f32 0.03125, %v661_v29  ;;  %v11184_v43 = vmul.f32 0.03125, %v655_v30  ;;  %v359_v12 = vmax.f32 %v7951_v61, 1e-06 }
  0x9e   :  { %10392 = vlog2.f32 %v11162_v28  ;;  %v610_v15 = vmul.f32 %v482_v62, %v354_v45  ;;  %v484_v29 = vmul.f32 %v356_v2, %v356_v2  ;;  %v483_v30 = vmul.f32 %v355_v3, %v355_v3 }
  0x9f   :  { %876 = vadd.xlane.f32.xlu1 %v875_v5  ;;  %873 = vadd.xlane.f32.xlu0 %v872_v6  ;;  %v11199_v52 = vand.u32 2147483647, %v11182_v42  ;;  %v11205_v56 = vand.u32 2147483647, %v11184_v43  ;;  %v607_v6 = vmul.f32 %v479_v44, %v351_v26  ;;  %v7959_v26 = vunpack.c.l.bf16 %v8065_v8 }
  0xa0   :  { %v667_v57 = vpop.xlane.xlu1 %666  ;;  %v664_v58 = vpop.xlane.xlu0 %663  ;;  %v11231_v46 = vsel %vm16848_vm0, %v610_v15, 0.0  ;;  %v612_v49 = vmul.f32 %v484_v29, %v356_v2  ;;  %v611_v50 = vmul.f32 %v483_v30, %v355_v3  ;;  %v617_v61 = vmul.f32 %v489_v36, %v361_v19 }
  0xa1   :  { %10394 = vlog2.f32 %v11199_v52  ;;  %v11212_v4 = vmul.f32 0.03125, %v667_v57  ;;  %v11214_v5 = vmul.f32 0.03125, %v664_v58  ;;  %v363_v41 = vmax.f32 %v7959_v26, 1e-06  ;;  %v8066_v58 = vld [vmem:[%s16846_s0 + $0x190] sm:$0xff]  }
  0xa2   :  { %10396 = vlog2.f32 %v11205_v56  ;;  %v908_v45 = vsel %vm16848_vm0, %v607_v6, 0.0  ;;  %v914_v62 = vsel %vm16848_vm0, %v609_v37, 0.0  ;;  %v11240_v2 = vsel %vm16848_vm0, %v612_v49, 0.0 }
  0xa3   :  { %882 = vadd.xlane.f32.xlu1 %v881_v11  ;;  %879 = vadd.xlane.f32.xlu0 %v878_v20  ;;  %v360_v11 = vmax.f32 %v7952_v60, 1e-06  ;;  %v11220_v14 = vand.u32 2147483647, %v11212_v4  ;;  %v11223_v22 = vand.u32 2147483647, %v11214_v5  ;;  %v618_v60 = vmul.f32 %v490_v35, %v362_v18 }
  0xa4   :  { %v491_v0 = vmul.f32 %v363_v41, %v363_v41  ;;  %v7964_v3 = vunpack.c.h.bf16 %v8066_v58  ;;  %v7963_v6 = vunpack.c.l.bf16 %v8066_v58  ;;  %v11243_v7 = vsel %vm16848_vm0, %v611_v50, 0.0 }
  0xa5   :  { %10398 = vlog2.f32 %v11220_v14  ;;  %v8086_v18 = vand.u32 2147483648, %v11154_v17  ;;  %vm8117_vm2 = vcmp.lt.f32.partialorder %v11152_v16, 0.0  ;;  %vm8126_vm3 = vweird.f32 %v11158_v24 }
  0xa6   :  { %v11272_v23 = vmax.f32 %v7964_v3, 1e-06  ;;  %v11274_v26 = vmax.f32 %v7963_v6, 1e-06  ;;  %vm8128_vm4 = vcmp.eq.f32.partialorder %v11158_v24, 0.0  ;;  %vm8090_vm5 = vweird.f32 %v11162_v28 }
  0xa7   :  { %v10391_v13 = vpop.eup %10390  ;;  %888 = vadd.xlane.f32.xlu1 %v887_v25  ;;  %885 = vadd.xlane.f32.xlu0 %v884_v31  ;;  %v488_v25 = vmul.f32 %v360_v11, %v360_v11  ;;  %v487_v31 = vmul.f32 %v359_v12, %v359_v12  ;;  %vm8080_vm6 = vcmp.eq.f32.partialorder %v11154_v17, 0.0  ;;  %vm8092_vm7 = vcmp.eq.f32.partialorder %v11162_v28, 0.0 }
  0xa8   :  { %v10393_v20 = vpop.eup %10392  ;;  %v8123_v21 = vmul.f32 0.33333334, %v10391_v13  ;;  %v11264_v13 = vsel %vm16848_vm0, %v617_v61, 0.0  ;;  %vm8081_vm8 = vcmp.lt.f32.partialorder %v11154_v17, 0.0  ;;  %v8140_v35 = vand.u32 2147483648, %v11182_v42 }
  0xa9   :  { %v8087_v27 = vmul.f32 0.33333334, %v10393_v20  ;;  %v616_v57 = vmul.f32 %v488_v25, %v360_v11  ;;  %v615_v59 = vmul.f32 %v487_v31, %v359_v12  ;;  %v11261_v12 = vsel %vm16848_vm0, %v618_v60, 0.0 }
  0xaa   :  { %10400 = vpow2.f32 %v8123_v21  ;;  %v11267_v20 = vmul.f32 %v492_v63, %v364_v40  ;;  %v11269_v21 = vmul.f32 %v491_v0, %v363_v41  ;;  %vm8119_vm9 = vcmp.eq.f32.partialorder %v11158_v24, inf }
  0xab   :  { %10402 = vpow2.f32 %v8087_v27  ;;  %894 = vadd.xlane.f32.xlu1 %v11167_v34  ;;  %891 = vadd.xlane.f32.xlu0 %v11174_v38  ;;  %v10395_v44 = vpop.eup %10394  ;;  %v613_v38 = vmul.f32 %v485_v33, %v357_v10  ;;  %v11252_v8 = vsel %vm16848_vm0, %v616_v57, 0.0  ;;  %v8122_v10 = vand.u32 2147483648, %v11152_v16 }
  0xac   :  { %10404 = vlog2.f32 %v11223_v22  ;;  %v10397_v51 = vpop.eup %10396  ;;  %v8141_v34 = vmul.f32 0.33333334, %v10395_v44  ;;  %v11258_v11 = vsel %vm16848_vm0, %v615_v59, 0.0  ;;  %vm8083_vm10 = vcmp.eq.f32.partialorder %v11162_v28, inf }
  0xad   :  { %v8105_v54 = vmul.f32 0.33333334, %v10397_v51  ;;  %vm8134_vm11 = vcmp.eq.f32.partialorder %v11182_v42, 0.0  ;;  %vm8135_vm12 = vcmp.lt.f32.partialorder %v11182_v42, 0.0  ;;  %vm8098_vm13 = vcmp.eq.f32.partialorder %v11184_v43, 0.0 }
  0xae   :  { %10406 = vpow2.f32 %v8141_v34  ;;  %vm8144_vm14 = vweird.f32 %v11199_v52  ;;  %vm8099_vm15 = vcmp.lt.f32.partialorder %v11184_v43, 0.0  ;;  %v8176_v57 = vand.u32 2147483648, %v11212_v4 }
  0xaf   :  { %900 = vadd.xlane.f32.xlu1 %v11177_v39  ;;  %897 = vadd.xlane.f32.xlu0 %v11190_v47  ;;  %10408 = vpow2.f32 %v8105_v54  ;;  %v11246_v39 = vsel %vm16848_vm0, %v614_v55, 0.0  ;;  %v11249_v47 = vsel %vm16848_vm0, %v613_v38, 0.0  ;;  %v10399_v9 = vpop.eup %10398  ;;  %v8067_v54 = vld [vmem:[%s16846_s0 + $0x198] sm:$0xff]   ;;  %v8158_v0 = vand.u32 2147483648, %v11214_v5 }
  0xb0   :  { %v8177_v19 = vmul.f32 0.33333334, %v10399_v9  ;;  %v7967_v6 = vunpack.c.l.bf16 %v8067_v54  ;;  %v494_v9 = vmul.f32 %v11272_v23, %v11272_v23 }
  0xb2   :  { %10410 = vpow2.f32 %v8177_v19 }
  0xb3   :  { %906 = vadd.xlane.f32.xlu1 %v11193_v48  ;;  %903 = vadd.xlane.f32.xlu0 %v11202_v53 }
  0xb4   :  { %v10401_v15 = vpop.eup %10400 }
  0xb5   :  { %v10403_v48 = vpop.eup %10402  ;;  %v8125_v53 = vor.u32 %v10401_v15, %v8122_v10 }
  0xb6   :  { %v10405_v27 = vpop.eup %10404  ;;  %v8089_v29 = vor.u32 %v10403_v48, %v8086_v18  ;;  %v367_v48 = vmax.f32 %v7967_v6, 1e-06 }
  0xb7   :  { %v8127_v30 = vsel %vm8126_vm3, %v11152_v16, %v8125_v53  ;;  %v8159_v32 = vmul.f32 0.33333334, %v10405_v27  ;;  %912 = vadd.xlane.f32.xlu1 %v11210_v1  ;;  %909 = vadd.xlane.f32.xlu0 %v908_v45  ;;  %v8104_v1 = vand.u32 2147483648, %v11184_v43  ;;  %vm8137_vm3 = vcmp.eq.f32.partialorder %v11199_v52, inf }
  0xb8   :  { %v8130_v33 = vsel %vm8128_vm4, %v8122_v10, %v8127_v30  ;;  %v8091_v25 = vsel %vm8090_vm5, %v11154_v17, %v8089_v29  ;;  %v10407_v36 = vpop.eup %10406  ;;  %vm8108_vm4 = vweird.f32 %v11205_v56  ;;  %vm8110_vm5 = vcmp.eq.f32.partialorder %v11205_v56, 0.0 }
  0xb9   :  { %v8094_v31 = vsel %vm8092_vm7, %v8086_v18, %v8091_v25  ;;  %10412 = vpow2.f32 %v8159_v32  ;;  %v10409_v37 = vpop.eup %10408  ;;  %v8131_v40 = vsel %vm8117_vm2, nan, %v8130_v33  ;;  %v8143_v41 = vor.u32 %v10407_v36, %v8140_v35 }
  0xba   :  { %v8095_v44 = vsel %vm8081_vm8, nan, %v8094_v31  ;;  %v8107_v45 = vor.u32 %v10409_v37, %v8104_v1  ;;  %vm8146_vm2 = vcmp.eq.f32.partialorder %v11199_v52, 0.0  ;;  %vm8182_vm7 = vcmp.eq.f32.partialorder %v11220_v14, 0.0 }
  0xbb   :  { %918 = vadd.xlane.f32.xlu1 %v11231_v46  ;;  %915 = vadd.xlane.f32.xlu0 %v914_v62  ;;  %v8145_v49 = vsel %vm8144_vm14, %v11182_v42, %v8143_v41  ;;  %v8132_v46 = vsel %vm8116_vm1, 0.0, %v8131_v40  ;;  %v8096_v34 = vsel %vm8080_vm6, 0.0, %v8095_v44  ;;  %vm8101_vm1 = vcmp.eq.f32.partialorder %v11205_v56, inf  ;;  %v673_v44 = vpop.xlane.xlu1 %672 }
  0xbc   :  { %v8148_v50 = vsel %vm8146_vm2, %v8140_v35, %v8145_v49  ;;  %v8109_v51 = vsel %vm8108_vm4, %v11184_v43, %v8107_v45  ;;  %v10411_v16 = vpop.eup %10410  ;;  %vm8180_vm6 = vweird.f32 %v11220_v14  ;;  %v8133_v59 = vsel %vm8119_vm9, inf, %v8132_v46  ;;  %v670_v49 = vpop.xlane.xlu0 %669  ;;  %v8069_v46 = vld [vmem:[%s16846_s0 + $0x1a8] sm:$0xff]  }
  0xbd   :  { %v8149_v55 = vsel %vm8135_vm12, nan, %v8148_v50  ;;  %v8112_v38 = vsel %vm8110_vm5, %v8104_v1, %v8109_v51  ;;  %v8179_v61 = vor.u32 %v10411_v16, %v8176_v57  ;;  %v8097_v56 = vsel %vm8083_vm10, inf, %v8096_v34 }
  0xbe   :  { %v8150_v58 = vsel %vm8134_vm11, 0.0, %v8149_v55  ;;  %v8113_v17 = vsel %vm8099_vm15, nan, %v8112_v38  ;;  %v7968_v43 = vunpack.c.h.bf16 %v8067_v54  ;;  %vm8171_vm8 = vcmp.lt.f32.partialorder %v11212_v4, 0.0 }
  0xbf   :  { %924 = vadd.xlane.f32.xlu1 %v11240_v2  ;;  %921 = vadd.xlane.f32.xlu0 %v11243_v7  ;;  %v8151_v60 = vsel %vm8137_vm3, inf, %v8150_v58  ;;  %v8114_v42 = vsel %vm8098_vm13, 0.0, %v8113_v17  ;;  %v8181_v24 = vsel %vm8180_vm6, %v11212_v4, %v8179_v61  ;;  %vm8170_vm9 = vcmp.eq.f32.partialorder %v11212_v4, 0.0  ;;  %v679_v58 = vpop.xlane.xlu1 %678 }
  0xc0   :  { %v11332_v62 = vpack.c.bf16 %v8151_v60, %v8133_v59  ;;  %v8115_v63 = vsel %vm8101_vm1, inf, %v8114_v42  ;;  %v8184_v28 = vsel %vm8182_vm7, %v8176_v57, %v8181_v24  ;;  %vm8162_vm10 = vweird.f32 %v11223_v22  ;;  %v8070_v60 = vld [vmem:[%s16846_s0 + $0x1b0] sm:$0xff]   ;;  %v676_v42 = vpop.xlane.xlu0 %675 }
  0xc1   :  { %v11335_v3 = vpack.c.bf16 %v8115_v63, %v8097_v56  ;;  %v8185_v7 = vsel %vm8171_vm8, nan, %v8184_v28  ;;  %vm8164_vm11 = vcmp.eq.f32.partialorder %v11223_v22, 0.0  ;;  %vm8173_vm12 = vcmp.eq.f32.partialorder %v11220_v14, inf }
  0xc2   :  { %v8186_v10 = vsel %vm8170_vm9, 0.0, %v8185_v7  ;;  %vm8153_vm13 = vcmp.lt.f32.partialorder %v11214_v5, 0.0  ;;  %v368_v4 = vmax.f32 %v7968_v43, 1e-06  ;;  %vm8152_vm14 = vcmp.eq.f32.partialorder %v11214_v5, 0.0  ;;  %v8071_v43 = vld [vmem:[%s16846_s0 + $0x1b8] sm:$0xff]  }
  0xc3   :  { %v10413_v2 = vpop.eup %10412  ;;  %930 = vadd.xlane.f32.xlu1 %v11246_v39  ;;  %927 = vadd.xlane.f32.xlu0 %v11249_v47  ;;  %v493_v39 = vmul.f32 %v11274_v26, %v11274_v26  ;;  %v8187_v18 = vsel %vm8173_vm12, inf, %v8186_v10  ;;  %vm8155_vm15 = vcmp.eq.f32.partialorder %v11223_v22, inf  ;;  %v947_v14 = vsel %vm16848_vm0, %v11267_v20, 0.0 }
  0xc4   :  { %v8161_v52 = vor.u32 %v10413_v2, %v8158_v0  ;;  %v496_v30 = vmul.f32 %v368_v4, %v368_v4  ;;  %v495_v22 = vmul.f32 %v367_v48, %v367_v48  ;;  %v7976_v50 = vunpack.c.h.bf16 %v8069_v46 }
  0xc5   :  { %v7975_v38 = vunpack.c.l.bf16 %v8069_v46  ;;  %v7980_v61 = vunpack.c.h.bf16 %v8070_v60  ;;  %v7979_v63 = vunpack.c.l.bf16 %v8070_v60  ;;  %v11383_v24 = vmul.f32 0.03125, %v673_v44 }
  0xc6   :  { %v8163_v15 = vsel %vm8162_vm10, %v11214_v5, %v8161_v52  ;;  %v622_v5 = vmul.f32 %v494_v9, %v11272_v23  ;;  %v624_v33 = vmul.f32 %v496_v30, %v368_v4  ;;  %v8068_v23 = vld [vmem:[%s16846_s0 + $0x1a0] sm:$0xff]   ;;  %v372_v51 = vmax.f32 %v7976_v50, 1e-06 }
  0xc7   :  { %v8166_v47 = vsel %vm8164_vm11, %v8158_v0, %v8163_v15  ;;  %936 = vadd.xlane.f32.xlu1 %v11252_v8  ;;  %933 = vadd.xlane.f32.xlu0 %v11258_v11  ;;  %v944_v8 = vsel %vm16848_vm0, %v11269_v21, 0.0  ;;  %v621_v11 = vmul.f32 %v493_v39, %v11274_v26  ;;  %v7972_v26 = vunpack.c.h.bf16 %v8068_v23  ;;  %v685_v39 = vpop.xlane.xlu1 %684 }
  0xc8   :  { %v8167_v19 = vsel %vm8153_vm13, nan, %v8166_v47  ;;  %v953_v32 = vsel %vm16848_vm0, %v622_v5, 0.0  ;;  %v959_v20 = vsel %vm16848_vm0, %v624_v33, 0.0  ;;  %v7971_v31 = vunpack.c.l.bf16 %v8068_v23  ;;  %v8072_v5 = vld [vmem:[%s16846_s0 + $0x1c0] sm:$0xff]  }
  0xc9   :  { %v8168_v53 = vsel %vm8152_vm14, 0.0, %v8167_v19  ;;  %v370_v25 = vmax.f32 %v7972_v26, 1e-06  ;;  %v500_v34 = vmul.f32 %v372_v51, %v372_v51  ;;  %v371_v16 = vmax.f32 %v7975_v38, 1e-06 }
  0xca   :  { %v8169_v27 = vsel %vm8155_vm15, inf, %v8168_v53  ;;  %v369_v36 = vmax.f32 %v7971_v31, 1e-06  ;;  %v374_v56 = vmax.f32 %v7980_v61, 1e-06  ;;  %v11388_v28 = vmul.f32 0.03125, %v670_v49 }
  0xcb   :  { %v11356_v29 = vpack.c.bf16 %v8187_v18, %v8169_v27  ;;  %942 = vadd.xlane.f32.xlu1 %v11261_v12  ;;  %939 = vadd.xlane.f32.xlu0 %v11264_v13  ;;  %v950_v12 = vsel %vm16848_vm0, %v621_v11, 0.0  ;;  %v623_v13 = vmul.f32 %v495_v22, %v367_v48  ;;  %v498_v35 = vmul.f32 %v370_v25, %v370_v25  ;;  %v682_v48 = vpop.xlane.xlu0 %681 }
  0xcc   :  { %v497_v37 = vmul.f32 %v369_v36, %v369_v36  ;;  %v628_v55 = vmul.f32 %v500_v34, %v372_v51  ;;  %v499_v17 = vmul.f32 %v371_v16, %v371_v16  ;;  %v502_v0 = vmul.f32 %v374_v56, %v374_v56 }
  0xcd   :  { %v956_v21 = vsel %vm16848_vm0, %v623_v13, 0.0  ;;  %v626_v1 = vmul.f32 %v498_v35, %v370_v25  ;;  %v373_v2 = vmax.f32 %v7979_v63, 1e-06  ;;  %v7984_v10 = vunpack.c.h.bf16 %v8071_v43 }
  0xce   :  { %v625_v41 = vmul.f32 %v497_v37, %v369_v36  ;;  %v971_v57 = vsel %vm16848_vm0, %v628_v55, 0.0  ;;  %v627_v54 = vmul.f32 %v499_v17, %v371_v16  ;;  %v630_v52 = vmul.f32 %v502_v0, %v374_v56  ;;  %v8073_v16 = vld [vmem:[%s16846_s0 + $0x1c8] sm:$0xff]  }
  0xcf   :  { %948 = vadd.xlane.f32.xlu1 %v947_v14  ;;  %945 = vadd.xlane.f32.xlu0 %v944_v8  ;;  %v965_v40 = vsel %vm16848_vm0, %v626_v1, 0.0  ;;  %v501_v6 = vmul.f32 %v373_v2, %v373_v2  ;;  %v11392_v15 = vand.u32 2147483647, %v11383_v24  ;;  %v11395_v47 = vand.u32 2147483647, %v11388_v28  ;;  %v688_v35 = vpop.xlane.xlu0 %687 }
  0xd0   :  { %v962_v45 = vsel %vm16848_vm0, %v625_v41, 0.0  ;;  %v968_v59 = vsel %vm16848_vm0, %v627_v54, 0.0  ;;  %v977_v7 = vsel %vm16848_vm0, %v630_v52, 0.0  ;;  %v11397_v4 = vmul.f32 0.03125, %v679_v58 }
  0xd1   :  { %v629_v9 = vmul.f32 %v501_v6, %v373_v2  ;;  %v11400_v19 = vmul.f32 0.03125, %v676_v42  ;;  %v7983_v53 = vunpack.c.l.bf16 %v8071_v43  ;;  %v376_v27 = vmax.f32 %v7984_v10, 1e-06  ;;  %v8074_v10 = vld [vmem:[%s16846_s0 + $0x1d0] sm:$0xff]  }
  0xd2   :  { %10414 = vlog2.f32 %v11392_v15  ;;  %v11405_v14 = vand.u32 2147483647, %v11397_v4  ;;  %v7988_v33 = vunpack.c.h.bf16 %v8072_v5  ;;  %v7987_v36 = vunpack.c.l.bf16 %v8072_v5 }
  0xd3   :  { %954 = vadd.xlane.f32.xlu1 %v953_v32  ;;  %951 = vadd.xlane.f32.xlu0 %v950_v12  ;;  %v974_v18 = vsel %vm16848_vm0, %v629_v9, 0.0  ;;  %10416 = vlog2.f32 %v11395_v47  ;;  %v504_v8 = vmul.f32 %v376_v27, %v376_v27  ;;  %v11411_v11 = vand.u32 2147483647, %v11400_v19  ;;  %v694_v60 = vpop.xlane.xlu0 %693 }
  0xd4   :  { %v375_v30 = vmax.f32 %v7983_v53, 1e-06  ;;  %v11413_v32 = vmul.f32 0.03125, %v685_v39  ;;  %10418 = vlog2.f32 %v11405_v14  ;;  %v378_v31 = vmax.f32 %v7988_v33, 1e-06 }
  0xd5   :  { %v632_v22 = vmul.f32 %v504_v8, %v376_v27  ;;  %10420 = vlog2.f32 %v11411_v11  ;;  %v377_v44 = vmax.f32 %v7987_v36, 1e-06  ;;  %v7992_v42 = vunpack.c.h.bf16 %v8073_v16 }
  0xd6   :  { %v503_v12 = vmul.f32 %v375_v30, %v375_v30  ;;  %v11421_v26 = vand.u32 2147483647, %v11413_v32  ;;  %v506_v41 = vmul.f32 %v378_v31, %v378_v31  ;;  %v11439_v0 = vmul.f32 0.03125, %v688_v35 }
  0xd7   :  { %960 = vadd.xlane.f32.xlu1 %v959_v20  ;;  %957 = vadd.xlane.f32.xlu0 %v956_v21  ;;  %v983_v13 = vsel %vm16848_vm0, %v632_v22, 0.0  ;;  %v11418_v20 = vmul.f32 0.03125, %v682_v48  ;;  %v691_v21 = vpop.xlane.xlu1 %690  ;;  %v505_v50 = vmul.f32 %v377_v44, %v377_v44  ;;  %v380_v56 = vmax.f32 %v7992_v42, 1e-06 }
  0xd8   :  { %v631_v23 = vmul.f32 %v503_v12, %v375_v30  ;;  %10422 = vlog2.f32 %v11421_v26  ;;  %v634_v49 = vmul.f32 %v506_v41, %v378_v31  ;;  %v11433_v58 = vmul.f32 0.03125, %v691_v21 }
  0xd9   :  { %v11425_v37 = vand.u32 2147483647, %v11418_v20  ;;  %v7991_v2 = vunpack.c.l.bf16 %v8073_v16  ;;  %v508_v43 = vmul.f32 %v380_v56, %v380_v56  ;;  %v11446_v39 = vand.u32 2147483647, %v11439_v0 }
  0xda   :  { %v980_v25 = vsel %vm16848_vm0, %v631_v23, 0.0  ;;  %v989_v34 = vsel %vm16848_vm0, %v634_v49, 0.0  ;;  %v11437_v61 = vand.u32 2147483647, %v11433_v58  ;;  %v11450_v8 = vmul.f32 0.03125, %v694_v60 }
  0xdb   :  { %966 = vadd.xlane.f32.xlu1 %v965_v40  ;;  %963 = vadd.xlane.f32.xlu0 %v962_v45  ;;  %10424 = vlog2.f32 %v11425_v37  ;;  %v697_v38 = vpop.xlane.xlu1 %696  ;;  %v379_v6 = vmax.f32 %v7991_v2, 1e-06  ;;  %v636_v9 = vmul.f32 %v508_v43, %v380_v56  ;;  %v8212_v22 = vand.u32 2147483648, %v11383_v24 }
  0xdc   :  { %v10415_v1 = vpop.eup %10414  ;;  %v8194_v21 = vand.u32 2147483648, %v11388_v28  ;;  %vm8207_vm3 = vcmp.lt.f32.partialorder %v11383_v24, 0.0  ;;  %vm8216_vm2 = vweird.f32 %v11392_v15  ;;  %v11463_v36 = vand.u32 2147483647, %v11450_v8 }
  0xdd   :  { %v10417_v40 = vpop.eup %10416  ;;  %v8213_v45 = vmul.f32 0.33333334, %v10415_v1  ;;  %v507_v48 = vmul.f32 %v379_v6, %v379_v6  ;;  %v995_v5 = vsel %vm16848_vm0, %v636_v9, 0.0  ;;  %v700_v1 = vpop.xlane.xlu0 %699  ;;  %vm8218_vm4 = vcmp.eq.f32.partialorder %v11392_v15, 0.0 }
  0xde   :  { %v8195_v46 = vmul.f32 0.33333334, %v10417_v40  ;;  %v10419_v51 = vpop.eup %10418  ;;  %vm8189_vm5 = vcmp.lt.f32.partialorder %v11388_v28, 0.0  ;;  %vm8198_vm1 = vweird.f32 %v11395_v47  ;;  %vm8200_vm6 = vcmp.eq.f32.partialorder %v11395_v47, 0.0 }
  0xdf   :  { %972 = vadd.xlane.f32.xlu1 %v971_v57  ;;  %969 = vadd.xlane.f32.xlu0 %v968_v59  ;;  %v10421_v55 = vpop.eup %10420  ;;  %v633_v57 = vmul.f32 %v505_v50, %v377_v44  ;;  %10426 = vpow2.f32 %v8213_v45  ;;  %v8249_v17 = vmul.f32 0.33333334, %v10419_v51  ;;  %v703_v12 = vpop.xlane.xlu1 %702  ;;  %v635_v33 = vmul.f32 %v507_v48, %v379_v6 }
  0xe0   :  { %10428 = vpow2.f32 %v8195_v46  ;;  %v8231_v59 = vmul.f32 0.33333334, %v10421_v55  ;;  %v8248_v45 = vand.u32 2147483648, %v11397_v4  ;;  %vm8252_vm7 = vweird.f32 %v11405_v14 }
  0xe1   :  { %v986_v54 = vsel %vm16848_vm0, %v633_v57, 0.0  ;;  %10430 = vpow2.f32 %v8249_v17  ;;  %v992_v31 = vsel %vm16848_vm0, %v635_v33, 0.0  ;;  %v8230_v49 = vand.u32 2147483648, %v11400_v19 }
  0xe2   :  { %v10423_v63 = vpop.eup %10422  ;;  %10432 = vpow2.f32 %v8231_v59  ;;  %v7995_v46 = vunpack.c.l.bf16 %v8074_v10  ;;  %vm8254_vm8 = vcmp.eq.f32.partialorder %v11405_v14, 0.0  ;;  %vm8206_vm9 = vcmp.eq.f32.partialorder %v11383_v24, 0.0 }
  0xe3   :  { %978 = vadd.xlane.f32.xlu1 %v977_v7  ;;  %975 = vadd.xlane.f32.xlu0 %v974_v18  ;;  %v8285_v7 = vmul.f32 0.33333334, %v10423_v63  ;;  %10434 = vlog2.f32 %v11437_v61  ;;  %v11448_v18 = vmul.f32 0.03125, %v697_v38  ;;  %vm8188_vm10 = vcmp.eq.f32.partialorder %v11388_v28, 0.0  ;;  %v709_v57 = vpop.xlane.xlu1 %708 }
  0xe4   :  { %v11481_v38 = vmul.f32 0.03125, %v703_v12  ;;  %v381_v16 = vmax.f32 %v7995_v46, 1e-06  ;;  %vm8234_vm11 = vweird.f32 %v11411_v11  ;;  %vm8243_vm12 = vcmp.lt.f32.partialorder %v11397_v4, 0.0 }
  0xe5   :  { %v10425_v52 = vpop.eup %10424  ;;  %10436 = vpow2.f32 %v8285_v7  ;;  %vm8225_vm13 = vcmp.lt.f32.partialorder %v11400_v19, 0.0  ;;  %vm8236_vm14 = vcmp.eq.f32.partialorder %v11411_v11, 0.0  ;;  %v11489_v42 = vmul.f32 0.03125, %v700_v1 }
  0xe6   :  { %v8267_v27 = vmul.f32 0.33333334, %v10425_v52  ;;  %10438 = vlog2.f32 %v11446_v39  ;;  %v509_v56 = vmul.f32 %v381_v16, %v381_v16  ;;  %v11493_v43 = vmul.f32 0.03125, %v709_v57  ;;  %v706_v52 = vpop.xlane.xlu0 %705 }
  0xe7   :  { %984 = vadd.xlane.f32.xlu1 %v983_v13  ;;  %981 = vadd.xlane.f32.xlu0 %v980_v25  ;;  %v7996_v13 = vunpack.c.h.bf16 %v8074_v10  ;;  %v11457_v25 = vand.u32 2147483647, %v11448_v18  ;;  %v8284_v9 = vand.u32 2147483648, %v11413_v32  ;;  %vm8288_vm15 = vweird.f32 %v11421_v26 }
  0xe8   :  { %10440 = vpow2.f32 %v8267_v27  ;;  %v11499_v10 = vand.u32 2147483647, %v11481_v38  ;;  %v637_v48 = vmul.f32 %v509_v56, %v381_v16  ;;  %v8266_v12 = vand.u32 2147483648, %v11418_v20 }
  0xe9   :  { %v10427_v53 = vpop.eup %10426  ;;  %v382_v41 = vmax.f32 %v7996_v13, 1e-06  ;;  %10442 = vlog2.f32 %v11457_v25  ;;  %v11528_v1 = vand.u32 2147483647, %v11493_v43 }
  0xea   :  { %v10429_v30 = vpop.eup %10428  ;;  %v8215_v23 = vor.u32 %v10427_v53, %v8212_v22  ;;  %10444 = vlog2.f32 %v11463_v36  ;;  %v8075_v53 = vld [vmem:[%s16846_s0 + $0x1d8] sm:$0xff]   ;;  %v712_v16 = vpop.xlane.xlu0 %711 }
  0xeb   :  { %990 = vadd.xlane.f32.xlu1 %v989_v34  ;;  %987 = vadd.xlane.f32.xlu0 %v986_v54  ;;  %v8197_v35 = vor.u32 %v10429_v30, %v8194_v21  ;;  %v10431_v40 = vpop.eup %10430  ;;  %v510_v51 = vmul.f32 %v382_v41, %v382_v41 }
  0xec   :  { %v10433_v44 = vpop.eup %10432  ;;  %v8217_v50 = vsel %vm8216_vm2, %v11383_v24, %v8215_v23  ;;  %v8251_v17 = vor.u32 %v10431_v40, %v8248_v45  ;;  %vm8209_vm2 = vcmp.eq.f32.partialorder %v11392_v15, inf  ;;  %v11521_v23 = vmul.f32 0.03125, %v706_v52 }
  0xed   :  { %v10435_v34 = vpop.eup %10434  ;;  %v8199_v55 = vsel %vm8198_vm1, %v11388_v28, %v8197_v35  ;;  %v8233_v54 = vor.u32 %v10433_v44, %v8230_v49  ;;  %v638_v59 = vmul.f32 %v510_v51, %v382_v41  ;;  %v8220_v60 = vsel %vm8218_vm4, %v8212_v22, %v8217_v50 }
  0xee   :  { %v8202_v63 = vsel %vm8200_vm6, %v8194_v21, %v8199_v55  ;;  %v8321_v2 = vmul.f32 0.33333334, %v10435_v34  ;;  %v8253_v30 = vsel %vm8252_vm7, %v11397_v4, %v8251_v17  ;;  %vm8191_vm4 = vcmp.eq.f32.partialorder %v11395_v47, inf }
  0xef   :  { %996 = vadd.xlane.f32.xlu1 %v995_v5  ;;  %993 = vadd.xlane.f32.xlu0 %v992_v31  ;;  %v1001_v6 = vsel %vm16848_vm0, %v638_v59, 0.0  ;;  %v10437_v7 = vpop.eup %10436  ;;  %v8221_v5 = vsel %vm8207_vm3, nan, %v8220_v60  ;;  %v8235_v22 = vsel %vm8234_vm11, %v11400_v19, %v8233_v54  ;;  %v8203_v13 = vsel %vm8189_vm5, nan, %v8202_v63  ;;  %v8076_v60 = vld [vmem:[%s16846_s0 + $0x1e0] sm:$0xff]  }
  0xf0   :  { %v10439_v27 = vpop.eup %10438  ;;  %vm8242_vm3 = vcmp.eq.f32.partialorder %v11397_v4, 0.0  ;;  %v11519_v21 = vand.u32 2147483647, %v11489_v42  ;;  %v998_v31 = vsel %vm16848_vm0, %v637_v48, 0.0  ;;  %vm8224_vm1 = vcmp.eq.f32.partialorder %v11400_v19, 0.0 }
  0xf1   :  { %v8287_v35 = vor.u32 %v10437_v7, %v8284_v9  ;;  %10446 = vpow2.f32 %v8321_v2  ;;  %v8000_v40 = vunpack.c.h.bf16 %v8075_v53  ;;  %v8256_v41 = vsel %vm8254_vm8, %v8248_v45, %v8253_v30  ;;  %v715_v45 = vpop.xlane.xlu1 %714 }
  0xf2   :  { %v10441_v33 = vpop.eup %10440  ;;  %v8238_v44 = vsel %vm8236_vm14, %v8230_v49, %v8235_v22  ;;  %vm8290_vm5 = vcmp.eq.f32.partialorder %v11421_v26, 0.0  ;;  %v8303_v46 = vmul.f32 0.33333334, %v10439_v27  ;;  %10448 = vlog2.f32 %v11499_v10 }
  0xf3   :  { %1002 = vadd.xlane.f32.xlu1 %v1001_v6  ;;  %999 = vadd.xlane.f32.xlu0 %v998_v31  ;;  %v10443_v50 = vpop.eup %10442  ;;  %v8222_v51 = vsel %vm8206_vm9, 0.0, %v8221_v5  ;;  %v8204_v34 = vsel %vm8188_vm10, 0.0, %v8203_v13  ;;  %v8269_v55 = vor.u32 %v10441_v33, %v8266_v12  ;;  %vm8270_vm6 = vweird.f32 %v11425_v37 }
  0xf4   :  { %v10445_v57 = vpop.eup %10444  ;;  %vm8245_vm7 = vcmp.eq.f32.partialorder %v11405_v14, inf  ;;  %10450 = vlog2.f32 %v11519_v21  ;;  %v11546_v49 = vand.u32 2147483647, %v11521_v23  ;;  %v384_v24 = vmax.f32 %v8000_v40, 1e-06 }
  0xf5   :  { %v7999_v17 = vunpack.c.l.bf16 %v8075_v53  ;;  %v8257_v28 = vsel %vm8243_vm12, nan, %v8256_v41  ;;  %vm8227_vm8 = vcmp.eq.f32.partialorder %v11411_v11, inf  ;;  %v8239_v54 = vsel %vm8225_vm13, nan, %v8238_v44 }
  0xf6   :  { %vm8279_vm9 = vcmp.lt.f32.partialorder %v11413_v32, 0.0  ;;  %v8289_v59 = vsel %vm8288_vm15, %v11413_v32, %v8287_v35  ;;  %vm8261_vm10 = vcmp.lt.f32.partialorder %v11418_v20, 0.0  ;;  %10452 = vlog2.f32 %v11528_v1 }
  0xf7   :  { %10454 = vpow2.f32 %v8303_v46  ;;  %v11562_v56 = vmul.f32 0.03125, %v715_v45  ;;  %v512_v63 = vmul.f32 %v384_v24, %v384_v24  ;;  %v383_v2 = vmax.f32 %v7999_v17, 1e-06  ;;  %v721_v46 = vpop.xlane.xlu1 %720 }
  0xf8   :  { %v8271_v52 = vsel %vm8270_vm6, %v11418_v20, %v8269_v55  ;;  %v8357_v6 = vmul.f32 0.33333334, %v10443_v50  ;;  %v8339_v7 = vmul.f32 0.33333334, %v10445_v57  ;;  %v11567_v48 = vmul.f32 0.03125, %v712_v16 }
  0xf9   :  { %vm8278_vm11 = vcmp.eq.f32.partialorder %v11413_v32, 0.0  ;;  %10456 = vlog2.f32 %v11546_v49  ;;  %v640_v53 = vmul.f32 %v512_v63, %v384_v24  ;;  %v511_v27 = vmul.f32 %v383_v2, %v383_v2 }
  0xfa   :  { %v8004_v5 = vunpack.c.h.bf16 %v8076_v60  ;;  %v8223_v30 = vsel %vm8209_vm2, inf, %v8222_v51  ;;  %v8205_v22 = vsel %vm8191_vm4, inf, %v8204_v34  ;;  %v8258_v33 = vsel %vm8242_vm3, 0.0, %v8257_v28 }
  0xfb   :  { %vm8260_vm12 = vcmp.eq.f32.partialorder %v11418_v20, 0.0  ;;  %vm8272_vm13 = vcmp.eq.f32.partialorder %v11425_v37, 0.0  ;;  %v8240_v13 = vsel %vm8224_vm1, 0.0, %v8239_v54  ;;  %v11582_v31 = vand.u32 2147483647, %v11562_v56  ;;  %v10447_v40 = vpop.eup %10446 }
  0xfc   :  { %v1007_v35 = vsel %vm16848_vm0, %v640_v53, 0.0  ;;  %v639_v15 = vmul.f32 %v511_v27, %v383_v2  ;;  %v8292_v47 = vsel %vm8290_vm5, %v8284_v9, %v8289_v59  ;;  %v8274_v4 = vsel %vm8272_vm13, %v8266_v12, %v8271_v52  ;;  %v10449_v19 = vpop.eup %10448  ;;  %v8077_v53 = vld [vmem:[%s16846_s0 + $0x1e8] sm:$0xff]  }
  0xfd   :  { %10458 = vpow2.f32 %v8357_v6  ;;  %v11592_v41 = vand.u32 2147483647, %v11567_v48  ;;  %1008 = vadd.xlane.f32.xlu1 %v1007_v35  ;;  %v8320_v44 = vand.u32 2147483648, %v11433_v58  ;;  %v386_v51 = vmax.f32 %v8004_v5, 1e-06 }
  0xfe   :  { %10460 = vpow2.f32 %v8339_v7  ;;  %v1004_v50 = vsel %vm16848_vm0, %v639_v15, 0.0  ;;  %v11596_v34 = vpack.c.bf16 %v8223_v30, %v8205_v22  ;;  %v8259_v9 = vsel %vm8245_vm7, inf, %v8258_v33  ;;  %v10451_v55 = vpop.eup %10450  ;;  %v718_v7 = vpop.xlane.xlu0 %717 }
  0xff   :  { %vm8281_vm14 = vcmp.eq.f32.partialorder %v11421_v26, inf  ;;  %vm8324_vm15 = vweird.f32 %v11437_v61  ;;  %1005 = vadd.xlane.f32.xlu0 %v1004_v50  ;;  %v8003_v12 = vunpack.c.l.bf16 %v8076_v60  ;;  %v8241_v45 = vsel %vm8227_vm8, inf, %v8240_v13  ;;  %v727_v50 = vpop.xlane.xlu1 %726 }
 0x100   :  { %v8293_v57 = vsel %vm8279_vm9, nan, %v8292_v47  ;;  %vm8263_vm2 = vcmp.eq.f32.partialorder %v11425_v37, inf  ;;  %v8275_v16 = vsel %vm8261_vm10, nan, %v8274_v4  ;;  %vm8326_vm4 = vcmp.eq.f32.partialorder %v11437_v61, 0.0  ;;  %v10453_v14 = vpop.eup %10452 }
 0x101   :  { %10462 = vlog2.f32 %v11582_v31  ;;  %v8323_v24 = vor.u32 %v10447_v40, %v8320_v44  ;;  %v8393_v17 = vmul.f32 0.33333334, %v10449_v19  ;;  %v11614_v11 = vmul.f32 0.03125, %v721_v46  ;;  %v10455_v28 = vpop.eup %10454 }
 0x102   :  { %10464 = vlog2.f32 %v11592_v41  ;;  %v8302_v54 = vand.u32 2147483648, %v11439_v0  ;;  %vm8306_vm3 = vweird.f32 %v11446_v39  ;;  %v514_v59 = vmul.f32 %v386_v51, %v386_v51  ;;  %v724_v26 = vpop.xlane.xlu0 %723 }
 0x103   :  { %v385_v60 = vmax.f32 %v8003_v12, 1e-06  ;;  %v11618_v63 = vpack.c.bf16 %v8259_v9, %v8241_v45  ;;  %v8294_v2 = vsel %vm8278_vm11, 0.0, %v8293_v57  ;;  %vm8315_vm1 = vcmp.lt.f32.partialorder %v11433_v58, 0.0  ;;  %v10457_v27 = vpop.eup %10456 }
 0x104   :  { %v8356_v52 = vand.u32 2147483648, %v11448_v18  ;;  %v8375_v6 = vmul.f32 0.33333334, %v10451_v55  ;;  %v8276_v5 = vsel %vm8260_vm12, 0.0, %v8275_v16  ;;  %vm8308_vm5 = vcmp.eq.f32.partialorder %v11446_v39, 0.0 }
 0x105   :  { %v8429_v30 = vmul.f32 0.33333334, %v10453_v14  ;;  %v642_v22 = vmul.f32 %v514_v59, %v386_v51  ;;  %v513_v32 = vmul.f32 %v385_v60, %v385_v60  ;;  %v8325_v33 = vsel %vm8324_vm15, %v11433_v58, %v8323_v24 }
 0x106   :  { %v8305_v13 = vor.u32 %v10455_v28, %v8302_v54  ;;  %vm8360_vm6 = vweird.f32 %v11457_v25  ;;  %10466 = vpow2.f32 %v8393_v17  ;;  %v11637_v35 = vand.u32 2147483647, %v11614_v11 }
 0x107   :  { %v11639_v20 = vmul.f32 0.03125, %v718_v7  ;;  %v1013_v15 = vsel %vm16848_vm0, %v642_v22, 0.0  ;;  %v641_v40 = vmul.f32 %v513_v32, %v385_v60  ;;  %v8008_v47 = vunpack.c.h.bf16 %v8077_v53  ;;  %v10459_v4 = vpop.eup %10458  ;;  %v733_v22 = vpop.xlane.xlu1 %732 }
 0x108   :  { %vm8314_vm7 = vcmp.eq.f32.partialorder %v11433_v58, 0.0  ;;  %vm8297_vm8 = vcmp.lt.f32.partialorder %v11439_v0, 0.0  ;;  %v8338_v19 = vand.u32 2147483648, %v11450_v8  ;;  %vm8342_vm9 = vweird.f32 %v11463_v36  ;;  %1014 = vadd.xlane.f32.xlu1 %v1013_v15  ;;  %v10461_v51 = vpop.eup %10460 }
 0x109   :  { %10468 = vpow2.f32 %v8375_v6  ;;  %v8411_v46 = vmul.f32 0.33333334, %v10457_v27  ;;  %v8295_v9 = vsel %vm8281_vm14, inf, %v8294_v2  ;;  %v8392_v12 = vand.u32 2147483648, %v11481_v38 }
 0x10a   :  { %10470 = vpow2.f32 %v8429_v30  ;;  %v1010_v55 = vsel %vm16848_vm0, %v641_v40, 0.0  ;;  %v8277_v45 = vsel %vm8263_vm2, inf, %v8276_v5  ;;  %v8328_v57 = vsel %vm8326_vm4, %v8320_v44, %v8325_v33 }
 0x10b   :  { %v8307_v16 = vsel %vm8306_vm3, %v11439_v0, %v8305_v13  ;;  %vm8362_vm10 = vcmp.eq.f32.partialorder %v11457_v25, 0.0  ;;  %vm8344_vm11 = vcmp.eq.f32.partialorder %v11463_v36, 0.0  ;;  %10472 = vlog2.f32 %v11637_v35  ;;  %1011 = vadd.xlane.f32.xlu0 %v1010_v55  ;;  %v10463_v14 = vpop.eup %10462 }
 0x10c   :  { %v8359_v37 = vor.u32 %v10459_v4, %v8356_v52  ;;  %v11665_v24 = vand.u32 2147483647, %v11639_v20  ;;  %v388_v44 = vmax.f32 %v8008_v47, 1e-06  ;;  %v8007_v17 = vunpack.c.l.bf16 %v8077_v53  ;;  %v10465_v28 = vpop.eup %10464 }
 0x10d   :  { %vm8296_vm12 = vcmp.eq.f32.partialorder %v11439_v0, 0.0  ;;  %v8341_v59 = vor.u32 %v10461_v51, %v8338_v19  ;;  %v8374_v60 = vand.u32 2147483648, %v11489_v42  ;;  %10474 = vpow2.f32 %v8411_v46 }
 0x10e   :  { %v11671_v2 = vmul.f32 0.03125, %v727_v50  ;;  %v11673_v6 = vpack.c.bf16 %v8295_v9, %v8277_v45  ;;  %vm8317_vm13 = vcmp.eq.f32.partialorder %v11437_v61, inf  ;;  %v8329_v7 = vsel %vm8315_vm1, nan, %v8328_v57 }
 0x10f   :  { %vm8351_vm14 = vcmp.lt.f32.partialorder %v11448_v18, 0.0  ;;  %vm8333_vm15 = vcmp.lt.f32.partialorder %v11450_v8, 0.0  ;;  %v8428_v53 = vand.u32 2147483648, %v11493_v43  ;;  %v11681_v27 = vmul.f32 0.03125, %v724_v26 }
 0x110   :  { %v8310_v5 = vsel %vm8308_vm5, %v8302_v54, %v8307_v16  ;;  %v8465_v30 = vmul.f32 0.33333334, %v10463_v14  ;;  %v516_v32 = vmul.f32 %v388_v44, %v388_v44  ;;  %v387_v33 = vmax.f32 %v8007_v17, 1e-06  ;;  %v8078_v54 = vld [vmem:[%s16846_s0 + $0x1f0] sm:$0xff]   ;;  %v10467_v47 = vpop.eup %10466  ;;  %v730_v16 = vpop.xlane.xlu0 %729 }
 0x111   :  { %vm8299_vm2 = vcmp.eq.f32.partialorder %v11446_v39, inf  ;;  %v8361_v13 = vsel %vm8360_vm6, %v11448_v18, %v8359_v37  ;;  %vm8396_vm4 = vweird.f32 %v11499_v10  ;;  %v8410_v15 = vand.u32 2147483648, %v11521_v23 }
 0x112   :  { %v8447_v40 = vmul.f32 0.33333334, %v10465_v28  ;;  %10476 = vlog2.f32 %v11665_v24  ;;  %vm8350_vm3 = vcmp.eq.f32.partialorder %v11448_v18, 0.0  ;;  %v8343_v4 = vsel %vm8342_vm9, %v11450_v8, %v8341_v59 }
 0x113   :  { %v11702_v46 = vand.u32 2147483647, %v11671_v2  ;;  %v644_v50 = vmul.f32 %v516_v32, %v388_v44  ;;  %v515_v51 = vmul.f32 %v387_v33, %v387_v33  ;;  %v8330_v9 = vsel %vm8314_vm7, 0.0, %v8329_v7  ;;  %v10469_v26 = vpop.eup %10468 }
 0x114   :  { %v8311_v55 = vsel %vm8297_vm8, nan, %v8310_v5  ;;  %vm8332_vm1 = vcmp.eq.f32.partialorder %v11450_v8, 0.0  ;;  %v11710_v45 = vand.u32 2147483647, %v11681_v27  ;;  %v11712_v57 = vmul.f32 0.03125, %v733_v22  ;;  %v10471_v44 = vpop.eup %10470 }
 0x115   :  { %vm8398_vm5 = vcmp.eq.f32.partialorder %v11499_v10, 0.0  ;;  %vm8378_vm6 = vweird.f32 %v11519_v21  ;;  %vm8432_vm9 = vweird.f32 %v11528_v1  ;;  %10478 = vpow2.f32 %v8465_v30  ;;  %v10473_v7 = vpop.eup %10472 }
 0x116   :  { %v1019_v58 = vsel %vm16848_vm0, %v644_v50, 0.0  ;;  %v643_v14 = vmul.f32 %v515_v51, %v387_v33  ;;  %v8012_v37 = vunpack.c.h.bf16 %v8078_v54  ;;  %v8364_v17 = vsel %vm8362_vm10, %v8356_v52, %v8361_v13  ;;  %v736_v51 = vpop.xlane.xlu0 %735 }
 0x117   :  { %v8346_v28 = vsel %vm8344_vm11, %v8338_v19, %v8343_v4  ;;  %10480 = vpow2.f32 %v8447_v40  ;;  %1020 = vadd.xlane.f32.xlu1 %v1019_v58  ;;  %v8011_v59 = vunpack.c.l.bf16 %v8078_v54  ;;  %vm8353_vm7 = vcmp.eq.f32.partialorder %v11457_v25, inf  ;;  %v10475_v33 = vpop.eup %10474  ;;  %v739_v54 = vpop.xlane.xlu1 %738 }
 0x118   :  { %v8395_v5 = vor.u32 %v10467_v47, %v8392_v12  ;;  %vm8414_vm8 = vweird.f32 %v11546_v49  ;;  %10482 = vlog2.f32 %v11702_v46  ;;  %v11731_v30 = vmul.f32 0.03125, %v730_v16 }
 0x119   :  { %v1016_v52 = vsel %vm16848_vm0, %v643_v14, 0.0  ;;  %v8312_v19 = vsel %vm8296_vm12, 0.0, %v8311_v55  ;;  %vm8335_vm10 = vcmp.eq.f32.partialorder %v11463_v36, inf  ;;  %v8464_v22 = vand.u32 2147483648, %v11562_v56 }
 0x11a   :  { %10484 = vlog2.f32 %v11710_v45  ;;  %v11740_v32 = vand.u32 2147483647, %v11712_v57  ;;  %1017 = vadd.xlane.f32.xlu0 %v1016_v52  ;;  %v8331_v13 = vsel %vm8317_vm13, inf, %v8330_v9  ;;  %v8365_v40 = vsel %vm8351_vm14, nan, %v8364_v17 }
 0x11b   :  { %v8347_v0 = vsel %vm8333_vm15, nan, %v8346_v28  ;;  %vm8387_vm11 = vcmp.lt.f32.partialorder %v11481_v38, 0.0  ;;  %vm8380_vm12 = vcmp.eq.f32.partialorder %v11519_v21, 0.0  ;;  %vm8434_vm0 = vcmp.eq.f32.partialorder %v11528_v1, 0.0 }
 0x11c   :  { %v390_v47 = vmax.f32 %v8012_v37, 1e-06  ;;  %v8377_v4 = vor.u32 %v10469_v26, %v8374_v60  ;;  %v8431_v61 = vor.u32 %v10471_v44, %v8428_v53  ;;  %vm8416_vm13 = vcmp.eq.f32.partialorder %v11546_v49, 0.0  ;;  %v10477_v26 = vpop.eup %10476 }
 0x11d   :  { %v8501_v50 = vmul.f32 0.33333334, %v10473_v7  ;;  %v389_v9 = vmax.f32 %v8011_v59, 1e-06  ;;  %v8313_v55 = vsel %vm8299_vm2, inf, %v8312_v19  ;;  %v8397_v16 = vsel %vm8396_vm4, %v11481_v38, %v8395_v5  ;;  %v745_v19 = vpop.xlane.xlu1 %744 }
 0x11e   :  { %v8446_v58 = vand.u32 2147483648, %v11567_v48  ;;  %v11763_v14 = vand.u32 2147483647, %v11731_v30  ;;  %v8366_v37 = vsel %vm8350_vm3, 0.0, %v8365_v40  ;;  %v8413_v44 = vor.u32 %v10475_v33, %v8410_v15 }
 0x11f   :  { %10486 = vlog2.f32 %v11740_v32  ;;  %v11770_v39 = vmul.f32 0.03125, %v739_v54  ;;  %v8348_v17 = vsel %vm8332_vm1, 0.0, %v8347_v0  ;;  %vm8386_vm14 = vcmp.eq.f32.partialorder %v11481_v38, 0.0  ;;  %v10479_v52 = vpop.eup %10478 }
 0x120   :  { %v11775_v28 = vmul.f32 0.03125, %v736_v51  ;;  %v518_v59 = vmul.f32 %v390_v47, %v390_v47  ;;  %v517_v7 = vmul.f32 %v389_v9, %v389_v9  ;;  %v8400_v18 = vsel %vm8398_vm5, %v8392_v12, %v8397_v16 }
 0x121   :  { %vm8369_vm15 = vcmp.lt.f32.partialorder %v11489_v42, 0.0  ;;  %v8379_v5 = vsel %vm8378_vm6, %v11489_v42, %v8377_v4  ;;  %vm8423_vm2 = vcmp.lt.f32.partialorder %v11493_v43, 0.0  ;;  %v8433_v8 = vsel %vm8432_vm9, %v11493_v43, %v8431_v61  ;;  %v10481_v0 = vpop.eup %10480 }
 0x122   :  { %vm8405_vm4 = vcmp.lt.f32.partialorder %v11521_v23, 0.0  ;;  %10488 = vpow2.f32 %v8501_v50  ;;  %vm8468_vm3 = vweird.f32 %v11582_v31  ;;  %vm8450_vm1 = vweird.f32 %v11592_v41  ;;  %v10483_v51 = vpop.eup %10482 }
 0x123   :  { %v8483_v12 = vmul.f32 0.33333334, %v10477_v26  ;;  %10490 = vlog2.f32 %v11763_v14  ;;  %v646_v33 = vmul.f32 %v518_v59, %v390_v47  ;;  %v645_v40 = vmul.f32 %v517_v7, %v389_v9  ;;  %v742_v9 = vpop.xlane.xlu0 %741 }
 0x124   :  { %v11793_v54 = vpack.c.bf16 %v8331_v13, %v8313_v55  ;;  %v8367_v4 = vsel %vm8353_vm7, inf, %v8366_v37  ;;  %v8415_v61 = vsel %vm8414_vm8, %v11521_v23, %v8413_v44  ;;  %v11801_v50 = vand.u32 2147483647, %v11770_v39  ;;  %v8079_v55 = vld [vmem:[%s16846_s0 + $0x1f8] sm:$0xff]   ;;  %v10485_v26 = vpop.eup %10484  ;;  %s10929_s0 = smov [#allocation2]  }
 0x125   :  { %v8349_v16 = vsel %vm8335_vm10, inf, %v8348_v17  ;;  %v11806_v47 = vand.u32 2147483647, %v11775_v28  ;;  %vm16908_vm5 = vcmask 261120   ;;  %v8401_v37 = vsel %vm8387_vm11, nan, %v8400_v18  ;;  %s7752_s18 = sshll.u32 %s10929_s0, 4  ;;  %s7753_s18 = int_to_ptr.vmem [resolvable:$true] %s7752_s18 }
 0x126   :  { %v1025_v13 = vsel %vm16908_vm5, %v646_v33, 0.0  ;;  %vm16909_vm6 = vmmov %vm16908_vm5  ;;  %vm8368_vm9 = vcmp.eq.f32.partialorder %v11489_v42, 0.0  ;;  %v8382_v36 = vsel %vm8380_vm12, %v8374_v60, %v8379_v5  ;;  %vm8422_vm7 = vcmp.eq.f32.partialorder %v11493_v43, 0.0  ;;  %s10902_s19 = scalar_lea.vmem %s7753_s18, 64  ;;  %p10907_p1 = scmp.lt.s32.totalorder %s7753_s18, %s7753_s18 }
 0x127   :  { %v1022_v25 = vsel %vm16909_vm6, %v645_v40, 0.0  ;;  %v8436_v44 = vsel %vm8434_vm0, %v8428_v53, %v8433_v8  ;;  %vm8404_vm8 = vcmp.eq.f32.partialorder %v11521_v23, 0.0  ;;  %v11826_v17 = vmul.f32 0.03125, %v745_v19  ;;  %1026 = vadd.xlane.f32.xlu1 %v1025_v13  ;;  %p10903_p0 = scmp.ne.s32.totalorder %s7753_s18, %s10902_s19  ;;  %p10908_p2 = scmp.lt.s32.totalorder %s10902_s19, %s10902_s19 }
 0x128   :  { %1023 = vadd.xlane.f32.xlu0 %v1022_v25  ;;  %v8418_v59 = vsel %vm8416_vm13, %v8410_v15, %v8415_v61  ;;  %v8467_v60 = vor.u32 %v10479_v52, %v8464_v22  ;;  %vm8470_vm10 = vcmp.eq.f32.partialorder %v11582_v31, 0.0  ;;  %v8449_v7 = vor.u32 %v10481_v0, %v8446_v58  ;;  %v751_v0 = vpop.xlane.xlu1 %750 }
 0x129   :  { %10492 = vpow2.f32 %v8483_v12  ;;  %vm8452_vm0 = vcmp.eq.f32.partialorder %v11592_v41, 0.0  ;;  %v8537_v53 = vmul.f32 0.33333334, %v10483_v51  ;;  %v8016_v18 = vunpack.c.h.bf16 %v8079_v55  ;;  %v10487_v19 = vpop.eup %10486  ;;  %p10909_p3 = por %p10908_p2, %p10907_p1 }
 0x12a   :  { %10494 = vlog2.f32 %v11801_v50  ;;  %v8015_v5 = vunpack.c.l.bf16 %v8079_v55  ;;  %v11839_v8 = vpack.c.bf16 %v8367_v4, %v8349_v16  ;;  %vm8389_vm11 = vcmp.eq.f32.partialorder %v11499_v10, inf  ;;  %v748_v16 = vpop.xlane.xlu0 %747 }
 0x12b   :  { %v8500_v15 = vand.u32 2147483648, %v11614_v11  ;;  %v8519_v52 = vmul.f32 0.33333334, %v10485_v26  ;;  %10496 = vlog2.f32 %v11806_v47  ;;  %v8402_v12 = vsel %vm8386_vm14, 0.0, %v8401_v37  ;;  %p10910_p4 = pnand %p10909_p3, %p10903_p0 }
 0x12c   :  { %vm8371_vm12 = vcmp.eq.f32.partialorder %v11519_v21, inf  ;;  %vm8425_vm13 = vcmp.eq.f32.partialorder %v11528_v1, inf  ;;  %v11850_v33 = vand.u32 2147483647, %v11826_v17  ;;  %v11852_v40 = vmul.f32 0.03125, %v742_v9  ;;  %v10489_v13 = vpop.eup %10488 }
 0x12d   :  { %v392_v4 = vmax.f32 %v8016_v18, 1e-06  ;;  %v8383_v61 = vsel %vm8369_vm15, nan, %v8382_v36  ;;  %v8437_v38 = vsel %vm8423_vm2, nan, %v8436_v44  ;;  %vm8407_vm14 = vcmp.eq.f32.partialorder %v11546_v49, inf  ;;  %v10491_v37 = vpop.eup %10490 }
 0x12e   :  { %v8419_v51 = vsel %vm8405_vm4, nan, %v8418_v59  ;;  %vm8441_vm6 = vcmp.lt.f32.partialorder %v11567_v48, 0.0  ;;  %vm8504_vm5 = vweird.f32 %v11637_v35  ;;  %v391_v9 = vmax.f32 %v8015_v5, 1e-06 }
 0x12f   :  { %v8469_v25 = vsel %vm8468_vm3, %v11562_v56, %v8467_v60  ;;  %v8451_v55 = vsel %vm8450_vm1, %v11567_v48, %v8449_v7  ;;  %10498 = vpow2.f32 %v8537_v53  ;;  %v520_v26 = vmul.f32 %v392_v4, %v392_v4 }
 0x130   :  { %vm8458_vm15 = vcmp.eq.f32.partialorder %v11562_v56, 0.0  ;;  %10500 = vpow2.f32 %v8519_v52  ;;  %v8573_v36 = vmul.f32 0.33333334, %v10487_v19  ;;  %v11870_v44 = vmul.f32 0.03125, %v751_v0 }
 0x131   :  { %v519_v59 = vmul.f32 %v391_v9, %v391_v9  ;;  %vm8440_vm2 = vcmp.eq.f32.partialorder %v11567_v48, 0.0  ;;  %10502 = vlog2.f32 %v11850_v33  ;;  %v11875_v60 = vand.u32 2147483647, %v11852_v40 }
 0x132   :  { %v11877_v18 = vmul.f32 0.03125, %v748_v16  ;;  %v648_v7 = vmul.f32 %v520_v26, %v392_v4  ;;  %v8384_v53 = vsel %vm8368_vm9, 0.0, %v8383_v61  ;;  %v8438_v5 = vsel %vm8422_vm7, 0.0, %v8437_v38 }
 0x133   :  { %v8420_v52 = vsel %vm8404_vm8, 0.0, %v8419_v51  ;;  %vm8506_vm4 = vcmp.eq.f32.partialorder %v11637_v35, 0.0  ;;  %v647_v19 = vmul.f32 %v519_v59, %v391_v9  ;;  %vm8461_vm3 = vcmp.eq.f32.partialorder %v11582_v31, inf  ;;  %v10493_v61 = vpop.eup %10492 }
 0x134   :  { %v8472_v0 = vsel %vm8470_vm10, %v8464_v22, %v8469_v25  ;;  %v8503_v42 = vor.u32 %v10489_v13, %v8500_v15  ;;  %v8555_v4 = vmul.f32 0.33333334, %v10491_v37  ;;  %vm16910_vm1 = vcmask 261120   ;;  %v10495_v51 = vpop.eup %10494 }
 0x135   :  { %v1031_v43 = vsel %vm16910_vm1, %v648_v7, 0.0  ;;  %vm8443_vm9 = vcmp.eq.f32.partialorder %v11592_v41, inf  ;;  %v8454_v23 = vsel %vm8452_vm0, %v8446_v58, %v8451_v55  ;;  %10504 = vpow2.f32 %v8573_v36  ;;  %vm16911_vm7 = vmmov %vm16910_vm1  ;;  %v757_v58 = vpop.xlane.xlu1 %756  ;;  %v10497_v25 = vpop.eup %10496 }
 0x136   :  { %v11900_v38 = vand.u32 2147483647, %v11870_v44  ;;  %1032 = vadd.xlane.f32.xlu1 %v1031_v43  ;;  %v1028_v22 = vsel %vm16911_vm7, %v647_v19, 0.0  ;;  %v8403_v16 = vsel %vm8389_vm11, inf, %v8402_v12  ;;  %vm8495_vm8 = vcmp.lt.f32.partialorder %v11614_v11, 0.0  ;;  %v754_v7 = vpop.xlane.xlu0 %753 }
 0x137   :  { %v8482_v9 = vand.u32 2147483648, %v11639_v20  ;;  %10506 = vlog2.f32 %v11875_v60  ;;  %v11909_v13 = vand.u32 2147483647, %v11877_v18  ;;  %1029 = vadd.xlane.f32.xlu0 %v1028_v22  ;;  %v8385_v55 = vsel %vm8371_vm12, inf, %v8384_v53 }
 0x138   :  { %v8439_v26 = vsel %vm8425_vm13, inf, %v8438_v5  ;;  %vm16912_vm10 = vcmp.lt.f32.partialorder %v11562_v56, 0.0  ;;  %vm8486_vm0 = vweird.f32 %v11665_v24  ;;  %v8421_v12 = vsel %vm8407_vm14, inf, %v8420_v52 }
 0x139   :  { %v8473_v10 = vsel %vm16912_vm10, nan, %v8472_v0  ;;  %v8455_v37 = vsel %vm8441_vm6, nan, %v8454_v23  ;;  %v8505_v36 = vsel %vm8504_vm5, %v11614_v11, %v8503_v42  ;;  %10508 = vpow2.f32 %v8555_v4  ;;  %v10499_v53 = vpop.eup %10498 }
 0x13a   :  { %vm8494_vm11 = vcmp.eq.f32.partialorder %v11614_v11, 0.0  ;;  %v8485_v21 = vor.u32 %v10493_v61, %v8482_v9  ;;  %v8609_v1 = vmul.f32 0.33333334, %v10495_v51  ;;  %10510 = vlog2.f32 %v11900_v38  ;;  %v10501_v52 = vpop.eup %10500 }
 0x13b   :  { %v11927_v59 = vmul.f32 0.03125, %v757_v58  ;;  %v8474_v49 = vsel %vm8458_vm15, 0.0, %v8473_v10  ;;  %vm8477_vm12 = vcmp.lt.f32.partialorder %v11639_v20, 0.0  ;;  %vm8488_vm13 = vcmp.eq.f32.partialorder %v11665_v24, 0.0  ;;  %v10503_v4 = vpop.eup %10502 }
 0x13c   :  { %v8591_v5 = vmul.f32 0.33333334, %v10497_v25  ;;  %10512 = vlog2.f32 %v11909_v13  ;;  %v11934_v19 = vpack.c.bf16 %v8403_v16, %v8385_v55  ;;  %v8456_v0 = vsel %vm8440_vm2, 0.0, %v8455_v37 }
 0x13d   :  { %v8536_v42 = vand.u32 2147483648, %v11671_v2  ;;  %vm8540_vm5 = vweird.f32 %v11702_v46  ;;  %v11940_v56 = vpack.c.bf16 %v8439_v26, %v8421_v12  ;;  %v8508_v43 = vsel %vm8506_vm4, %v8500_v15, %v8505_v36 }
 0x13e   :  { %vm8542_vm14 = vcmp.eq.f32.partialorder %v11702_v46, 0.0  ;;  %v8518_v61 = vand.u32 2147483648, %v11681_v27  ;;  %v11948_v23 = vmul.f32 0.03125, %v754_v7  ;;  %v8475_v48 = vsel %vm8461_vm3, inf, %v8474_v49  ;;  %v760_v49 = vpop.xlane.xlu0 %759 }
 0x13f   :  { %vm8497_vm6 = vcmp.eq.f32.partialorder %v11637_v35, inf  ;;  %vm8476_vm15 = vcmp.eq.f32.partialorder %v11639_v20, 0.0  ;;  %v8487_v22 = vsel %vm8486_vm0, %v11639_v20, %v8485_v21  ;;  %10514 = vpow2.f32 %v8609_v1  ;;  %v10505_v31 = vpop.eup %10504  ;;  %v763_v21 = vpop.xlane.xlu1 %762 }
 0x140   :  { %v11958_v15 = vand.u32 2147483647, %v11927_v59  ;;  %v8457_v51 = vsel %vm8443_vm9, inf, %v8456_v0  ;;  %v8539_v16 = vor.u32 %v10499_v53, %v8536_v42  ;;  %v8521_v58 = vor.u32 %v10501_v52, %v8518_v61 }
 0x141   :  { %10516 = vpow2.f32 %v8591_v5  ;;  %v8509_v25 = vsel %vm8495_vm8, nan, %v8508_v43  ;;  %vm8531_vm2 = vcmp.lt.f32.partialorder %v11671_v2, 0.0  ;;  %vm8513_vm4 = vcmp.lt.f32.partialorder %v11681_v27, 0.0  ;;  %v10507_v26 = vpop.eup %10506 }
 0x142   :  { %vm8522_vm3 = vweird.f32 %v11710_v45  ;;  %vm8524_vm1 = vcmp.eq.f32.partialorder %v11710_v45, 0.0  ;;  %v8645_v55 = vmul.f32 0.33333334, %v10503_v4  ;;  %vm8479_vm7 = vcmp.eq.f32.partialorder %v11665_v24, inf }
 0x143   :  { %v8490_v41 = vsel %vm8488_vm13, %v8482_v9, %v8487_v22  ;;  %v8572_v10 = vand.u32 2147483648, %v11712_v57  ;;  %vm8576_vm9 = vweird.f32 %v11740_v32  ;;  %v11974_v12 = vand.u32 2147483647, %v11948_v23  ;;  %v10509_v1 = vpop.eup %10508 }
 0x144   :  { %v11976_v37 = vpack.c.bf16 %v8475_v48, %v8457_v51  ;;  %vm8578_vm8 = vcmp.eq.f32.partialorder %v11740_v32, 0.0  ;;  %v8554_v36 = vand.u32 2147483648, %v11731_v30  ;;  %10518 = vlog2.f32 %v11958_v15  ;;  %v10511_v5 = vpop.eup %10510 }
 0x145   :  { %v8510_v9 = vsel %vm8494_vm11, 0.0, %v8509_v25  ;;  %vm8530_vm10 = vcmp.eq.f32.partialorder %v11671_v2, 0.0  ;;  %v8541_v7 = vsel %vm8540_vm5, %v11671_v2, %v8539_v16  ;;  %vm8512_vm0 = vcmp.eq.f32.partialorder %v11681_v27, 0.0 }
 0x146   :  { %v8523_v53 = vsel %vm8522_vm3, %v11681_v27, %v8521_v58  ;;  %vm8558_vm13 = vweird.f32 %v11763_v14  ;;  %v8491_v11 = vsel %vm8477_vm12, nan, %v8490_v41  ;;  %v8575_v52 = vor.u32 %v10505_v31, %v8572_v10  ;;  %v10513_v4 = vpop.eup %10512 }
 0x147   :  { %10520 = vpow2.f32 %v8645_v55  ;;  %v8627_v0 = vmul.f32 0.33333334, %v10507_v26  ;;  %vm8567_vm11 = vcmp.lt.f32.partialorder %v11712_v57, 0.0  ;;  %vm8560_vm5 = vcmp.eq.f32.partialorder %v11763_v14, 0.0 }
 0x148   :  { %v8608_v43 = vand.u32 2147483648, %v11770_v39  ;;  %10522 = vlog2.f32 %v11974_v12  ;;  %v11998_v48 = vmul.f32 0.03125, %v763_v21  ;;  %v8544_v22 = vsel %vm8542_vm14, %v8536_v42, %v8541_v7 }
 0x149   :  { %v8526_v51 = vsel %vm8524_vm1, %v8518_v61, %v8523_v53  ;;  %v8557_v16 = vor.u32 %v10509_v1, %v8554_v36  ;;  %v12008_v58 = vmul.f32 0.03125, %v760_v49  ;;  %v8511_v31 = vsel %vm8497_vm6, inf, %v8510_v9  ;;  %v10515_v55 = vpop.eup %10514  ;;  %v769_v49 = vpop.xlane.xlu1 %768 }
 0x14a   :  { %v8492_v25 = vsel %vm8476_vm15, 0.0, %v8491_v11  ;;  %vm8549_vm3 = vcmp.lt.f32.partialorder %v11731_v30, 0.0  ;;  %vm8612_vm14 = vweird.f32 %v11801_v50  ;;  %v8681_v42 = vmul.f32 0.33333334, %v10511_v5 }
 0x14b   :  { %vm8566_vm12 = vcmp.eq.f32.partialorder %v11712_v57, 0.0  ;;  %v8577_v61 = vsel %vm8576_vm9, %v11712_v57, %v8575_v52  ;;  %v8590_v26 = vand.u32 2147483648, %v11775_v28  ;;  %10524 = vpow2.f32 %v8627_v0  ;;  %v10517_v41 = vpop.eup %10516 }
 0x14c   :  { %v8663_v35 = vmul.f32 0.33333334, %v10513_v4  ;;  %v8545_v20 = vsel %vm8531_vm2, nan, %v8544_v22  ;;  %v8527_v21 = vsel %vm8513_vm4, nan, %v8526_v51  ;;  %vm8614_vm6 = vcmp.eq.f32.partialorder %v11801_v50, 0.0 }
 0x14d   :  { %vm8594_vm15 = vweird.f32 %v11806_v47  ;;  %v12028_v1 = vand.u32 2147483647, %v11998_v48  ;;  %v8493_v9 = vsel %vm8479_vm7, inf, %v8492_v25  ;;  %vm8548_vm1 = vcmp.eq.f32.partialorder %v11731_v30, 0.0 }
 0x14e   :  { %v8559_v7 = vsel %vm8558_vm13, %v11731_v30, %v8557_v16  ;;  %vm8596_vm2 = vcmp.eq.f32.partialorder %v11806_v47, 0.0  ;;  %v12038_v53 = vand.u32 2147483647, %v12008_v58  ;;  %vm8569_vm4 = vcmp.eq.f32.partialorder %v11740_v32, inf  ;;  %v10519_v0 = vpop.eup %10518 }
 0x14f   :  { %v8580_v5 = vsel %vm8578_vm8, %v8572_v10, %v8577_v61  ;;  %v8611_v24 = vor.u32 %v10515_v55, %v8608_v43  ;;  %v8644_v11 = vand.u32 2147483648, %v11826_v17  ;;  %10526 = vpow2.f32 %v8681_v42 }
 0x150   :  { %v10926_v52 = vmov 0   ;;  %v8546_v4 = vsel %vm8530_vm10, 0.0, %v8545_v20  ;;  %v8528_v22 = vsel %vm8512_vm0, 0.0, %v8527_v21  ;;  %vm8603_vm7 = vcmp.lt.f32.partialorder %v11770_v39, 0.0 }
 0x151   :  { %10389 = vset.pattern.permute.xlu1 %v10926_v52  ;;  %10388 = vset.pattern.permute.xlu0 %v10926_v52  ;;  %v8593_v10 = vor.u32 %v10517_v41, %v8590_v26  ;;  %10528 = vpow2.f32 %v8663_v35  ;;  %v12053_v51 = vpack.c.bf16 %v8511_v31, %v8493_v9  ;;  %vm8551_vm9 = vcmp.eq.f32.partialorder %v11763_v14, inf  ;;  %v10521_v27 = vpop.eup %10520 }
 0x152   :  { %v8562_v16 = vsel %vm8560_vm5, %v8554_v36, %v8559_v7  ;;  %vm8585_vm8 = vcmp.lt.f32.partialorder %v11775_v28, 0.0  ;;  %10530 = vlog2.f32 %v12028_v1  ;;  %v12062_v2 = vmul.f32 0.03125, %v769_v49  ;;  %v10523_v42 = vpop.eup %10522 }
 0x153   :  { %v8581_v25 = vsel %vm8567_vm11, nan, %v8580_v5  ;;  %vm8648_vm10 = vweird.f32 %v11850_v33  ;;  %v8626_v31 = vand.u32 2147483648, %v11852_v40  ;;  %10532 = vlog2.f32 %v12038_v53 }
 0x154   :  { %vm16913_vm0 = vcmp.eq.f32.partialorder %v11702_v46, inf  ;;  %vm16914_vm13 = vcmp.eq.f32.partialorder %v11710_v45, inf  ;;  %vm8602_vm5 = vcmp.eq.f32.partialorder %v11770_v39, 0.0  ;;  %v8613_v61 = vsel %vm8612_vm14, %v11770_v39, %v8611_v24  ;;  %v766_v45 = vpop.xlane.xlu0 %765 }
 0x155   :  { %v8547_v36 = vsel %vm16913_vm0, inf, %v8546_v4  ;;  %v8529_v55 = vsel %vm16914_vm13, inf, %v8528_v22  ;;  %v8717_v35 = vmul.f32 0.33333334, %v10519_v0  ;;  %v8563_v41 = vsel %vm8549_vm3, nan, %v8562_v16  ;;  %v10525_v5 = vpop.eup %10524 }
 0x156   :  { %vm8584_vm11 = vcmp.eq.f32.partialorder %v11775_v28, 0.0  ;;  %v8595_v46 = vsel %vm8594_vm15, %v11775_v28, %v8593_v10  ;;  %vm8630_vm0 = vweird.f32 %v11875_v60  ;;  %v16849_v20 = vlaneseq }
 0x157   :  { %v8582_v21 = vsel %vm8566_vm12, 0.0, %v8581_v25  ;;  %vm8650_vm13 = vcmp.eq.f32.partialorder %v11850_v33, 0.0  ;;  %v16851_v9 = vand.u32 2147483648, %v11870_v44  ;;  %v16850_v7 = vand.u32 2147483648, %v11877_v18 }
 0x158   :  { %v12090_v49 = vand.u32 2147483647, %v12062_v2  ;;  %v12092_v24 = vpack.c.bf16 %v8547_v36, %v8529_v55  ;;  %v8616_v52 = vsel %vm8614_vm6, %v8608_v43, %v8613_v61  ;;  %v8647_v57 = vor.u32 %v10521_v27, %v8644_v11 }
 0x159   :  { %v8699_v0 = vmul.f32 0.33333334, %v10523_v42  ;;  %v8564_v4 = vsel %vm8548_vm1, 0.0, %v8563_v41  ;;  %vm8605_vm3 = vcmp.eq.f32.partialorder %v11801_v50, inf  ;;  %v8598_v22 = vsel %vm8596_vm2, %v8590_v26, %v8595_v46  ;;  %v10527_v27 = vpop.eup %10526 }
 0x15a   :  { %16915 = vst [vmem:[#allocation5_spill] sm:$0xff] %v12092_v24  ;;  %vm8632_vm12 = vcmp.eq.f32.partialorder %v11875_v60, 0.0  ;;  %vm8684_vm14 = vweird.f32 %v11900_v38  ;;  %10534 = vpow2.f32 %v8717_v35  ;;  %v12109_v43 = vmul.f32 0.03125, %v766_v45 }
 0x15b   :  { %v8583_v10 = vsel %vm8569_vm4, inf, %v8582_v21  ;;  %vm8666_vm6 = vweird.f32 %v11909_v13  ;;  %v12116_v16 = vshrl.u32 %v16849_v20, 7  ;;  %v8617_v26 = vsel %vm8603_vm7, nan, %v8616_v52  ;;  %v10529_v32 = vpop.eup %10528 }
 0x15c   :  { %vm8587_vm15 = vcmp.eq.f32.partialorder %v11806_v47, inf  ;;  %vm8639_vm1 = vcmp.lt.f32.partialorder %v11826_v17, 0.0  ;;  %v8629_v25 = vor.u32 %v10525_v5, %v8626_v31  ;;  %10536 = vlog2.f32 %v12090_v49  ;;  %v10531_v61 = vpop.eup %10530 }
 0x15d   :  { %16916 = vst [vmem:[#allocation6_spill] sm:$0xff] %v12116_v16  ;;  %v8565_v42 = vsel %vm8551_vm9, inf, %v8564_v4  ;;  %v8599_v36 = vsel %vm8585_vm8, nan, %v8598_v22  ;;  %v8649_v55 = vsel %vm8648_vm10, %v11826_v17, %v8647_v57  ;;  %vm8686_vm2 = vcmp.eq.f32.partialorder %v11900_v38, 0.0  ;;  %v10533_v45 = vpop.eup %10532 }
 0x15e   :  { %10538 = vpow2.f32 %v8699_v0  ;;  %vm8621_vm4 = vcmp.lt.f32.partialorder %v11852_v40, 0.0  ;;  %vm8668_vm7 = vcmp.eq.f32.partialorder %v11909_v13, 0.0  ;;  %v12136_v35 = vand.u32 2147483647, %v12109_v43 }
 0x15f   :  { %v12139_v14 = vsub.s32 4, %v12116_v16  ;;  %v12142_v41 = vsub.s32 5, %v12116_v16  ;;  %v12145_v46 = vsub.s32 6, %v12116_v16  ;;  %v8618_v21 = vsel %vm8602_vm5, 0.0, %v8617_v26 }
 0x160   :  { %vm8638_vm9 = vcmp.eq.f32.partialorder %v11826_v17, 0.0  ;;  %v8683_v5 = vor.u32 %v10527_v27, %v16851_v9  ;;  %v12153_v52 = vsub.s32 7, %v12116_v16  ;;  %v10927_v57 = vmov 1935823168  }
 0x161   :  { %v3470_v0 = vunpack.c.l.s4 %v10927_v57  ;;  %v8600_v4 = vsel %vm8584_vm11, 0.0, %v8599_v36  ;;  %v8631_v22 = vsel %vm8630_vm0, %v11852_v40, %v8629_v25  ;;  %vm8675_vm8 = vcmp.lt.f32.partialorder %v11870_v44, 0.0  ;;  %v775_v36 = vpop.xlane.xlu1 %774 }
 0x162   :  { %v8665_v39 = vor.u32 %v10529_v32, %v16850_v7  ;;  %v1438_v27 = vrot.slane %v11335_v3, %v12139_v14  ;;  %v8652_v26 = vsel %vm8650_vm13, %v8644_v11, %v8649_v55  ;;  %vm8620_vm10 = vcmp.eq.f32.partialorder %v11852_v40, 0.0  ;;  %v772_v7 = vpop.xlane.xlu0 %771 }
 0x163   :  { %vm8657_vm5 = vcmp.lt.f32.partialorder %v11877_v18, 0.0  ;;  %v8753_v28 = vmul.f32 0.33333334, %v10531_v61  ;;  %v1442_v25 = vrot.slane %v11335_v3, %v12142_v41  ;;  %v1446_v32 = vrot.slane %v11335_v3, %v12145_v46 }
 0x164   :  { %v8735_v57 = vmul.f32 0.33333334, %v10533_v45  ;;  %10540 = vlog2.f32 %v12136_v35  ;;  %v1450_v11 = vrot.slane %v11335_v3, %v12153_v52  ;;  %v3471_v55 = vunpack.c.0.s8 %v3470_v0  ;;  %v10535_v9 = vpop.eup %10534 }
 0x165   :  { %v12180_v20 = vpack.c.bf16 %v8583_v10, %v8565_v42  ;;  %v8619_v61 = vsel %vm8605_vm3, inf, %v8618_v21  ;;  %v8634_v30 = vsel %vm8632_vm12, %v8626_v31, %v8631_v22  ;;  %vm8674_vm13 = vcmp.eq.f32.partialorder %v11870_v44, 0.0 }
 0x166   :  { %v8685_v45 = vsel %vm8684_vm14, %v11870_v44, %v8683_v5  ;;  %vm8623_vm0 = vcmp.eq.f32.partialorder %v11875_v60, inf  ;;  %vm8656_vm11 = vcmp.eq.f32.partialorder %v11877_v18, 0.0  ;;  %v8667_v50 = vsel %vm8666_vm6, %v11877_v18, %v8665_v39  ;;  %v10537_v22 = vpop.eup %10536 }
 0x167   :  { %16917 = vst [vmem:[#allocation7_spill] sm:$0xff] %v12180_v20  ;;  %v12197_v10 = vmul.f32 0.03125, %v775_v36  ;;  %v12200_v31 = vsub.s32 %v3471_v55, %v12116_v16  ;;  %v3491_v42 = vcombine.low %v1438_v27, %v1446_v32  ;;  %v8601_v21 = vsel %vm8587_vm15, inf, %v8600_v4 }
 0x168   :  { %v8653_v5 = vsel %vm8639_vm1, nan, %v8652_v26  ;;  %vm8722_vm3 = vcmp.eq.f32.partialorder %v11958_v15, 0.0  ;;  %10542 = vpow2.f32 %v8753_v28  ;;  %v3492_v0 = vcombine.low %v1442_v25, %v1450_v11  ;;  %v10539_v4 = vpop.eup %10538 }
 0x169   :  { %vm8677_vm12 = vcmp.eq.f32.partialorder %v11900_v38, inf  ;;  %v16918_v39 = vand.u32 2147483648, %v11870_v44  ;;  %10544 = vpow2.f32 %v8735_v57  ;;  %v12212_v27 = vmul.f32 0.03125, %v772_v7  ;;  %v778_v44 = vpop.xlane.xlu0 %777 }
 0x16a   :  { %v3499_v47 = vrot.slane %v3491_v42, %v12200_v31  ;;  %v8635_v26 = vsel %vm8621_vm4, nan, %v8634_v30  ;;  %v16919_v28 = vand.u32 2147483648, %v11877_v18  ;;  %v16920_v32 = vand.u32 2147483648, %v11927_v59 }
 0x16b   :  { %v8688_v36 = vsel %vm8686_vm2, %v16918_v39, %v8685_v45  ;;  %v3506_v55 = vrot.slane %v3492_v0, %v12200_v31  ;;  %v8654_v7 = vsel %vm8638_vm9, 0.0, %v8653_v5  ;;  %vm8659_vm14 = vcmp.eq.f32.partialorder %v11909_v13, inf }
 0x16c   :  { %v8670_v25 = vsel %vm8668_vm7, %v16919_v28, %v8667_v50  ;;  %v8719_v11 = vor.u32 %v10535_v9, %v16920_v32  ;;  %vm8711_vm6 = vcmp.lt.f32.partialorder %v11927_v59, 0.0  ;;  %v8698_v57 = vand.u32 2147483648, %v11948_v23  ;;  %v781_v50 = vpop.xlane.xlu1 %780 }
 0x16d   :  { %vm8702_vm15 = vweird.f32 %v11974_v12  ;;  %v12231_v30 = vand.u32 2147483647, %v12197_v10  ;;  %v8689_v45 = vsel %vm8675_vm8, nan, %v8688_v36  ;;  %vm8704_vm1 = vcmp.eq.f32.partialorder %v11974_v12, 0.0 }
 0x16e   :  { %v8789_v9 = vmul.f32 0.33333334, %v10537_v22  ;;  %v3507_v17 = vcombine.low %v3499_v47, %v3506_v55  ;;  %v12236_v42 = vpack.c.bf16 %v8619_v61, %v8601_v21  ;;  %v8636_v5 = vsel %vm8620_vm10, 0.0, %v8635_v26  ;;  %v10541_v21 = vpop.eup %10540 }
 0x16f   :  { %v8671_v0 = vsel %vm8657_vm5, nan, %v8670_v25  ;;  %v12243_v39 = vand.u32 2147483647, %v12212_v27  ;;  %vm16922_vm2 = vcmp.eq.f32.partialorder %v11850_v33, inf  ;;  %vm16923_vm4 = vweird.f32 %v11958_v15 }
 0x170   :  { %16921 = vst [vmem:[#allocation8_spill] sm:$0xff] %v12236_v42  ;;  %v8655_v28 = vsel %vm16922_vm2, inf, %v8654_v7  ;;  %v8721_v22 = vsel %vm16923_vm4, %v11927_v59, %v8719_v11  ;;  %v8701_v36 = vor.u32 %v10539_v4, %v8698_v57  ;;  %v3514_v61 = vrot.slane %v3507_v17, %v12200_v31 }
 0x171   :  { %v8690_v40 = vsel %vm8674_vm13, 0.0, %v8689_v45  ;;  %vm8710_vm7 = vcmp.eq.f32.partialorder %v11927_v59, 0.0  ;;  %vm8693_vm9 = vcmp.lt.f32.partialorder %v11948_v23, 0.0  ;;  %v16852_v47 = vand.u32 2147483648, %v11998_v48 }
 0x172   :  { %10546 = vlog2.f32 %v12231_v30  ;;  %v12257_v33 = vmul.f32 0.03125, %v781_v50  ;;  %v8637_v26 = vsel %vm8623_vm0, inf, %v8636_v5  ;;  %v8672_v4 = vsel %vm8656_vm11, 0.0, %v8671_v0  ;;  %v10543_v18 = vpop.eup %10542 }
 0x173   :  { %vm8756_vm8 = vweird.f32 %v12028_v1  ;;  %10548 = vpow2.f32 %v8789_v9  ;;  %v6540_v25 = vunpack.c.l.b16 %v3514_v61  ;;  %v8724_v11 = vsel %vm8722_vm3, %v16920_v32, %v8721_v22  ;;  %v10545_v17 = vpop.eup %10544 }
 0x174   :  { %10550 = vlog2.f32 %v12243_v39  ;;  %v12270_v55 = vsub.s32 0, %v12116_v16  ;;  %v12273_v60 = vsub.s32 1, %v12116_v16  ;;  %v8691_v7 = vsel %vm8677_vm12, inf, %v8690_v40 }
 0x175   :  { %vm8713_vm10 = vcmp.eq.f32.partialorder %v11958_v15, inf  ;;  %vm8692_vm5 = vcmp.eq.f32.partialorder %v11948_v23, 0.0  ;;  %v8703_v45 = vsel %vm8702_vm15, %v11948_v23, %v8701_v36  ;;  %v8734_v9 = vand.u32 2147483648, %v12008_v58  ;;  %6671 = vperm.xlu1 %10389, %v6540_v25  }
 0x176   :  { %v8771_v50 = vmul.f32 0.33333334, %v10541_v21  ;;  %vm8758_vm11 = vcmp.eq.f32.partialorder %v12028_v1, 0.0  ;;  %v12285_v5 = vand.u32 2147483647, %v12257_v33  ;;  %v12287_v38 = vmul.f32 0.03125, %v778_v44 }
 0x177   :  { %v12290_v0 = vsub.s32 2, %v12116_v16  ;;  %v12293_v22 = vsub.s32 3, %v12116_v16  ;;  %v8673_v36 = vsel %vm8659_vm14, inf, %v8672_v4  ;;  %v8725_v61 = vsel %vm8711_vm6, nan, %v8724_v11 }
 0x178   :  { %v1454_v21 = vrot.slane %v11332_v62, %v12270_v55  ;;  %v1458_v40 = vrot.slane %v11332_v62, %v12273_v60  ;;  %v8706_v44 = vsel %vm8704_vm1, %v8698_v57, %v8703_v45  ;;  %v8755_v25 = vor.u32 %v10543_v18, %v16852_v47  ;;  %v787_v18 = vpop.xlane.xlu1 %786 }
 0x179   :  { %v1462_v32 = vrot.slane %v11332_v62, %v12290_v0  ;;  %v1466_v13 = vrot.slane %v11332_v62, %v12293_v22  ;;  %v12311_v4 = vpack.c.bf16 %v8655_v28, %v8637_v26  ;;  %v8737_v11 = vor.u32 %v10545_v17, %v8734_v9 }
 0x17a   :  { %vm8738_vm0 = vweird.f32 %v12038_v53  ;;  %10552 = vpow2.f32 %v8771_v50  ;;  %vm8695_vm13 = vcmp.eq.f32.partialorder %v11974_v12, inf  ;;  %v12317_v57 = vand.u32 2147483647, %v12287_v38 }
 0x17b   :  { %16924 = vst [vmem:[#allocation9_spill] sm:$0xff] %v12311_v4  ;;  %10554 = vlog2.f32 %v12285_v5  ;;  %v3515_v45 = vcombine.low %v1454_v21, %v1462_v32  ;;  %v3516_v47 = vcombine.low %v1458_v40, %v1466_v13  ;;  %v12319_v16 = vpack.c.bf16 %v8691_v7, %v8673_v36  ;;  %v784_v36 = vpop.xlane.xlu0 %783 }
 0x17c   :  { %v8726_v28 = vsel %vm8710_vm7, 0.0, %v8725_v61  ;;  %v8707_v26 = vsel %vm8693_vm9, nan, %v8706_v44  ;;  %vm8740_vm3 = vcmp.eq.f32.partialorder %v12038_v53, 0.0  ;;  %v10547_v50 = vpop.eup %10546  ;;  %vm8747_vm12 = vcmp.lt.f32.partialorder %v11998_v48, 0.0 }
 0x17d   :  { %16925 = vst [vmem:[#allocation10_spill] sm:$0xff] %v12319_v16  ;;  %v8757_v17 = vsel %vm8756_vm8, %v11998_v48, %v8755_v25  ;;  %vm8729_vm14 = vcmp.lt.f32.partialorder %v12008_v58, 0.0  ;;  %v3523_v59 = vrot.slane %v3515_v45, %v12200_v31  ;;  %v3530_v61 = vrot.slane %v3516_v47, %v12200_v31  ;;  %v10549_v21 = vpop.eup %10548 }
 0x17e   :  { %v8739_v40 = vsel %vm8738_vm0, %v12008_v58, %v8737_v11  ;;  %vm8792_vm6 = vweird.f32 %v12090_v49  ;;  %v12339_v32 = vmul.f32 0.03125, %v787_v18  ;;  %v10551_v25 = vpop.eup %10550  ;;  %v8727_v13 = vsel %vm8713_vm10, inf, %v8726_v28 }
 0x17f   :  { %v8708_v45 = vsel %vm8692_vm5, 0.0, %v8707_v26  ;;  %10556 = vlog2.f32 %v12317_v57  ;;  %v3531_v47 = vcombine.low %v3523_v59, %v3530_v61  ;;  %v16926_v7 = vand.u32 2147483648, %v11998_v48 }
 0x180   :  { %v12350_v16 = vmul.f32 0.03125, %v784_v36  ;;  %v1422_v18 = vrot.slane %v11335_v3, %v12270_v55  ;;  %v1426_v15 = vrot.slane %v11335_v3, %v12273_v60  ;;  %v8742_v23 = vsel %vm8740_vm3, %v8734_v9, %v8739_v40 }
 0x181   :  { %v8760_v11 = vsel %vm8758_vm11, %v16926_v7, %v8757_v17  ;;  %v8825_v28 = vmul.f32 0.33333334, %v10547_v50  ;;  %v3538_v26 = vrot.slane %v3531_v47, %v12200_v31  ;;  %v1430_v59 = vrot.slane %v11335_v3, %v12290_v0 }
 0x182   :  { %v16927_v61 = vand.u32 2147483648, %v12062_v2  ;;  %v8807_v7 = vmul.f32 0.33333334, %v10551_v25  ;;  %v12364_v36 = vand.u32 2147483647, %v12339_v32  ;;  %v1434_v44 = vrot.slane %v11335_v3, %v12293_v22 }
 0x183   :  { %vm8746_vm15 = vcmp.eq.f32.partialorder %v11998_v48, 0.0  ;;  %v6541_v4 = vunpack.c.l.b16 %v3538_v26  ;;  %v3467_v9 = vcombine.low %v1422_v18, %v1430_v59  ;;  %v1470_v50 = vrot.slane %v11332_v62, %v12139_v14 }
 0x184   :  { %v8791_v17 = vor.u32 %v10549_v21, %v16927_v61  ;;  %v1474_v40 = vrot.slane %v11332_v62, %v12142_v41  ;;  %v10553_v47 = vpop.eup %10552  ;;  %v8709_v21 = vsel %vm8695_vm13, inf, %v8708_v45  ;;  %vm8728_vm1 = vcmp.eq.f32.partialorder %v12008_v58, 0.0 }
 0x185   :  { %vm8794_vm2 = vcmp.eq.f32.partialorder %v12090_v49, 0.0  ;;  %vm8774_vm4 = vweird.f32 %v12136_v35  ;;  %v12379_v3 = vand.u32 2147483647, %v12350_v16  ;;  %v3468_v25 = vcombine.low %v1426_v15, %v1434_v44  ;;  %v10555_v18 = vpop.eup %10554  ;;  %6674 = vperm.xlu1 %10389, %v6541_v4   ;;  %v793_v44 = vpop.xlane.xlu1 %792 }
 0x186   :  { %10558 = vpow2.f32 %v8825_v28  ;;  %v3475_v26 = vrot.slane %v3467_v9, %v12200_v31  ;;  %v1478_v59 = vrot.slane %v11332_v62, %v12145_v46  ;;  %v1482_v12 = vrot.slane %v11332_v62, %v12153_v52  ;;  %v790_v15 = vpop.xlane.xlu0 %789 }
 0x187   :  { %v8761_v45 = vsel %vm8747_vm12, nan, %v8760_v11  ;;  %v8743_v61 = vsel %vm8729_vm14, nan, %v8742_v23  ;;  %vm8776_vm7 = vcmp.eq.f32.partialorder %v12136_v35, 0.0  ;;  %10560 = vpow2.f32 %v8807_v7 }
 0x188   :  { %v3482_v4 = vrot.slane %v3468_v25, %v12200_v31  ;;  %v8793_v28 = vsel %vm8792_vm6, %v12062_v2, %v8791_v17  ;;  %10562 = vlog2.f32 %v12364_v36  ;;  %v3539_v62 = vcombine.low %v1470_v50, %v1478_v59 }
 0x189   :  { %v3540_v9 = vcombine.low %v1474_v40, %v1482_v12  ;;  %vm8749_vm9 = vcmp.eq.f32.partialorder %v12028_v1, inf  ;;  %vm8731_vm8 = vcmp.eq.f32.partialorder %v12038_v53, inf  ;;  %vm8783_vm10 = vcmp.lt.f32.partialorder %v12062_v2, 0.0  ;;  %v10557_v42 = vpop.eup %10556  ;;  %v799_v53 = vpop.xlane.xlu1 %798 }
 0x18a   :  { %v16928_v11 = vand.u32 2147483648, %v12109_v43  ;;  %v8861_v7 = vmul.f32 0.33333334, %v10555_v18  ;;  %10564 = vlog2.f32 %v12379_v3  ;;  %v3483_v25 = vcombine.low %v3475_v26, %v3482_v4 }
 0x18b   :  { %vm8765_vm5 = vcmp.lt.f32.partialorder %v12109_v43, 0.0  ;;  %v12403_v17 = vmul.f32 0.03125, %v793_v44  ;;  %v12405_v50 = vmul.f32 0.03125, %v790_v15  ;;  %v3547_v40 = vrot.slane %v3539_v62, %v12200_v31 }
 0x18c   :  { %v8773_v23 = vor.u32 %v10553_v47, %v16928_v11  ;;  %v3554_v59 = vrot.slane %v3540_v9, %v12200_v31  ;;  %v3490_v12 = vrot.slane %v3483_v25, %v12200_v31  ;;  %v1566_v47 = vrot.slane %v11618_v63, %v12139_v14 }
 0x18d   :  { %v1570_v18 = vrot.slane %v11618_v63, %v12142_v41  ;;  %v1574_v26 = vrot.slane %v11618_v63, %v12145_v46  ;;  %v12416_v4 = vpack.c.bf16 %v8727_v13, %v8709_v21  ;;  %vm8782_vm11 = vcmp.eq.f32.partialorder %v12062_v2, 0.0 }
 0x18e   :  { %v3555_v15 = vcombine.low %v3547_v40, %v3554_v59  ;;  %v1578_v62 = vrot.slane %v11618_v63, %v12153_v52  ;;  %v8762_v9 = vsel %vm8746_vm15, 0.0, %v8761_v45  ;;  %vm8764_vm0 = vcmp.eq.f32.partialorder %v12109_v43, 0.0 }
 0x18f   :  { %16929 = vst [vmem:[#allocation11_spill] sm:$0xff] %v12416_v4  ;;  %v8775_v11 = vsel %vm8774_vm4, %v12109_v43, %v8773_v23  ;;  %v8843_v25 = vmul.f32 0.33333334, %v10557_v42  ;;  %v6539_v13 = vunpack.c.l.b16 %v3490_v12  ;;  %v8744_v21 = vsel %vm8728_vm1, 0.0, %v8743_v61 }
 0x190   :  { %v16930_v44 = vand.u32 2147483648, %v12062_v2  ;;  %v12435_v59 = vand.u32 2147483647, %v12403_v17  ;;  %v3562_v48 = vrot.slane %v3555_v15, %v12200_v31  ;;  %10566 = vpow2.f32 %v8861_v7  ;;  %v10559_v12 = vpop.eup %10558 }
 0x191   :  { %v12439_v45 = vand.u32 2147483647, %v12405_v50  ;;  %6668 = vperm.xlu0 %10388, %v6539_v13   ;;  %v3683_v42 = vcombine.low %v1566_v47, %v1574_v26  ;;  %v3684_v23 = vcombine.low %v1570_v18, %v1578_v62  ;;  %vm8785_vm13 = vcmp.eq.f32.partialorder %v12090_v49, inf }
 0x192   :  { %v8796_v40 = vsel %vm8794_vm2, %v16930_v44, %v8793_v28  ;;  %vm8767_vm3 = vcmp.eq.f32.partialorder %v12136_v35, inf  ;;  %v16931_v58 = vand.u32 2147483648, %v12109_v43  ;;  %vm8828_vm12 = vweird.f32 %v12231_v30  ;;  %v10561_v44 = vpop.eup %10560  ;;  %v805_v35 = vpop.xlane.xlu1 %804 }
 0x193   :  { %v8806_v28 = vand.u32 2147483648, %v12212_v27  ;;  %v6542_v7 = vunpack.c.l.b16 %v3562_v48  ;;  %vm8830_vm14 = vcmp.eq.f32.partialorder %v12231_v30, 0.0  ;;  %vm8810_vm6 = vweird.f32 %v12243_v39  ;;  %v10563_v26 = vpop.eup %10562 }
 0x194   :  { %v8778_v61 = vsel %vm8776_vm7, %v16931_v58, %v8775_v11  ;;  %10568 = vpow2.f32 %v8843_v25  ;;  %v3691_v47 = vrot.slane %v3683_v42, %v12200_v31  ;;  %v3698_v18 = vrot.slane %v3684_v23, %v12200_v31  ;;  %v10565_v13 = vpop.eup %10564 }
 0x195   :  { %v8763_v15 = vsel %vm8749_vm9, inf, %v8762_v9  ;;  %v8745_v62 = vsel %vm8731_vm8, inf, %v8744_v21  ;;  %v8797_v11 = vsel %vm8783_vm10, nan, %v8796_v40  ;;  %10570 = vlog2.f32 %v12435_v59  ;;  %6677 = vperm.xlu1 %10389, %v6542_v7  }
 0x196   :  { %v8779_v25 = vsel %vm8765_vm5, nan, %v8778_v61  ;;  %v16932_v48 = vand.u32 2147483648, %v12197_v10  ;;  %10572 = vlog2.f32 %v12439_v45  ;;  %v3699_v1 = vcombine.low %v3691_v47, %v3698_v18  ;;  %v796_v47 = vpop.xlane.xlu0 %795 }
 0x197   :  { %v8809_v9 = vor.u32 %v10561_v44, %v8806_v28  ;;  %vm8812_vm15 = vcmp.eq.f32.partialorder %v12243_v39, 0.0  ;;  %v1486_v21 = vrot.slane %v11356_v29, %v12270_v55  ;;  %v1490_v40 = vrot.slane %v11356_v29, %v12273_v60 }
 0x198   :  { %v8827_v42 = vor.u32 %v10559_v12, %v16932_v48  ;;  %v12470_v23 = vpack.c.bf16 %v8763_v15, %v8745_v62  ;;  %v8798_v58 = vsel %vm8782_vm11, 0.0, %v8797_v11  ;;  %vm8819_vm1 = vcmp.lt.f32.partialorder %v12197_v10, 0.0 }
 0x199   :  { %vm8801_vm2 = vcmp.lt.f32.partialorder %v12212_v27, 0.0  ;;  %v3706_v61 = vrot.slane %v3699_v1, %v12200_v31  ;;  %v8780_v7 = vsel %vm8764_vm0, 0.0, %v8779_v25  ;;  %v8897_v44 = vmul.f32 0.33333334, %v10563_v26 }
 0x19a   :  { %16933 = vst [vmem:[#allocation12_spill] sm:$0xff] %v12470_v23  ;;  %v1494_v18 = vrot.slane %v11356_v29, %v12290_v0  ;;  %v1498_v2 = vrot.slane %v11356_v29, %v12293_v22  ;;  %v8829_v15 = vsel %vm8828_vm12, %v12197_v10, %v8827_v42  ;;  %vm8864_vm4 = vweird.f32 %v12285_v5  ;;  %v10567_v12 = vpop.eup %10566 }
 0x19b   :  { %v8842_v62 = vand.u32 2147483648, %v12287_v38  ;;  %v12489_v11 = vmul.f32 0.03125, %v799_v53  ;;  %v6548_v43 = vunpack.c.l.b16 %v3706_v61  ;;  %v8811_v26 = vsel %vm8810_vm6, %v12212_v27, %v8809_v9 }
 0x19c   :  { %v8879_v25 = vmul.f32 0.33333334, %v10565_v13  ;;  %v3563_v48 = vcombine.low %v1486_v21, %v1494_v18  ;;  %v3564_v1 = vcombine.low %v1490_v40, %v1498_v2  ;;  %v12496_v23 = vsel %vm8785_vm13, inf, %v8798_v58 }
 0x19d   :  { %v12500_v42 = vsel %vm8767_vm3, inf, %v8780_v7  ;;  %vm8818_vm7 = vcmp.eq.f32.partialorder %v12197_v10, 0.0  ;;  %vm8800_vm9 = vcmp.eq.f32.partialorder %v12212_v27, 0.0  ;;  %v12505_v61 = vmul.f32 0.03125, %v796_v47  ;;  %6695 = vperm.xlu0 %10388, %v6548_v43  }
 0x19e   :  { %v16934_v13 = vand.u32 2147483648, %v12197_v10  ;;  %vm8866_vm8 = vcmp.eq.f32.partialorder %v12285_v5, 0.0  ;;  %vm8846_vm10 = vweird.f32 %v12317_v57  ;;  %10574 = vpow2.f32 %v8897_v44  ;;  %v10569_v40 = vpop.eup %10568 }
 0x19f   :  { %v3571_v9 = vrot.slane %v3563_v48, %v12200_v31  ;;  %v3578_v21 = vrot.slane %v3564_v1, %v12200_v31  ;;  %v8814_v58 = vsel %vm8812_vm15, %v8806_v28, %v8811_v26  ;;  %v12518_v7 = vand.u32 2147483647, %v12489_v11  ;;  %v10571_v2 = vpop.eup %10570 }
 0x1a0   :  { %v8832_v49 = vsel %vm8830_vm14, %v16934_v13, %v8829_v15  ;;  %v1598_v47 = vrot.slane %v11673_v6, %v12139_v14  ;;  %v1602_v18 = vrot.slane %v11673_v6, %v12142_v41  ;;  %vm8821_vm5 = vcmp.eq.f32.partialorder %v12231_v30, inf  ;;  %v10573_v28 = vpop.eup %10572  ;;  %v802_v13 = vpop.xlane.xlu0 %801 }
 0x1a1   :  { %v16935_v44 = vand.u32 2147483648, %v12257_v33  ;;  %10576 = vpow2.f32 %v8879_v25  ;;  %v3579_v48 = vcombine.low %v3571_v9, %v3578_v21  ;;  %vm8803_vm11 = vcmp.eq.f32.partialorder %v12243_v39, inf }
 0x1a2   :  { %vm8855_vm0 = vcmp.lt.f32.partialorder %v12257_v33, 0.0  ;;  %v12531_v26 = vand.u32 2147483647, %v12505_v61  ;;  %v12533_v1 = vmul.f32 0.03125, %v805_v35  ;;  %v1606_v53 = vrot.slane %v11673_v6, %v12145_v46 }
 0x1a3   :  { %v8863_v15 = vor.u32 %v10567_v12, %v16935_v44  ;;  %v1610_v12 = vrot.slane %v11673_v6, %v12153_v52  ;;  %v8833_v25 = vsel %vm8819_vm1, nan, %v8832_v49  ;;  %v8815_v9 = vsel %vm8801_vm2, nan, %v8814_v58 }
 0x1a4   :  { %v8845_v21 = vor.u32 %v10569_v40, %v8842_v62  ;;  %vm8848_vm13 = vcmp.eq.f32.partialorder %v12317_v57, 0.0  ;;  %v3586_v35 = vrot.slane %v3579_v48, %v12200_v31  ;;  %v8933_v44 = vmul.f32 0.33333334, %v10571_v2 }
 0x1a5   :  { %10578 = vlog2.f32 %v12518_v7  ;;  %v3731_v43 = vcombine.low %v1598_v47, %v1606_v53  ;;  %v3732_v4 = vcombine.low %v1602_v18, %v1610_v12  ;;  %vm8854_vm3 = vcmp.eq.f32.partialorder %v12257_v33, 0.0 }
 0x1a6   :  { %v8865_v49 = vsel %vm8864_vm4, %v12257_v33, %v8863_v15  ;;  %v8915_v20 = vmul.f32 0.33333334, %v10573_v28  ;;  %v12552_v58 = vmul.f32 0.03125, %v802_v13  ;;  %v6543_v24 = vunpack.c.l.b16 %v3586_v35 }
 0x1a7   :  { %vm8837_vm12 = vcmp.lt.f32.partialorder %v12287_v38, 0.0  ;;  %10580 = vlog2.f32 %v12531_v26  ;;  %v12557_v40 = vand.u32 2147483647, %v12533_v1  ;;  %v3739_v53 = vrot.slane %v3731_v43, %v12200_v31 }
 0x1a8   :  { %v3746_v47 = vrot.slane %v3732_v4, %v12200_v31  ;;  %v8834_v18 = vsel %vm8818_vm7, 0.0, %v8833_v25  ;;  %v8816_v2 = vsel %vm8800_vm9, 0.0, %v8815_v9  ;;  %vm8900_vm14 = vweird.f32 %v12364_v36  ;;  %6680 = vperm.xlu1 %10389, %v6543_v24   ;;  %v10575_v24 = vpop.eup %10574 }
 0x1a9   :  { %v1502_v15 = vrot.slane %v11356_v29, %v12139_v14  ;;  %v1506_v48 = vrot.slane %v11356_v29, %v12142_v41  ;;  %vm8857_vm6 = vcmp.eq.f32.partialorder %v12285_v5, inf  ;;  %v16936_v43 = vand.u32 2147483648, %v12257_v33 }
 0x1aa   :  { %v8847_v27 = vsel %vm8846_vm10, %v12287_v38, %v8845_v21  ;;  %10582 = vpow2.f32 %v8933_v44  ;;  %v3747_v4 = vcombine.low %v3739_v53, %v3746_v47  ;;  %vm8836_vm15 = vcmp.eq.f32.partialorder %v12287_v38, 0.0 }
 0x1ab   :  { %v8868_v10 = vsel %vm8866_vm8, %v16936_v43, %v8865_v49  ;;  %10584 = vpow2.f32 %v8915_v20  ;;  %v12580_v28 = vand.u32 2147483647, %v12552_v58  ;;  %v1510_v13 = vrot.slane %v11356_v29, %v12145_v46  ;;  %v10577_v21 = vpop.eup %10576 }
 0x1ac   :  { %v1514_v12 = vrot.slane %v11356_v29, %v12153_v52  ;;  %v12588_v25 = vpack.c.bf16 %v12496_v23, %v12500_v42  ;;  %v8835_v9 = vsel %vm8821_vm5, inf, %v8834_v18  ;;  %vm8902_vm1 = vcmp.eq.f32.partialorder %v12364_v36, 0.0 }
 0x1ad   :  { %10586 = vlog2.f32 %v12557_v40  ;;  %v3754_v20 = vrot.slane %v3747_v4, %v12200_v31  ;;  %v8817_v35 = vsel %vm8803_vm11, inf, %v8816_v2  ;;  %v8869_v29 = vsel %vm8855_vm0, nan, %v8868_v10 }
 0x1ae   :  { %v3587_v44 = vcombine.low %v1502_v15, %v1510_v13  ;;  %v3588_v49 = vcombine.low %v1506_v48, %v1514_v12  ;;  %v8850_v30 = vsel %vm8848_vm13, %v8842_v62, %v8847_v27  ;;  %v16937_v23 = vand.u32 2147483648, %v12339_v32  ;;  %v811_v48 = vpop.xlane.xlu1 %810 }
 0x1af   :  { %vm8882_vm2 = vweird.f32 %v12379_v3  ;;  %v6550_v53 = vunpack.c.l.b16 %v3754_v20  ;;  %vm8839_vm4 = vcmp.eq.f32.partialorder %v12317_v57, inf  ;;  %vm8891_vm7 = vcmp.lt.f32.partialorder %v12339_v32, 0.0  ;;  %v10579_v18 = vpop.eup %10578 }
 0x1b0   :  { %v8899_v42 = vor.u32 %v10575_v24, %v16937_v23  ;;  %vm8884_vm9 = vcmp.eq.f32.partialorder %v12379_v3, 0.0  ;;  %10588 = vlog2.f32 %v12580_v28  ;;  %v3595_v39 = vrot.slane %v3587_v44, %v12200_v31 }
 0x1b1   :  { %v3602_v47 = vrot.slane %v3588_v49, %v12200_v31  ;;  %v12612_v62 = vpack.c.bf16 %v8835_v9, %v8817_v35  ;;  %v8870_v2 = vsel %vm8854_vm3, 0.0, %v8869_v29  ;;  %v16863_v15 = vand.u32 2147483648, %v12403_v17  ;;  %6701 = vperm.xlu0 %10388, %v6550_v53   ;;  %v10581_v12 = vpop.eup %10580  ;;  %v808_v49 = vpop.xlane.xlu0 %807 }
 0x1b2   :  { %v1630_v43 = vrot.slane %v11793_v54, %v12139_v14  ;;  %v8851_v10 = vsel %vm8837_vm12, nan, %v8850_v30  ;;  %v16938_v27 = vand.u32 2147483648, %v12350_v16  ;;  %v16862_v24 = vand.u32 2147483648, %v12405_v50 }
 0x1b3   :  { %v3603_v13 = vcombine.low %v3595_v39, %v3602_v47  ;;  %vm8890_vm8 = vcmp.eq.f32.partialorder %v12339_v32, 0.0  ;;  %v8901_v33 = vsel %vm8900_vm14, %v12339_v32, %v8899_v42  ;;  %vm8873_vm10 = vcmp.lt.f32.partialorder %v12350_v16, 0.0 }
 0x1b4   :  { %v8881_v4 = vor.u32 %v10577_v21, %v16938_v27  ;;  %v1634_v9 = vrot.slane %v11793_v54, %v12142_v41  ;;  %v1638_v20 = vrot.slane %v11793_v54, %v12145_v46  ;;  %v1642_v21 = vrot.slane %v11793_v54, %v12153_v52  ;;  %v10583_v23 = vpop.eup %10582 }
 0x1b5   :  { %v12637_v35 = vsel %vm8857_vm6, inf, %v8870_v2  ;;  %v8969_v29 = vmul.f32 0.33333334, %v10579_v18  ;;  %v12639_v44 = vmul.f32 0.03125, %v811_v48  ;;  %v3610_v30 = vrot.slane %v3603_v13, %v12200_v31  ;;  %v10585_v27 = vpop.eup %10584 }
 0x1b6   :  { %v8852_v42 = vsel %vm8836_vm15, 0.0, %v8851_v10  ;;  %vm8936_vm5 = vweird.f32 %v12435_v59  ;;  %v3779_v39 = vcombine.low %v1630_v43, %v1638_v20  ;;  %v3780_v47 = vcombine.low %v1634_v9, %v1642_v21 }
 0x1b7   :  { %v16939_v5 = vand.u32 2147483648, %v12339_v32  ;;  %vm8872_vm11 = vcmp.eq.f32.partialorder %v12350_v16, 0.0  ;;  %v8883_v2 = vsel %vm8882_vm2, %v12350_v16, %v8881_v4  ;;  %vm8918_vm0 = vweird.f32 %v12439_v45  ;;  %v10587_v10 = vpop.eup %10586 }
 0x1b8   :  { %v8951_v38 = vmul.f32 0.33333334, %v10581_v12  ;;  %v6544_v48 = vunpack.c.l.b16 %v3610_v30  ;;  %v12655_v13 = vmul.f32 0.03125, %v808_v49  ;;  %v3787_v43 = vrot.slane %v3779_v39, %v12200_v31 }
 0x1b9   :  { %v8904_v18 = vsel %vm8902_vm1, %v16939_v5, %v8901_v33  ;;  %v3794_v9 = vrot.slane %v3780_v47, %v12200_v31  ;;  %v1518_v33 = vrot.slane %v11596_v34, %v12270_v55  ;;  %vm8938_vm13 = vcmp.eq.f32.partialorder %v12435_v59, 0.0 }
 0x1ba   :  { %10590 = vpow2.f32 %v8969_v29  ;;  %v12663_v20 = vand.u32 2147483647, %v12639_v44  ;;  %6683 = vperm.xlu1 %10389, %v6544_v48   ;;  %v1522_v4 = vrot.slane %v11596_v34, %v12273_v60  ;;  %v1526_v12 = vrot.slane %v11596_v34, %v12290_v0  ;;  %v10589_v47 = vpop.eup %10588 }
 0x1bb   :  { %v8853_v21 = vsel %vm8839_vm4, inf, %v8852_v42  ;;  %v8905_v49 = vsel %vm8891_vm7, nan, %v8904_v18  ;;  %v16940_v30 = vand.u32 2147483648, %v12350_v16  ;;  %vm8920_vm3 = vcmp.eq.f32.partialorder %v12439_v45, 0.0  ;;  %v817_v18 = vpop.xlane.xlu1 %816 }
 0x1bc   :  { %v3795_v39 = vcombine.low %v3787_v43, %v3794_v9  ;;  %vm8893_vm12 = vcmp.eq.f32.partialorder %v12364_v36, inf  ;;  %vm8875_vm14 = vcmp.eq.f32.partialorder %v12379_v3, inf  ;;  %v8935_v57 = vor.u32 %v10583_v23, %v16863_v15 }
 0x1bd   :  { %v8886_v29 = vsel %vm8884_vm9, %v16940_v30, %v8883_v2  ;;  %v8917_v42 = vor.u32 %v10585_v27, %v16862_v24  ;;  %v9005_v5 = vmul.f32 0.33333334, %v10587_v10  ;;  %v1530_v48 = vrot.slane %v11596_v34, %v12293_v22 }
 0x1be   :  { %vm8927_vm6 = vcmp.lt.f32.partialorder %v12403_v17, 0.0  ;;  %10592 = vpow2.f32 %v8951_v38  ;;  %v12688_v2 = vand.u32 2147483647, %v12655_v13  ;;  %v3802_v43 = vrot.slane %v3795_v39, %v12200_v31  ;;  %v814_v38 = vpop.xlane.xlu0 %813 }
 0x1bf   :  { %v3611_v9 = vcombine.low %v1518_v33, %v1526_v12  ;;  %v8906_v23 = vsel %vm8890_vm8, 0.0, %v8905_v49  ;;  %v8887_v27 = vsel %vm8873_vm10, nan, %v8886_v29  ;;  %vm8909_vm15 = vcmp.lt.f32.partialorder %v12405_v50, 0.0 }
 0x1c0   :  { %10594 = vlog2.f32 %v12663_v20  ;;  %v3612_v10 = vcombine.low %v1522_v4, %v1530_v48  ;;  %v8987_v30 = vmul.f32 0.33333334, %v10589_v47  ;;  %v12697_v53 = vmul.f32 0.03125, %v817_v18 }
 0x1c1   :  { %v6552_v24 = vunpack.c.l.b16 %v3802_v43  ;;  %v3619_v15 = vrot.slane %v3611_v9, %v12200_v31  ;;  %v8937_v32 = vsel %vm8936_vm5, %v12403_v17, %v8935_v57  ;;  %10596 = vpow2.f32 %v9005_v5 }
 0x1c2   :  { %v3626_v33 = vrot.slane %v3612_v10, %v12200_v31  ;;  %v1662_v12 = vrot.slane %v11839_v8, %v12139_v14  ;;  %v8888_v4 = vsel %vm8872_vm11, 0.0, %v8887_v27  ;;  %vm8926_vm1 = vcmp.eq.f32.partialorder %v12403_v17, 0.0 }
 0x1c3   :  { %vm8908_vm2 = vcmp.eq.f32.partialorder %v12405_v50, 0.0  ;;  %v8919_v49 = vsel %vm8918_vm0, %v12405_v50, %v8917_v42  ;;  %10598 = vlog2.f32 %v12688_v2  ;;  %6707 = vperm.xlu0 %10388, %v6552_v24   ;;  %v1666_v29 = vrot.slane %v11839_v8, %v12142_v41 }
 0x1c4   :  { %v12716_v39 = vmul.f32 0.03125, %v814_v38  ;;  %v3627_v47 = vcombine.low %v3619_v15, %v3626_v33  ;;  %v1670_v16 = vrot.slane %v11839_v8, %v12145_v46  ;;  %v1674_v57 = vrot.slane %v11839_v8, %v12153_v52  ;;  %v10591_v18 = vpop.eup %10590 }
 0x1c5   :  { %v16941_v5 = vand.u32 2147483648, %v12403_v17  ;;  %vm8972_vm4 = vweird.f32 %v12518_v7  ;;  %10600 = vpow2.f32 %v8987_v30  ;;  %v12728_v24 = vand.u32 2147483647, %v12697_v53 }
 0x1c6   :  { %v12731_v15 = vpack.c.bf16 %v12637_v35, %v8853_v21  ;;  %vm8929_vm7 = vcmp.eq.f32.partialorder %v12435_v59, inf  ;;  %vm8911_vm9 = vcmp.eq.f32.partialorder %v12439_v45, inf  ;;  %v16942_v48 = vand.u32 2147483648, %v12405_v50 }
 0x1c7   :  { %v8940_v42 = vsel %vm8938_vm13, %v16941_v5, %v8937_v32  ;;  %v3634_v9 = vrot.slane %v3627_v47, %v12200_v31  ;;  %v3827_v27 = vcombine.low %v1662_v12, %v1670_v16  ;;  %v8907_v10 = vsel %vm8893_vm12, inf, %v8906_v23  ;;  %v823_v16 = vpop.xlane.xlu1 %822 }
 0x1c8   :  { %v8922_v43 = vsel %vm8920_vm3, %v16942_v48, %v8919_v49  ;;  %v8889_v30 = vsel %vm8875_vm14, inf, %v8888_v4  ;;  %vm8974_vm8 = vcmp.eq.f32.partialorder %v12518_v7, 0.0  ;;  %v8950_v35 = vand.u32 2147483648, %v12505_v61  ;;  %v10593_v49 = vpop.eup %10592 }
 0x1c9   :  { %v3828_v21 = vcombine.low %v1666_v29, %v1674_v57  ;;  %v8941_v38 = vsel %vm8927_vm6, nan, %v8940_v42  ;;  %v12749_v32 = vand.u32 2147483647, %v12716_v39  ;;  %v6545_v33 = vunpack.c.l.b16 %v3634_v9 }
 0x1ca   :  { %v3835_v12 = vrot.slane %v3827_v27, %v12200_v31  ;;  %v8923_v36 = vsel %vm8909_vm15, nan, %v8922_v43  ;;  %v16943_v3 = vand.u32 2147483648, %v12489_v11  ;;  %10602 = vlog2.f32 %v12728_v24  ;;  %v10595_v29 = vpop.eup %10594 }
 0x1cb   :  { %v3842_v4 = vrot.slane %v3828_v21, %v12200_v31  ;;  %vm8963_vm10 = vcmp.lt.f32.partialorder %v12489_v11, 0.0  ;;  %vm8954_vm5 = vweird.f32 %v12531_v26  ;;  %v9004_v47 = vand.u32 2147483648, %v12533_v1  ;;  %6686 = vperm.xlu1 %10389, %v6545_v33   ;;  %v10597_v9 = vpop.eup %10596 }
 0x1cc   :  { %v8971_v23 = vor.u32 %v10591_v18, %v16943_v3  ;;  %v1534_v57 = vrot.slane %v11596_v34, %v12139_v14  ;;  %v1538_v5 = vrot.slane %v11596_v34, %v12142_v41  ;;  %v12765_v42 = vpack.c.bf16 %v8907_v10, %v8889_v30 }
 0x1cd   :  { %v3843_v18 = vcombine.low %v3835_v12, %v3842_v4  ;;  %v1542_v48 = vrot.slane %v11596_v34, %v12145_v46  ;;  %v1546_v43 = vrot.slane %v11596_v34, %v12153_v52  ;;  %v8942_v27 = vsel %vm8926_vm1, 0.0, %v8941_v38  ;;  %v10599_v10 = vpop.eup %10598 }
 0x1ce   :  { %16944 = vst [vmem:[#allocation13_spill] sm:$0xff] %v12765_v42  ;;  %v8924_v21 = vsel %vm8908_vm2, 0.0, %v8923_v36  ;;  %vm8956_vm11 = vcmp.eq.f32.partialorder %v12531_v26, 0.0  ;;  %vm9008_vm0 = vweird.f32 %v12557_v40  ;;  %10604 = vlog2.f32 %v12749_v32 }
 0x1cf   :  { %v8973_v30 = vsel %vm8972_vm4, %v12489_v11, %v8971_v23  ;;  %v8986_v34 = vand.u32 2147483648, %v12552_v58  ;;  %v12782_v33 = vmul.f32 0.03125, %v823_v16  ;;  %v3850_v17 = vrot.slane %v3843_v18, %v12200_v31  ;;  %v10601_v36 = vpop.eup %10600 }
 0x1d0   :  { %v8953_v50 = vor.u32 %v10593_v49, %v8950_v35  ;;  %vm8990_vm13 = vweird.f32 %v12580_v28  ;;  %v3635_v38 = vcombine.low %v1534_v57, %v1542_v48  ;;  %v3636_v12 = vcombine.low %v1538_v5, %v1546_v43  ;;  %v820_v5 = vpop.xlane.xlu0 %819 }
 0x1d1   :  { %v8943_v3 = vsel %vm8929_vm7, inf, %v8942_v27  ;;  %v8925_v23 = vsel %vm8911_vm9, inf, %v8924_v21  ;;  %vm8945_vm3 = vcmp.lt.f32.partialorder %v12505_v61, 0.0  ;;  %v9041_v4 = vmul.f32 0.33333334, %v10595_v29 }
 0x1d2   :  { %v6554_v16 = vunpack.c.l.b16 %v3850_v17  ;;  %v16945_v18 = vand.u32 2147483648, %v12489_v11  ;;  %vm9010_vm12 = vcmp.eq.f32.partialorder %v12557_v40, 0.0  ;;  %v9023_v57 = vmul.f32 0.33333334, %v10599_v10 }
 0x1d3   :  { %v3643_v48 = vrot.slane %v3635_v38, %v12200_v31  ;;  %v3650_v59 = vrot.slane %v3636_v12, %v12200_v31  ;;  %vm8962_vm14 = vcmp.eq.f32.partialorder %v12489_v11, 0.0  ;;  %v9007_v45 = vor.u32 %v10597_v9, %v9004_v47 }
 0x1d4   :  { %v8976_v49 = vsel %vm8974_vm8, %v16945_v18, %v8973_v30  ;;  %vm8992_vm6 = vcmp.eq.f32.partialorder %v12580_v28, 0.0  ;;  %v12805_v29 = vand.u32 2147483647, %v12782_v33  ;;  %6713 = vperm.xlu0 %10388, %v6554_v16   ;;  %v1694_v43 = vrot.slane %v11934_v19, %v12139_v14  ;;  %v10603_v17 = vpop.eup %10602 }
 0x1d5   :  { %v1702_v27 = vrot.slane %v11934_v19, %v12145_v46  ;;  %vm8944_vm15 = vcmp.eq.f32.partialorder %v12505_v61, 0.0  ;;  %v8955_v21 = vsel %vm8954_vm5, %v12505_v61, %v8953_v50  ;;  %v8989_v9 = vor.u32 %v10601_v36, %v8986_v34  ;;  %v829_v36 = vpop.xlane.xlu1 %828 }
 0x1d6   :  { %v3651_v10 = vcombine.low %v3643_v48, %v3650_v59  ;;  %v1698_v30 = vrot.slane %v11934_v19, %v12142_v41  ;;  %v12819_v38 = vpack.c.bf16 %v8943_v3, %v8925_v23  ;;  %v8977_v12 = vsel %vm8963_vm10, nan, %v8976_v49  ;;  %v826_v59 = vpop.xlane.xlu0 %825 }
 0x1d7   :  { %vm8999_vm1 = vcmp.lt.f32.partialorder %v12533_v1, 0.0  ;;  %10606 = vpow2.f32 %v9041_v4  ;;  %vm8981_vm2 = vcmp.lt.f32.partialorder %v12552_v58, 0.0  ;;  %v12826_v50 = vmul.f32 0.03125, %v820_v5 }
 0x1d8   :  { %16946 = vst [vmem:[#allocation14_spill] sm:$0xff] %v12819_v38  ;;  %10608 = vpow2.f32 %v9023_v57  ;;  %v3658_v18 = vrot.slane %v3651_v10, %v12200_v31  ;;  %v1706_v3 = vrot.slane %v11934_v19, %v12153_v52  ;;  %v8958_v23 = vsel %vm8956_vm11, %v8950_v35, %v8955_v21  ;;  %v10605_v57 = vpop.eup %10604 }
 0x1d9   :  { %v9009_v4 = vsel %vm9008_vm0, %v12533_v1, %v9007_v45  ;;  %10610 = vlog2.f32 %v12805_v29  ;;  %v3875_v49 = vcombine.low %v1694_v43, %v1702_v27  ;;  %vm8965_vm4 = vcmp.eq.f32.partialorder %v12518_v7, inf  ;;  %v835_v11 = vpop.xlane.xlu1 %834 }
 0x1da   :  { %v8991_v5 = vsel %vm8990_vm13, %v12552_v58, %v8989_v9  ;;  %v9077_v48 = vmul.f32 0.33333334, %v10603_v17  ;;  %v6546_v10 = vunpack.c.l.b16 %v3658_v18  ;;  %v3876_v16 = vcombine.low %v1698_v30, %v1706_v3 }
 0x1db   :  { %vm8947_vm7 = vcmp.eq.f32.partialorder %v12531_v26, inf  ;;  %vm8998_vm9 = vcmp.eq.f32.partialorder %v12533_v1, 0.0  ;;  %v12845_v35 = vmul.f32 0.03125, %v829_v36  ;;  %v3883_v45 = vrot.slane %v3875_v49, %v12200_v31 }
 0x1dc   :  { %v1550_v43 = vrot.slane %v11618_v63, %v12270_v55  ;;  %v1558_v27 = vrot.slane %v11618_v63, %v12290_v0  ;;  %v8959_v21 = vsel %vm8945_vm3, nan, %v8958_v23  ;;  %vm8980_vm8 = vcmp.eq.f32.partialorder %v12552_v58, 0.0  ;;  %6689 = vperm.xlu1 %10389, %v6546_v10  }
 0x1dd   :  { %v12856_v9 = vand.u32 2147483647, %v12826_v50  ;;  %v3890_v30 = vrot.slane %v3876_v16, %v12200_v31  ;;  %v1554_v17 = vrot.slane %v11618_v63, %v12273_v60  ;;  %v9012_v36 = vsel %vm9010_vm12, %v9004_v47, %v9009_v4 }
 0x1de   :  { %v9059_v18 = vmul.f32 0.33333334, %v10605_v57  ;;  %v12865_v3 = vmul.f32 0.03125, %v826_v59  ;;  %v1562_v23 = vrot.slane %v11618_v63, %v12293_v22  ;;  %v8978_v49 = vsel %vm8962_vm14, 0.0, %v8977_v12 }
 0x1df   :  { %v8994_v16 = vsel %vm8992_vm6, %v8986_v34, %v8991_v5  ;;  %v9022_v10 = vand.u32 2147483648, %v12655_v13  ;;  %v3891_v38 = vcombine.low %v3883_v45, %v3890_v30  ;;  %v8960_v47 = vsel %vm8944_vm15, 0.0, %v8959_v21 }
 0x1e0   :  { %10612 = vpow2.f32 %v9077_v48  ;;  %v12879_v4 = vand.u32 2147483647, %v12845_v35  ;;  %v3659_v57 = vcombine.low %v1550_v43, %v1558_v27  ;;  %vm9001_vm10 = vcmp.eq.f32.partialorder %v12557_v40, inf  ;;  %v832_v43 = vpop.xlane.xlu0 %831 }
 0x1e1   :  { %v9013_v63 = vsel %vm8999_vm1, nan, %v9012_v36  ;;  %vm8983_vm5 = vcmp.eq.f32.partialorder %v12580_v28, inf  ;;  %vm9044_vm11 = vweird.f32 %v12663_v20  ;;  %10614 = vlog2.f32 %v12856_v9  ;;  %v10607_v12 = vpop.eup %10606 }
 0x1e2   :  { %v3898_v61 = vrot.slane %v3891_v38, %v12200_v31  ;;  %v3660_v34 = vcombine.low %v1554_v17, %v1562_v23  ;;  %v8995_v5 = vsel %vm8981_vm2, nan, %v8994_v16  ;;  %10616 = vpow2.f32 %v9059_v18  ;;  %v10609_v45 = vpop.eup %10608 }
 0x1e3   :  { %v12891_v48 = vand.u32 2147483647, %v12865_v3  ;;  %v3667_v59 = vrot.slane %v3659_v57, %v12200_v31  ;;  %v1726_v30 = vrot.slane %v11940_v56, %v12139_v14  ;;  %v1734_v38 = vrot.slane %v11940_v56, %v12145_v46  ;;  %v10611_v17 = vpop.eup %10610 }
 0x1e4   :  { %v6556_v27 = vunpack.c.l.b16 %v3898_v61  ;;  %v3674_v21 = vrot.slane %v3660_v34, %v12200_v31  ;;  %v8979_v36 = vsel %vm8965_vm4, inf, %v8978_v49  ;;  %10618 = vlog2.f32 %v12879_v4 }
 0x1e5   :  { %v12902_v18 = vmul.f32 0.03125, %v835_v11  ;;  %v1730_v23 = vrot.slane %v11940_v56, %v12142_v41  ;;  %v8961_v16 = vsel %vm8947_vm7, inf, %v8960_v47  ;;  %v9014_v57 = vsel %vm8998_vm9, 0.0, %v9013_v63 }
 0x1e6   :  { %vm9046_vm0 = vcmp.eq.f32.partialorder %v12663_v20, 0.0  ;;  %6719 = vperm.xlu0 %10388, %v6556_v27   ;;  %v3675_v61 = vcombine.low %v3667_v59, %v3674_v21  ;;  %v1738_v7 = vrot.slane %v11940_v56, %v12153_v52  ;;  %v8996_v49 = vsel %vm8980_vm8, 0.0, %v8995_v5 }
 0x1e7   :  { %v16947_v11 = vand.u32 2147483648, %v12639_v44  ;;  %v9025_v26 = vor.u32 %v10609_v45, %v9022_v10  ;;  %v12919_v47 = vmul.f32 0.03125, %v832_v43  ;;  %v9113_v1 = vmul.f32 0.33333334, %v10611_v17 }
 0x1e8   :  { %10620 = vlog2.f32 %v12891_v48  ;;  %v3682_v63 = vrot.slane %v3675_v61, %v12200_v31  ;;  %v3923_v59 = vcombine.low %v1726_v30, %v1734_v38  ;;  %vm9035_vm13 = vcmp.lt.f32.partialorder %v12639_v44, 0.0 }
 0x1e9   :  { %v9043_v34 = vor.u32 %v10607_v12, %v16947_v11  ;;  %vm9026_vm3 = vweird.f32 %v12688_v2  ;;  %vm9028_vm12 = vcmp.eq.f32.partialorder %v12688_v2, 0.0  ;;  %v12927_v58 = vand.u32 2147483647, %v12902_v18 }
 0x1ea   :  { %v3924_v12 = vcombine.low %v1730_v23, %v1738_v7  ;;  %v12929_v5 = vpack.c.bf16 %v8979_v36, %v8961_v16  ;;  %v16867_v45 = vand.u32 2147483648, %v12697_v53  ;;  %v6547_v43 = vunpack.c.l.b16 %v3682_v63  ;;  %v10613_v21 = vpop.eup %10612 }
 0x1eb   :  { %v3931_v27 = vrot.slane %v3923_v59, %v12200_v31  ;;  %v9015_v30 = vsel %vm9001_vm10, inf, %v9014_v57  ;;  %v8997_v38 = vsel %vm8983_vm5, inf, %v8996_v49  ;;  %v9045_v17 = vsel %vm9044_vm11, %v12639_v44, %v9043_v34  ;;  %v10615_v23 = vpop.eup %10614  ;;  %v841_v57 = vpop.xlane.xlu1 %840 }
 0x1ec   :  { %16948 = vst [vmem:[#allocation15_spill] sm:$0xff] %v12929_v5  ;;  %vm9017_vm14 = vcmp.lt.f32.partialorder %v12655_v13, 0.0  ;;  %v3938_v36 = vrot.slane %v3924_v12, %v12200_v31  ;;  %v9027_v16 = vsel %vm9026_vm3, %v12655_v13, %v9025_v26  ;;  %vm9080_vm6 = vweird.f32 %v12728_v24  ;;  %6692 = vperm.xlu1 %10389, %v6547_v43   ;;  %v10617_v61 = vpop.eup %10616 }
 0x1ed   :  { %10622 = vpow2.f32 %v9113_v1  ;;  %v12945_v40 = vand.u32 2147483647, %v12919_v47  ;;  %v1582_v28 = vrot.slane %v11673_v6, %v12270_v55  ;;  %vm9034_vm15 = vcmp.eq.f32.partialorder %v12639_v44, 0.0 }
 0x1ee   :  { %10624 = vlog2.f32 %v12927_v58  ;;  %v3939_v7 = vcombine.low %v3931_v27, %v3938_v36  ;;  %v1586_v49 = vrot.slane %v11673_v6, %v12273_v60  ;;  %v1590_v11 = vrot.slane %v11673_v6, %v12290_v0  ;;  %v10619_v63 = vpop.eup %10618 }
 0x1ef   :  { %v12955_v34 = vpack.c.bf16 %v9015_v30, %v8997_v38  ;;  %v9058_v26 = vand.u32 2147483648, %v12716_v39  ;;  %vm9062_vm1 = vweird.f32 %v12749_v32  ;;  %v16950_v59 = vand.u32 2147483648, %v12639_v44 }
 0x1f0   :  { %vm9016_vm2 = vcmp.eq.f32.partialorder %v12655_v13, 0.0  ;;  %vm9082_vm4 = vcmp.eq.f32.partialorder %v12728_v24, 0.0  ;;  %vm9064_vm7 = vcmp.eq.f32.partialorder %v12749_v32, 0.0  ;;  %v12967_v43 = vmul.f32 0.03125, %v841_v57 }
 0x1f1   :  { %16949 = vst [vmem:[#allocation16_spill] sm:$0xff] %v12955_v34  ;;  %v9048_v12 = vsel %vm9046_vm0, %v16950_v59, %v9045_v17  ;;  %v3946_v27 = vrot.slane %v3939_v7, %v12200_v31  ;;  %v1594_v30 = vrot.slane %v11673_v6, %v12293_v22  ;;  %v9030_v38 = vsel %vm9028_vm12, %v9022_v10, %v9027_v16  ;;  %v838_v17 = vpop.xlane.xlu0 %837 }
 0x1f2   :  { %v9095_v36 = vmul.f32 0.33333334, %v10615_v23  ;;  %10626 = vlog2.f32 %v12945_v40  ;;  %v3707_v59 = vcombine.low %v1582_v28, %v1590_v11  ;;  %vm9037_vm9 = vcmp.eq.f32.partialorder %v12663_v20, inf  ;;  %v10621_v5 = vpop.eup %10620 }
 0x1f3   :  { %v9079_v57 = vor.u32 %v10613_v21, %v16867_v45  ;;  %v9061_v1 = vor.u32 %v10617_v61, %v9058_v26  ;;  %v6558_v7 = vunpack.c.l.b16 %v3946_v27  ;;  %v3708_v34 = vcombine.low %v1586_v49, %v1594_v30 }
 0x1f4   :  { %v9049_v6 = vsel %vm9035_vm13, nan, %v9048_v12  ;;  %vm9019_vm8 = vcmp.eq.f32.partialorder %v12688_v2, inf  ;;  %v9149_v10 = vmul.f32 0.33333334, %v10619_v63  ;;  %v3715_v23 = vrot.slane %v3707_v59, %v12200_v31 }
 0x1f5   :  { %v1758_v16 = vrot.slane %v11976_v37, %v12139_v14  ;;  %vm9071_vm10 = vcmp.lt.f32.partialorder %v12697_v53, 0.0  ;;  %vm9053_vm5 = vcmp.lt.f32.partialorder %v12716_v39, 0.0  ;;  %v12989_v21 = vand.u32 2147483647, %v12967_v43  ;;  %6725 = vperm.xlu0 %10388, %v6558_v7   ;;  %v844_v42 = vpop.xlane.xlu0 %843 }
 0x1f6   :  { %v12991_v28 = vmul.f32 0.03125, %v838_v17  ;;  %v3722_v61 = vrot.slane %v3708_v34, %v12200_v31  ;;  %v1762_v49 = vrot.slane %v11976_v37, %v12142_v41  ;;  %v9031_v11 = vsel %vm9017_vm14, nan, %v9030_v38 }
 0x1f7   :  { %vm9116_vm11 = vweird.f32 %v12805_v29  ;;  %10628 = vpow2.f32 %v9095_v36  ;;  %v1766_v63 = vrot.slane %v11976_v37, %v12145_v46  ;;  %v1770_v12 = vrot.slane %v11976_v37, %v12153_v52  ;;  %v10623_v38 = vpop.eup %10622 }
 0x1f8   :  { %v9081_v27 = vsel %vm9080_vm6, %v12697_v53, %v9079_v57  ;;  %v9063_v34 = vsel %vm9062_vm1, %v12716_v39, %v9061_v1  ;;  %v9131_v30 = vmul.f32 0.33333334, %v10621_v5  ;;  %v3723_v17 = vcombine.low %v3715_v23, %v3722_v61  ;;  %v10625_v45 = vpop.eup %10624  ;;  %v847_v1 = vpop.xlane.xlu1 %846 }
 0x1f9   :  { %v9050_v36 = vsel %vm9034_vm15, 0.0, %v9049_v6  ;;  %vm9070_vm0 = vcmp.eq.f32.partialorder %v12697_v53, 0.0  ;;  %10630 = vpow2.f32 %v9149_v10  ;;  %v3971_v7 = vcombine.low %v1758_v16, %v1766_v63 }
 0x1fa   :  { %vm9052_vm13 = vcmp.eq.f32.partialorder %v12716_v39, 0.0  ;;  %vm9118_vm3 = vcmp.eq.f32.partialorder %v12805_v29, 0.0  ;;  %10632 = vlog2.f32 %v12989_v21  ;;  %v13017_v5 = vand.u32 2147483647, %v12991_v28 }
 0x1fb   :  { %v3730_v44 = vrot.slane %v3723_v17, %v12200_v31  ;;  %v3972_v57 = vcombine.low %v1762_v49, %v1770_v12  ;;  %v9032_v6 = vsel %vm9016_vm2, 0.0, %v9031_v11  ;;  %v16951_v10 = vand.u32 2147483648, %v12697_v53 }
 0x1fc   :  { %v9066_v16 = vsel %vm9064_vm7, %v9058_v26, %v9063_v34  ;;  %v3979_v61 = vrot.slane %v3971_v7, %v12200_v31  ;;  %v16952_v63 = vand.u32 2147483648, %v12782_v33  ;;  %10634 = vpow2.f32 %v9131_v30  ;;  %v10627_v13 = vpop.eup %10626 }
 0x1fd   :  { %v9084_v23 = vsel %vm9082_vm4, %v16951_v10, %v9081_v27  ;;  %v6549_v17 = vunpack.c.l.b16 %v3730_v44  ;;  %v3986_v49 = vrot.slane %v3972_v57, %v12200_v31  ;;  %v9051_v11 = vsel %vm9037_vm9, inf, %v9050_v36 }
 0x1fe   :  { %v9115_v59 = vor.u32 %v10623_v38, %v16952_v63  ;;  %vm9073_vm12 = vcmp.eq.f32.partialorder %v12728_v24, inf  ;;  %vm9055_vm14 = vcmp.eq.f32.partialorder %v12749_v32, inf  ;;  %v9148_v26 = vand.u32 2147483648, %v12845_v35 }
 0x1ff   :  { %v9185_v12 = vmul.f32 0.33333334, %v10625_v45  ;;  %v13037_v27 = vmul.f32 0.03125, %v847_v1  ;;  %v9033_v34 = vsel %vm9019_vm8, inf, %v9032_v6  ;;  %10636 = vlog2.f32 %v13017_v5  ;;  %6698 = vperm.xlu1 %10389, %v6549_v17  }
 0x200   :  { %v3987_v30 = vcombine.low %v3979_v61, %v3986_v49  ;;  %v1614_v20 = vrot.slane %v11793_v54, %v12270_v55  ;;  %v9085_v38 = vsel %vm9071_vm10, nan, %v9084_v23  ;;  %v9067_v36 = vsel %vm9053_vm5, nan, %v9066_v16 }
 0x201   :  { %vm9107_vm6 = vcmp.lt.f32.partialorder %v12782_v33, 0.0  ;;  %v13049_v45 = vmul.f32 0.03125, %v844_v42  ;;  %v1618_v2 = vrot.slane %v11793_v54, %v12273_v60  ;;  %v9117_v7 = vsel %vm9116_vm11, %v12782_v33, %v9115_v59  ;;  %v10629_v6 = vpop.eup %10628 }
 0x202   :  { %vm9098_vm15 = vweird.f32 %v12856_v9  ;;  %v9167_v1 = vmul.f32 0.33333334, %v10627_v13  ;;  %v3994_v44 = vrot.slane %v3987_v30, %v12200_v31  ;;  %v1622_v57 = vrot.slane %v11793_v54, %v12290_v0 }
 0x203   :  { %vm9152_vm1 = vweird.f32 %v12879_v4  ;;  %v9130_v42 = vand.u32 2147483648, %v12865_v3  ;;  %10638 = vpow2.f32 %v9185_v12  ;;  %v13063_v10 = vand.u32 2147483647, %v13037_v27  ;;  %v10631_v17 = vpop.eup %10630 }
 0x204   :  { %v1626_v59 = vrot.slane %v11793_v54, %v12293_v22  ;;  %v13067_v23 = vpack.c.bf16 %v9051_v11, %v9033_v34  ;;  %v9086_v16 = vsel %vm9070_vm0, 0.0, %v9085_v38  ;;  %v6560_v61 = vunpack.c.l.b16 %v3994_v44  ;;  %v10633_v11 = vpop.eup %10632  ;;  %v853_v38 = vpop.xlane.xlu1 %852 }
 0x205   :  { %v3755_v63 = vcombine.low %v1614_v20, %v1622_v57  ;;  %v9068_v49 = vsel %vm9052_vm13, 0.0, %v9067_v36  ;;  %vm9106_vm2 = vcmp.eq.f32.partialorder %v12782_v33, 0.0  ;;  %v16953_v13 = vand.u32 2147483648, %v12782_v33 }
 0x206   :  { %vm9100_vm4 = vcmp.eq.f32.partialorder %v12856_v9, 0.0  ;;  %v13080_v54 = vand.u32 2147483647, %v13049_v45  ;;  %v3756_v53 = vcombine.low %v1618_v2, %v1626_v59  ;;  %v16954_v34 = vand.u32 2147483648, %v12826_v50  ;;  %6731 = vperm.xlu0 %10388, %v6560_v61  }
 0x207   :  { %v9120_v12 = vsel %vm9118_vm3, %v16953_v13, %v9117_v7  ;;  %vm9134_vm7 = vweird.f32 %v12891_v48  ;;  %10640 = vpow2.f32 %v9167_v1  ;;  %v3763_v39 = vrot.slane %v3755_v63, %v12200_v31  ;;  %v10635_v1 = vpop.eup %10634 }
 0x208   :  { %v9097_v30 = vor.u32 %v10629_v6, %v16954_v34  ;;  %v1790_v20 = vrot.slane %v12053_v51, %v12139_v14  ;;  %vm9154_vm9 = vcmp.eq.f32.partialorder %v12879_v4, 0.0  ;;  %10642 = vlog2.f32 %v13063_v10 }
 0x209   :  { %v3770_v36 = vrot.slane %v3756_v53, %v12200_v31  ;;  %v1794_v2 = vrot.slane %v12053_v51, %v12142_v41  ;;  %v1798_v7 = vrot.slane %v12053_v51, %v12145_v46  ;;  %v9087_v44 = vsel %vm9073_vm12, inf, %v9086_v16  ;;  %v10637_v32 = vpop.eup %10636 }
 0x20a   :  { %v9069_v57 = vsel %vm9055_vm14, inf, %v9068_v49  ;;  %vm9109_vm8 = vcmp.eq.f32.partialorder %v12805_v29, inf  ;;  %v9151_v6 = vor.u32 %v10631_v17, %v9148_v26  ;;  %v9184_v59 = vand.u32 2147483648, %v12902_v18  ;;  %v859_v29 = vpop.xlane.xlu1 %858 }
 0x20b   :  { %vm9089_vm10 = vcmp.lt.f32.partialorder %v12826_v50, 0.0  ;;  %vm9136_vm5 = vcmp.eq.f32.partialorder %v12891_v48, 0.0  ;;  %v9221_v61 = vmul.f32 0.33333334, %v10633_v11  ;;  %10644 = vlog2.f32 %v13080_v54 }
 0x20c   :  { %v3771_v63 = vcombine.low %v3763_v39, %v3770_v36  ;;  %v1802_v24 = vrot.slane %v12053_v51, %v12153_v52  ;;  %v9121_v16 = vsel %vm9107_vm6, nan, %v9120_v12  ;;  %vm9143_vm11 = vcmp.lt.f32.partialorder %v12845_v35, 0.0  ;;  %v850_v36 = vpop.xlane.xlu0 %849 }
 0x20d   :  { %v16869_v17 = vand.u32 2147483648, %v12919_v47  ;;  %v13112_v49 = vmul.f32 0.03125, %v853_v38  ;;  %v4019_v13 = vcombine.low %v1790_v20, %v1798_v7  ;;  %v9099_v53 = vsel %vm9098_vm15, %v12826_v50, %v9097_v30  ;;  %v10639_v7 = vpop.eup %10638 }
 0x20e   :  { %v9133_v11 = vor.u32 %v10635_v1, %v9130_v42  ;;  %vm9188_vm0 = vweird.f32 %v12927_v58  ;;  %v3778_v34 = vrot.slane %v3771_v63, %v12200_v31  ;;  %v4020_v39 = vcombine.low %v1794_v2, %v1802_v24 }
 0x20f   :  { %v13121_v12 = vpack.c.bf16 %v9087_v44, %v9069_v57  ;;  %v9153_v38 = vsel %vm9152_vm1, %v12845_v35, %v9151_v6  ;;  %vm9125_vm13 = vcmp.lt.f32.partialorder %v12865_v3, 0.0  ;;  %v9220_v20 = vand.u32 2147483648, %v12967_v43 }
 0x210   :  { %v4027_v30 = vrot.slane %v4019_v13, %v12200_v31  ;;  %vm9088_vm3 = vcmp.eq.f32.partialorder %v12826_v50, 0.0  ;;  %vm9142_vm12 = vcmp.eq.f32.partialorder %v12845_v35, 0.0  ;;  %10646 = vpow2.f32 %v9221_v61 }
 0x211   :  { %v9203_v2 = vmul.f32 0.33333334, %v10637_v32  ;;  %v6551_v1 = vunpack.c.l.b16 %v3778_v34  ;;  %v4034_v44 = vrot.slane %v4020_v39, %v12200_v31  ;;  %v9122_v57 = vsel %vm9106_vm2, 0.0, %v9121_v16 }
 0x212   :  { %v16955_v6 = vand.u32 2147483648, %v12826_v50  ;;  %vm9190_vm14 = vcmp.eq.f32.partialorder %v12927_v58, 0.0  ;;  %v13140_v24 = vand.u32 2147483647, %v13112_v49  ;;  %v1646_v61 = vrot.slane %v11839_v8, %v12270_v55 }
 0x213   :  { %vm9124_vm6 = vcmp.eq.f32.partialorder %v12865_v3, 0.0  ;;  %v9135_v33 = vsel %vm9134_vm7, %v12865_v3, %v9133_v11  ;;  %vm9170_vm15 = vweird.f32 %v12945_v40  ;;  %v13149_v32 = vmul.f32 0.03125, %v850_v36  ;;  %6704 = vperm.xlu1 %10389, %v6551_v1  }
 0x214   :  { %v9102_v63 = vsel %vm9100_vm4, %v16955_v6, %v9099_v53  ;;  %v4035_v16 = vcombine.low %v4027_v30, %v4034_v44  ;;  %v1650_v13 = vrot.slane %v11839_v8, %v12273_v60  ;;  %v10641_v53 = vpop.eup %10640  ;;  %v9156_v34 = vsel %vm9154_vm9, %v9148_v26, %v9153_v38 }
 0x215   :  { %v9187_v39 = vor.u32 %v10639_v7, %v9184_v59  ;;  %v1654_v36 = vrot.slane %v11839_v8, %v12290_v0  ;;  %v10643_v6 = vpop.eup %10642  ;;  %v13164_v30 = vsel %vm9109_vm8, inf, %v9122_v57  ;;  %vm9179_vm1 = vcmp.lt.f32.partialorder %v12902_v18, 0.0 }
 0x216   :  { %10648 = vpow2.f32 %v9203_v2  ;;  %v4042_v1 = vrot.slane %v4035_v16, %v12200_v31  ;;  %v1658_v26 = vrot.slane %v11839_v8, %v12293_v22  ;;  %v9103_v38 = vsel %vm9089_vm10, nan, %v9102_v63  ;;  %v10645_v2 = vpop.eup %10644 }
 0x217   :  { %v9138_v7 = vsel %vm9136_vm5, %v9130_v42, %v9135_v33  ;;  %vm9172_vm2 = vcmp.eq.f32.partialorder %v12945_v40, 0.0  ;;  %10650 = vlog2.f32 %v13140_v24  ;;  %v3803_v44 = vcombine.low %v1646_v61, %v1654_v36 }
 0x218   :  { %vm9091_vm4 = vcmp.eq.f32.partialorder %v12856_v9, inf  ;;  %vm9145_vm7 = vcmp.eq.f32.partialorder %v12879_v4, inf  ;;  %v9157_v8 = vsel %vm9143_vm11, nan, %v9156_v34  ;;  %vm9127_vm9 = vcmp.eq.f32.partialorder %v12891_v48, inf }
 0x219   :  { %v13184_v57 = vand.u32 2147483647, %v13149_v32  ;;  %v6562_v42 = vunpack.c.l.b16 %v4042_v1  ;;  %v3804_v63 = vcombine.low %v1650_v13, %v1658_v26  ;;  %vm9178_vm8 = vcmp.eq.f32.partialorder %v12902_v18, 0.0 }
 0x21a   :  { %v9189_v61 = vsel %vm9188_vm0, %v12902_v18, %v9187_v39  ;;  %v9169_v33 = vor.u32 %v10641_v53, %v16869_v17  ;;  %v9257_v16 = vmul.f32 0.33333334, %v10643_v6  ;;  %v3811_v36 = vrot.slane %v3803_v44, %v12200_v31  ;;  %v16956_v39 = vld [vmem:[#allocation5_spill] sm:$0xff]  ;;  %v10647_v17 = vpop.eup %10646  ;;  %v865_v18 = vpop.xlane.xlu1 %864 }
 0x21b   :  { %v9139_v34 = vsel %vm9125_vm13, nan, %v9138_v7  ;;  %vm9161_vm10 = vcmp.lt.f32.partialorder %v12919_v47, 0.0  ;;  %vm9224_vm5 = vweird.f32 %v12989_v21  ;;  %v13197_v13 = vmul.f32 0.03125, %v859_v29  ;;  %6737 = vperm.xlu0 %10388, %v6562_v42   ;;  %v856_v7 = vpop.xlane.xlu0 %855 }
 0x21c   :  { %v3818_v1 = vrot.slane %v3804_v63, %v12200_v31  ;;  %v1822_v26 = vrot.slane %v16956_v39, %v12139_v14  ;;  %v9104_v53 = vsel %vm9088_vm3, 0.0, %v9103_v38  ;;  %v9158_v6 = vsel %vm9142_vm12, 0.0, %v9157_v8 }
 0x21d   :  { %v9239_v44 = vmul.f32 0.33333334, %v10645_v2  ;;  %v1826_v11 = vrot.slane %v16956_v39, %v12142_v41  ;;  %v9192_v29 = vsel %vm9190_vm14, %v9184_v59, %v9189_v61  ;;  %10652 = vlog2.f32 %v13184_v57 }
 0x21e   :  { %v3819_v42 = vcombine.low %v3811_v36, %v3818_v1  ;;  %v1830_v50 = vrot.slane %v16956_v39, %v12145_v46  ;;  %v9140_v35 = vsel %vm9124_vm6, 0.0, %v9139_v34  ;;  %v9171_v38 = vsel %vm9170_vm15, %v12919_v47, %v9169_v33 }
 0x21f   :  { %10654 = vpow2.f32 %v9257_v16  ;;  %v1834_v2 = vrot.slane %v16956_v39, %v12153_v52  ;;  %vm9181_vm11 = vcmp.eq.f32.partialorder %v12927_v58, inf  ;;  %vm9160_vm0 = vcmp.eq.f32.partialorder %v12919_v47, 0.0 }
 0x220   :  { %vm9226_vm13 = vcmp.eq.f32.partialorder %v12989_v21, 0.0  ;;  %v13226_v59 = vand.u32 2147483647, %v13197_v13  ;;  %v13228_v8 = vmul.f32 0.03125, %v856_v7  ;;  %v3826_v3 = vrot.slane %v3819_v42, %v12200_v31  ;;  %v10649_v36 = vpop.eup %10648 }
 0x221   :  { %v4067_v63 = vcombine.low %v1822_v26, %v1830_v50  ;;  %v9193_v61 = vsel %vm9179_vm1, nan, %v9192_v29  ;;  %v9223_v33 = vor.u32 %v10647_v17, %v9220_v20  ;;  %vm9206_vm3 = vweird.f32 %v13017_v5  ;;  %v10651_v50 = vpop.eup %10650 }
 0x222   :  { %10656 = vpow2.f32 %v9239_v44  ;;  %v4068_v16 = vcombine.low %v1826_v11, %v1834_v2  ;;  %v16957_v34 = vand.u32 2147483648, %v12919_v47  ;;  %v9256_v7 = vand.u32 2147483648, %v13037_v27 }
 0x223   :  { %v6553_v42 = vunpack.c.l.b16 %v3826_v3  ;;  %v4075_v26 = vrot.slane %v4067_v63, %v12200_v31  ;;  %v9105_v29 = vsel %vm9091_vm4, inf, %v9104_v53  ;;  %v9159_v17 = vsel %vm9145_vm7, inf, %v9158_v6 }
 0x224   :  { %v9174_v1 = vsel %vm9172_vm2, %v16957_v34, %v9171_v38  ;;  %v9141_v11 = vsel %vm9127_vm9, inf, %v9140_v35  ;;  %vm9163_vm12 = vcmp.eq.f32.partialorder %v12945_v40, inf  ;;  %vm9215_vm14 = vcmp.lt.f32.partialorder %v12967_v43, 0.0 }
 0x225   :  { %v4082_v44 = vrot.slane %v4068_v16, %v12200_v31  ;;  %v9194_v38 = vsel %vm9178_vm8, 0.0, %v9193_v61  ;;  %vm9208_vm6 = vcmp.eq.f32.partialorder %v13017_v5, 0.0  ;;  %10658 = vlog2.f32 %v13226_v59  ;;  %6710 = vperm.xlu1 %10389, %v6553_v42  }
 0x226   :  { %v13256_v9 = vand.u32 2147483647, %v13228_v8  ;;  %v1678_v4 = vrot.slane %v11934_v19, %v12270_v55  ;;  %v9175_v48 = vsel %vm9161_vm10, nan, %v9174_v1  ;;  %v9225_v53 = vsel %vm9224_vm5, %v12967_v43, %v9223_v33 }
 0x227   :  { %v4083_v6 = vcombine.low %v4075_v26, %v4082_v44  ;;  %v1682_v35 = vrot.slane %v11934_v19, %v12273_v60  ;;  %v16958_v2 = vand.u32 2147483648, %v12991_v28  ;;  %v9293_v63 = vmul.f32 0.33333334, %v10651_v50  ;;  %v10653_v42 = vpop.eup %10652 }
 0x228   :  { %v1686_v61 = vrot.slane %v11934_v19, %v12290_v0  ;;  %v1690_v16 = vrot.slane %v11934_v19, %v12293_v22  ;;  %v13274_v34 = vpack.c.bf16 %v13164_v30, %v9105_v29  ;;  %v13276_v1 = vpack.c.bf16 %v9159_v17, %v9141_v11 }
 0x229   :  { %v9205_v3 = vor.u32 %v10649_v36, %v16958_v2  ;;  %vm9214_vm15 = vcmp.eq.f32.partialorder %v12967_v43, 0.0  ;;  %vm9197_vm1 = vcmp.lt.f32.partialorder %v12991_v28, 0.0  ;;  %v9238_v33 = vand.u32 2147483648, %v13049_v45  ;;  %v10655_v50 = vpop.eup %10654 }
 0x22a   :  { %v4090_v36 = vrot.slane %v4083_v6, %v12200_v31  ;;  %vm9260_vm2 = vweird.f32 %v13063_v10  ;;  %10660 = vlog2.f32 %v13256_v9  ;;  %v13284_v26 = vmul.f32 0.03125, %v865_v18 }
 0x22b   :  { %v3851_v19 = vcombine.low %v1678_v4, %v1686_v61  ;;  %v3852_v30 = vcombine.low %v1682_v35, %v1690_v16  ;;  %v9195_v29 = vsel %vm9181_vm11, inf, %v9194_v38  ;;  %v9176_v17 = vsel %vm9160_vm0, 0.0, %v9175_v48  ;;  %v862_v48 = vpop.xlane.xlu0 %861 }
 0x22c   :  { %v9228_v11 = vsel %vm9226_vm13, %v9220_v20, %v9225_v53  ;;  %v6564_v44 = vunpack.c.l.b16 %v4090_v36  ;;  %vm9217_vm4 = vcmp.eq.f32.partialorder %v12989_v21, inf  ;;  %vm9196_vm7 = vcmp.eq.f32.partialorder %v12991_v28, 0.0  ;;  %v10657_v38 = vpop.eup %10656  ;;  %v16959_v53 = vld [vmem:[#allocation7_spill] sm:$0xff] }
 0x22d   :  { %v9207_v4 = vsel %vm9206_vm3, %v12991_v28, %v9205_v3  ;;  %10662 = vpow2.f32 %v9293_v63  ;;  %v3859_v58 = vrot.slane %v3851_v19, %v12200_v31  ;;  %v3866_v47 = vrot.slane %v3852_v30, %v12200_v31 }
 0x22e   :  { %vm9262_vm9 = vcmp.eq.f32.partialorder %v13063_v10, 0.0  ;;  %vm9242_vm8 = vweird.f32 %v13080_v54  ;;  %v9275_v20 = vmul.f32 0.33333334, %v10653_v42  ;;  %6743 = vperm.xlu0 %10388, %v6564_v44   ;;  %v1854_v18 = vrot.slane %v16959_v53, %v12139_v14 }
 0x22f   :  { %v1858_v6 = vrot.slane %v16959_v53, %v12142_v41  ;;  %v9177_v35 = vsel %vm9163_vm12, inf, %v9176_v17  ;;  %v9229_v2 = vsel %vm9215_vm14, nan, %v9228_v11  ;;  %vm9244_vm10 = vcmp.eq.f32.partialorder %v13080_v54, 0.0  ;;  %v10659_v19 = vpop.eup %10658 }
 0x230   :  { %v13313_v3 = vand.u32 2147483647, %v13284_v26  ;;  %v3867_v63 = vcombine.low %v3859_v58, %v3866_v47  ;;  %v16960_v61 = vand.u32 2147483648, %v12991_v28  ;;  %v9259_v36 = vor.u32 %v10655_v50, %v9256_v7  ;;  %v871_v50 = vpop.xlane.xlu1 %870 }
 0x231   :  { %v1862_v40 = vrot.slane %v16959_v53, %v12145_v46  ;;  %v1866_v42 = vrot.slane %v16959_v53, %v12153_v52  ;;  %vm9199_vm5 = vcmp.eq.f32.partialorder %v13017_v5, inf  ;;  %v9241_v30 = vor.u32 %v10657_v38, %v9238_v33 }
 0x232   :  { %v9210_v16 = vsel %vm9208_vm6, %v16960_v61, %v9207_v4  ;;  %v9292_v17 = vand.u32 2147483648, %v13112_v49  ;;  %v13329_v11 = vmul.f32 0.03125, %v862_v48  ;;  %v3874_v44 = vrot.slane %v3867_v63, %v12200_v31 }
 0x233   :  { %v13332_v4 = vpack.c.bf16 %v9195_v29, %v9177_v35  ;;  %vm9251_vm11 = vcmp.lt.f32.partialorder %v13037_v27, 0.0  ;;  %vm9233_vm0 = vcmp.lt.f32.partialorder %v13049_v45, 0.0  ;;  %10664 = vpow2.f32 %v9275_v20 }
 0x234   :  { %v4115_v58 = vcombine.low %v1854_v18, %v1862_v40  ;;  %v4116_v47 = vcombine.low %v1858_v6, %v1866_v42  ;;  %v9230_v61 = vsel %vm9214_vm15, 0.0, %v9229_v2  ;;  %v9211_v38 = vsel %vm9197_vm1, nan, %v9210_v16  ;;  %v10661_v18 = vpop.eup %10660 }
 0x235   :  { %16961 = vst [vmem:[#allocation5_spill] sm:$0xff] %v13332_v4  ;;  %10666 = vlog2.f32 %v13313_v3  ;;  %v6555_v48 = vunpack.c.l.b16 %v3874_v44  ;;  %v9261_v29 = vsel %vm9260_vm2, %v13037_v27, %v9259_v36  ;;  %v9329_v35 = vmul.f32 0.33333334, %v10659_v19  ;;  %v868_v44 = vpop.xlane.xlu0 %867 }
 0x236   :  { %v4123_v63 = vrot.slane %v4115_v58, %v12200_v31  ;;  %v4130_v20 = vrot.slane %v4116_v47, %v12200_v31  ;;  %vm9250_vm13 = vcmp.eq.f32.partialorder %v13037_v27, 0.0  ;;  %v9243_v43 = vsel %vm9242_vm8, %v13049_v45, %v9241_v30 }
 0x237   :  { %v13351_v6 = vand.u32 2147483647, %v13329_v11  ;;  %v13353_v2 = vmul.f32 0.03125, %v871_v50  ;;  %6716 = vperm.xlu1 %10389, %v6555_v48   ;;  %v1710_v16 = vrot.slane %v11940_v56, %v12270_v55  ;;  %v9231_v36 = vsel %vm9217_vm4, inf, %v9230_v61  ;;  %v10663_v19 = vpop.eup %10662 }
 0x238   :  { %v9212_v40 = vsel %vm9196_vm7, 0.0, %v9211_v38  ;;  %vm9232_vm3 = vcmp.eq.f32.partialorder %v13049_v45, 0.0  ;;  %vm9296_vm12 = vweird.f32 %v13140_v24  ;;  %v4131_v42 = vcombine.low %v4123_v63, %v4130_v20 }
 0x239   :  { %v9264_v30 = vsel %vm9262_vm9, %v9256_v7, %v9261_v29  ;;  %v1714_v50 = vrot.slane %v11940_v56, %v12273_v60  ;;  %v1718_v21 = vrot.slane %v11940_v56, %v12290_v0  ;;  %v1722_v28 = vrot.slane %v11940_v56, %v12293_v22 }
 0x23a   :  { %vm9253_vm14 = vcmp.eq.f32.partialorder %v13063_v10, inf  ;;  %v9246_v58 = vsel %vm9244_vm10, %v9238_v33, %v9243_v43  ;;  %vm9298_vm6 = vcmp.eq.f32.partialorder %v13140_v24, 0.0  ;;  %10668 = vpow2.f32 %v9329_v35 }
 0x23b   :  { %v9311_v7 = vmul.f32 0.33333334, %v10661_v18  ;;  %v4138_v47 = vrot.slane %v4131_v42, %v12200_v31  ;;  %10670 = vlog2.f32 %v13351_v6  ;;  %v13382_v61 = vand.u32 2147483647, %v13353_v2 }
 0x23c   :  { %v3899_v38 = vcombine.low %v1710_v16, %v1718_v21  ;;  %v3900_v56 = vcombine.low %v1714_v50, %v1722_v28  ;;  %v9213_v48 = vsel %vm9199_vm5, inf, %v9212_v40  ;;  %vm9235_vm15 = vcmp.eq.f32.partialorder %v13080_v54, inf  ;;  %v16962_v16 = vld [vmem:[#allocation8_spill] sm:$0xff]  ;;  %v877_v50 = vpop.xlane.xlu1 %876 }
 0x23d   :  { %v9295_v33 = vor.u32 %v10663_v19, %v9292_v17  ;;  %v13389_v29 = vmul.f32 0.03125, %v868_v44  ;;  %v6566_v35 = vunpack.c.l.b16 %v4138_v47  ;;  %v9265_v63 = vsel %vm9251_vm11, nan, %v9264_v30  ;;  %v10665_v43 = vpop.eup %10664 }
 0x23e   :  { %v9247_v20 = vsel %vm9233_vm0, nan, %v9246_v58  ;;  %vm9287_vm1 = vcmp.lt.f32.partialorder %v13112_v49, 0.0  ;;  %v3907_v18 = vrot.slane %v3899_v38, %v12200_v31  ;;  %v3914_v5 = vrot.slane %v3900_v56, %v12200_v31 }
 0x23f   :  { %10672 = vpow2.f32 %v9311_v7  ;;  %6749 = vperm.xlu0 %10388, %v6566_v35   ;;  %v1886_v40 = vrot.slane %v16962_v16, %v12139_v14  ;;  %v1890_v42 = vrot.slane %v16962_v16, %v12142_v41  ;;  %v1894_v19 = vrot.slane %v16962_v16, %v12145_v46  ;;  %v10667_v30 = vpop.eup %10666 }
 0x240   :  { %v9274_v44 = vand.u32 2147483648, %v13149_v32  ;;  %10674 = vlog2.f32 %v13382_v61  ;;  %v3915_v21 = vcombine.low %v3907_v18, %v3914_v5  ;;  %v1898_v28 = vrot.slane %v16962_v16, %v12153_v52 }
 0x241   :  { %v13408_v58 = vpack.c.bf16 %v9231_v36, %v9213_v48  ;;  %v9266_v7 = vsel %vm9250_vm13, 0.0, %v9265_v63  ;;  %v9297_v47 = vsel %vm9296_vm12, %v13112_v49, %v9295_v33  ;;  %v13416_v38 = vand.u32 2147483647, %v13389_v29 }
 0x242   :  { %v9248_v56 = vsel %vm9232_vm3, 0.0, %v9247_v20  ;;  %vm9286_vm2 = vcmp.eq.f32.partialorder %v13112_v49, 0.0  ;;  %v9277_v35 = vor.u32 %v10665_v43, %v9274_v44  ;;  %vm9278_vm4 = vweird.f32 %v13184_v57 }
 0x243   :  { %16963 = vst [vmem:[#allocation7_spill] sm:$0xff] %v13408_v58  ;;  %v3922_v36 = vrot.slane %v3915_v21, %v12200_v31  ;;  %vm9269_vm7 = vcmp.lt.f32.partialorder %v13149_v32, 0.0  ;;  %v9365_v27 = vmul.f32 0.33333334, %v10667_v30  ;;  %v13424_v48 = vmul.f32 0.03125, %v877_v50  ;;  %v874_v21 = vpop.xlane.xlu0 %873 }
 0x244   :  { %v4163_v63 = vcombine.low %v1886_v40, %v1894_v19  ;;  %v4164_v33 = vcombine.low %v1890_v42, %v1898_v28  ;;  %v9267_v18 = vsel %vm9253_vm14, inf, %v9266_v7  ;;  %v9300_v45 = vsel %vm9298_vm6, %v9292_v17, %v9297_v47  ;;  %v10669_v5 = vpop.eup %10668 }
 0x245   :  { %vm9280_vm9 = vcmp.eq.f32.partialorder %v13184_v57, 0.0  ;;  %v6557_v20 = vunpack.c.l.b16 %v3922_v36  ;;  %v9328_v43 = vand.u32 2147483648, %v13197_v13  ;;  %10676 = vlog2.f32 %v13416_v38  ;;  %v10671_v42 = vpop.eup %10670 }
 0x246   :  { %v4171_v30 = vrot.slane %v4163_v63, %v12200_v31  ;;  %v4178_v40 = vrot.slane %v4164_v33, %v12200_v31  ;;  %v9249_v10 = vsel %vm9235_vm15, inf, %v9248_v56  ;;  %vm9268_vm8 = vcmp.eq.f32.partialorder %v13149_v32, 0.0 }
 0x247   :  { %v9279_v17 = vsel %vm9278_vm4, %v13149_v32, %v9277_v35  ;;  %vm9332_vm10 = vweird.f32 %v13226_v59  ;;  %6722 = vperm.xlu1 %10389, %v6557_v20   ;;  %vm9289_vm5 = vcmp.eq.f32.partialorder %v13140_v24, inf  ;;  %v9301_v50 = vsel %vm9287_vm1, nan, %v9300_v45 }
 0x248   :  { %vm9334_vm11 = vcmp.eq.f32.partialorder %v13226_v59, 0.0  ;;  %10678 = vpow2.f32 %v9365_v27  ;;  %v13450_v54 = vand.u32 2147483647, %v13424_v48  ;;  %v4179_v28 = vcombine.low %v4171_v30, %v4178_v40  ;;  %v16964_v40 = vld [vmem:[#allocation9_spill] sm:$0xff] }
 0x249   :  { %v9331_v7 = vor.u32 %v10669_v5, %v9328_v43  ;;  %v1742_v47 = vrot.slane %v11976_v37, %v12270_v55  ;;  %v1746_v56 = vrot.slane %v11976_v37, %v12273_v60  ;;  %v1750_v35 = vrot.slane %v11976_v37, %v12290_v0  ;;  %v10673_v36 = vpop.eup %10672 }
 0x24a   :  { %vm9271_vm0 = vcmp.eq.f32.partialorder %v13184_v57, inf  ;;  %v9282_v27 = vsel %vm9280_vm9, %v9274_v44, %v9279_v17  ;;  %v9347_v63 = vmul.f32 0.33333334, %v10671_v42  ;;  %v4186_v33 = vrot.slane %v4179_v28, %v12200_v31  ;;  %v10675_v20 = vpop.eup %10674 }
 0x24b   :  { %v1754_v45 = vrot.slane %v11976_v37, %v12293_v22  ;;  %v13464_v5 = vmul.f32 0.03125, %v874_v21  ;;  %v3947_v30 = vcombine.low %v1742_v47, %v1750_v35  ;;  %v1918_v19 = vrot.slane %v16964_v40, %v12139_v14 }
 0x24c   :  { %v1926_v58 = vrot.slane %v16964_v40, %v12145_v46  ;;  %v9302_v4 = vsel %vm9286_vm2, 0.0, %v9301_v50  ;;  %vm9323_vm13 = vcmp.lt.f32.partialorder %v13197_v13, 0.0  ;;  %10680 = vlog2.f32 %v13450_v54 }
 0x24d   :  { %v6568_v44 = vunpack.c.l.b16 %v4186_v33  ;;  %v3948_v42 = vcombine.low %v1746_v56, %v1754_v45  ;;  %v9283_v37 = vsel %vm9269_vm7, nan, %v9282_v27  ;;  %v9333_v17 = vsel %vm9332_vm10, %v13197_v13, %v9331_v7 }
 0x24e   :  { %v16965_v21 = vand.u32 2147483648, %v13228_v8  ;;  %v3955_v47 = vrot.slane %v3947_v30, %v12200_v31  ;;  %10682 = vpow2.f32 %v9347_v63  ;;  %v9401_v49 = vmul.f32 0.33333334, %v10675_v20 }
 0x24f   :  { %6755 = vperm.xlu0 %10388, %v6568_v44   ;;  %v3962_v50 = vrot.slane %v3948_v42, %v12200_v31  ;;  %v1922_v56 = vrot.slane %v16964_v40, %v12142_v41  ;;  %vm9314_vm3 = vweird.f32 %v13256_v9  ;;  %v13487_v35 = vand.u32 2147483647, %v13464_v5 }
 0x250   :  { %v9313_v28 = vor.u32 %v10673_v36, %v16965_v21  ;;  %v1930_v7 = vrot.slane %v16964_v40, %v12153_v52  ;;  %v4211_v27 = vcombine.low %v1918_v19, %v1926_v58  ;;  %v10677_v36 = vpop.eup %10676  ;;  %v13491_v33 = vpack.c.bf16 %v9267_v18, %v9249_v10  ;;  %v883_v10 = vpop.xlane.xlu1 %882 }
 0x251   :  { %v9284_v63 = vsel %vm9268_vm8, 0.0, %v9283_v37  ;;  %vm9322_vm12 = vcmp.eq.f32.partialorder %v13197_v13, 0.0  ;;  %vm9305_vm14 = vcmp.lt.f32.partialorder %v13228_v8, 0.0  ;;  %vm9316_vm6 = vcmp.eq.f32.partialorder %v13256_v9, 0.0 }
 0x252   :  { %16966 = vst [vmem:[#allocation8_spill] sm:$0xff] %v13491_v33  ;;  %v3963_v45 = vcombine.low %v3955_v47, %v3962_v50  ;;  %v9303_v20 = vsel %vm9289_vm5, inf, %v9302_v4  ;;  %v9336_v30 = vsel %vm9334_vm11, %v9328_v43, %v9333_v17  ;;  %v9315_v58 = vsel %vm9314_vm3, %v13228_v8, %v9313_v28  ;;  %v10679_v32 = vpop.eup %10678  ;;  %v880_v4 = vpop.xlane.xlu0 %879 }
 0x253   :  { %v9364_v18 = vand.u32 2147483648, %v13284_v26  ;;  %10684 = vpow2.f32 %v9401_v49  ;;  %v4212_v44 = vcombine.low %v1922_v56, %v1930_v7  ;;  %v4219_v42 = vrot.slane %v4211_v27, %v12200_v31 }
 0x254   :  { %v3970_v19 = vrot.slane %v3963_v45, %v12200_v31  ;;  %v9285_v37 = vsel %vm9271_vm0, inf, %v9284_v63  ;;  %vm9368_vm15 = vweird.f32 %v13313_v3  ;;  %v9383_v24 = vmul.f32 0.33333334, %v10677_v36 }
 0x255   :  { %10686 = vlog2.f32 %v13487_v35  ;;  %v13510_v43 = vmul.f32 0.03125, %v883_v10  ;;  %v4226_v21 = vrot.slane %v4212_v44, %v12200_v31  ;;  %v1774_v28 = vrot.slane %v12053_v51, %v12270_v55 }
 0x256   :  { %v6559_v17 = vunpack.c.l.b16 %v3970_v19  ;;  %vm9325_vm1 = vcmp.eq.f32.partialorder %v13226_v59, inf  ;;  %v9337_v57 = vsel %vm9323_vm13, nan, %v9336_v30  ;;  %vm9304_vm2 = vcmp.eq.f32.partialorder %v13228_v8, 0.0  ;;  %v10681_v56 = vpop.eup %10680 }
 0x257   :  { %v16967_v47 = vand.u32 2147483648, %v13228_v8  ;;  %v9367_v50 = vor.u32 %v10679_v32, %v9364_v18  ;;  %vm9370_vm4 = vcmp.eq.f32.partialorder %v13313_v3, 0.0  ;;  %v13526_v7 = vmul.f32 0.03125, %v880_v4  ;;  %v889_v4 = vpop.xlane.xlu1 %888 }
 0x258   :  { %6728 = vperm.xlu1 %10389, %v6559_v17   ;;  %v4227_v27 = vcombine.low %v4219_v42, %v4226_v21  ;;  %v1778_v36 = vrot.slane %v12053_v51, %v12273_v60  ;;  %v1782_v63 = vrot.slane %v12053_v51, %v12290_v0  ;;  %v13532_v45 = vpack.c.bf16 %v9303_v20, %v9285_v37 }
 0x259   :  { %v9318_v49 = vsel %vm9316_vm6, %v16967_v47, %v9315_v58  ;;  %vm9359_vm7 = vcmp.lt.f32.partialorder %v13284_v26, 0.0  ;;  %v9346_v30 = vand.u32 2147483648, %v13329_v11  ;;  %vm9350_vm9 = vweird.f32 %v13351_v6  ;;  %v10683_v58 = vpop.eup %10682 }
 0x25a   :  { %16968 = vst [vmem:[#allocation9_spill] sm:$0xff] %v13532_v45  ;;  %10688 = vpow2.f32 %v9383_v24  ;;  %v13538_v10 = vand.u32 2147483647, %v13510_v43  ;;  %v4234_v32 = vrot.slane %v4227_v27, %v12200_v31  ;;  %v1786_v19 = vrot.slane %v12053_v51, %v12293_v22 }
 0x25b   :  { %v3995_v44 = vcombine.low %v1774_v28, %v1782_v63  ;;  %v9338_v20 = vsel %vm9322_vm12, 0.0, %v9337_v57  ;;  %vm9307_vm8 = vcmp.eq.f32.partialorder %v13256_v9, inf  ;;  %v9319_v42 = vsel %vm9305_vm14, nan, %v9318_v49  ;;  %v16969_v57 = vld [vmem:[#allocation10_spill] sm:$0xff] }
 0x25c   :  { %v9369_v37 = vsel %vm9368_vm15, %v13284_v26, %v9367_v50  ;;  %vm9352_vm10 = vcmp.eq.f32.partialorder %v13351_v6, 0.0  ;;  %v9437_v24 = vmul.f32 0.33333334, %v10681_v56  ;;  %vm9358_vm5 = vcmp.eq.f32.partialorder %v13284_v26, 0.0 }
 0x25d   :  { %v13554_v51 = vand.u32 2147483647, %v13526_v7  ;;  %v6570_v13 = vunpack.c.l.b16 %v4234_v32  ;;  %v3996_v17 = vcombine.low %v1778_v36, %v1786_v19  ;;  %v4003_v21 = vrot.slane %v3995_v44, %v12200_v31  ;;  %v10685_v56 = vpop.eup %10684 }
 0x25e   :  { %v9349_v28 = vor.u32 %v10683_v58, %v9346_v30  ;;  %v1950_v47 = vrot.slane %v16969_v57, %v12139_v14  ;;  %v1954_v49 = vrot.slane %v16969_v57, %v12142_v41  ;;  %v1958_v50 = vrot.slane %v16969_v57, %v12145_v46 }
 0x25f   :  { %vm9341_vm11 = vcmp.lt.f32.partialorder %v13329_v11, 0.0  ;;  %v9400_v27 = vand.u32 2147483648, %v13353_v2  ;;  %10690 = vlog2.f32 %v13538_v10  ;;  %6761 = vperm.xlu0 %10388, %v6570_v13   ;;  %v4010_v36 = vrot.slane %v3996_v17, %v12200_v31  ;;  %v10687_v58 = vpop.eup %10686 }
 0x260   :  { %v1962_v63 = vrot.slane %v16969_v57, %v12153_v52  ;;  %v9372_v32 = vsel %vm9370_vm4, %v9364_v18, %v9369_v37  ;;  %vm9404_vm0 = vweird.f32 %v13382_v61  ;;  %10692 = vpow2.f32 %v9437_v24  ;;  %v886_v24 = vpop.xlane.xlu0 %885 }
 0x261   :  { %v13574_v19 = vmul.f32 0.03125, %v889_v4  ;;  %v9339_v44 = vsel %vm9325_vm1, inf, %v9338_v20  ;;  %v9320_v13 = vsel %vm9304_vm2, 0.0, %v9319_v42  ;;  %vm9361_vm13 = vcmp.eq.f32.partialorder %v13313_v3, inf }
 0x262   :  { %vm9406_vm3 = vcmp.eq.f32.partialorder %v13382_v61, 0.0  ;;  %10694 = vlog2.f32 %v13554_v51  ;;  %v4011_v17 = vcombine.low %v4003_v21, %v4010_v36  ;;  %vm9340_vm12 = vcmp.eq.f32.partialorder %v13329_v11, 0.0 }
 0x263   :  { %v9351_v18 = vsel %vm9350_vm9, %v13329_v11, %v9349_v28  ;;  %v9403_v37 = vor.u32 %v10685_v56, %v9400_v27  ;;  %v4259_v59 = vcombine.low %v1950_v47, %v1958_v50  ;;  %v4260_v20 = vcombine.low %v1954_v49, %v1962_v63 }
 0x264   :  { %v9373_v8 = vsel %vm9359_vm7, nan, %v9372_v32  ;;  %v9382_v42 = vand.u32 2147483648, %v13389_v29  ;;  %v9419_v4 = vmul.f32 0.33333334, %v10687_v58  ;;  %v4018_v45 = vrot.slane %v4011_v17, %v12200_v31  ;;  %v10689_v33 = vpop.eup %10688 }
 0x265   :  { %vm9395_vm14 = vcmp.lt.f32.partialorder %v13353_v2, 0.0  ;;  %vm9386_vm6 = vweird.f32 %v13416_v38  ;;  %v13594_v21 = vand.u32 2147483647, %v13574_v19  ;;  %v4267_v28 = vrot.slane %v4259_v59, %v12200_v31 }
 0x266   :  { %v4274_v47 = vrot.slane %v4260_v20, %v12200_v31  ;;  %v9321_v49 = vsel %vm9307_vm8, inf, %v9320_v13  ;;  %v9354_v50 = vsel %vm9352_vm10, %v9346_v30, %v9351_v18  ;;  %v13602_v56 = vmul.f32 0.03125, %v886_v24  ;;  %v895_v24 = vpop.xlane.xlu1 %894 }
 0x267   :  { %v6561_v36 = vunpack.c.l.b16 %v4018_v45  ;;  %v9374_v63 = vsel %vm9358_vm5, 0.0, %v9373_v8  ;;  %vm9343_vm15 = vcmp.eq.f32.partialorder %v13351_v6, inf  ;;  %v9405_v58 = vsel %vm9404_vm0, %v13353_v2, %v9403_v37 }
 0x268   :  { %vm9388_vm1 = vcmp.eq.f32.partialorder %v13416_v38, 0.0  ;;  %v4275_v32 = vcombine.low %v4267_v28, %v4274_v47  ;;  %v9385_v9 = vor.u32 %v10689_v33, %v9382_v42  ;;  %10696 = vpow2.f32 %v9419_v4 }
 0x269   :  { %6734 = vperm.xlu1 %10389, %v6561_v36   ;;  %v1806_v30 = vrot.slane %v16956_v39, %v12270_v55  ;;  %v1810_v45 = vrot.slane %v16956_v39, %v12273_v60  ;;  %v13615_v26 = vpack.c.bf16 %v9339_v44, %v9321_v49  ;;  %v9355_v13 = vsel %vm9341_vm11, nan, %v9354_v50  ;;  %v10691_v17 = vpop.eup %10690 }
 0x26a   :  { %vm9394_vm2 = vcmp.eq.f32.partialorder %v13353_v2, 0.0  ;;  %vm9377_vm4 = vcmp.lt.f32.partialorder %v13389_v29, 0.0  ;;  %10698 = vlog2.f32 %v13594_v21  ;;  %v4282_v33 = vrot.slane %v4275_v32, %v12200_v31  ;;  %v10693_v20 = vpop.eup %10692  ;;  %v892_v32 = vpop.xlane.xlu0 %891 }
 0x26b   :  { %v9436_v18 = vand.u32 2147483648, %v13424_v48  ;;  %v13625_v37 = vand.u32 2147483647, %v13602_v56  ;;  %v1814_v44 = vrot.slane %v16956_v39, %v12290_v0  ;;  %v1818_v59 = vrot.slane %v16956_v39, %v12293_v22 }
 0x26c   :  { %v9375_v8 = vsel %vm9361_vm13, inf, %v9374_v63  ;;  %v9408_v4 = vsel %vm9406_vm3, %v9400_v27, %v9405_v58  ;;  %vm9440_vm7 = vweird.f32 %v13450_v54  ;;  %v6572_v28 = vunpack.c.l.b16 %v4282_v33  ;;  %v10695_v47 = vpop.eup %10694  ;;  %v16970_v27 = vld [vmem:[#allocation11_spill] sm:$0xff] }
 0x26d   :  { %v9356_v49 = vsel %vm9340_vm12, 0.0, %v9355_v13  ;;  %vm9376_vm9 = vcmp.eq.f32.partialorder %v13389_v29, 0.0  ;;  %v9387_v39 = vsel %vm9386_vm6, %v13389_v29, %v9385_v9  ;;  %v4043_v50 = vcombine.low %v1806_v30, %v1814_v44 }
 0x26e   :  { %v4044_v36 = vcombine.low %v1810_v45, %v1818_v59  ;;  %v9473_v3 = vmul.f32 0.33333334, %v10691_v17  ;;  %v13642_v63 = vmul.f32 0.03125, %v895_v24  ;;  %6767 = vperm.xlu0 %10388, %v6572_v28   ;;  %v1982_v58 = vrot.slane %v16970_v27, %v12139_v14 }
 0x26f   :  { %v1990_v11 = vrot.slane %v16970_v27, %v12145_v46  ;;  %v9409_v13 = vsel %vm9395_vm14, nan, %v9408_v4  ;;  %vm9442_vm8 = vcmp.eq.f32.partialorder %v13450_v54, 0.0  ;;  %10700 = vlog2.f32 %v13625_v37 }
 0x270   :  { %v4051_v9 = vrot.slane %v4043_v50, %v12200_v31  ;;  %v4058_v30 = vrot.slane %v4044_v36, %v12200_v31  ;;  %v9390_v45 = vsel %vm9388_vm1, %v9382_v42, %v9387_v39  ;;  %v9439_v33 = vor.u32 %v10693_v20, %v9436_v18  ;;  %v901_v20 = vpop.xlane.xlu1 %900 }
 0x271   :  { %v9455_v17 = vmul.f32 0.33333334, %v10695_v47  ;;  %v1986_v24 = vrot.slane %v16970_v27, %v12142_v41  ;;  %v9357_v44 = vsel %vm9343_vm15, inf, %v9356_v49  ;;  %vm9397_vm10 = vcmp.eq.f32.partialorder %v13382_v61, inf }
 0x272   :  { %vm9379_vm5 = vcmp.eq.f32.partialorder %v13416_v38, inf  ;;  %v9418_v59 = vand.u32 2147483648, %v13464_v5  ;;  %v13665_v4 = vmul.f32 0.03125, %v892_v32  ;;  %v4059_v28 = vcombine.low %v4051_v9, %v4058_v30  ;;  %v10697_v49 = vpop.eup %10696 }
 0x273   :  { %vm9431_vm11 = vcmp.lt.f32.partialorder %v13424_v48, 0.0  ;;  %10702 = vpow2.f32 %v9473_v3  ;;  %v13669_v42 = vand.u32 2147483647, %v13642_v63  ;;  %v1994_v6 = vrot.slane %v16970_v27, %v12153_v52 }
 0x274   :  { %v4307_v47 = vcombine.low %v1982_v58, %v1990_v11  ;;  %v9410_v39 = vsel %vm9394_vm2, 0.0, %v9409_v13  ;;  %v9391_v50 = vsel %vm9377_vm4, nan, %v9390_v45  ;;  %vm9422_vm0 = vweird.f32 %v13487_v35  ;;  %v10699_v3 = vpop.eup %10698 }
 0x275   :  { %v4066_v36 = vrot.slane %v4059_v28, %v12200_v31  ;;  %v9441_v32 = vsel %vm9440_vm7, %v13424_v48, %v9439_v33  ;;  %10704 = vpow2.f32 %v9455_v17  ;;  %v4308_v9 = vcombine.low %v1986_v24, %v1994_v6 }
 0x276   :  { %v4315_v58 = vrot.slane %v4307_v47, %v12200_v31  ;;  %vm9430_vm13 = vcmp.eq.f32.partialorder %v13424_v48, 0.0  ;;  %v13685_v2 = vand.u32 2147483647, %v13665_v4  ;;  %v13687_v11 = vmul.f32 0.03125, %v901_v20 }
 0x277   :  { %v6563_v13 = vunpack.c.l.b16 %v4066_v36  ;;  %v1838_v30 = vrot.slane %v16959_v53, %v12270_v55  ;;  %v9392_v45 = vsel %vm9376_vm9, 0.0, %v9391_v50  ;;  %10706 = vlog2.f32 %v13669_v42 }
 0x278   :  { %v4322_v33 = vrot.slane %v4308_v9, %v12200_v31  ;;  %v1842_v17 = vrot.slane %v16959_v53, %v12273_v60  ;;  %v9421_v24 = vor.u32 %v10697_v49, %v9418_v59  ;;  %v9509_v28 = vmul.f32 0.33333334, %v10699_v3 }
 0x279   :  { %6740 = vperm.xlu1 %10389, %v6563_v13   ;;  %v1846_v20 = vrot.slane %v16959_v53, %v12290_v0  ;;  %v1850_v6 = vrot.slane %v16959_v53, %v12293_v22  ;;  %v13703_v29 = vpack.c.bf16 %v9375_v8, %v9357_v44  ;;  %vm9433_vm3 = vcmp.eq.f32.partialorder %v13450_v54, inf  ;;  %v10701_v50 = vpop.eup %10700  ;;  %v898_v8 = vpop.xlane.xlu0 %897 }
 0x27a   :  { %v9444_v47 = vsel %vm9442_vm8, %v9436_v18, %v9441_v32  ;;  %vm9424_vm12 = vcmp.eq.f32.partialorder %v13487_v35, 0.0  ;;  %v4323_v49 = vcombine.low %v4315_v58, %v4322_v33  ;;  %vm9413_vm14 = vcmp.lt.f32.partialorder %v13464_v5, 0.0 }
 0x27b   :  { %v16874_v36 = vand.u32 2147483648, %v13510_v43  ;;  %10708 = vlog2.f32 %v13685_v2  ;;  %v13715_v53 = vand.u32 2147483647, %v13687_v11  ;;  %v4091_v44 = vcombine.low %v1838_v30, %v1846_v20 }
 0x27c   :  { %v9411_v3 = vsel %vm9397_vm10, inf, %v9410_v39  ;;  %v9393_v18 = vsel %vm9379_vm5, inf, %v9392_v45  ;;  %vm9476_vm6 = vweird.f32 %v13538_v10  ;;  %v4330_v32 = vrot.slane %v4323_v49, %v12200_v31 }
 0x27d   :  { %v4092_v9 = vcombine.low %v1842_v17, %v1850_v6  ;;  %v9445_v58 = vsel %vm9431_vm11, nan, %v9444_v47  ;;  %v9423_v13 = vsel %vm9422_vm0, %v13464_v5, %v9421_v24  ;;  %10710 = vpow2.f32 %v9509_v28  ;;  %v10703_v61 = vpop.eup %10702  ;;  %v16971_v24 = vld [vmem:[#allocation12_spill] sm:$0xff] }
 0x27e   :  { %v4099_v30 = vrot.slane %v4091_v44, %v12200_v31  ;;  %vm9412_vm15 = vcmp.eq.f32.partialorder %v13464_v5, 0.0  ;;  %v9491_v38 = vmul.f32 0.33333334, %v10701_v50  ;;  %v13730_v39 = vmul.f32 0.03125, %v898_v8 }
 0x27f   :  { %v6574_v45 = vunpack.c.l.b16 %v4330_v32  ;;  %v4106_v33 = vrot.slane %v4092_v9, %v12200_v31  ;;  %vm9478_vm1 = vcmp.eq.f32.partialorder %v13538_v10, 0.0  ;;  %v9454_v17 = vand.u32 2147483648, %v13526_v7  ;;  %v10705_v20 = vpop.eup %10704 }
 0x280   :  { %10712 = vlog2.f32 %v13715_v53  ;;  %v2014_v28 = vrot.slane %v16971_v24, %v12139_v14  ;;  %v9446_v6 = vsel %vm9430_vm13, 0.0, %v9445_v58  ;;  %v2018_v49 = vrot.slane %v16971_v24, %v12142_v41 }
 0x281   :  { %6773 = vperm.xlu0 %10388, %v6574_v45   ;;  %v4107_v47 = vcombine.low %v4099_v30, %v4106_v33  ;;  %v2022_v50 = vrot.slane %v16971_v24, %v12145_v46  ;;  %v13744_v8 = vpack.c.bf16 %v9411_v3, %v9393_v18  ;;  %vm9415_vm2 = vcmp.eq.f32.partialorder %v13487_v35, inf  ;;  %v10707_v32 = vpop.eup %10706  ;;  %v907_v3 = vpop.xlane.xlu1 %906 }
 0x282   :  { %v9426_v44 = vsel %vm9424_vm12, %v9418_v59, %v9423_v13  ;;  %v9475_v48 = vor.u32 %v10703_v61, %v16874_v36  ;;  %vm9458_vm4 = vweird.f32 %v13554_v51  ;;  %vm9467_vm7 = vcmp.lt.f32.partialorder %v13510_v43, 0.0  ;;  %v904_v30 = vpop.xlane.xlu0 %903 }
 0x283   :  { %16972 = vst [vmem:[#allocation10_spill] sm:$0xff] %v13744_v8  ;;  %10714 = vpow2.f32 %v9491_v38  ;;  %v13756_v9 = vand.u32 2147483647, %v13730_v39  ;;  %v4114_v18 = vrot.slane %v4107_v47, %v12200_v31  ;;  %v2026_v58 = vrot.slane %v16971_v24, %v12153_v52 }
 0x284   :  { %v9447_v59 = vsel %vm9433_vm3, inf, %v9446_v6  ;;  %vm9460_vm9 = vcmp.eq.f32.partialorder %v13554_v51, 0.0  ;;  %v16876_v13 = vand.u32 2147483648, %v13574_v19  ;;  %v4355_v61 = vcombine.low %v2014_v28, %v2022_v50 }
 0x285   :  { %v9427_v38 = vsel %vm9413_vm14, nan, %v9426_v44  ;;  %v9457_v45 = vor.u32 %v10705_v20, %v9454_v17  ;;  %v6565_v33 = vunpack.c.l.b16 %v4114_v18  ;;  %v4356_v47 = vcombine.low %v2018_v49, %v2026_v58  ;;  %v10709_v36 = vpop.eup %10708 }
 0x286   :  { %v9477_v54 = vsel %vm9476_vm6, %v13510_v43, %v9475_v48  ;;  %vm9449_vm8 = vcmp.lt.f32.partialorder %v13526_v7, 0.0  ;;  %v9545_v6 = vmul.f32 0.33333334, %v10707_v32  ;;  %v13773_v8 = vmul.f32 0.03125, %v907_v3 }
 0x287   :  { %v4363_v28 = vrot.slane %v4355_v61, %v12200_v31  ;;  %vm9466_vm10 = vcmp.eq.f32.partialorder %v13510_v43, 0.0  ;;  %10716 = vlog2.f32 %v13756_v9  ;;  %v13778_v50 = vmul.f32 0.03125, %v904_v30  ;;  %6746 = vperm.xlu1 %10389, %v6565_v33   ;;  %v10711_v44 = vpop.eup %10710  ;;  %v913_v33 = vpop.xlane.xlu1 %912 }
 0x288   :  { %v4370_v20 = vrot.slane %v4356_v47, %v12200_v31  ;;  %v1870_v49 = vrot.slane %v16962_v16, %v12270_v55  ;;  %v9428_v48 = vsel %vm9412_vm15, 0.0, %v9427_v38  ;;  %vm9512_vm5 = vweird.f32 %v13594_v21 }
 0x289   :  { %v1874_v32 = vrot.slane %v16962_v16, %v12273_v60  ;;  %v1878_v3 = vrot.slane %v16962_v16, %v12290_v0  ;;  %v16973_v18 = vand.u32 2147483648, %v13510_v43  ;;  %vm9448_vm11 = vcmp.eq.f32.partialorder %v13526_v7, 0.0 }
 0x28a   :  { %v9459_v5 = vsel %vm9458_vm4, %v13526_v7, %v9457_v45  ;;  %v9527_v30 = vmul.f32 0.33333334, %v10709_v36  ;;  %v4371_v61 = vcombine.low %v4363_v28, %v4370_v20  ;;  %v10713_v38 = vpop.eup %10712  ;;  %vm9469_vm0 = vcmp.eq.f32.partialorder %v13538_v10, inf }
 0x28b   :  { %v9480_v58 = vsel %vm9478_vm1, %v16973_v18, %v9477_v54  ;;  %vm9514_vm13 = vcmp.eq.f32.partialorder %v13594_v21, 0.0  ;;  %10718 = vpow2.f32 %v9545_v6  ;;  %v13802_v47 = vand.u32 2147483647, %v13773_v8 }
 0x28c   :  { %v1882_v54 = vrot.slane %v16962_v16, %v12293_v22  ;;  %v9429_v18 = vsel %vm9415_vm2, inf, %v9428_v48  ;;  %vm9494_vm3 = vweird.f32 %v13625_v37  ;;  %v13810_v36 = vand.u32 2147483647, %v13778_v50 }
 0x28d   :  { %v4378_v45 = vrot.slane %v4371_v61, %v12200_v31  ;;  %v4139_v28 = vcombine.low %v1870_v49, %v1878_v3  ;;  %v9481_v6 = vsel %vm9467_vm7, nan, %v9480_v58  ;;  %vm9451_vm12 = vcmp.eq.f32.partialorder %v13554_v51, inf  ;;  %v10715_v48 = vpop.eup %10714 }
 0x28e   :  { %v9462_v16 = vsel %vm9460_vm9, %v9454_v17, %v9459_v5  ;;  %v9511_v35 = vor.u32 %v10711_v44, %v16876_v13  ;;  %v4140_v20 = vcombine.low %v1874_v32, %v1882_v54  ;;  %vm9503_vm14 = vcmp.lt.f32.partialorder %v13574_v19, 0.0  ;;  %v910_v5 = vpop.xlane.xlu0 %909 }
 0x28f   :  { %10720 = vpow2.f32 %v9527_v30  ;;  %v9581_v61 = vmul.f32 0.33333334, %v10713_v38  ;;  %v6576_v49 = vunpack.c.l.b16 %v4378_v45  ;;  %v4147_v3 = vrot.slane %v4139_v28, %v12200_v31 }
 0x290   :  { %v13824_v58 = vpack.c.bf16 %v9447_v59, %v9429_v18  ;;  %vm9496_vm6 = vcmp.eq.f32.partialorder %v13625_v37, 0.0  ;;  %10722 = vlog2.f32 %v13802_v47  ;;  %v4154_v17 = vrot.slane %v4140_v20, %v12200_v31 }
 0x291   :  { %v2046_v44 = vrot.slane %v12588_v25, %v12139_v14  ;;  %v9463_v32 = vsel %vm9449_vm8, nan, %v9462_v16  ;;  %10724 = vlog2.f32 %v13810_v36  ;;  %6779 = vperm.xlu0 %10388, %v6576_v49   ;;  %v2050_v59 = vrot.slane %v12588_v25, %v12142_v41  ;;  %v10717_v16 = vpop.eup %10716 }
 0x292   :  { %16974 = vst [vmem:[#allocation11_spill] sm:$0xff] %v13824_v58  ;;  %v2054_v30 = vrot.slane %v12588_v25, %v12145_v46  ;;  %v9482_v38 = vsel %vm9466_vm10, 0.0, %v9481_v6  ;;  %vm9502_vm15 = vcmp.eq.f32.partialorder %v13574_v19, 0.0  ;;  %v9513_v54 = vsel %vm9512_vm5, %v13574_v19, %v9511_v35 }
 0x293   :  { %v16975_v18 = vand.u32 2147483648, %v13602_v56  ;;  %v4155_v28 = vcombine.low %v4147_v3, %v4154_v17  ;;  %vm9485_vm1 = vcmp.lt.f32.partialorder %v13602_v56, 0.0  ;;  %v16877_v20 = vand.u32 2147483648, %v13642_v63 }
 0x294   :  { %10726 = vpow2.f32 %v9581_v61  ;;  %v13848_v49 = vmul.f32 0.03125, %v913_v33  ;;  %v2058_v43 = vrot.slane %v12588_v25, %v12153_v52  ;;  %v9464_v6 = vsel %vm9448_vm11, 0.0, %v9463_v32 }
 0x295   :  { %v9493_v45 = vor.u32 %v10715_v48, %v16975_v18  ;;  %v13854_v13 = vmul.f32 0.03125, %v910_v5  ;;  %v4162_v35 = vrot.slane %v4155_v28, %v12200_v31  ;;  %v4403_v48 = vcombine.low %v2046_v44, %v2054_v30  ;;  %v10719_v18 = vpop.eup %10718 }
 0x296   :  { %v9483_v3 = vsel %vm9469_vm0, inf, %v9482_v38  ;;  %v16976_v17 = vand.u32 2147483648, %v13574_v19  ;;  %vm9548_vm2 = vweird.f32 %v13669_v42  ;;  %v4404_v61 = vcombine.low %v2050_v59, %v2058_v43 }
 0x297   :  { %vm9505_vm4 = vcmp.eq.f32.partialorder %v13594_v21, inf  ;;  %vm9484_vm7 = vcmp.eq.f32.partialorder %v13602_v56, 0.0  ;;  %v9495_v7 = vsel %vm9494_vm3, %v13602_v56, %v9493_v45  ;;  %v9563_v44 = vmul.f32 0.33333334, %v10717_v16 }
 0x298   :  { %v9516_v33 = vsel %vm9514_vm13, %v16976_v17, %v9513_v54  ;;  %v6567_v10 = vunpack.c.l.b16 %v4162_v35  ;;  %v4411_v32 = vrot.slane %v4403_v48, %v12200_v31  ;;  %v9465_v5 = vsel %vm9451_vm12, inf, %v9464_v6 }
 0x299   :  { %vm9550_vm9 = vcmp.eq.f32.partialorder %v13669_v42, 0.0  ;;  %v13875_v30 = vand.u32 2147483647, %v13848_v49  ;;  %v4418_v38 = vrot.slane %v4404_v61, %v12200_v31  ;;  %v9517_v54 = vsel %vm9503_vm14, nan, %v9516_v33  ;;  %v10721_v28 = vpop.eup %10720  ;;  %v919_v61 = vpop.xlane.xlu1 %918 }
 0x29a   :  { %vm9530_vm8 = vweird.f32 %v13685_v2  ;;  %v13882_v45 = vand.u32 2147483647, %v13854_v13  ;;  %6752 = vperm.xlu1 %10389, %v6567_v10   ;;  %v1902_v51 = vrot.slane %v16964_v40, %v12270_v55  ;;  %vm9487_vm10 = vcmp.eq.f32.partialorder %v13625_v37, inf  ;;  %v10723_v17 = vpop.eup %10722 }
 0x29b   :  { %v16977_v16 = vand.u32 2147483648, %v13602_v56  ;;  %v9547_v6 = vor.u32 %v10719_v18, %v16877_v20  ;;  %v4419_v35 = vcombine.low %v4411_v32, %v4418_v38  ;;  %v1906_v48 = vrot.slane %v16964_v40, %v12273_v60  ;;  %v10725_v59 = vpop.eup %10724 }
 0x29c   :  { %v13895_v33 = vpack.c.bf16 %v9483_v3, %v9465_v5  ;;  %10728 = vpow2.f32 %v9563_v44  ;;  %v1910_v10 = vrot.slane %v16964_v40, %v12290_v0  ;;  %vm9539_vm5 = vcmp.lt.f32.partialorder %v13642_v63, 0.0 }
 0x29d   :  { %v9498_v43 = vsel %vm9496_vm6, %v16977_v16, %v9495_v7  ;;  %v9518_v7 = vsel %vm9502_vm15, 0.0, %v9517_v54  ;;  %vm9532_vm11 = vcmp.eq.f32.partialorder %v13685_v2, 0.0  ;;  %10730 = vlog2.f32 %v13875_v30 }
 0x29e   :  { %16978 = vst [vmem:[#allocation12_spill] sm:$0xff] %v13895_v33  ;;  %v4426_v18 = vrot.slane %v4419_v35, %v12200_v31  ;;  %v1914_v3 = vrot.slane %v16964_v40, %v12293_v22  ;;  %v9499_v44 = vsel %vm9485_vm1, nan, %v9498_v43  ;;  %v16979_v32 = vand.u32 2147483648, %v13665_v4  ;;  %v10727_v38 = vpop.eup %10726 }
 0x29f   :  { %10732 = vlog2.f32 %v13882_v45  ;;  %v4187_v19 = vcombine.low %v1902_v51, %v1910_v10  ;;  %v9549_v54 = vsel %vm9548_vm2, %v13642_v63, %v9547_v6  ;;  %v9617_v16 = vmul.f32 0.33333334, %v10723_v17  ;;  %v916_v6 = vpop.xlane.xlu0 %915 }
 0x2a0   :  { %v9529_v5 = vor.u32 %v10721_v28, %v16979_v32  ;;  %v6578_v35 = vunpack.c.l.b16 %v4426_v18  ;;  %v4188_v20 = vcombine.low %v1906_v48, %v1914_v3  ;;  %vm9538_vm0 = vcmp.eq.f32.partialorder %v13642_v63, 0.0 }
 0x2a1   :  { %vm9521_vm13 = vcmp.lt.f32.partialorder %v13665_v4, 0.0  ;;  %vm9584_vm3 = vweird.f32 %v13715_v53  ;;  %vm9586_vm12 = vcmp.eq.f32.partialorder %v13715_v53, 0.0  ;;  %v9599_v40 = vmul.f32 0.33333334, %v10725_v59 }
 0x2a2   :  { %v4195_v51 = vrot.slane %v4187_v19, %v12200_v31  ;;  %v9519_v28 = vsel %vm9505_vm4, inf, %v9518_v7  ;;  %v9500_v43 = vsel %vm9484_vm7, 0.0, %v9499_v44  ;;  %6785 = vperm.xlu0 %10388, %v6578_v35   ;;  %v4202_v48 = vrot.slane %v4188_v20, %v12200_v31 }
 0x2a3   :  { %v2078_v17 = vrot.slane %v12612_v62, %v12139_v14  ;;  %v16980_v10 = vand.u32 2147483648, %v13642_v63  ;;  %v9531_v21 = vsel %vm9530_vm8, %v13665_v4, %v9529_v5  ;;  %v16981_v7 = vand.u32 2147483648, %v13687_v11 }
 0x2a4   :  { %v2082_v18 = vrot.slane %v12612_v62, %v12142_v41  ;;  %10734 = vpow2.f32 %v9617_v16  ;;  %v13939_v20 = vmul.f32 0.03125, %v919_v61  ;;  %v4203_v3 = vcombine.low %v4195_v51, %v4202_v48 }
 0x2a5   :  { %v9552_v59 = vsel %vm9550_vm9, %v16980_v10, %v9549_v54  ;;  %v9583_v56 = vor.u32 %v10727_v38, %v16981_v7  ;;  %v2086_v44 = vrot.slane %v12612_v62, %v12145_v46  ;;  %v9501_v32 = vsel %vm9487_vm10, inf, %v9500_v43  ;;  %v925_v38 = vpop.xlane.xlu1 %924 }
 0x2a6   :  { %vm9520_vm14 = vcmp.eq.f32.partialorder %v13665_v4, 0.0  ;;  %10736 = vpow2.f32 %v9599_v40  ;;  %v13946_v5 = vmul.f32 0.03125, %v916_v6  ;;  %v2090_v19 = vrot.slane %v12612_v62, %v12153_v52  ;;  %v10729_v37 = vpop.eup %10728 }
 0x2a7   :  { %vm9575_vm6 = vcmp.lt.f32.partialorder %v13687_v11, 0.0  ;;  %v16878_v61 = vand.u32 2147483648, %v13730_v39  ;;  %vm9566_vm15 = vweird.f32 %v13756_v9  ;;  %v4210_v54 = vrot.slane %v4203_v3, %v12200_v31  ;;  %v10731_v48 = vpop.eup %10730 }
 0x2a8   :  { %v4451_v16 = vcombine.low %v2078_v17, %v2086_v44  ;;  %v9553_v35 = vsel %vm9539_vm5, nan, %v9552_v59  ;;  %v16982_v40 = vand.u32 2147483648, %v13665_v4  ;;  %v9585_v43 = vsel %vm9584_vm3, %v13687_v11, %v9583_v56 }
 0x2a9   :  { %v4452_v6 = vcombine.low %v2082_v18, %v2090_v19  ;;  %v13963_v10 = vpack.c.bf16 %v9519_v28, %v9501_v32  ;;  %v13966_v7 = vand.u32 2147483647, %v13939_v20  ;;  %v6569_v17 = vunpack.c.l.b16 %v4210_v54  ;;  %v10733_v59 = vpop.eup %10732 }
 0x2aa   :  { %v9534_v51 = vsel %vm9532_vm11, %v16982_v40, %v9531_v21  ;;  %v4459_v3 = vrot.slane %v4451_v16, %v12200_v31  ;;  %vm9541_vm1 = vcmp.eq.f32.partialorder %v13669_v42, inf  ;;  %vm9568_vm2 = vcmp.eq.f32.partialorder %v13756_v9, 0.0 }
 0x2ab   :  { %16983 = vst [vmem:[#allocation17_spill] sm:$0xff] %v13963_v10  ;;  %v13973_v44 = vand.u32 2147483647, %v13946_v5  ;;  %v13975_v56 = vmul.f32 0.03125, %v925_v38  ;;  %v4466_v28 = vrot.slane %v4452_v6, %v12200_v31  ;;  %v9554_v18 = vsel %vm9538_vm0, 0.0, %v9553_v35  ;;  %6758 = vperm.xlu1 %10389, %v6569_v17  }
 0x2ac   :  { %vm9523_vm4 = vcmp.eq.f32.partialorder %v13685_v2, inf  ;;  %v9535_v32 = vsel %vm9521_vm13, nan, %v9534_v51  ;;  %v16984_v19 = vand.u32 2147483648, %v13687_v11  ;;  %v1934_v38 = vrot.slane %v16969_v57, %v12270_v55 }
 0x2ad   :  { %vm9574_vm7 = vcmp.eq.f32.partialorder %v13687_v11, 0.0  ;;  %v9565_v63 = vor.u32 %v10729_v37, %v16878_v61  ;;  %v9653_v16 = vmul.f32 0.33333334, %v10731_v48  ;;  %v4467_v35 = vcombine.low %v4459_v3, %v4466_v28  ;;  %v922_v48 = vpop.xlane.xlu0 %921 }
 0x2ae   :  { %v9588_v54 = vsel %vm9586_vm12, %v16984_v19, %v9585_v43  ;;  %v1938_v40 = vrot.slane %v16969_v57, %v12273_v60  ;;  %vm9557_vm9 = vcmp.lt.f32.partialorder %v13730_v39, 0.0  ;;  %v9635_v51 = vmul.f32 0.33333334, %v10733_v59  ;;  %v10735_v3 = vpop.eup %10734 }
 0x2af   :  { %10738 = vlog2.f32 %v13966_v7  ;;  %v1942_v43 = vrot.slane %v16969_v57, %v12290_v0  ;;  %v1946_v6 = vrot.slane %v16969_v57, %v12293_v22  ;;  %vm9620_vm8 = vweird.f32 %v13802_v47 }
 0x2b0   :  { %10740 = vlog2.f32 %v13973_v44  ;;  %v14003_v37 = vand.u32 2147483647, %v13975_v56  ;;  %v4474_v17 = vrot.slane %v4467_v35, %v12200_v31  ;;  %v9536_v59 = vsel %vm9520_vm14, 0.0, %v9535_v32  ;;  %v10737_v61 = vpop.eup %10736 }
 0x2b1   :  { %vm9577_vm10 = vcmp.eq.f32.partialorder %v13715_v53, inf  ;;  %v9598_v28 = vand.u32 2147483648, %v13778_v50  ;;  %v4235_v19 = vcombine.low %v1934_v38, %v1942_v43  ;;  %v4236_v57 = vcombine.low %v1938_v40, %v1946_v6  ;;  %v931_v53 = vpop.xlane.xlu1 %930 }
 0x2b2   :  { %v9589_v21 = vsel %vm9575_vm6, nan, %v9588_v54  ;;  %vm9556_vm5 = vcmp.eq.f32.partialorder %v13730_v39, 0.0  ;;  %v9567_v35 = vsel %vm9566_vm15, %v13730_v39, %v9565_v63  ;;  %vm9622_vm11 = vcmp.eq.f32.partialorder %v13802_v47, 0.0 }
 0x2b3   :  { %10742 = vpow2.f32 %v9653_v16  ;;  %v6580_v4 = vunpack.c.l.b16 %v4474_v17  ;;  %v14017_v32 = vmul.f32 0.03125, %v922_v48  ;;  %v4243_v38 = vrot.slane %v4235_v19, %v12200_v31 }
 0x2b4   :  { %10744 = vpow2.f32 %v9635_v51  ;;  %v4250_v40 = vrot.slane %v4236_v57, %v12200_v31  ;;  %v16985_v43 = vand.u32 2147483648, %v13773_v8  ;;  %v2110_v63 = vrot.slane %v12731_v15, %v12139_v14 }
 0x2b5   :  { %10746 = vlog2.f32 %v14003_v37  ;;  %6791 = vperm.xlu0 %10388, %v6580_v4   ;;  %v2114_v16 = vrot.slane %v12731_v15, %v12142_v41  ;;  %v9555_v51 = vsel %vm9541_vm1, inf, %v9554_v18  ;;  %vm9559_vm0 = vcmp.eq.f32.partialorder %v13756_v9, inf }
 0x2b6   :  { %v9619_v54 = vor.u32 %v10735_v3, %v16985_v43  ;;  %v16986_v6 = vand.u32 2147483648, %v13730_v39  ;;  %vm9611_vm13 = vcmp.lt.f32.partialorder %v13773_v8, 0.0  ;;  %v9601_v17 = vor.u32 %v10737_v61, %v9598_v28 }
 0x2b7   :  { %v4251_v3 = vcombine.low %v4243_v38, %v4250_v40  ;;  %v9537_v19 = vsel %vm9523_vm4, inf, %v9536_v59  ;;  %vm9593_vm3 = vcmp.lt.f32.partialorder %v13778_v50, 0.0  ;;  %vm9602_vm12 = vweird.f32 %v13810_v36 }
 0x2b8   :  { %v9570_v48 = vsel %vm9568_vm2, %v16986_v6, %v9567_v35  ;;  %v2118_v42 = vrot.slane %v12731_v15, %v12145_v46  ;;  %v2122_v18 = vrot.slane %v12731_v15, %v12153_v52  ;;  %v9590_v57 = vsel %vm9574_vm7, 0.0, %v9589_v21 }
 0x2b9   :  { %vm9604_vm14 = vcmp.eq.f32.partialorder %v13810_v36, 0.0  ;;  %v14048_v61 = vand.u32 2147483647, %v14017_v32  ;;  %v4258_v2 = vrot.slane %v4251_v3, %v12200_v31  ;;  %v9571_v59 = vsel %vm9557_vm9, nan, %v9570_v48  ;;  %v10739_v40 = vpop.eup %10738 }
 0x2ba   :  { %v9621_v35 = vsel %vm9620_vm8, %v13773_v8, %v9619_v54  ;;  %v4499_v4 = vcombine.low %v2110_v63, %v2118_v42  ;;  %v4500_v38 = vcombine.low %v2114_v16, %v2122_v18  ;;  %v14056_v43 = vpack.c.bf16 %v9555_v51, %v9537_v19  ;;  %v10741_v10 = vpop.eup %10740  ;;  %v928_v18 = vpop.xlane.xlu0 %927 }
 0x2bb   :  { %v9603_v11 = vsel %vm9602_vm12, %v13778_v50, %v9601_v17  ;;  %v9652_v21 = vand.u32 2147483648, %v13848_v49  ;;  %v6571_v6 = vunpack.c.l.b16 %v4258_v2  ;;  %v9591_v3 = vsel %vm9577_vm10, inf, %v9590_v57 }
 0x2bc   :  { %16987 = vst [vmem:[#allocation18_spill] sm:$0xff] %v14056_v43  ;;  %v9634_v48 = vand.u32 2147483648, %v13854_v13  ;;  %v4507_v33 = vrot.slane %v4499_v4, %v12200_v31  ;;  %v4514_v54 = vrot.slane %v4500_v38, %v12200_v31  ;;  %v9572_v63 = vsel %vm9556_vm5, 0.0, %v9571_v59 }
 0x2bd   :  { %vm9610_vm6 = vcmp.eq.f32.partialorder %v13773_v8, 0.0  ;;  %v16988_v16 = vand.u32 2147483648, %v13773_v8  ;;  %vm9592_vm15 = vcmp.eq.f32.partialorder %v13778_v50, 0.0  ;;  %vm9656_vm1 = vweird.f32 %v13875_v30  ;;  %6764 = vperm.xlu1 %10389, %v6571_v6   ;;  %v10743_v39 = vpop.eup %10742 }
 0x2be   :  { %10748 = vlog2.f32 %v14048_v61  ;;  %v1966_v17 = vrot.slane %v16970_v27, %v12270_v55  ;;  %v9606_v19 = vsel %vm9604_vm14, %v9598_v28, %v9603_v11  ;;  %vm9638_vm2 = vweird.f32 %v13882_v45  ;;  %v10745_v2 = vpop.eup %10744 }
 0x2bf   :  { %v9624_v51 = vsel %vm9622_vm11, %v16988_v16, %v9621_v35  ;;  %v9689_v42 = vmul.f32 0.33333334, %v10739_v40  ;;  %v4515_v57 = vcombine.low %v4507_v33, %v4514_v54  ;;  %v9671_v59 = vmul.f32 0.33333334, %v10741_v10  ;;  %v10747_v6 = vpop.eup %10746 }
 0x2c0   :  { %v1970_v35 = vrot.slane %v16970_v27, %v12273_v60  ;;  %v1974_v4 = vrot.slane %v16970_v27, %v12290_v0  ;;  %v1978_v38 = vrot.slane %v16970_v27, %v12293_v22  ;;  %v9573_v28 = vsel %vm9559_vm0, inf, %v9572_v63 }
 0x2c1   :  { %vm9613_vm4 = vcmp.eq.f32.partialorder %v13802_v47, inf  ;;  %v9625_v33 = vsel %vm9611_vm13, nan, %v9624_v51  ;;  %vm9595_vm7 = vcmp.eq.f32.partialorder %v13810_v36, inf  ;;  %v14092_v10 = vmul.f32 0.03125, %v931_v53 }
 0x2c2   :  { %v4522_v40 = vrot.slane %v4515_v57, %v12200_v31  ;;  %v9607_v11 = vsel %vm9593_vm3, nan, %v9606_v19  ;;  %vm9658_vm9 = vcmp.eq.f32.partialorder %v13875_v30, 0.0  ;;  %v14098_v27 = vmul.f32 0.03125, %v928_v18  ;;  %v937_v18 = vpop.xlane.xlu1 %936 }
 0x2c3   :  { %v4283_v9 = vcombine.low %v1966_v17, %v1974_v4  ;;  %v4284_v54 = vcombine.low %v1970_v35, %v1978_v38  ;;  %v9655_v63 = vor.u32 %v10743_v39, %v9652_v21  ;;  %v9637_v16 = vor.u32 %v10745_v2, %v9634_v48  ;;  %v16989_v39 = vld [vmem:[#allocation13_spill] sm:$0xff]  ;;  %v934_v38 = vpop.xlane.xlu0 %933 }
 0x2c4   :  { %vm9640_vm8 = vcmp.eq.f32.partialorder %v13882_v45, 0.0  ;;  %10750 = vpow2.f32 %v9689_v42  ;;  %v6582_v51 = vunpack.c.l.b16 %v4522_v40  ;;  %v9725_v53 = vmul.f32 0.33333334, %v10747_v6 }
 0x2c5   :  { %10752 = vpow2.f32 %v9671_v59  ;;  %v4291_v19 = vrot.slane %v4283_v9, %v12200_v31  ;;  %v4298_v57 = vrot.slane %v4284_v54, %v12200_v31  ;;  %vm9647_vm10 = vcmp.lt.f32.partialorder %v13848_v49, 0.0 }
 0x2c6   :  { %v14109_v17 = vand.u32 2147483647, %v14092_v10  ;;  %6797 = vperm.xlu0 %10388, %v6582_v51   ;;  %v2142_v2 = vrot.slane %v16989_v39, %v12139_v14  ;;  %v2146_v42 = vrot.slane %v16989_v39, %v12142_v41  ;;  %v2150_v59 = vrot.slane %v16989_v39, %v12145_v46 }
 0x2c7   :  { %v14117_v35 = vpack.c.bf16 %v9591_v3, %v9573_v28  ;;  %vm9629_vm5 = vcmp.lt.f32.partialorder %v13854_v13, 0.0  ;;  %v14121_v4 = vand.u32 2147483647, %v14098_v27  ;;  %v4299_v6 = vcombine.low %v4291_v19, %v4298_v57 }
 0x2c8   :  { %v2154_v40 = vrot.slane %v16989_v39, %v12153_v52  ;;  %v9626_v9 = vsel %vm9610_vm6, 0.0, %v9625_v33  ;;  %v9608_v54 = vsel %vm9592_vm15, 0.0, %v9607_v11  ;;  %v9657_v3 = vsel %vm9656_vm1, %v13848_v49, %v9655_v63  ;;  %v10749_v51 = vpop.eup %10748 }
 0x2c9   :  { %16990 = vst [vmem:[#allocation13_spill] sm:$0xff] %v14117_v35  ;;  %v16883_v28 = vand.u32 2147483648, %v13939_v20  ;;  %v9639_v19 = vsel %vm9638_vm2, %v13854_v13, %v9637_v16  ;;  %10754 = vpow2.f32 %v9725_v53  ;;  %v14136_v57 = vmul.f32 0.03125, %v937_v18 }
 0x2ca   :  { %v4306_v8 = vrot.slane %v4299_v6, %v12200_v31  ;;  %vm9646_vm11 = vcmp.eq.f32.partialorder %v13848_v49, 0.0  ;;  %vm9628_vm0 = vcmp.eq.f32.partialorder %v13854_v13, 0.0  ;;  %10756 = vlog2.f32 %v14109_v17 }
 0x2cb   :  { %v14142_v50 = vmul.f32 0.03125, %v934_v38  ;;  %v4547_v33 = vcombine.low %v2142_v2, %v2150_v59  ;;  %v4548_v11 = vcombine.low %v2146_v42, %v2154_v40  ;;  %v9627_v63 = vsel %vm9613_vm4, inf, %v9626_v9 }
 0x2cc   :  { %v9609_v16 = vsel %vm9595_vm7, inf, %v9608_v54  ;;  %10758 = vlog2.f32 %v14121_v4  ;;  %v6573_v53 = vunpack.c.l.b16 %v4306_v8  ;;  %v9660_v18 = vsel %vm9658_vm9, %v9652_v21, %v9657_v3 }
 0x2cd   :  { %v9707_v6 = vmul.f32 0.33333334, %v10749_v51  ;;  %v4555_v38 = vrot.slane %v4547_v33, %v12200_v31  ;;  %v4562_v2 = vrot.slane %v4548_v11, %v12200_v31  ;;  %vm9649_vm13 = vcmp.eq.f32.partialorder %v13875_v30, inf }
 0x2ce   :  { %vm9631_vm3 = vcmp.eq.f32.partialorder %v13882_v45, inf  ;;  %v9642_v47 = vsel %vm9640_vm8, %v9634_v48, %v9639_v19  ;;  %vm9692_vm12 = vweird.f32 %v13966_v7  ;;  %v16882_v36 = vand.u32 2147483648, %v13946_v5  ;;  %6770 = vperm.xlu1 %10389, %v6573_v53   ;;  %v10751_v42 = vpop.eup %10750 }
 0x2cf   :  { %v14164_v21 = vand.u32 2147483647, %v14136_v57  ;;  %v14166_v59 = vpack.c.bf16 %v9627_v63, %v9609_v16  ;;  %vm9674_vm14 = vweird.f32 %v13973_v44  ;;  %v14170_v40 = vand.u32 2147483647, %v14142_v50  ;;  %v10753_v54 = vpop.eup %10752  ;;  %v16992_v16 = vld [vmem:[#allocation14_spill] sm:$0xff] }
 0x2d0   :  { %v4563_v9 = vcombine.low %v4555_v38, %v4562_v2  ;;  %v9661_v48 = vsel %vm9647_vm10, nan, %v9660_v18  ;;  %v1998_v3 = vrot.slane %v16971_v24, %v12270_v55  ;;  %v2002_v51 = vrot.slane %v16971_v24, %v12273_v60 }
 0x2d1   :  { %16991 = vst [vmem:[#allocation19_spill] sm:$0xff] %v14166_v59  ;;  %v2006_v19 = vrot.slane %v16971_v24, %v12290_v0  ;;  %v9643_v8 = vsel %vm9629_vm5, nan, %v9642_v47  ;;  %vm9694_vm6 = vcmp.eq.f32.partialorder %v13966_v7, 0.0  ;;  %10760 = vpow2.f32 %v9707_v6 }
 0x2d2   :  { %v4570_v33 = vrot.slane %v4563_v9, %v12200_v31  ;;  %v2010_v11 = vrot.slane %v16971_v24, %v12293_v22  ;;  %10762 = vlog2.f32 %v14164_v21  ;;  %v2174_v53 = vrot.slane %v16992_v16, %v12139_v14 }
 0x2d3   :  { %v4331_v63 = vcombine.low %v1998_v3, %v2006_v19  ;;  %v2182_v18 = vrot.slane %v16992_v16, %v12145_v46  ;;  %v9691_v38 = vor.u32 %v10751_v42, %v16883_v28  ;;  %10764 = vlog2.f32 %v14170_v40  ;;  %v10755_v47 = vpop.eup %10754 }
 0x2d4   :  { %v6584_v6 = vunpack.c.l.b16 %v4570_v33  ;;  %v4332_v2 = vcombine.low %v2002_v51, %v2010_v11  ;;  %v9662_v24 = vsel %vm9646_vm11, 0.0, %v9661_v48  ;;  %v9644_v9 = vsel %vm9628_vm0, 0.0, %v9643_v8  ;;  %v10757_v59 = vpop.eup %10756  ;;  %v943_v51 = vpop.xlane.xlu1 %942 }
 0x2d5   :  { %v9673_v3 = vor.u32 %v10753_v54, %v16882_v36  ;;  %v4339_v19 = vrot.slane %v4331_v63, %v12200_v31  ;;  %vm9683_vm15 = vcmp.lt.f32.partialorder %v13939_v20, 0.0  ;;  %vm9665_vm1 = vcmp.lt.f32.partialorder %v13946_v5, 0.0 }
 0x2d6   :  { %vm9676_vm2 = vcmp.eq.f32.partialorder %v13973_v44, 0.0  ;;  %v9724_v42 = vand.u32 2147483648, %v13975_v56  ;;  %6803 = vperm.xlu0 %10388, %v6584_v6   ;;  %v4346_v49 = vrot.slane %v4332_v2, %v12200_v31  ;;  %v2178_v13 = vrot.slane %v16992_v16, %v12142_v41  ;;  %v10759_v48 = vpop.eup %10758  ;;  %v940_v6 = vpop.xlane.xlu0 %939 }
 0x2d7   :  { %vm9728_vm4 = vweird.f32 %v14003_v37  ;;  %vm9730_vm7 = vcmp.eq.f32.partialorder %v14003_v37, 0.0  ;;  %v2186_v54 = vrot.slane %v16992_v16, %v12153_v52  ;;  %v4595_v8 = vcombine.low %v2174_v53, %v2182_v18 }
 0x2d8   :  { %v9663_v33 = vsel %vm9649_vm13, inf, %v9662_v24  ;;  %v9645_v11 = vsel %vm9631_vm3, inf, %v9644_v9  ;;  %v9693_v63 = vsel %vm9692_vm12, %v13939_v20, %v9691_v38  ;;  %v4347_v2 = vcombine.low %v4339_v19, %v4346_v49 }
 0x2d9   :  { %v9675_v36 = vsel %vm9674_vm14, %v13946_v5, %v9673_v3  ;;  %v9727_v28 = vor.u32 %v10755_v47, %v9724_v42  ;;  %v9761_v35 = vmul.f32 0.33333334, %v10757_v59  ;;  %v14222_v43 = vmul.f32 0.03125, %v943_v51 }
 0x2da   :  { %v9743_v53 = vmul.f32 0.33333334, %v10759_v48  ;;  %v4354_v30 = vrot.slane %v4347_v2, %v12200_v31  ;;  %v4596_v18 = vcombine.low %v2178_v13, %v2186_v54  ;;  %v4603_v45 = vrot.slane %v4595_v8, %v12200_v31 }
 0x2db   :  { %v14226_v24 = vpack.c.bf16 %v9663_v33, %v9645_v11  ;;  %vm9682_vm9 = vcmp.eq.f32.partialorder %v13939_v20, 0.0  ;;  %v16994_v38 = vand.u32 2147483648, %v13939_v20  ;;  %vm9664_vm8 = vcmp.eq.f32.partialorder %v13946_v5, 0.0  ;;  %v10761_v3 = vpop.eup %10760 }
 0x2dc   :  { %v9706_v59 = vand.u32 2147483648, %v14017_v32  ;;  %v14235_v47 = vmul.f32 0.03125, %v940_v6  ;;  %v16995_v19 = vand.u32 2147483648, %v13946_v5  ;;  %vm9719_vm10 = vcmp.lt.f32.partialorder %v13975_v56, 0.0  ;;  %v10763_v54 = vpop.eup %10762 }
 0x2dd   :  { %16993 = vst [vmem:[#allocation14_spill] sm:$0xff] %v14226_v24  ;;  %v9696_v9 = vsel %vm9694_vm6, %v16994_v38, %v9693_v63  ;;  %v6575_v49 = vunpack.c.l.b16 %v4354_v30  ;;  %v4610_v13 = vrot.slane %v4596_v18, %v12200_v31  ;;  %v2030_v48 = vrot.slane %v12588_v25, %v12270_v55 }
 0x2de   :  { %v9678_v51 = vsel %vm9676_vm2, %v16995_v19, %v9675_v36  ;;  %v9729_v8 = vsel %vm9728_vm4, %v13975_v56, %v9727_v28  ;;  %vm9710_vm5 = vweird.f32 %v14048_v61  ;;  %10766 = vpow2.f32 %v9761_v35  ;;  %v10765_v36 = vpop.eup %10764 }
 0x2df   :  { %v14250_v33 = vand.u32 2147483647, %v14222_v43  ;;  %vm9685_vm11 = vcmp.eq.f32.partialorder %v13966_v7, inf  ;;  %vm9667_vm0 = vcmp.eq.f32.partialorder %v13973_v44, inf  ;;  %10768 = vpow2.f32 %v9743_v53  ;;  %6776 = vperm.xlu1 %10389, %v6575_v49   ;;  %v949_v53 = vpop.xlane.xlu1 %948 }
 0x2e0   :  { %v4611_v11 = vcombine.low %v4603_v45, %v4610_v13  ;;  %v2034_v63 = vrot.slane %v12588_v25, %v12273_v60  ;;  %v2038_v28 = vrot.slane %v12588_v25, %v12290_v0  ;;  %v9697_v35 = vsel %vm9683_vm15, nan, %v9696_v9 }
 0x2e1   :  { %v9679_v6 = vsel %vm9665_vm1, nan, %v9678_v51  ;;  %vm9712_vm13 = vcmp.eq.f32.partialorder %v14048_v61, 0.0  ;;  %v14264_v2 = vand.u32 2147483647, %v14235_v47  ;;  %vm9718_vm3 = vcmp.eq.f32.partialorder %v13975_v56, 0.0 }
 0x2e2   :  { %v9732_v30 = vsel %vm9730_vm7, %v9724_v42, %v9729_v8  ;;  %v4618_v18 = vrot.slane %v4611_v11, %v12200_v31  ;;  %v2042_v45 = vrot.slane %v12588_v25, %v12293_v22  ;;  %v4379_v38 = vcombine.low %v2030_v48, %v2038_v28  ;;  %v946_v25 = vpop.xlane.xlu0 %945  ;;  %v16996_v48 = vld [vmem:[#allocation15_spill] sm:$0xff] }
 0x2e3   :  { %v9709_v9 = vor.u32 %v10761_v3, %v9706_v59  ;;  %v9797_v19 = vmul.f32 0.33333334, %v10763_v54  ;;  %v9779_v51 = vmul.f32 0.33333334, %v10765_v36  ;;  %10770 = vlog2.f32 %v14250_v33 }
 0x2e4   :  { %vm9701_vm12 = vcmp.lt.f32.partialorder %v14017_v32, 0.0  ;;  %v14276_v49 = vmul.f32 0.03125, %v949_v53  ;;  %v6586_v13 = vunpack.c.l.b16 %v4618_v18  ;;  %v4380_v24 = vcombine.low %v2034_v63, %v2042_v45 }
 0x2e5   :  { %v4387_v42 = vrot.slane %v4379_v38, %v12200_v31  ;;  %vm9721_vm14 = vcmp.eq.f32.partialorder %v14003_v37, inf  ;;  %10772 = vlog2.f32 %v14264_v2  ;;  %v2206_v3 = vrot.slane %v16996_v48, %v12139_v14 }
 0x2e6   :  { %v2210_v54 = vrot.slane %v16996_v48, %v12142_v41  ;;  %v2214_v8 = vrot.slane %v16996_v48, %v12145_v46  ;;  %v9698_v36 = vsel %vm9682_vm9, 0.0, %v9697_v35  ;;  %v9680_v11 = vsel %vm9664_vm8, 0.0, %v9679_v6  ;;  %6809 = vperm.xlu0 %10388, %v6586_v13  }
 0x2e7   :  { %v4394_v63 = vrot.slane %v4380_v24, %v12200_v31  ;;  %v2218_v28 = vrot.slane %v16996_v48, %v12153_v52  ;;  %v9733_v53 = vsel %vm9719_vm10, nan, %v9732_v30  ;;  %vm9700_vm6 = vcmp.eq.f32.partialorder %v14017_v32, 0.0 }
 0x2e8   :  { %v9711_v18 = vsel %vm9710_vm5, %v14017_v32, %v9709_v9  ;;  %v9760_v20 = vand.u32 2147483648, %v14092_v10  ;;  %10774 = vpow2.f32 %v9797_v19  ;;  %v14302_v5 = vand.u32 2147483647, %v14276_v49  ;;  %v10767_v6 = vpop.eup %10766 }
 0x2e9   :  { %10776 = vpow2.f32 %v9779_v51  ;;  %v14304_v24 = vmul.f32 0.03125, %v946_v25  ;;  %v4395_v35 = vcombine.low %v4387_v42, %v4394_v63  ;;  %v9699_v30 = vsel %vm9685_vm11, inf, %v9698_v36  ;;  %v10769_v9 = vpop.eup %10768 }
 0x2ea   :  { %v9681_v45 = vsel %vm9667_vm0, inf, %v9680_v11  ;;  %v4643_v38 = vcombine.low %v2206_v3, %v2214_v8  ;;  %v4644_v13 = vcombine.low %v2210_v54, %v2218_v28  ;;  %vm9703_vm15 = vcmp.eq.f32.partialorder %v14048_v61, inf  ;;  %v955_v54 = vpop.xlane.xlu1 %954 }
 0x2eb   :  { %v9714_v19 = vsel %vm9712_vm13, %v9706_v59, %v9711_v18  ;;  %vm9764_vm1 = vweird.f32 %v14109_v17  ;;  %v9742_v51 = vand.u32 2147483648, %v14098_v27  ;;  %v4402_v7 = vrot.slane %v4395_v35, %v12200_v31 }
 0x2ec   :  { %v9734_v44 = vsel %vm9718_vm3, 0.0, %v9733_v53  ;;  %vm9766_vm2 = vcmp.eq.f32.partialorder %v14109_v17, 0.0  ;;  %vm9746_vm4 = vweird.f32 %v14121_v4  ;;  %v4651_v42 = vrot.slane %v4643_v38, %v12200_v31  ;;  %v952_v38 = vpop.xlane.xlu0 %951 }
 0x2ed   :  { %v4658_v25 = vrot.slane %v4644_v13, %v12200_v31  ;;  %v14324_v3 = vpack.c.bf16 %v9699_v30, %v9681_v45  ;;  %vm9748_vm7 = vcmp.eq.f32.partialorder %v14121_v4, 0.0  ;;  %10778 = vlog2.f32 %v14302_v5  ;;  %v10771_v8 = vpop.eup %10770 }
 0x2ee   :  { %v14329_v59 = vand.u32 2147483647, %v14304_v24  ;;  %v6577_v56 = vunpack.c.l.b16 %v4402_v7  ;;  %v9715_v36 = vsel %vm9701_vm12, nan, %v9714_v19  ;;  %v9763_v11 = vor.u32 %v10767_v6, %v9760_v20 }
 0x2ef   :  { %16997 = vst [vmem:[#allocation15_spill] sm:$0xff] %v14324_v3  ;;  %v9745_v63 = vor.u32 %v10769_v9, %v9742_v51  ;;  %v4659_v28 = vcombine.low %v4651_v42, %v4658_v25  ;;  %v9735_v53 = vsel %vm9721_vm14, inf, %v9734_v44  ;;  %v2062_v35 = vrot.slane %v12612_v62, %v12270_v55  ;;  %v10773_v45 = vpop.eup %10772 }
 0x2f0   :  { %6782 = vperm.xlu1 %10389, %v6577_v56   ;;  %v2066_v30 = vrot.slane %v12612_v62, %v12273_v60  ;;  %vm9755_vm9 = vcmp.lt.f32.partialorder %v14092_v10, 0.0  ;;  %vm9737_vm8 = vcmp.lt.f32.partialorder %v14098_v27, 0.0  ;;  %vm9800_vm10 = vweird.f32 %v14164_v21 }
 0x2f1   :  { %v14346_v37 = vmul.f32 0.03125, %v955_v54  ;;  %v4666_v13 = vrot.slane %v4659_v28, %v12200_v31  ;;  %v9716_v9 = vsel %vm9700_vm6, 0.0, %v9715_v36  ;;  %vm9782_vm5 = vweird.f32 %v14170_v40 }
 0x2f2   :  { %10780 = vlog2.f32 %v14329_v59  ;;  %v2070_v19 = vrot.slane %v12612_v62, %v12290_v0  ;;  %v2074_v7 = vrot.slane %v12612_v62, %v12293_v22  ;;  %v10775_v44 = vpop.eup %10774  ;;  %v9765_v42 = vsel %vm9764_vm1, %v14092_v10, %v9763_v11 }
 0x2f3   :  { %v9747_v32 = vsel %vm9746_vm4, %v14098_v27, %v9745_v63  ;;  %v9833_v25 = vmul.f32 0.33333334, %v10771_v8  ;;  %v6588_v54 = vunpack.c.l.b16 %v4666_v13  ;;  %v10777_v56 = vpop.eup %10776  ;;  %vm9754_vm11 = vcmp.eq.f32.partialorder %v14092_v10, 0.0  ;;  %v16998_v8 = vld [vmem:[#allocation16_spill] sm:$0xff] }
 0x2f4   :  { %v9815_v36 = vmul.f32 0.33333334, %v10773_v45  ;;  %v14364_v28 = vmul.f32 0.03125, %v952_v38  ;;  %v4427_v6 = vcombine.low %v2062_v35, %v2070_v19  ;;  %v4428_v18 = vcombine.low %v2066_v30, %v2074_v7 }
 0x2f5   :  { %v9717_v62 = vsel %vm9703_vm15, inf, %v9716_v9  ;;  %vm9802_vm0 = vcmp.eq.f32.partialorder %v14164_v21, 0.0  ;;  %v14370_v11 = vand.u32 2147483647, %v14346_v37  ;;  %6815 = vperm.xlu0 %10388, %v6588_v54   ;;  %v2238_v63 = vrot.slane %v16998_v8, %v12139_v14 }
 0x2f6   :  { %v2246_v13 = vrot.slane %v16998_v8, %v12145_v46  ;;  %v9768_v35 = vsel %vm9766_vm2, %v9760_v20, %v9765_v42  ;;  %vm9736_vm13 = vcmp.eq.f32.partialorder %v14098_v27, 0.0  ;;  %v16999_v61 = vand.u32 2147483648, %v14136_v57 }
 0x2f7   :  { %v4435_v45 = vrot.slane %v4427_v6, %v12200_v31  ;;  %v4442_v38 = vrot.slane %v4428_v18, %v12200_v31  ;;  %vm9757_vm3 = vcmp.eq.f32.partialorder %v14109_v17, inf  ;;  %v9750_v9 = vsel %vm9748_vm7, %v9742_v51, %v9747_v32  ;;  %v10779_v42 = vpop.eup %10778 }
 0x2f8   :  { %v9799_v30 = vor.u32 %v10775_v44, %v16999_v61  ;;  %v17000_v19 = vand.u32 2147483648, %v14142_v50  ;;  %10782 = vpow2.f32 %v9833_v25  ;;  %v2242_v20 = vrot.slane %v16998_v8, %v12142_v41  ;;  %v961_v44 = vpop.xlane.xlu1 %960 }
 0x2f9   :  { %vm9791_vm12 = vcmp.lt.f32.partialorder %v14136_v57, 0.0  ;;  %vm9773_vm14 = vcmp.lt.f32.partialorder %v14142_v50, 0.0  ;;  %vm9784_vm6 = vcmp.eq.f32.partialorder %v14170_v40, 0.0  ;;  %10784 = vpow2.f32 %v9815_v36 }
 0x2fa   :  { %v9781_v7 = vor.u32 %v10777_v56, %v17000_v19  ;;  %v14396_v18 = vand.u32 2147483647, %v14364_v28  ;;  %v4443_v6 = vcombine.low %v4435_v45, %v4442_v38  ;;  %v14398_v51 = vpack.c.bf16 %v9735_v53, %v9717_v62 }
 0x2fb   :  { %vm9739_vm15 = vcmp.eq.f32.partialorder %v14121_v4, inf  ;;  %10786 = vlog2.f32 %v14370_v11  ;;  %v2250_v32 = vrot.slane %v16998_v8, %v12153_v52  ;;  %v4691_v25 = vcombine.low %v2238_v63, %v2246_v13 }
 0x2fc   :  { %17001 = vst [vmem:[#allocation16_spill] sm:$0xff] %v14398_v51  ;;  %v9769_v54 = vsel %vm9755_vm9, nan, %v9768_v35  ;;  %v9751_v56 = vsel %vm9737_vm8, nan, %v9750_v9  ;;  %v9801_v53 = vsel %vm9800_vm10, %v14136_v57, %v9799_v30  ;;  %v4450_v36 = vrot.slane %v4443_v6, %v12200_v31  ;;  %v10781_v61 = vpop.eup %10780 }
 0x2fd   :  { %vm9790_vm1 = vcmp.eq.f32.partialorder %v14136_v57, 0.0  ;;  %vm9772_vm2 = vcmp.eq.f32.partialorder %v14142_v50, 0.0  ;;  %v9783_v62 = vsel %vm9782_vm5, %v14142_v50, %v9781_v7  ;;  %v9869_v63 = vmul.f32 0.33333334, %v10779_v42 }
 0x2fe   :  { %v4692_v13 = vcombine.low %v2242_v20, %v2250_v32  ;;  %v4699_v35 = vrot.slane %v4691_v25, %v12200_v31  ;;  %10788 = vlog2.f32 %v14396_v18  ;;  %v14419_v45 = vmul.f32 0.03125, %v961_v44 }
 0x2ff   :  { %v6579_v30 = vunpack.c.l.b16 %v4450_v36  ;;  %v2094_v38 = vrot.slane %v12731_v15, %v12270_v55  ;;  %v9770_v9 = vsel %vm9754_vm11, 0.0, %v9769_v54  ;;  %v16887_v19 = vand.u32 2147483648, %v14222_v43 }
 0x300   :  { %v4706_v7 = vrot.slane %v4692_v13, %v12200_v31  ;;  %v2098_v20 = vrot.slane %v12731_v15, %v12273_v60  ;;  %v17002_v42 = vand.u32 2147483648, %v14136_v57  ;;  %v17003_v44 = vand.u32 2147483648, %v14142_v50 }
 0x301   :  { %6788 = vperm.xlu1 %10389, %v6579_v30   ;;  %v2102_v10 = vrot.slane %v12731_v15, %v12290_v0  ;;  %v2106_v25 = vrot.slane %v12731_v15, %v12293_v22  ;;  %v9752_v54 = vsel %vm9736_vm13, 0.0, %v9751_v56  ;;  %vm9793_vm4 = vcmp.eq.f32.partialorder %v14164_v21, inf  ;;  %v958_v30 = vpop.xlane.xlu0 %957 }
 0x302   :  { %v9804_v6 = vsel %vm9802_vm0, %v17002_v42, %v9801_v53  ;;  %v9786_v32 = vsel %vm9784_vm6, %v17003_v44, %v9783_v62  ;;  %vm9775_vm7 = vcmp.eq.f32.partialorder %v14170_v40, inf  ;;  %10790 = vpow2.f32 %v9869_v63  ;;  %v10783_v42 = vpop.eup %10782 }
 0x303   :  { %v9851_v53 = vmul.f32 0.33333334, %v10781_v61  ;;  %v4707_v36 = vcombine.low %v4699_v35, %v4706_v7  ;;  %v9771_v62 = vsel %vm9757_vm3, inf, %v9770_v9  ;;  %vm9836_vm9 = vweird.f32 %v14250_v33  ;;  %v10785_v61 = vpop.eup %10784 }
 0x304   :  { %v14449_v13 = vand.u32 2147483647, %v14419_v45  ;;  %v4475_v15 = vcombine.low %v2094_v38, %v2102_v10  ;;  %v9805_v27 = vsel %vm9791_vm12, nan, %v9804_v6  ;;  %v9787_v56 = vsel %vm9773_vm14, nan, %v9786_v32 }
 0x305   :  { %v4714_v63 = vrot.slane %v4707_v36, %v12200_v31  ;;  %v4476_v35 = vcombine.low %v2098_v20, %v2106_v25  ;;  %v9753_v17 = vsel %vm9739_vm15, inf, %v9752_v54  ;;  %v9814_v9 = vand.u32 2147483648, %v14235_v47  ;;  %v10787_v7 = vpop.eup %10786 }
 0x306   :  { %vm9818_vm8 = vweird.f32 %v14264_v2  ;;  %v4483_v38 = vrot.slane %v4475_v15, %v12200_v31  ;;  %10792 = vpow2.f32 %v9851_v53  ;;  %v14461_v44 = vmul.f32 0.03125, %v958_v30 }
 0x307   :  { %v6590_v6 = vunpack.c.l.b16 %v4714_v63  ;;  %v4490_v32 = vrot.slane %v4476_v35, %v12200_v31  ;;  %v9806_v20 = vsel %vm9790_vm1, 0.0, %v9805_v27  ;;  %v9788_v4 = vsel %vm9772_vm2, 0.0, %v9787_v56  ;;  %v967_v27 = vpop.xlane.xlu1 %966 }
 0x308   :  { %vm9838_vm10 = vcmp.eq.f32.partialorder %v14250_v33, 0.0  ;;  %10794 = vlog2.f32 %v14449_v13  ;;  %v2270_v10 = vrot.slane %v13067_v23, %v12139_v14  ;;  %v9835_v25 = vor.u32 %v10783_v42, %v16887_v19  ;;  %v10789_v50 = vpop.eup %10788 }
 0x309   :  { %6821 = vperm.xlu0 %10388, %v6590_v6   ;;  %v4491_v54 = vcombine.low %v4483_v38, %v4490_v32  ;;  %v2274_v53 = vrot.slane %v13067_v23, %v12142_v41  ;;  %v2278_v57 = vrot.slane %v13067_v23, %v12145_v46  ;;  %v14478_v36 = vpack.c.bf16 %v9771_v62, %v9753_v17  ;;  %v964_v17 = vpop.xlane.xlu0 %963 }
 0x30a   :  { %v9817_v30 = vor.u32 %v10785_v61, %v9814_v9  ;;  %vm9820_vm5 = vcmp.eq.f32.partialorder %v14264_v2, 0.0  ;;  %v9905_v15 = vmul.f32 0.33333334, %v10787_v7  ;;  %vm9827_vm11 = vcmp.lt.f32.partialorder %v14222_v43, 0.0 }
 0x30b   :  { %17004 = vst [vmem:[#allocation20_spill] sm:$0xff] %v14478_v36  ;;  %vm9809_vm0 = vcmp.lt.f32.partialorder %v14235_v47, 0.0  ;;  %v16888_v42 = vand.u32 2147483648, %v14276_v49  ;;  %v14485_v56 = vand.u32 2147483647, %v14461_v44  ;;  %v4498_v63 = vrot.slane %v4491_v54, %v12200_v31 }
 0x30c   :  { %v2282_v62 = vrot.slane %v13067_v23, %v12153_v52  ;;  %v9807_v35 = vsel %vm9793_vm4, inf, %v9806_v20  ;;  %v9789_v61 = vsel %vm9775_vm7, inf, %v9788_v4  ;;  %vm9872_vm13 = vweird.f32 %v14302_v5  ;;  %v10791_v7 = vpop.eup %10790 }
 0x30d   :  { %v4739_v38 = vcombine.low %v2270_v10, %v2278_v57  ;;  %v9837_v6 = vsel %vm9836_vm9, %v14222_v43, %v9835_v25  ;;  %v9887_v32 = vmul.f32 0.33333334, %v10789_v50  ;;  %v6581_v54 = vunpack.c.l.b16 %v4498_v63  ;;  %v973_v50 = vpop.xlane.xlu1 %972 }
 0x30e   :  { %v4740_v19 = vcombine.low %v2274_v53, %v2282_v62  ;;  %v9819_v21 = vsel %vm9818_vm8, %v14235_v47, %v9817_v30  ;;  %10796 = vpow2.f32 %v9905_v15  ;;  %v14501_v20 = vmul.f32 0.03125, %v967_v27 }
 0x30f   :  { %v4747_v40 = vrot.slane %v4739_v38, %v12200_v31  ;;  %vm9826_vm3 = vcmp.eq.f32.partialorder %v14222_v43, 0.0  ;;  %vm9874_vm12 = vcmp.eq.f32.partialorder %v14302_v5, 0.0  ;;  %10798 = vlog2.f32 %v14485_v56  ;;  %6794 = vperm.xlu1 %10389, %v6581_v54  }
 0x310   :  { %v14507_v4 = vmul.f32 0.03125, %v964_v17  ;;  %v4754_v10 = vrot.slane %v4740_v19, %v12200_v31  ;;  %v2126_v25 = vrot.slane %v16989_v39, %v12270_v55  ;;  %v9871_v53 = vor.u32 %v10791_v7, %v16888_v42  ;;  %v10793_v27 = vpop.eup %10792 }
 0x311   :  { %v16889_v57 = vand.u32 2147483648, %v14304_v24  ;;  %v2130_v30 = vrot.slane %v16989_v39, %v12273_v60  ;;  %v2134_v15 = vrot.slane %v16989_v39, %v12290_v0  ;;  %v17005_v63 = vand.u32 2147483648, %v14222_v43 }
 0x312   :  { %vm9808_vm14 = vcmp.eq.f32.partialorder %v14235_v47, 0.0  ;;  %v9822_v62 = vsel %vm9820_vm5, %v9814_v9, %v9819_v21  ;;  %10800 = vpow2.f32 %v9887_v32  ;;  %v4755_v17 = vcombine.low %v4747_v40, %v4754_v10  ;;  %v10795_v38 = vpop.eup %10794  ;;  %v970_v9 = vpop.xlane.xlu0 %969 }
 0x313   :  { %v9840_v19 = vsel %vm9838_vm10, %v17005_v63, %v9837_v6  ;;  %v14526_v7 = vpack.c.bf16 %v9807_v35, %v9789_v61  ;;  %vm9863_vm6 = vcmp.lt.f32.partialorder %v14276_v49, 0.0  ;;  %vm9854_vm15 = vweird.f32 %v14329_v59 }
 0x314   :  { %v14531_v54 = vand.u32 2147483647, %v14501_v20  ;;  %v2138_v6 = vrot.slane %v16989_v39, %v12293_v22  ;;  %v14536_v63 = vand.u32 2147483647, %v14507_v4  ;;  %v14538_v42 = vmul.f32 0.03125, %v973_v50 }
 0x315   :  { %17006 = vst [vmem:[#allocation21_spill] sm:$0xff] %v14526_v7  ;;  %v4762_v32 = vrot.slane %v4755_v17, %v12200_v31  ;;  %v4523_v35 = vcombine.low %v2126_v25, %v2134_v15  ;;  %vm9829_vm1 = vcmp.eq.f32.partialorder %v14250_v33, inf  ;;  %v9841_v61 = vsel %vm9827_vm11, nan, %v9840_v19 }
 0x316   :  { %vm9811_vm2 = vcmp.eq.f32.partialorder %v14264_v2, inf  ;;  %v9823_v21 = vsel %vm9809_vm0, nan, %v9822_v62  ;;  %v9873_v39 = vsel %vm9872_vm13, %v14276_v49, %v9871_v53  ;;  %v4524_v40 = vcombine.low %v2130_v30, %v2138_v6 }
 0x317   :  { %v9853_v10 = vor.u32 %v10793_v27, %v16889_v57  ;;  %vm9856_vm4 = vcmp.eq.f32.partialorder %v14329_v59, 0.0  ;;  %v9941_v25 = vmul.f32 0.33333334, %v10795_v38  ;;  %v6592_v50 = vunpack.c.l.b16 %v4762_v32  ;;  %v14565_v27 = vpop.xlane.xlu1 %978 }
 0x318   :  { %v4531_v15 = vrot.slane %v4523_v35, %v12200_v31  ;;  %vm9862_vm7 = vcmp.eq.f32.partialorder %v14276_v49, 0.0  ;;  %10802 = vlog2.f32 %v14531_v54  ;;  %v14556_v19 = vmul.f32 0.03125, %v970_v9  ;;  %v10797_v6 = vpop.eup %10796 }
 0x319   :  { %v4538_v62 = vrot.slane %v4524_v40, %v12200_v31  ;;  %v2302_v53 = vrot.slane %v13121_v12, %v12139_v14  ;;  %10804 = vlog2.f32 %v14536_v63  ;;  %v14563_v30 = vand.u32 2147483647, %v14538_v42  ;;  %6827 = vperm.xlu0 %10388, %v6592_v50   ;;  %v10799_v57 = vpop.eup %10798 }
 0x31a   :  { %v2306_v17 = vrot.slane %v13121_v12, %v12142_v41  ;;  %v2310_v38 = vrot.slane %v13121_v12, %v12145_v46  ;;  %v9842_v9 = vsel %vm9826_vm3, 0.0, %v9841_v61  ;;  %v17007_v32 = vand.u32 2147483648, %v14276_v49 }
 0x31b   :  { %vm9845_vm9 = vcmp.lt.f32.partialorder %v14304_v24, 0.0  ;;  %v9904_v40 = vand.u32 2147483648, %v14346_v37  ;;  %v4539_v50 = vcombine.low %v4531_v15, %v4538_v62  ;;  %vm9865_vm8 = vcmp.eq.f32.partialorder %v14302_v5, inf }
 0x31c   :  { %v9876_v35 = vsel %vm9874_vm12, %v17007_v32, %v9873_v39  ;;  %vm9908_vm10 = vweird.f32 %v14370_v11  ;;  %10806 = vpow2.f32 %v9941_v25  ;;  %v2314_v43 = vrot.slane %v13121_v12, %v12153_v52  ;;  %v10801_v32 = vpop.eup %10800 }
 0x31d   :  { %v9824_v61 = vsel %vm9808_vm14, 0.0, %v9823_v21  ;;  %vm9910_vm5 = vcmp.eq.f32.partialorder %v14370_v11, 0.0  ;;  %v14588_v39 = vand.u32 2147483647, %v14556_v19  ;;  %v4546_v15 = vrot.slane %v4539_v50, %v12200_v31 }
 0x31e   :  { %v4787_v62 = vcombine.low %v2302_v53, %v2310_v38  ;;  %v9877_v36 = vsel %vm9863_vm6, nan, %v9876_v35  ;;  %vm9844_vm11 = vcmp.eq.f32.partialorder %v14304_v24, 0.0  ;;  %v9855_v25 = vsel %vm9854_vm15, %v14304_v24, %v9853_v10  ;;  %v14605_v35 = vpop.xlane.xlu1 %984 }
 0x31f   :  { %10808 = vlog2.f32 %v14563_v30  ;;  %v4788_v47 = vcombine.low %v2306_v17, %v2314_v43  ;;  %v9907_v21 = vor.u32 %v10797_v6, %v9904_v40  ;;  %v9923_v7 = vmul.f32 0.33333334, %v10799_v57 }
 0x320   :  { %v6583_v51 = vunpack.c.l.b16 %v4546_v15  ;;  %v4795_v3 = vrot.slane %v4787_v62, %v12200_v31  ;;  %v9843_v53 = vsel %vm9829_vm1, inf, %v9842_v9  ;;  %v9825_v38 = vsel %vm9811_vm2, inf, %v9824_v61 }
 0x321   :  { %vm9899_vm0 = vcmp.lt.f32.partialorder %v14346_v37, 0.0  ;;  %vm9890_vm13 = vweird.f32 %v14396_v18  ;;  %v4802_v10 = vrot.slane %v4788_v47, %v12200_v31  ;;  %vm9847_vm3 = vcmp.eq.f32.partialorder %v14329_v59, inf }
 0x322   :  { %v17008_v57 = vand.u32 2147483648, %v14304_v24  ;;  %v17009_v33 = vand.u32 2147483648, %v14364_v28  ;;  %10810 = vlog2.f32 %v14588_v39  ;;  %6800 = vperm.xlu1 %10389, %v6583_v51   ;;  %v2158_v2 = vrot.slane %v16992_v16, %v12270_v55  ;;  %v10803_v61 = vpop.eup %10802 }
 0x323   :  { %v9878_v9 = vsel %vm9862_vm7, 0.0, %v9877_v36  ;;  %vm9881_vm12 = vcmp.lt.f32.partialorder %v14364_v28, 0.0  ;;  %vm9892_vm14 = vcmp.eq.f32.partialorder %v14396_v18, 0.0  ;;  %v4803_v50 = vcombine.low %v4795_v3, %v4802_v10  ;;  %v10805_v36 = vpop.eup %10804 }
 0x324   :  { %v9858_v17 = vsel %vm9856_vm4, %v17008_v57, %v9855_v25  ;;  %v9889_v6 = vor.u32 %v10801_v32, %v17009_v33  ;;  %v2162_v43 = vrot.slane %v16992_v16, %v12273_v60  ;;  %v14624_v15 = vpack.c.bf16 %v9843_v53, %v9825_v38  ;;  %v14648_v57 = vpop.xlane.xlu1 %990 }
 0x325   :  { %vm9898_vm6 = vcmp.eq.f32.partialorder %v14346_v37, 0.0  ;;  %v9909_v51 = vsel %vm9908_vm10, %v14346_v37, %v9907_v21  ;;  %10812 = vpow2.f32 %v9923_v7  ;;  %v2166_v49 = vrot.slane %v16992_v16, %v12290_v0 }
 0x326   :  { %17010 = vst [vmem:[#allocation22_spill] sm:$0xff] %v14624_v15  ;;  %v9859_v3 = vsel %vm9845_vm9, nan, %v9858_v17  ;;  %v9940_v62 = vand.u32 2147483648, %v14419_v45  ;;  %v4810_v32 = vrot.slane %v4803_v50, %v12200_v31  ;;  %v2170_v25 = vrot.slane %v16992_v16, %v12293_v22  ;;  %v10807_v53 = vpop.eup %10806  ;;  %v976_v16 = vpop.xlane.xlu0 %975 }
 0x327   :  { %v9879_v47 = vsel %vm9865_vm8, inf, %v9878_v9  ;;  %vm9880_vm15 = vcmp.eq.f32.partialorder %v14364_v28, 0.0  ;;  %v9891_v7 = vsel %vm9890_vm13, %v14364_v28, %v9889_v6  ;;  %vm9944_vm1 = vweird.f32 %v14449_v13 }
 0x328   :  { %v4571_v21 = vcombine.low %v2158_v2, %v2166_v49  ;;  %vm9901_vm2 = vcmp.eq.f32.partialorder %v14370_v11, inf  ;;  %v9912_v38 = vsel %vm9910_vm5, %v9904_v40, %v9909_v51  ;;  %v9977_v10 = vmul.f32 0.33333334, %v10803_v61 }
 0x329   :  { %v6594_v5 = vunpack.c.l.b16 %v4810_v32  ;;  %v4572_v17 = vcombine.low %v2162_v43, %v2170_v25  ;;  %v9860_v33 = vsel %vm9844_vm11, 0.0, %v9859_v3  ;;  %vm9946_vm4 = vcmp.eq.f32.partialorder %v14449_v13, 0.0  ;;  %v10809_v50 = vpop.eup %10808 }
 0x32a   :  { %v9922_v6 = vand.u32 2147483648, %v14461_v44  ;;  %v9959_v2 = vmul.f32 0.33333334, %v10805_v36  ;;  %v4579_v9 = vrot.slane %v4571_v21, %v12200_v31  ;;  %vm9883_vm7 = vcmp.eq.f32.partialorder %v14396_v18, inf }
 0x32b   :  { %v17011_v40 = vand.u32 2147483648, %v14364_v28  ;;  %v14661_v43 = vmul.f32 0.03125, %v14565_v27  ;;  %6833 = vperm.xlu0 %10388, %v6594_v5   ;;  %v4586_v24 = vrot.slane %v4572_v17, %v12200_v31  ;;  %v2334_v51 = vrot.slane %v13274_v34, %v12139_v14 }
 0x32c   :  { %v9913_v49 = vsel %vm9899_vm0, nan, %v9912_v38  ;;  %v9943_v36 = vor.u32 %v10807_v53, %v9940_v62  ;;  %v14670_v3 = vmul.f32 0.03125, %v976_v16  ;;  %v2338_v32 = vrot.slane %v13274_v34, %v12142_v41  ;;  %v10811_v21 = vpop.eup %10810 }
 0x32d   :  { %v9894_v61 = vsel %vm9892_vm14, %v17011_v40, %v9891_v7  ;;  %v9861_v27 = vsel %vm9847_vm3, inf, %v9860_v33  ;;  %vm9935_vm9 = vcmp.lt.f32.partialorder %v14419_v45, 0.0  ;;  %10814 = vpow2.f32 %v9977_v10  ;;  %v14688_v10 = vpop.xlane.xlu1 %996 }
 0x32e   :  { %v4587_v25 = vcombine.low %v4579_v9, %v4586_v24  ;;  %v2342_v7 = vrot.slane %v13274_v34, %v12145_v46  ;;  %v9895_v38 = vsel %vm9881_vm12, nan, %v9894_v61  ;;  %10816 = vpow2.f32 %v9959_v2 }
 0x32f   :  { %v10013_v53 = vmul.f32 0.33333334, %v10809_v50  ;;  %v2346_v16 = vrot.slane %v13274_v34, %v12153_v52  ;;  %v9914_v59 = vsel %vm9898_vm6, 0.0, %v9913_v49  ;;  %v14686_v5 = vand.u32 2147483647, %v14661_v43  ;;  %v10813_v9 = vpop.eup %10812 }
 0x330   :  { %v4594_v17 = vrot.slane %v4587_v25, %v12200_v31  ;;  %v4835_v33 = vcombine.low %v2334_v51, %v2342_v7  ;;  %vm9934_vm8 = vcmp.eq.f32.partialorder %v14419_v45, 0.0  ;;  %v9945_v2 = vsel %vm9944_vm1, %v14419_v45, %v9943_v36 }
 0x331   :  { %vm9926_vm10 = vweird.f32 %v14485_v56  ;;  %v14697_v37 = vand.u32 2147483647, %v14670_v3  ;;  %v4836_v50 = vcombine.low %v2338_v32, %v2346_v16  ;;  %v9896_v40 = vsel %vm9880_vm15, 0.0, %v9895_v38  ;;  %v14727_v38 = vpop.xlane.xlu1 %1002 }
 0x332   :  { %vm9928_vm5 = vcmp.eq.f32.partialorder %v14485_v56, 0.0  ;;  %v9995_v61 = vmul.f32 0.33333334, %v10811_v21  ;;  %v6585_v24 = vunpack.c.l.b16 %v4594_v17  ;;  %v4843_v51 = vrot.slane %v4835_v33, %v12200_v31 }
 0x333   :  { %v14703_v49 = vpack.c.bf16 %v9879_v47, %v9861_v27  ;;  %v9915_v36 = vsel %vm9901_vm2, inf, %v9914_v59  ;;  %10818 = vpow2.f32 %v10013_v53  ;;  %v4850_v25 = vrot.slane %v4836_v50, %v12200_v31  ;;  %v982_v27 = vpop.xlane.xlu0 %981 }
 0x334   :  { %vm9937_vm11 = vcmp.eq.f32.partialorder %v14449_v13, inf  ;;  %v9948_v28 = vsel %vm9946_vm4, %v9940_v62, %v9945_v2  ;;  %v9925_v32 = vor.u32 %v10813_v9, %v9922_v6  ;;  %10820 = vlog2.f32 %v14686_v5  ;;  %6806 = vperm.xlu1 %10389, %v6585_v24  }
 0x335   :  { %17012 = vst [vmem:[#allocation23_spill] sm:$0xff] %v14703_v49  ;;  %v2190_v11 = vrot.slane %v16996_v48, %v12270_v55  ;;  %v9897_v47 = vsel %vm9883_vm7, inf, %v9896_v40  ;;  %vm9917_vm0 = vcmp.lt.f32.partialorder %v14461_v44, 0.0  ;;  %10822 = vlog2.f32 %v14697_v37 }
 0x336   :  { %v4851_v7 = vcombine.low %v4843_v51, %v4850_v25  ;;  %v2194_v62 = vrot.slane %v16996_v48, %v12273_v60  ;;  %10824 = vpow2.f32 %v9995_v61  ;;  %v14725_v21 = vmul.f32 0.03125, %v14605_v35 }
 0x337   :  { %v2198_v53 = vrot.slane %v16996_v48, %v12290_v0  ;;  %v2202_v18 = vrot.slane %v16996_v48, %v12293_v22  ;;  %v9949_v16 = vsel %vm9935_vm9, nan, %v9948_v28  ;;  %v9976_v59 = vand.u32 2147483648, %v14501_v20  ;;  %v10815_v33 = vpop.eup %10814 }
 0x338   :  { %vm9980_vm13 = vweird.f32 %v14531_v54  ;;  %v4858_v17 = vrot.slane %v4851_v7, %v12200_v31  ;;  %vm9916_vm3 = vcmp.eq.f32.partialorder %v14461_v44, 0.0  ;;  %v9927_v35 = vsel %vm9926_vm10, %v14461_v44, %v9925_v32  ;;  %v10817_v50 = vpop.eup %10816 }
 0x339   :  { %v14742_v9 = vmul.f32 0.03125, %v982_v27  ;;  %v4619_v2 = vcombine.low %v2190_v11, %v2198_v53  ;;  %v4620_v48 = vcombine.low %v2194_v62, %v2202_v18  ;;  %v14744_v40 = vpack.c.bf16 %v9915_v36, %v9897_v47  ;;  %v14770_v53 = vpop.xlane.xlu1 %1008 }
 0x33a   :  { %vm9982_vm12 = vcmp.eq.f32.partialorder %v14531_v54, 0.0  ;;  %v9958_v61 = vand.u32 2147483648, %v14507_v4  ;;  %vm9962_vm14 = vweird.f32 %v14536_v63  ;;  %v6596_v24 = vunpack.c.l.b16 %v4858_v17  ;;  %v988_v17 = vpop.xlane.xlu0 %987 }
 0x33b   :  { %17013 = vst [vmem:[#allocation24_spill] sm:$0xff] %v14744_v40  ;;  %v9950_v51 = vsel %vm9934_vm8, 0.0, %v9949_v16  ;;  %vm9964_vm6 = vcmp.eq.f32.partialorder %v14536_v63, 0.0  ;;  %v14753_v25 = vand.u32 2147483647, %v14725_v21  ;;  %v4627_v28 = vrot.slane %v4619_v2, %v12200_v31 }
 0x33c   :  { %v4634_v36 = vrot.slane %v4620_v48, %v12200_v31  ;;  %v9930_v32 = vsel %vm9928_vm5, %v9922_v6, %v9927_v35  ;;  %v9979_v11 = vor.u32 %v10815_v33, %v9976_v59  ;;  %6839 = vperm.xlu0 %10388, %v6596_v24   ;;  %v2366_v45 = vrot.slane %v13276_v1, %v12139_v14 }
 0x33d   :  { %v2370_v47 = vrot.slane %v13276_v1, %v12142_v41  ;;  %vm9919_vm15 = vcmp.eq.f32.partialorder %v14485_v56, inf  ;;  %v9961_v27 = vor.u32 %v10817_v50, %v9958_v61  ;;  %v14768_v62 = vand.u32 2147483647, %v14742_v9  ;;  %v10819_v6 = vpop.eup %10818 }
 0x33e   :  { %v4635_v18 = vcombine.low %v4627_v28, %v4634_v36  ;;  %v14774_v16 = vsel %vm9937_vm11, inf, %v9950_v51  ;;  %vm10016_vm1 = vweird.f32 %v14563_v30  ;;  %v2374_v33 = vrot.slane %v13276_v1, %v12145_v46  ;;  %v10821_v2 = vpop.eup %10820 }
 0x33f   :  { %v2378_v35 = vrot.slane %v13276_v1, %v12153_v52  ;;  %v9931_v48 = vsel %vm9917_vm0, nan, %v9930_v32  ;;  %vm9971_vm2 = vcmp.lt.f32.partialorder %v14501_v20, 0.0  ;;  %vm9953_vm4 = vcmp.lt.f32.partialorder %v14507_v4, 0.0  ;;  %v10823_v24 = vpop.eup %10822 }
 0x340   :  { %10826 = vlog2.f32 %v14753_v25  ;;  %v4642_v50 = vrot.slane %v4635_v18, %v12200_v31  ;;  %v9981_v51 = vsel %vm9980_vm13, %v14501_v20, %v9979_v11  ;;  %v14792_v28 = vmul.f32 0.03125, %v14648_v57  ;;  %v10825_v7 = vpop.eup %10824 }
 0x341   :  { %v4883_v36 = vcombine.low %v2366_v45, %v2374_v33  ;;  %v4884_v32 = vcombine.low %v2370_v47, %v2378_v35  ;;  %v9963_v40 = vsel %vm9962_vm14, %v14507_v4, %v9961_v27  ;;  %vm10018_vm7 = vcmp.eq.f32.partialorder %v14563_v30, 0.0 }
 0x342   :  { %10828 = vlog2.f32 %v14768_v62  ;;  %v14799_v18 = vmul.f32 0.03125, %v988_v17  ;;  %v6587_v13 = vunpack.c.l.b16 %v4642_v50  ;;  %v9932_v11 = vsel %vm9916_vm3, 0.0, %v9931_v48  ;;  %v14810_v17 = vpop.xlane.xlu1 %1014 }
 0x343   :  { %v10049_v49 = vmul.f32 0.33333334, %v10821_v2  ;;  %v4891_v57 = vrot.slane %v4883_v36, %v12200_v31  ;;  %v4898_v45 = vrot.slane %v4884_v32, %v12200_v31  ;;  %vm9970_vm9 = vcmp.eq.f32.partialorder %v14501_v20, 0.0 }
 0x344   :  { %v9984_v47 = vsel %vm9982_vm12, %v9976_v59, %v9981_v51  ;;  %v17014_v27 = vand.u32 2147483648, %v14538_v42  ;;  %v10031_v35 = vmul.f32 0.33333334, %v10823_v24  ;;  %6812 = vperm.xlu1 %10389, %v6587_v13   ;;  %v2222_v44 = vrot.slane %v16998_v8, %v12270_v55 }
 0x345   :  { %vm9952_vm8 = vcmp.eq.f32.partialorder %v14507_v4, 0.0  ;;  %v9966_v2 = vsel %vm9964_vm6, %v9958_v61, %v9963_v40  ;;  %vm10007_vm10 = vcmp.lt.f32.partialorder %v14538_v42, 0.0  ;;  %v17015_v48 = vand.u32 2147483648, %v14556_v19 }
 0x346   :  { %v10015_v33 = vor.u32 %v10819_v6, %v17014_v27  ;;  %v14821_v50 = vand.u32 2147483647, %v14792_v28  ;;  %v4899_v6 = vcombine.low %v4891_v57, %v4898_v45  ;;  %v14824_v13 = vand.u32 2147483647, %v14799_v18 }
 0x347   :  { %v9997_v59 = vor.u32 %v10825_v7, %v17015_v48  ;;  %v2226_v24 = vrot.slane %v16998_v8, %v12273_v60  ;;  %v2230_v51 = vrot.slane %v16998_v8, %v12290_v0  ;;  %v2234_v40 = vrot.slane %v16998_v8, %v12293_v22 }
 0x348   :  { %v9933_v61 = vsel %vm9919_vm15, inf, %v9932_v11  ;;  %vm9973_vm5 = vcmp.eq.f32.partialorder %v14531_v54, inf  ;;  %vm9989_vm11 = vcmp.lt.f32.partialorder %v14556_v19, 0.0  ;;  %vm9998_vm0 = vweird.f32 %v14588_v39 }
 0x349   :  { %10830 = vpow2.f32 %v10049_v49  ;;  %v4906_v7 = vrot.slane %v4899_v6, %v12200_v31  ;;  %v10017_v36 = vsel %vm10016_vm1, %v14538_v42, %v10015_v33  ;;  %v4667_v32 = vcombine.low %v2222_v44, %v2230_v51  ;;  %v14853_v33 = vpop.xlane.xlu1 %1020 }
 0x34a   :  { %10832 = vpow2.f32 %v10031_v35  ;;  %v4668_v57 = vcombine.low %v2226_v24, %v2234_v40  ;;  %v9985_v8 = vsel %vm9971_vm2, nan, %v9984_v47  ;;  %vm9955_vm13 = vcmp.eq.f32.partialorder %v14536_v63, inf  ;;  %v10827_v11 = vpop.eup %10826  ;;  %v994_v40 = vpop.xlane.xlu0 %993 }
 0x34b   :  { %v9967_v56 = vsel %vm9953_vm4, nan, %v9966_v2  ;;  %vm10006_vm3 = vcmp.eq.f32.partialorder %v14538_v42, 0.0  ;;  %10834 = vlog2.f32 %v14821_v50  ;;  %v6598_v49 = vunpack.c.l.b16 %v4906_v7  ;;  %v17017_v2 = vld [vmem:[#allocation5_spill] sm:$0xff] }
 0x34c   :  { %vm9988_vm12 = vcmp.eq.f32.partialorder %v14556_v19, 0.0  ;;  %v9999_v45 = vsel %vm9998_vm0, %v14556_v19, %v9997_v59  ;;  %10836 = vlog2.f32 %v14824_v13  ;;  %v4675_v27 = vrot.slane %v4667_v32, %v12200_v31  ;;  %v10829_v24 = vpop.eup %10828 }
 0x34d   :  { %v4682_v47 = vrot.slane %v4668_v57, %v12200_v31  ;;  %v17016_v35 = vand.u32 2147483648, %v14538_v42  ;;  %6845 = vperm.xlu0 %10388, %v6598_v49   ;;  %v2398_v48 = vrot.slane %v17017_v2, %v12139_v14  ;;  %v2402_v59 = vrot.slane %v17017_v2, %v12142_v41 }
 0x34e   :  { %v2406_v6 = vrot.slane %v17017_v2, %v12145_v46  ;;  %v14866_v51 = vpack.c.bf16 %v14774_v16, %v9933_v61  ;;  %vm10000_vm14 = vcmp.eq.f32.partialorder %v14588_v39, 0.0  ;;  %v9986_v32 = vsel %vm9970_vm9, 0.0, %v9985_v8 }
 0x34f   :  { %v10020_v44 = vsel %vm10018_vm7, %v17016_v35, %v10017_v36  ;;  %v4683_v7 = vcombine.low %v4675_v27, %v4682_v47  ;;  %v2410_v36 = vrot.slane %v17017_v2, %v12153_v52  ;;  %v17019_v57 = vand.u32 2147483648, %v14556_v19 }
 0x350   :  { %17018 = vst [vmem:[#allocation5_spill] sm:$0xff] %v14866_v51  ;;  %v10085_v35 = vmul.f32 0.33333334, %v10827_v11  ;;  %v14876_v15 = vmul.f32 0.03125, %v14688_v10  ;;  %v9968_v16 = vsel %vm9952_vm8, 0.0, %v9967_v56  ;;  %v10021_v61 = vsel %vm10007_vm10, nan, %v10020_v44  ;;  %v14893_v56 = vpop.xlane.xlu1 %1026 }
 0x351   :  { %v10002_v49 = vsel %vm10000_vm14, %v17019_v57, %v9999_v45  ;;  %v16899_v27 = vand.u32 2147483648, %v14661_v43  ;;  %v4690_v47 = vrot.slane %v4683_v7, %v12200_v31  ;;  %v10067_v51 = vmul.f32 0.33333334, %v10829_v24 }
 0x352   :  { %v14884_v20 = vmul.f32 0.03125, %v994_v40  ;;  %v4931_v8 = vcombine.low %v2398_v48, %v2406_v6  ;;  %v4932_v58 = vcombine.low %v2402_v59, %v2410_v36  ;;  %v9987_v11 = vsel %vm9973_vm5, inf, %v9986_v32 }
 0x353   :  { %vm10009_vm6 = vcmp.eq.f32.partialorder %v14563_v30, inf  ;;  %vm9991_vm15 = vcmp.eq.f32.partialorder %v14588_v39, inf  ;;  %v10003_v4 = vsel %vm9989_vm11, nan, %v10002_v49  ;;  %vm10052_vm1 = vweird.f32 %v14686_v5  ;;  %v10831_v45 = vpop.eup %10830 }
 0x354   :  { %v6589_v10 = vunpack.c.l.b16 %v4690_v47  ;;  %10838 = vpow2.f32 %v10085_v35  ;;  %v14896_v44 = vand.u32 2147483647, %v14876_v15  ;;  %v4939_v54 = vrot.slane %v4931_v8, %v12200_v31  ;;  %v10833_v59 = vpop.eup %10832  ;;  %v17020_v8 = vld [vmem:[#allocation7_spill] sm:$0xff] }
 0x355   :  { %v4946_v48 = vrot.slane %v4932_v58, %v12200_v31  ;;  %v9969_v6 = vsel %vm9955_vm13, inf, %v9968_v16  ;;  %v10022_v24 = vsel %vm10006_vm3, 0.0, %v10021_v61  ;;  %vm10054_vm2 = vcmp.eq.f32.partialorder %v14686_v5, 0.0  ;;  %v10835_v7 = vpop.eup %10834 }
 0x356   :  { %v10030_v40 = vand.u32 2147483648, %v14670_v3  ;;  %vm10034_vm4 = vweird.f32 %v14697_v37  ;;  %6818 = vperm.xlu1 %10389, %v6589_v10   ;;  %v10004_v36 = vsel %vm9988_vm12, 0.0, %v10003_v4  ;;  %10840 = vpow2.f32 %v10067_v51  ;;  %v10837_v32 = vpop.eup %10836 }
 0x357   :  { %v14910_v58 = vand.u32 2147483647, %v14884_v20  ;;  %v4947_v63 = vcombine.low %v4939_v54, %v4946_v48  ;;  %v10051_v42 = vor.u32 %v10831_v45, %v16899_v27  ;;  %vm10036_vm7 = vcmp.eq.f32.partialorder %v14697_v37, 0.0  ;;  %v14930_v45 = vpop.xlane.xlu1 %1032 }
 0x358   :  { %v2254_v57 = vrot.slane %v13067_v23, %v12270_v55  ;;  %v2258_v49 = vrot.slane %v13067_v23, %v12273_v60  ;;  %v2262_v19 = vrot.slane %v13067_v23, %v12290_v0  ;;  %vm10043_vm9 = vcmp.lt.f32.partialorder %v14661_v43, 0.0 }
 0x359   :  { %v10033_v51 = vor.u32 %v10833_v59, %v10030_v40  ;;  %10842 = vlog2.f32 %v14896_v44  ;;  %v4954_v35 = vrot.slane %v4947_v63, %v12200_v31  ;;  %v2266_v16 = vrot.slane %v13067_v23, %v12293_v22 }
 0x35a   :  { %v10121_v61 = vmul.f32 0.33333334, %v10835_v7  ;;  %v4715_v47 = vcombine.low %v2254_v57, %v2262_v19  ;;  %v2430_v4 = vrot.slane %v17020_v8, %v12139_v14  ;;  %v2438_v10 = vrot.slane %v17020_v8, %v12145_v46  ;;  %v1000_v57 = vpop.xlane.xlu0 %999 }
 0x35b   :  { %vm10025_vm8 = vcmp.lt.f32.partialorder %v14670_v3, 0.0  ;;  %v10103_v54 = vmul.f32 0.33333334, %v10837_v32  ;;  %10844 = vlog2.f32 %v14910_v58  ;;  %v6600_v48 = vunpack.c.l.b16 %v4954_v35 }
 0x35c   :  { %v4716_v59 = vcombine.low %v2258_v49, %v2266_v16  ;;  %v14934_v63 = vpack.c.bf16 %v9987_v11, %v9969_v6  ;;  %v10053_v23 = vsel %vm10052_vm1, %v14661_v43, %v10051_v42  ;;  %v14940_v7 = vmul.f32 0.03125, %v14727_v38 }
 0x35d   :  { %v4723_v19 = vrot.slane %v4715_v47, %v12200_v31  ;;  %v10023_v27 = vsel %vm10009_vm6, inf, %v10022_v24  ;;  %v10005_v32 = vsel %vm9991_vm15, inf, %v10004_v36  ;;  %vm10042_vm10 = vcmp.eq.f32.partialorder %v14661_v43, 0.0  ;;  %6851 = vperm.xlu0 %10388, %v6600_v48   ;;  %v14969_v47 = vpop.permute.xlu1 %6671 }
 0x35e   :  { %17021 = vst [vmem:[#allocation7_spill] sm:$0xff] %v14934_v63  ;;  %v4730_v11 = vrot.slane %v4716_v59, %v12200_v31  ;;  %v2434_v6 = vrot.slane %v17020_v8, %v12142_v41  ;;  %v10035_v38 = vsel %vm10034_vm4, %v14670_v3, %v10033_v51  ;;  %10846 = vpow2.f32 %v10121_v61  ;;  %v10839_v42 = vpop.eup %10838  ;;  %17023 = vst [vmem:[#allocation25_spill] sm:$0xff] %v14969_v47 }
 0x35f   :  { %v2442_v30 = vrot.slane %v17020_v8, %v12153_v52  ;;  %v4979_v24 = vcombine.low %v2430_v4, %v2438_v10  ;;  %v17022_v39 = vand.u32 2147483648, %v14661_v43  ;;  %vm10024_vm5 = vcmp.eq.f32.partialorder %v14670_v3, 0.0 }
 0x360   :  { %10848 = vpow2.f32 %v10103_v54  ;;  %v14961_v49 = vmul.f32 0.03125, %v1000_v57  ;;  %v4731_v35 = vcombine.low %v4723_v19, %v4730_v11  ;;  %v10084_v16 = vand.u32 2147483648, %v14725_v21  ;;  %v10841_v4 = vpop.eup %10840 }
 0x361   :  { %v10056_v36 = vsel %vm10054_vm2, %v17022_v39, %v10053_v23  ;;  %vm10088_vm11 = vweird.f32 %v14753_v25  ;;  %v16900_v51 = vand.u32 2147483648, %v14742_v9  ;;  %v14967_v61 = vand.u32 2147483647, %v14940_v7 }
 0x362   :  { %v10038_v10 = vsel %vm10036_vm7, %v10030_v40, %v10035_v38  ;;  %vm10090_vm0 = vcmp.eq.f32.partialorder %v14753_v25, 0.0  ;;  %v4738_v54 = vrot.slane %v4731_v35, %v12200_v31  ;;  %v4980_v48 = vcombine.low %v2434_v6, %v2442_v30 }
 0x363   :  { %v4987_v59 = vrot.slane %v4979_v24, %v12200_v31  ;;  %v14976_v23 = vpack.c.bf16 %v10023_v27, %v10005_v32  ;;  %v10057_v57 = vsel %vm10043_vm9, nan, %v10056_v36  ;;  %v10087_v19 = vor.u32 %v10839_v42, %v10084_v16  ;;  %v10843_v11 = vpop.eup %10842  ;;  %v1006_v36 = vpop.xlane.xlu0 %1005 }
 0x364   :  { %vm10070_vm13 = vweird.f32 %v14768_v62  ;;  %vm10045_vm3 = vcmp.eq.f32.partialorder %v14686_v5, inf  ;;  %vm10072_vm12 = vcmp.eq.f32.partialorder %v14768_v62, 0.0  ;;  %v14984_v40 = vand.u32 2147483647, %v14961_v49 }
 0x365   :  { %17024 = vst [vmem:[#allocation26_spill] sm:$0xff] %v14976_v23  ;;  %v6591_v38 = vunpack.c.l.b16 %v4738_v54  ;;  %v4994_v6 = vrot.slane %v4980_v48, %v12200_v31  ;;  %v2286_v27 = vrot.slane %v13121_v12, %v12270_v55  ;;  %v10039_v32 = vsel %vm10025_vm8, nan, %v10038_v10  ;;  %v10845_v42 = vpop.eup %10844 }
 0x366   :  { %v10069_v30 = vor.u32 %v10841_v4, %v16900_v51  ;;  %10850 = vlog2.f32 %v14967_v61  ;;  %vm10027_vm14 = vcmp.eq.f32.partialorder %v14697_v37, inf  ;;  %vm10079_vm6 = vcmp.lt.f32.partialorder %v14725_v21, 0.0 }
 0x367   :  { %v14998_v39 = vmul.f32 0.03125, %v14770_v53  ;;  %6824 = vperm.xlu1 %10389, %v6591_v38   ;;  %v4995_v35 = vcombine.low %v4987_v59, %v4994_v6  ;;  %v2290_v10 = vrot.slane %v13121_v12, %v12273_v60  ;;  %v2294_v4 = vrot.slane %v13121_v12, %v12290_v0  ;;  %v15011_v38 = vpop.permute.xlu1 %6674 }
 0x368   :  { %v10058_v54 = vsel %vm10042_vm10, 0.0, %v10057_v57  ;;  %v10089_v48 = vsel %vm10088_vm11, %v14725_v21, %v10087_v19  ;;  %vm10061_vm15 = vcmp.lt.f32.partialorder %v14742_v9, 0.0  ;;  %vm10124_vm1 = vweird.f32 %v14821_v50  ;;  %17025 = vst [vmem:[#allocation27_spill] sm:$0xff] %v15011_v38  ;;  %v10847_v57 = vpop.eup %10846 }
 0x369   :  { %v10157_v53 = vmul.f32 0.33333334, %v10843_v11  ;;  %10852 = vlog2.f32 %v14984_v40  ;;  %v5002_v59 = vrot.slane %v4995_v35, %v12200_v31  ;;  %v2298_v6 = vrot.slane %v13121_v12, %v12293_v22 }
 0x36a   :  { %v4763_v43 = vcombine.low %v2286_v27, %v2294_v4  ;;  %v10040_v51 = vsel %vm10024_vm5, 0.0, %v10039_v32  ;;  %vm10078_vm2 = vcmp.eq.f32.partialorder %v14725_v21, 0.0  ;;  %v10071_v19 = vsel %vm10070_vm13, %v14742_v9, %v10069_v30  ;;  %v10849_v38 = vpop.eup %10848  ;;  %v17026_v30 = vld [vmem:[#allocation8_spill] sm:$0xff] }
 0x36b   :  { %v10102_v11 = vand.u32 2147483648, %v14799_v18  ;;  %v10139_v24 = vmul.f32 0.33333334, %v10845_v42  ;;  %vm10060_vm4 = vcmp.eq.f32.partialorder %v14742_v9, 0.0  ;;  %vm10126_vm7 = vcmp.eq.f32.partialorder %v14821_v50, 0.0 }
 0x36c   :  { %v15027_v12 = vand.u32 2147483647, %v14998_v39  ;;  %v6602_v27 = vunpack.c.l.b16 %v5002_v59  ;;  %v4764_v3 = vcombine.low %v2290_v10, %v2298_v6  ;;  %v4771_v32 = vrot.slane %v4763_v43, %v12200_v31  ;;  %v15041_v10 = vpop.xlane.xlu0 %1011 }
 0x36d   :  { %v10092_v35 = vsel %vm10090_vm0, %v10084_v16, %v10089_v48  ;;  %v2462_v4 = vrot.slane %v17026_v30, %v12139_v14  ;;  %v2466_v42 = vrot.slane %v17026_v30, %v12142_v41  ;;  %v2470_v47 = vrot.slane %v17026_v30, %v12145_v46 }
 0x36e   :  { %vm10081_vm9 = vcmp.eq.f32.partialorder %v14753_v25, inf  ;;  %v17027_v23 = vand.u32 2147483648, %v14792_v28  ;;  %10854 = vpow2.f32 %v10157_v53  ;;  %6857 = vperm.xlu0 %10388, %v6602_v27   ;;  %v4778_v16 = vrot.slane %v4764_v3, %v12200_v31  ;;  %v15053_v53 = vpop.permute.xlu1 %6677 }
 0x36f   :  { %v2474_v48 = vrot.slane %v17026_v30, %v12153_v52  ;;  %v10059_v6 = vsel %vm10045_vm3, inf, %v10058_v54  ;;  %vm10063_vm8 = vcmp.eq.f32.partialorder %v14768_v62, inf  ;;  %v17028_v43 = vand.u32 2147483648, %v14742_v9  ;;  %17029 = vst [vmem:[#allocation8_spill] sm:$0xff] %v15053_v53 }
 0x370   :  { %v10123_v59 = vor.u32 %v10847_v57, %v17027_v23  ;;  %v10105_v23 = vor.u32 %v10849_v38, %v10102_v11  ;;  %10856 = vpow2.f32 %v10139_v24  ;;  %vm10115_vm10 = vcmp.lt.f32.partialorder %v14792_v28, 0.0  ;;  %v10851_v54 = vpop.eup %10850 }
 0x371   :  { %v10074_v63 = vsel %vm10072_vm12, %v17028_v43, %v10071_v19  ;;  %vm10097_vm5 = vcmp.lt.f32.partialorder %v14799_v18, 0.0  ;;  %vm10106_vm11 = vweird.f32 %v14824_v13  ;;  %10858 = vlog2.f32 %v15027_v12 }
 0x372   :  { %v4779_v5 = vcombine.low %v4771_v32, %v4778_v16  ;;  %v10041_v57 = vsel %vm10027_vm14, inf, %v10040_v51  ;;  %v10093_v19 = vsel %vm10079_vm6, nan, %v10092_v35  ;;  %v5027_v38 = vcombine.low %v2462_v4, %v2470_v47 }
 0x373   :  { %v5028_v24 = vcombine.low %v2466_v42, %v2474_v48  ;;  %v10075_v27 = vsel %vm10061_vm15, nan, %v10074_v63  ;;  %v10125_v3 = vsel %vm10124_vm1, %v14792_v28, %v10123_v59  ;;  %v15068_v43 = vmul.f32 0.03125, %v1006_v36  ;;  %v10853_v35 = vpop.eup %10852  ;;  %v15082_v42 = vpop.xlane.xlu0 %1017 }
 0x374   :  { %v4786_v32 = vrot.slane %v4779_v5, %v12200_v31  ;;  %vm10114_vm0 = vcmp.eq.f32.partialorder %v14792_v28, 0.0  ;;  %v10107_v37 = vsel %vm10106_vm11, %v14799_v18, %v10105_v23  ;;  %vm10108_vm13 = vcmp.eq.f32.partialorder %v14824_v13, 0.0 }
 0x375   :  { %v5035_v51 = vrot.slane %v5027_v38, %v12200_v31  ;;  %v5042_v47 = vrot.slane %v5028_v24, %v12200_v31  ;;  %v15076_v63 = vpack.c.bf16 %v10059_v6, %v10041_v57  ;;  %v10094_v4 = vsel %vm10078_vm2, 0.0, %v10093_v19  ;;  %v15090_v57 = vpop.permute.xlu1 %6680 }
 0x376   :  { %vm10096_vm3 = vcmp.eq.f32.partialorder %v14799_v18, 0.0  ;;  %v10156_v36 = vand.u32 2147483648, %v14876_v15  ;;  %v6593_v59 = vunpack.c.l.b16 %v4786_v32  ;;  %v10076_v16 = vsel %vm10060_vm4, 0.0, %v10075_v27  ;;  %17031 = vst [vmem:[#allocation28_spill] sm:$0xff] %v15090_v57 }
 0x377   :  { %v17030_v48 = vand.u32 2147483648, %v14792_v28  ;;  %v10193_v6 = vmul.f32 0.33333334, %v10851_v54  ;;  %v5043_v5 = vcombine.low %v5035_v51, %v5042_v47  ;;  %vm10117_vm12 = vcmp.eq.f32.partialorder %v14821_v50, inf }
 0x378   :  { %v10110_v21 = vsel %vm10108_vm13, %v10102_v11, %v10107_v37  ;;  %vm10160_vm14 = vweird.f32 %v14896_v44  ;;  %v15097_v19 = vand.u32 2147483647, %v15068_v43  ;;  %6830 = vperm.xlu1 %10389, %v6593_v59   ;;  %v2318_v9 = vrot.slane %v13274_v34, %v12270_v55 }
 0x379   :  { %v10128_v23 = vsel %vm10126_vm7, %v17030_v48, %v10125_v3  ;;  %v2322_v54 = vrot.slane %v13274_v34, %v12273_v60  ;;  %v10095_v38 = vsel %vm10081_vm9, inf, %v10094_v4  ;;  %vm10099_vm6 = vcmp.eq.f32.partialorder %v14824_v13, inf  ;;  %v10855_v3 = vpop.eup %10854 }
 0x37a   :  { %v10138_v24 = vand.u32 2147483648, %v14884_v20  ;;  %v10175_v11 = vmul.f32 0.33333334, %v10853_v35  ;;  %v5050_v27 = vrot.slane %v5043_v5, %v12200_v31  ;;  %v10077_v32 = vsel %vm10063_vm8, inf, %v10076_v16  ;;  %v10857_v51 = vpop.eup %10856  ;;  %v15124_v16 = vpop.xlane.xlu0 %1023  ;;  %v17032_v5 = vld [vmem:[#allocation9_spill] sm:$0xff] }
 0x37b   :  { %vm10142_vm15 = vweird.f32 %v14910_v58  ;;  %v2326_v37 = vrot.slane %v13274_v34, %v12290_v0  ;;  %v2330_v25 = vrot.slane %v13274_v34, %v12293_v22  ;;  %v10129_v47 = vsel %vm10115_vm10, nan, %v10128_v23  ;;  %v10859_v4 = vpop.eup %10858 }
 0x37c   :  { %v10111_v35 = vsel %vm10097_vm5, nan, %v10110_v21  ;;  %vm10162_vm1 = vcmp.eq.f32.partialorder %v14896_v44, 0.0  ;;  %10860 = vpow2.f32 %v10193_v6  ;;  %v6604_v62 = vunpack.c.l.b16 %v5050_v27  ;;  %v15132_v27 = vpop.permute.xlu1 %6683 }
 0x37d   :  { %10862 = vlog2.f32 %v15097_v19  ;;  %v15122_v59 = vmul.f32 0.03125, %v14810_v17  ;;  %v4811_v34 = vcombine.low %v2318_v9, %v2326_v37  ;;  %v4812_v48 = vcombine.low %v2322_v54, %v2330_v25  ;;  %17033 = vst [vmem:[#allocation9_spill] sm:$0xff] %v15132_v27 }
 0x37e   :  { %v10159_v23 = vor.u32 %v10855_v3, %v10156_v36  ;;  %10864 = vpow2.f32 %v10175_v11  ;;  %6863 = vperm.xlu0 %10388, %v6604_v62   ;;  %v2494_v21 = vrot.slane %v17032_v5, %v12139_v14  ;;  %v2502_v6 = vrot.slane %v17032_v5, %v12145_v46 }
 0x37f   :  { %v10130_v17 = vsel %vm10114_vm0, 0.0, %v10129_v47  ;;  %vm10151_vm2 = vcmp.lt.f32.partialorder %v14876_v15, 0.0  ;;  %v10141_v9 = vor.u32 %v10857_v51, %v10138_v24  ;;  %v4819_v54 = vrot.slane %v4811_v34, %v12200_v31 }
 0x380   :  { %v4826_v11 = vrot.slane %v4812_v48, %v12200_v31  ;;  %v10112_v3 = vsel %vm10096_vm3, 0.0, %v10111_v35  ;;  %vm10133_vm4 = vcmp.lt.f32.partialorder %v14884_v20, 0.0  ;;  %vm10144_vm7 = vcmp.eq.f32.partialorder %v14910_v58, 0.0  ;;  %v15167_v48 = vpop.xlane.xlu0 %1029 }
 0x381   :  { %v10229_v37 = vmul.f32 0.33333334, %v10859_v4  ;;  %v2498_v28 = vrot.slane %v17032_v5, %v12142_v41  ;;  %v15147_v25 = vpack.c.bf16 %v10095_v38, %v10077_v32  ;;  %v16903_v47 = vand.u32 2147483648, %v14940_v7 }
 0x382   :  { %v15151_v51 = vand.u32 2147483647, %v15122_v59  ;;  %v4827_v62 = vcombine.low %v4819_v54, %v4826_v11  ;;  %v10131_v18 = vsel %vm10117_vm12, inf, %v10130_v17  ;;  %vm10150_vm9 = vcmp.eq.f32.partialorder %v14876_v15, 0.0 }
 0x383   :  { %17034 = vst [vmem:[#allocation29_spill] sm:$0xff] %v15147_v25  ;;  %v10161_v35 = vsel %vm10160_vm14, %v14876_v15, %v10159_v23  ;;  %v2506_v4 = vrot.slane %v17032_v5, %v12153_v52  ;;  %v5075_v38 = vcombine.low %v2494_v21, %v2502_v6  ;;  %v10113_v32 = vsel %vm10099_vm6, inf, %v10112_v3  ;;  %v15175_v6 = vpop.permute.xlu1 %6686 }
 0x384   :  { %v10143_v34 = vsel %vm10142_vm15, %v14884_v20, %v10141_v9  ;;  %v4834_v50 = vrot.slane %v4827_v62, %v12200_v31  ;;  %v2350_v17 = vrot.slane %v13276_v1, %v12270_v55  ;;  %vm10132_vm8 = vcmp.eq.f32.partialorder %v14884_v20, 0.0  ;;  %17035 = vst [vmem:[#allocation30_spill] sm:$0xff] %v15175_v6 }
 0x385   :  { %10866 = vpow2.f32 %v10229_v37  ;;  %v5076_v23 = vcombine.low %v2498_v28, %v2506_v4  ;;  %v5083_v21 = vrot.slane %v5075_v38, %v12200_v31  ;;  %v2354_v13 = vrot.slane %v13276_v1, %v12273_v60 }
 0x386   :  { %v10164_v9 = vsel %vm10162_vm1, %v10156_v36, %v10161_v35  ;;  %vm10196_vm10 = vweird.f32 %v14967_v61  ;;  %10868 = vlog2.f32 %v15151_v51  ;;  %v6595_v54 = vunpack.c.l.b16 %v4834_v50  ;;  %v10861_v3 = vpop.eup %10860 }
 0x387   :  { %v2358_v11 = vrot.slane %v13276_v1, %v12290_v0  ;;  %v10146_v37 = vsel %vm10144_vm7, %v10138_v24, %v10143_v34  ;;  %v5090_v62 = vrot.slane %v5076_v23, %v12200_v31  ;;  %v2362_v36 = vrot.slane %v13276_v1, %v12293_v22  ;;  %v10863_v35 = vpop.eup %10862  ;;  %v15199_v24 = vpop.permute.xlu0 %6668 }
 0x388   :  { %v15193_v4 = vpack.c.bf16 %v10131_v18, %v10113_v32  ;;  %vm10153_vm5 = vcmp.eq.f32.partialorder %v14896_v44, inf  ;;  %vm10178_vm11 = vweird.f32 %v14984_v40  ;;  %6836 = vperm.xlu1 %10389, %v6595_v54   ;;  %v2526_v50 = vrot.slane %v13615_v26, %v12139_v14  ;;  %17036 = vst [vmem:[#allocation31_spill] sm:$0xff] %v15199_v24  ;;  %v10865_v34 = vpop.eup %10864 }
 0x389   :  { %v4859_v38 = vcombine.low %v2350_v17, %v2358_v11  ;;  %v10165_v23 = vsel %vm10151_vm2, nan, %v10164_v9  ;;  %vm10135_vm0 = vcmp.eq.f32.partialorder %v14910_v58, inf  ;;  %vm10198_vm13 = vcmp.eq.f32.partialorder %v14967_v61, 0.0 }
 0x38a   :  { %v5091_v1 = vcombine.low %v5083_v21, %v5090_v62  ;;  %v4860_v18 = vcombine.low %v2354_v13, %v2362_v36  ;;  %v2530_v32 = vrot.slane %v13615_v26, %v12142_v41  ;;  %v10147_v17 = vsel %vm10133_vm4, nan, %v10146_v37  ;;  %v15219_v36 = vpop.permute.xlu1 %6689 }
 0x38b   :  { %v10195_v54 = vor.u32 %v10861_v3, %v16903_v47  ;;  %vm10180_vm3 = vcmp.eq.f32.partialorder %v14984_v40, 0.0  ;;  %v4867_v11 = vrot.slane %v4859_v38, %v12200_v31  ;;  %v2534_v9 = vrot.slane %v13615_v26, %v12145_v46  ;;  %17037 = vst [vmem:[#allocation32_spill] sm:$0xff] %v15219_v36 }
 0x38c   :  { %v10211_v28 = vmul.f32 0.33333334, %v10863_v35  ;;  %v5098_v21 = vrot.slane %v5091_v1, %v12200_v31  ;;  %v4874_v13 = vrot.slane %v4860_v18, %v12200_v31  ;;  %v2538_v62 = vrot.slane %v13615_v26, %v12153_v52 }
 0x38d   :  { %v10166_v3 = vsel %vm10150_vm9, 0.0, %v10165_v23  ;;  %vm10187_vm12 = vcmp.lt.f32.partialorder %v14940_v7, 0.0  ;;  %v17038_v37 = vand.u32 2147483648, %v14961_v49  ;;  %v10228_v47 = vand.u32 2147483648, %v14998_v39 }
 0x38e   :  { %v5123_v35 = vcombine.low %v2526_v50, %v2534_v9  ;;  %vm10169_vm14 = vcmp.lt.f32.partialorder %v14961_v49, 0.0  ;;  %v15229_v1 = vmul.f32 0.03125, %v15041_v10  ;;  %v6606_v18 = vunpack.c.l.b16 %v5098_v21  ;;  %v15238_v50 = vpop.permute.xlu0 %6695 }
 0x38f   :  { %v10177_v38 = vor.u32 %v10865_v34, %v17038_v37  ;;  %v4875_v6 = vcombine.low %v4867_v11, %v4874_v13  ;;  %v5124_v27 = vcombine.low %v2530_v32, %v2538_v62  ;;  %v10148_v15 = vsel %vm10132_vm8, 0.0, %v10147_v17  ;;  %17039 = vst [vmem:[#allocation33_spill] sm:$0xff] %v15238_v50  ;;  %v10867_v9 = vpop.eup %10866  ;;  %v15260_v62 = vpop.permute.xlu1 %6692 }
 0x390   :  { %v5131_v23 = vrot.slane %v5123_v35, %v12200_v31  ;;  %v2382_v36 = vrot.slane %v17017_v2, %v12270_v55  ;;  %v2386_v34 = vrot.slane %v17017_v2, %v12273_v60  ;;  %v10197_v10 = vsel %vm10196_vm10, %v14940_v7, %v10195_v54  ;;  %6869 = vperm.xlu0 %10388, %v6606_v18   ;;  %v10869_v17 = vpop.eup %10868 }
 0x391   :  { %10870 = vpow2.f32 %v10211_v28  ;;  %v4882_v20 = vrot.slane %v4875_v6, %v12200_v31  ;;  %v5138_v32 = vrot.slane %v5124_v27, %v12200_v31  ;;  %vm10186_vm6 = vcmp.eq.f32.partialorder %v14940_v7, 0.0  ;;  %17040 = vst [vmem:[#allocation34_spill] sm:$0xff] %v15260_v62 }
 0x392   :  { %vm10168_vm15 = vcmp.eq.f32.partialorder %v14961_v49, 0.0  ;;  %v10179_v11 = vsel %vm10178_vm11, %v14961_v49, %v10177_v38  ;;  %vm10232_vm1 = vweird.f32 %v15027_v12  ;;  %v2390_v54 = vrot.slane %v17017_v2, %v12290_v0 }
 0x393   :  { %v2394_v28 = vrot.slane %v17017_v2, %v12293_v22  ;;  %v10167_v27 = vsel %vm10153_vm5, inf, %v10166_v3  ;;  %v15258_v6 = vand.u32 2147483647, %v15229_v1  ;;  %v6597_v21 = vunpack.c.l.b16 %v4882_v20 }
 0x394   :  { %v5139_v13 = vcombine.low %v5131_v23, %v5138_v32  ;;  %v10149_v37 = vsel %vm10135_vm0, inf, %v10148_v15  ;;  %v17041_v38 = vand.u32 2147483648, %v14940_v7  ;;  %vm10234_vm2 = vcmp.eq.f32.partialorder %v15027_v12, 0.0  ;;  %v15284_v32 = vpop.permute.xlu0 %6701 }
 0x395   :  { %v4907_v2 = vcombine.low %v2382_v36, %v2390_v54  ;;  %v4908_v44 = vcombine.low %v2386_v34, %v2394_v28  ;;  %vm10189_vm4 = vcmp.eq.f32.partialorder %v14967_v61, inf  ;;  %v17042_v3 = vand.u32 2147483648, %v14961_v49  ;;  %6842 = vperm.xlu1 %10389, %v6597_v21   ;;  %17043 = vst [vmem:[#allocation35_spill] sm:$0xff] %v15284_v32 }
 0x396   :  { %v10200_v35 = vsel %vm10198_vm13, %v17041_v38, %v10197_v10  ;;  %v10231_v58 = vor.u32 %v10867_v9, %v10228_v47  ;;  %v10265_v15 = vmul.f32 0.33333334, %v10869_v17  ;;  %v5146_v23 = vrot.slane %v5139_v13, %v12200_v31 }
 0x397   :  { %v10182_v18 = vsel %vm10180_vm3, %v17042_v3, %v10179_v11  ;;  %vm10171_vm7 = vcmp.eq.f32.partialorder %v14984_v40, inf  ;;  %v4915_v10 = vrot.slane %v4907_v2, %v12200_v31  ;;  %v4922_v36 = vrot.slane %v4908_v44, %v12200_v31  ;;  %v15303_v44 = vpop.permute.xlu1 %6698 }
 0x398   :  { %v2558_v34 = vrot.slane %v13703_v29, %v12139_v14  ;;  %v2562_v20 = vrot.slane %v13703_v29, %v12142_v41  ;;  %v10201_v9 = vsel %vm10187_vm12, nan, %v10200_v35  ;;  %vm10223_vm9 = vcmp.lt.f32.partialorder %v14998_v39, 0.0  ;;  %17044 = vst [vmem:[#allocation36_spill] sm:$0xff] %v15303_v44 }
 0x399   :  { %10872 = vlog2.f32 %v15258_v6  ;;  %v6608_v17 = vunpack.c.l.b16 %v5146_v23  ;;  %v2566_v11 = vrot.slane %v13703_v29, %v12145_v46  ;;  %v10183_v54 = vsel %vm10169_vm14, nan, %v10182_v18 }
 0x39a   :  { %v15295_v28 = vmul.f32 0.03125, %v14853_v33  ;;  %v4923_v21 = vcombine.low %v4915_v10, %v4922_v36  ;;  %v2570_v13 = vrot.slane %v13703_v29, %v12153_v52  ;;  %v15299_v38 = vpack.c.bf16 %v10167_v27, %v10149_v37 }
 0x39b   :  { %v16904_v35 = vand.u32 2147483648, %v15068_v43  ;;  %vm10214_vm8 = vweird.f32 %v15097_v19  ;;  %6875 = vperm.xlu0 %10388, %v6608_v17   ;;  %v5171_v2 = vcombine.low %v2558_v34, %v2566_v11  ;;  %vm10222_vm10 = vcmp.eq.f32.partialorder %v14998_v39, 0.0  ;;  %v10871_v27 = vpop.eup %10870 }
 0x39c   :  { %v10233_v33 = vsel %vm10232_vm1, %v14998_v39, %v10231_v58  ;;  %10874 = vpow2.f32 %v10265_v15  ;;  %v4930_v3 = vrot.slane %v4923_v21, %v12200_v31  ;;  %v5172_v18 = vcombine.low %v2562_v20, %v2570_v13  ;;  %v15324_v20 = vpop.permute.xlu0 %6707 }
 0x39d   :  { %v10202_v37 = vsel %vm10186_vm6, 0.0, %v10201_v9  ;;  %v10184_v23 = vsel %vm10168_vm15, 0.0, %v10183_v54  ;;  %v5179_v10 = vrot.slane %v5171_v2, %v12200_v31  ;;  %v2414_v36 = vrot.slane %v17020_v8, %v12270_v55  ;;  %17045 = vst [vmem:[#allocation37_spill] sm:$0xff] %v15324_v20  ;;  %v17046_v2 = vld [vmem:[#allocation10_spill] sm:$0xff] }
 0x39e   :  { %vm10216_vm5 = vcmp.eq.f32.partialorder %v15097_v19, 0.0  ;;  %v15319_v58 = vand.u32 2147483647, %v15295_v28  ;;  %v6599_v15 = vunpack.c.l.b16 %v4930_v3  ;;  %v5186_v34 = vrot.slane %v5172_v18, %v12200_v31 }
 0x39f   :  { %v2418_v7 = vrot.slane %v17020_v8, %v12273_v60  ;;  %v10236_v49 = vsel %vm10234_vm2, %v10228_v47, %v10233_v33  ;;  %v2422_v17 = vrot.slane %v17020_v8, %v12290_v0  ;;  %v2426_v11 = vrot.slane %v17020_v8, %v12293_v22  ;;  %v15345_v8 = vpop.permute.xlu1 %6704 }
 0x3a0   :  { %v10203_v54 = vsel %vm10189_vm4, inf, %v10202_v37  ;;  %v10213_v21 = vor.u32 %v10871_v27, %v16904_v35  ;;  %6848 = vperm.xlu1 %10389, %v6599_v15   ;;  %v5187_v13 = vcombine.low %v5179_v10, %v5186_v34  ;;  %v2590_v3 = vrot.slane %v17046_v2, %v12139_v14  ;;  %17047 = vst [vmem:[#allocation10_spill] sm:$0xff] %v15345_v8 }
 0x3a1   :  { %v10185_v47 = vsel %vm10171_vm7, inf, %v10184_v23  ;;  %v4955_v33 = vcombine.low %v2414_v36, %v2422_v17  ;;  %v4956_v18 = vcombine.low %v2418_v7, %v2426_v11  ;;  %v2594_v9 = vrot.slane %v17046_v2, %v12142_v41  ;;  %v15367_v11 = vpop.permute.xlu0 %6713 }
 0x3a2   :  { %vm10225_vm11 = vcmp.eq.f32.partialorder %v15027_v12, inf  ;;  %v10237_v61 = vsel %vm10223_vm9, nan, %v10236_v49  ;;  %10876 = vlog2.f32 %v15319_v58  ;;  %v5194_v27 = vrot.slane %v5187_v13, %v12200_v31  ;;  %17048 = vst [vmem:[#allocation38_spill] sm:$0xff] %v15367_v11 }
 0x3a3   :  { %v2598_v40 = vrot.slane %v17046_v2, %v12145_v46  ;;  %v10873_v37 = vpop.eup %10872  ;;  %vm10205_vm0 = vcmp.lt.f32.partialorder %v15068_v43, 0.0  ;;  %v4963_v10 = vrot.slane %v4955_v33, %v12200_v31  ;;  %v4970_v36 = vrot.slane %v4956_v18, %v12200_v31 }
 0x3a4   :  { %v2602_v15 = vrot.slane %v17046_v2, %v12153_v52  ;;  %v10215_v34 = vsel %vm10214_vm8, %v15068_v43, %v10213_v21  ;;  %vm10268_vm13 = vweird.f32 %v15151_v51  ;;  %v15365_v7 = vmul.f32 0.03125, %v15082_v42 }
 0x3a5   :  { %v6610_v49 = vunpack.c.l.b16 %v5194_v27  ;;  %v5219_v17 = vcombine.low %v2590_v3, %v2598_v40  ;;  %v15369_v13 = vpack.c.bf16 %v10203_v54, %v10185_v47  ;;  %v10238_v33 = vsel %vm10222_vm10, 0.0, %v10237_v61  ;;  %v15387_v27 = vpop.permute.xlu1 %6710 }
 0x3a6   :  { %v4971_v18 = vcombine.low %v4963_v10, %v4970_v36  ;;  %v5220_v23 = vcombine.low %v2594_v9, %v2602_v15  ;;  %v10875_v35 = vpop.eup %10874  ;;  %vm10204_vm3 = vcmp.eq.f32.partialorder %v15068_v43, 0.0  ;;  %v10247_v21 = vmul.f32 0.33333334, %v10873_v37  ;;  %17050 = vst [vmem:[#allocation39_spill] sm:$0xff] %v15387_v27  ;;  %v17051_v10 = vld [vmem:[#allocation11_spill] sm:$0xff]  ;;  %v15406_v27 = vpop.permute.xlu0 %6719 }
 0x3a7   :  { %6881 = vperm.xlu0 %10388, %v6610_v49   ;;  %v5227_v20 = vrot.slane %v5219_v17, %v12200_v31  ;;  %v2446_v42 = vrot.slane %v17026_v30, %v12270_v55  ;;  %v2450_v3 = vrot.slane %v17026_v30, %v12273_v60  ;;  %v17049_v54 = vand.u32 2147483648, %v15068_v43  ;;  %17053 = vst [vmem:[#allocation11_spill] sm:$0xff] %v15406_v27 }
 0x3a8   :  { %v4978_v9 = vrot.slane %v4971_v18, %v12200_v31  ;;  %v5234_v47 = vrot.slane %v5220_v23, %v12200_v31  ;;  %v2454_v61 = vrot.slane %v17026_v30, %v12290_v0  ;;  %vm10270_vm12 = vcmp.eq.f32.partialorder %v15151_v51, 0.0 }
 0x3a9   :  { %v10218_v39 = vsel %vm10216_vm5, %v17049_v54, %v10215_v34  ;;  %v15391_v40 = vand.u32 2147483647, %v15365_v7  ;;  %v2458_v37 = vrot.slane %v17026_v30, %v12293_v22  ;;  %v2622_v36 = vrot.slane %v17051_v10, %v12139_v14 }
 0x3aa   :  { %v2626_v15 = vrot.slane %v17051_v10, %v12142_v41  ;;  %v17052_v23 = vand.u32 2147483648, %v15122_v59  ;;  %v6601_v49 = vunpack.c.l.b16 %v4978_v9  ;;  %v5235_v17 = vcombine.low %v5227_v20, %v5234_v47 }
 0x3ab   :  { %v5003_v18 = vcombine.low %v2446_v42, %v2454_v61  ;;  %vm10207_vm14 = vcmp.eq.f32.partialorder %v15097_v19, inf  ;;  %10878 = vpow2.f32 %v10247_v21  ;;  %v5004_v54 = vcombine.low %v2450_v3, %v2458_v37 }
 0x3ac   :  { %v10267_v34 = vor.u32 %v10875_v35, %v17052_v23  ;;  %v2630_v11 = vrot.slane %v17051_v10, %v12145_v46  ;;  %v2634_v30 = vrot.slane %v17051_v10, %v12153_v52  ;;  %v15410_v32 = vsel %vm10225_vm11, inf, %v10238_v33  ;;  %6854 = vperm.xlu1 %10389, %v6601_v49   ;;  %v10877_v42 = vpop.eup %10876  ;;  %v15425_v23 = vpop.permute.xlu1 %6716 }
 0x3ad   :  { %v5242_v20 = vrot.slane %v5235_v17, %v12200_v31  ;;  %v5011_v21 = vrot.slane %v5003_v18, %v12200_v31  ;;  %v10219_v3 = vsel %vm10205_vm0, nan, %v10218_v39  ;;  %vm10259_vm6 = vcmp.lt.f32.partialorder %v15122_v59, 0.0  ;;  %17054 = vst [vmem:[#allocation40_spill] sm:$0xff] %v15425_v23 }
 0x3ae   :  { %v5018_v9 = vrot.slane %v5004_v54, %v12200_v31  ;;  %v5267_v47 = vcombine.low %v2622_v36, %v2630_v11  ;;  %v5268_v61 = vcombine.low %v2626_v15, %v2634_v30  ;;  %v10269_v12 = vsel %vm10268_vm13, %v15122_v59, %v10267_v34 }
 0x3af   :  { %10880 = vlog2.f32 %v15391_v40  ;;  %v6612_v33 = vunpack.c.l.b16 %v5242_v20  ;;  %v2478_v37 = vrot.slane %v17032_v5, %v12270_v55  ;;  %v2482_v11 = vrot.slane %v17032_v5, %v12273_v60  ;;  %v17055_v20 = vld [vmem:[#allocation12_spill] sm:$0xff] }
 0x3b0   :  { %v5019_v49 = vcombine.low %v5011_v21, %v5018_v9  ;;  %v5275_v39 = vrot.slane %v5267_v47, %v12200_v31  ;;  %v5282_v17 = vrot.slane %v5268_v61, %v12200_v31  ;;  %v10220_v36 = vsel %vm10204_vm3, 0.0, %v10219_v3  ;;  %v15443_v3 = vpop.permute.xlu0 %6725 }
 0x3b1   :  { %v10301_v15 = vmul.f32 0.33333334, %v10877_v42  ;;  %6887 = vperm.xlu0 %10388, %v6612_v33   ;;  %v2486_v34 = vrot.slane %v17032_v5, %v12290_v0  ;;  %v2490_v18 = vrot.slane %v17032_v5, %v12293_v22  ;;  %vm10258_vm15 = vcmp.eq.f32.partialorder %v15122_v59, 0.0  ;;  %17056 = vst [vmem:[#allocation12_spill] sm:$0xff] %v15443_v3 }
 0x3b2   :  { %v5026_v54 = vrot.slane %v5019_v49, %v12200_v31  ;;  %v5283_v30 = vcombine.low %v5275_v39, %v5282_v17  ;;  %v2654_v21 = vrot.slane %v17055_v20, %v12139_v14  ;;  %v2658_v43 = vrot.slane %v17055_v20, %v12142_v41 }
 0x3b3   :  { %v17057_v42 = vand.u32 2147483648, %v15122_v59  ;;  %v5051_v47 = vcombine.low %v2478_v37, %v2486_v34  ;;  %v5052_v61 = vcombine.low %v2482_v11, %v2490_v18  ;;  %vm10250_vm1 = vweird.f32 %v15258_v6  ;;  %v15463_v34 = vpop.permute.xlu1 %6722 }
 0x3b4   :  { %v6603_v33 = vunpack.c.l.b16 %v5026_v54  ;;  %v5290_v49 = vrot.slane %v5283_v30, %v12200_v31  ;;  %v2662_v39 = vrot.slane %v17055_v20, %v12145_v46  ;;  %v2666_v17 = vrot.slane %v17055_v20, %v12153_v52  ;;  %17058 = vst [vmem:[#allocation41_spill] sm:$0xff] %v15463_v34 }
 0x3b5   :  { %v10272_v9 = vsel %vm10270_vm12, %v17057_v42, %v10269_v12  ;;  %v10221_v35 = vsel %vm10207_vm14, inf, %v10220_v36  ;;  %v15459_v12 = vmul.f32 0.03125, %v14893_v56  ;;  %v5059_v37 = vrot.slane %v5051_v47, %v12200_v31  ;;  %v10879_v18 = vpop.eup %10878 }
 0x3b6   :  { %v5066_v11 = vrot.slane %v5052_v61, %v12200_v31  ;;  %vm10261_vm2 = vcmp.eq.f32.partialorder %v15151_v51, inf  ;;  %10882 = vpow2.f32 %v10301_v15  ;;  %6860 = vperm.xlu1 %10389, %v6603_v33   ;;  %v6614_v54 = vunpack.c.l.b16 %v5290_v49 }
 0x3b7   :  { %v5315_v30 = vcombine.low %v2654_v21, %v2662_v39  ;;  %v5316_v42 = vcombine.low %v2658_v43, %v2666_v17  ;;  %v10273_v19 = vsel %vm10259_vm6, nan, %v10272_v9  ;;  %vm10252_vm4 = vcmp.eq.f32.partialorder %v15258_v6, 0.0  ;;  %v15479_v9 = vpop.permute.xlu0 %6731 }
 0x3b8   :  { %v5067_v56 = vcombine.low %v5059_v37, %v5066_v11  ;;  %v2510_v36 = vrot.slane %v13615_v26, %v12270_v55  ;;  %v2514_v47 = vrot.slane %v13615_v26, %v12273_v60  ;;  %6893 = vperm.xlu0 %10388, %v6614_v54   ;;  %v2518_v21 = vrot.slane %v13615_v26, %v12290_v0  ;;  %v17061_v11 = vld [vmem:[#allocation17_spill] sm:$0xff] }
 0x3b9   :  { %v5323_v61 = vrot.slane %v5315_v30, %v12200_v31  ;;  %v5330_v15 = vrot.slane %v5316_v42, %v12200_v31  ;;  %v2522_v43 = vrot.slane %v13615_v26, %v12293_v22  ;;  %17059 = vst [vmem:[#allocation42_spill] sm:$0xff] %v15479_v9  ;;  %v10881_v33 = vpop.eup %10880  ;;  %v15482_v49 = vpack.c.bf16 %v15410_v32, %v10221_v35 }
 0x3ba   :  { %v17060_v39 = vand.u32 2147483648, %v15229_v1  ;;  %v5074_v37 = vrot.slane %v5067_v56, %v12200_v31  ;;  %v2686_v54 = vrot.slane %v17061_v11, %v12139_v14  ;;  %v5099_v42 = vcombine.low %v2510_v36, %v2518_v21  ;;  %v15499_v56 = vpop.permute.xlu1 %6728 }
 0x3bb   :  { %v5331_v30 = vcombine.low %v5323_v61, %v5330_v15  ;;  %v5100_v5 = vcombine.low %v2514_v47, %v2522_v43  ;;  %v2690_v26 = vrot.slane %v17061_v11, %v12142_v41  ;;  %v10274_v8 = vsel %vm10258_vm15, 0.0, %v10273_v19  ;;  %17062 = vst [vmem:[#allocation17_spill] sm:$0xff] %v15499_v56 }
 0x3bc   :  { %v10249_v17 = vor.u32 %v10879_v18, %v17060_v39  ;;  %vm10241_vm7 = vcmp.lt.f32.partialorder %v15229_v1, 0.0  ;;  %v15495_v32 = vand.u32 2147483647, %v15459_v12  ;;  %v6605_v35 = vunpack.c.l.b16 %v5074_v37 }
 0x3bd   :  { %v2694_v18 = vrot.slane %v17061_v11, %v12145_v46  ;;  %v5338_v36 = vrot.slane %v5331_v30, %v12200_v31  ;;  %v5107_v47 = vrot.slane %v5099_v42, %v12200_v31  ;;  %v5114_v61 = vrot.slane %v5100_v5, %v12200_v31  ;;  %v15513_v42 = vpop.permute.xlu0 %6737 }
 0x3be   :  { %v2698_v59 = vrot.slane %v17061_v11, %v12153_v52  ;;  %v10251_v19 = vsel %vm10250_vm1, %v15229_v1, %v10249_v17  ;;  %v10283_v15 = vmul.f32 0.33333334, %v10881_v33  ;;  %6866 = vperm.xlu1 %10389, %v6605_v35   ;;  %vm10240_vm9 = vcmp.eq.f32.partialorder %v15229_v1, 0.0  ;;  %17063 = vst [vmem:[#allocation43_spill] sm:$0xff] %v15513_v42  ;;  %v15537_v21 = vpop.permute.xlu1 %6734 }
 0x3bf   :  { %v5363_v43 = vcombine.low %v2686_v54, %v2694_v18  ;;  %v6616_v39 = vunpack.c.l.b16 %v5338_v36  ;;  %v5115_v37 = vcombine.low %v5107_v47, %v5114_v61  ;;  %v2542_v5 = vrot.slane %v13703_v29, %v12270_v55  ;;  %v17065_v61 = vld [vmem:[#allocation18_spill] sm:$0xff] }
 0x3c0   :  { %v5364_v30 = vcombine.low %v2690_v26, %v2698_v59  ;;  %v15517_v50 = vsel %vm10261_vm2, inf, %v10274_v8  ;;  %v2546_v17 = vrot.slane %v13703_v29, %v12273_v60  ;;  %v2550_v54 = vrot.slane %v13703_v29, %v12290_v0  ;;  %v10883_v35 = vpop.eup %10882  ;;  %17066 = vst [vmem:[#allocation18_spill] sm:$0xff] %v15537_v21 }
 0x3c1   :  { %v5371_v33 = vrot.slane %v5363_v43, %v12200_v31  ;;  %v17064_v26 = vand.u32 2147483648, %v15229_v1  ;;  %vm10304_vm8 = vweird.f32 %v15319_v58  ;;  %6899 = vperm.xlu0 %10388, %v6616_v39   ;;  %v5122_v51 = vrot.slane %v5115_v37, %v12200_v31 }
 0x3c2   :  { %v5378_v8 = vrot.slane %v5364_v30, %v12200_v31  ;;  %v2554_v36 = vrot.slane %v13703_v29, %v12293_v22  ;;  %10884 = vpow2.f32 %v10283_v15  ;;  %v5147_v47 = vcombine.low %v2542_v5, %v2550_v54 }
 0x3c3   :  { %v10254_v18 = vsel %vm10252_vm4, %v17064_v26, %v10251_v19  ;;  %v2718_v59 = vrot.slane %v17065_v61, %v12139_v14  ;;  %v2722_v43 = vrot.slane %v17065_v61, %v12142_v41  ;;  %v6607_v19 = vunpack.c.l.b16 %v5122_v51  ;;  %v15554_v51 = vpop.permute.xlu0 %6743 }
 0x3c4   :  { %v5379_v26 = vcombine.low %v5371_v33, %v5378_v8  ;;  %v5148_v39 = vcombine.low %v2546_v17, %v2554_v36  ;;  %v2726_v37 = vrot.slane %v17065_v61, %v12145_v46  ;;  %vm10243_vm10 = vcmp.eq.f32.partialorder %v15258_v6, inf  ;;  %17067 = vst [vmem:[#allocation44_spill] sm:$0xff] %v15554_v51 }
 0x3c5   :  { %vm10306_vm5 = vcmp.eq.f32.partialorder %v15319_v58, 0.0  ;;  %10886 = vlog2.f32 %v15495_v32  ;;  %v15545_v29 = vmul.f32 0.03125, %v15124_v16  ;;  %v5155_v15 = vrot.slane %v5147_v47, %v12200_v31  ;;  %6872 = vperm.xlu1 %10389, %v6607_v19  }
 0x3c6   :  { %v2730_v30 = vrot.slane %v17065_v61, %v12153_v52  ;;  %v10255_v5 = vsel %vm10241_vm7, nan, %v10254_v18  ;;  %v5386_v33 = vrot.slane %v5379_v26, %v12200_v31  ;;  %v5162_v17 = vrot.slane %v5148_v39, %v12200_v31 }
 0x3c7   :  { %v5411_v54 = vcombine.low %v2718_v59, %v2726_v37  ;;  %v17068_v8 = vand.u32 2147483648, %v15295_v28  ;;  %v2574_v47 = vrot.slane %v17046_v2, %v12270_v55  ;;  %v2578_v44 = vrot.slane %v17046_v2, %v12273_v60  ;;  %v15591_v51 = vpop.permute.xlu0 %6749 }
 0x3c8   :  { %v5412_v36 = vcombine.low %v2722_v43, %v2730_v30  ;;  %vm10295_vm11 = vcmp.lt.f32.partialorder %v15295_v28, 0.0  ;;  %v6618_v18 = vunpack.c.l.b16 %v5386_v33  ;;  %v5163_v19 = vcombine.low %v5155_v15, %v5162_v17  ;;  %v15574_v30 = vpop.permute.xlu1 %6740  ;;  %v17070_v17 = vld [vmem:[#allocation13_spill] sm:$0xff] }
 0x3c9   :  { %v10303_v16 = vor.u32 %v10883_v35, %v17068_v8  ;;  %v5419_v26 = vrot.slane %v5411_v54, %v12200_v31  ;;  %v2582_v59 = vrot.slane %v17046_v2, %v12290_v0  ;;  %v10256_v39 = vsel %vm10240_vm9, 0.0, %v10255_v5  ;;  %17069 = vst [vmem:[#allocation45_spill] sm:$0xff] %v15574_v30  ;;  %17071 = vst [vmem:[#allocation13_spill] sm:$0xff] %v15591_v51 }
 0x3ca   :  { %v15569_v35 = vand.u32 2147483647, %v15545_v29  ;;  %v5426_v43 = vrot.slane %v5412_v36, %v12200_v31  ;;  %v2586_v37 = vrot.slane %v17046_v2, %v12293_v22  ;;  %6905 = vperm.xlu0 %10388, %v6618_v18   ;;  %v5170_v15 = vrot.slane %v5163_v19, %v12200_v31 }
 0x3cb   :  { %v5195_v33 = vcombine.low %v2574_v47, %v2582_v59  ;;  %v2750_v54 = vrot.slane %v17070_v17, %v12139_v14  ;;  %v2754_v1 = vrot.slane %v17070_v17, %v12142_v41  ;;  %v10305_v5 = vsel %vm10304_vm8, %v15295_v28, %v10303_v16 }
 0x3cc   :  { %v5427_v8 = vcombine.low %v5419_v26, %v5426_v43  ;;  %v5196_v36 = vcombine.low %v2578_v44, %v2586_v37  ;;  %v2758_v2 = vrot.slane %v17070_v17, %v12145_v46  ;;  %vm10294_vm0 = vcmp.eq.f32.partialorder %v15295_v28, 0.0  ;;  %v10885_v42 = vpop.eup %10884  ;;  %v15609_v6 = vpop.permute.xlu1 %6746 }
 0x3cd   :  { %v6609_v47 = vunpack.c.l.b16 %v5170_v15  ;;  %v5203_v19 = vrot.slane %v5195_v33, %v12200_v31  ;;  %v2762_v59 = vrot.slane %v17070_v17, %v12153_v52  ;;  %vm10286_vm13 = vweird.f32 %v15391_v40  ;;  %17073 = vst [vmem:[#allocation46_spill] sm:$0xff] %v15609_v6  ;;  %v15629_v6 = vpop.permute.xlu0 %6755 }
 0x3ce   :  { %10888 = vlog2.f32 %v15569_v35  ;;  %v5434_v44 = vrot.slane %v5427_v8, %v12200_v31  ;;  %v5210_v16 = vrot.slane %v5196_v36, %v12200_v31  ;;  %v5459_v26 = vcombine.low %v2750_v54, %v2758_v2 }
 0x3cf   :  { %v10257_v43 = vsel %vm10243_vm10, inf, %v10256_v39  ;;  %v17072_v37 = vand.u32 2147483648, %v15295_v28  ;;  %6878 = vperm.xlu1 %10389, %v6609_v47   ;;  %v5460_v33 = vcombine.low %v2754_v1, %v2762_v59  ;;  %v2606_v18 = vrot.slane %v17051_v10, %v12270_v55  ;;  %v10887_v51 = vpop.eup %10886 }
 0x3d0   :  { %v15606_v30 = vmul.f32 0.03125, %v14930_v45  ;;  %v6620_v8 = vunpack.c.l.b16 %v5434_v44  ;;  %v5211_v36 = vcombine.low %v5203_v19, %v5210_v16  ;;  %v5467_v54 = vrot.slane %v5459_v26, %v12200_v31  ;;  %v17075_v44 = vld [vmem:[#allocation19_spill] sm:$0xff] }
 0x3d1   :  { %v10308_v15 = vsel %vm10306_vm5, %v17072_v37, %v10305_v5  ;;  %vm10288_vm3 = vcmp.eq.f32.partialorder %v15391_v40, 0.0  ;;  %v5474_v39 = vrot.slane %v5460_v33, %v12200_v31  ;;  %v2610_v1 = vrot.slane %v17051_v10, %v12273_v60  ;;  %17076 = vst [vmem:[#allocation19_spill] sm:$0xff] %v15629_v6 }
 0x3d2   :  { %v2614_v5 = vrot.slane %v17051_v10, %v12290_v0  ;;  %v2618_v45 = vrot.slane %v17051_v10, %v12293_v22  ;;  %v10309_v2 = vsel %vm10295_vm11, nan, %v10308_v15  ;;  %v17074_v47 = vand.u32 2147483648, %v15365_v7  ;;  %6911 = vperm.xlu0 %10388, %v6620_v8  }
 0x3d3   :  { %v5218_v59 = vrot.slane %v5211_v36, %v12200_v31  ;;  %v2782_v16 = vrot.slane %v17075_v44, %v12139_v14  ;;  %vm10297_vm12 = vcmp.eq.f32.partialorder %v15319_v58, inf  ;;  %v5475_v26 = vcombine.low %v5467_v54, %v5474_v39 }
 0x3d4   :  { %v10285_v19 = vor.u32 %v10885_v42, %v17074_v47  ;;  %v5243_v37 = vcombine.low %v2606_v18, %v2614_v5  ;;  %v5244_v33 = vcombine.low %v2610_v1, %v2618_v45  ;;  %v2786_v10 = vrot.slane %v17075_v44, %v12142_v41  ;;  %v15647_v47 = vpop.permute.xlu1 %6752 }
 0x3d5   :  { %v10337_v15 = vmul.f32 0.33333334, %v10887_v51  ;;  %v6611_v62 = vunpack.c.l.b16 %v5218_v59  ;;  %v2790_v42 = vrot.slane %v17075_v44, %v12145_v46  ;;  %v2794_v8 = vrot.slane %v17075_v44, %v12153_v52  ;;  %17077 = vst [vmem:[#allocation47_spill] sm:$0xff] %v15647_v47 }
 0x3d6   :  { %v15636_v36 = vpack.c.bf16 %v15517_v50, %v10257_v43  ;;  %vm10277_vm14 = vcmp.lt.f32.partialorder %v15365_v7, 0.0  ;;  %v5482_v18 = vrot.slane %v5475_v26, %v12200_v31  ;;  %v5251_v54 = vrot.slane %v5243_v37, %v12200_v31 }
 0x3d7   :  { %v5258_v39 = vrot.slane %v5244_v33, %v12200_v31  ;;  %v10310_v51 = vsel %vm10294_vm0, 0.0, %v10309_v2  ;;  %v15645_v1 = vand.u32 2147483647, %v15606_v30  ;;  %6884 = vperm.xlu1 %10389, %v6611_v62   ;;  %v5507_v5 = vcombine.low %v2782_v16, %v2790_v42 }
 0x3d8   :  { %v5508_v45 = vcombine.low %v2786_v10, %v2794_v8  ;;  %v10287_v50 = vsel %vm10286_vm13, %v15365_v7, %v10285_v19  ;;  %v6622_v43 = vunpack.c.l.b16 %v5482_v18  ;;  %v2638_v26 = vrot.slane %v17055_v20, %v12270_v55  ;;  %v10889_v37 = vpop.eup %10888 }
 0x3d9   :  { %v5259_v59 = vcombine.low %v5251_v54, %v5258_v39  ;;  %vm10276_vm6 = vcmp.eq.f32.partialorder %v15365_v7, 0.0  ;;  %10890 = vpow2.f32 %v10337_v15  ;;  %v5515_v28 = vrot.slane %v5507_v5, %v12200_v31  ;;  %v15667_v15 = vpop.permute.xlu0 %6761 }
 0x3da   :  { %v5522_v62 = vrot.slane %v5508_v45, %v12200_v31  ;;  %v2642_v2 = vrot.slane %v17055_v20, %v12273_v60  ;;  %v15660_v16 = vmul.f32 0.03125, %v15167_v48  ;;  %6917 = vperm.xlu0 %10388, %v6622_v43   ;;  %v2646_v33 = vrot.slane %v17055_v20, %v12290_v0  ;;  %17078 = vst [vmem:[#allocation48_spill] sm:$0xff] %v15667_v15  ;;  %v17080_v48 = vld [vmem:[#allocation14_spill] sm:$0xff] }
 0x3db   :  { %v5266_v19 = vrot.slane %v5259_v59, %v12200_v31  ;;  %v2650_v10 = vrot.slane %v17055_v20, %v12293_v22  ;;  %v17079_v42 = vand.u32 2147483648, %v15365_v7  ;;  %v2814_v54 = vrot.slane %v17080_v48, %v12139_v14 }
 0x3dc   :  { %v5523_v18 = vcombine.low %v5515_v28, %v5522_v62  ;;  %v2818_v39 = vrot.slane %v17080_v48, %v12142_v41  ;;  %vm10279_vm15 = vcmp.eq.f32.partialorder %v15391_v40, inf  ;;  %v5291_v45 = vcombine.low %v2638_v26, %v2646_v33 }
 0x3dd   :  { %v10290_v8 = vsel %vm10288_vm3, %v17079_v42, %v10287_v50  ;;  %v6613_v5 = vunpack.c.l.b16 %v5266_v19  ;;  %v5292_v43 = vcombine.low %v2642_v2, %v2650_v10  ;;  %v2822_v20 = vrot.slane %v17080_v48, %v12145_v46  ;;  %v15686_v42 = vpop.permute.xlu1 %6758 }
 0x3de   :  { %v10311_v59 = vsel %vm10297_vm12, inf, %v10310_v51  ;;  %v5530_v28 = vrot.slane %v5523_v18, %v12200_v31  ;;  %v2826_v62 = vrot.slane %v17080_v48, %v12153_v52  ;;  %17081 = vst [vmem:[#allocation14_spill] sm:$0xff] %v15686_v42  ;;  %v10319_v15 = vmul.f32 0.33333334, %v10889_v37 }
 0x3df   :  { %6890 = vperm.xlu1 %10389, %v6613_v5   ;;  %v5299_v26 = vrot.slane %v5291_v45, %v12200_v31  ;;  %v5306_v2 = vrot.slane %v5292_v43, %v12200_v31  ;;  %v5555_v19 = vcombine.low %v2814_v54, %v2822_v20  ;;  %v10291_v58 = vsel %vm10277_vm14, nan, %v10290_v8  ;;  %v15698_v5 = vpop.permute.xlu0 %6767 }
 0x3e0   :  { %10892 = vlog2.f32 %v15645_v1  ;;  %v6624_v51 = vunpack.c.l.b16 %v5530_v28  ;;  %v5556_v33 = vcombine.low %v2818_v39, %v2826_v62  ;;  %v15694_v10 = vand.u32 2147483647, %v15660_v16  ;;  %17082 = vst [vmem:[#allocation49_spill] sm:$0xff] %v15698_v5 }
 0x3e1   :  { %v5307_v50 = vcombine.low %v5299_v26, %v5306_v2  ;;  %v5563_v37 = vrot.slane %v5555_v19, %v12200_v31  ;;  %v2670_v8 = vrot.slane %v17061_v11, %v12270_v55  ;;  %v2674_v45 = vrot.slane %v17061_v11, %v12273_v60  ;;  %v17083_v19 = vld [vmem:[#allocation15_spill] sm:$0xff]  ;;  %v15717_v18 = vpop.permute.xlu1 %6764 }
 0x3e2   :  { %6923 = vperm.xlu0 %10388, %v6624_v51   ;;  %v5570_v54 = vrot.slane %v5556_v33, %v12200_v31  ;;  %v2678_v39 = vrot.slane %v17061_v11, %v12290_v0  ;;  %v10292_v43 = vsel %vm10276_vm6, 0.0, %v10291_v58  ;;  %vm10340_vm1 = vweird.f32 %v15495_v32  ;;  %17084 = vst [vmem:[#allocation15_spill] sm:$0xff] %v15717_v18 }
 0x3e3   :  { %10894 = vpow2.f32 %v10319_v15  ;;  %v5314_v20 = vrot.slane %v5307_v50, %v12200_v31  ;;  %v2682_v28 = vrot.slane %v17061_v11, %v12293_v22  ;;  %v10891_v62 = vpop.eup %10890  ;;  %v2846_v51 = vrot.slane %v17083_v19, %v12139_v14 }
 0x3e4   :  { %v5571_v26 = vcombine.low %v5563_v37, %v5570_v54  ;;  %v5339_v2 = vcombine.low %v2670_v8, %v2678_v39  ;;  %v2850_v33 = vrot.slane %v17083_v19, %v12142_v41  ;;  %10896 = vlog2.f32 %v15694_v10 }
 0x3e5   :  { %v6615_v7 = vunpack.c.l.b16 %v5314_v20  ;;  %v5340_v15 = vcombine.low %v2674_v45, %v2682_v28  ;;  %v2854_v50 = vrot.slane %v17083_v19, %v12145_v46  ;;  %v10293_v11 = vsel %vm10279_vm15, inf, %v10292_v43  ;;  %v15734_v43 = vpop.permute.xlu0 %6773 }
 0x3e6   :  { %v5578_v58 = vrot.slane %v5571_v26, %v12200_v31  ;;  %v5347_v37 = vrot.slane %v5339_v2, %v12200_v31  ;;  %v2858_v54 = vrot.slane %v17083_v19, %v12153_v52  ;;  %v17085_v8 = vand.u32 2147483648, %v15459_v12  ;;  %17086 = vst [vmem:[#allocation50_spill] sm:$0xff] %v15734_v43 }
 0x3e7   :  { %vm10342_vm2 = vcmp.eq.f32.partialorder %v15495_v32, 0.0  ;;  %6896 = vperm.xlu1 %10389, %v6615_v7   ;;  %v5354_v45 = vrot.slane %v5340_v15, %v12200_v31  ;;  %v5603_v20 = vcombine.low %v2846_v51, %v2854_v50  ;;  %v2702_v40 = vrot.slane %v17065_v61, %v12270_v55 }
 0x3e8   :  { %v10339_v39 = vor.u32 %v10891_v62, %v17085_v8  ;;  %v6626_v28 = vunpack.c.l.b16 %v5578_v58  ;;  %v5604_v26 = vcombine.low %v2850_v33, %v2858_v54  ;;  %v2706_v2 = vrot.slane %v17065_v61, %v12273_v60  ;;  %v17089_v54 = vld [vmem:[#allocation16_spill] sm:$0xff] }
 0x3e9   :  { %v2710_v5 = vrot.slane %v17065_v61, %v12290_v0  ;;  %v17087_v62 = vlaneseq  ;;  %v5355_v7 = vcombine.low %v5347_v37, %v5354_v45  ;;  %v5611_v15 = vrot.slane %v5603_v20, %v12200_v31 }
 0x3ea   :  { %v2714_v51 = vrot.slane %v17065_v61, %v12293_v22  ;;  %v10893_v50 = vpop.eup %10892  ;;  %v15746_v18 = vpack.c.bf16 %v10311_v59, %v10293_v11  ;;  %vm10331_vm4 = vcmp.lt.f32.partialorder %v15459_v12, 0.0  ;;  %6929 = vperm.xlu0 %10388, %v6626_v28   ;;  %v5618_v33 = vrot.slane %v5604_v26, %v12200_v31 }
 0x3eb   :  { %v15741_v8 = vand.u32 127, %v17087_v62  ;;  %v5387_v58 = vcombine.low %v2702_v40, %v2710_v5  ;;  %v2878_v43 = vrot.slane %v17089_v54, %v12139_v14  ;;  %v15752_v62 = vpop.permute.xlu1 %6770  ;;  %v5362_v37 = vrot.slane %v5355_v7, %v12200_v31 }
 0x3ec   :  { %17090 = vst [vmem:[#allocation16_spill] sm:$0xff] %v15752_v62  ;;  %v5388_v45 = vcombine.low %v2706_v2, %v2714_v51  ;;  %v2882_v61 = vrot.slane %v17089_v54, %v12142_v41  ;;  %v2886_v59 = vrot.slane %v17089_v54, %v12145_v46  ;;  %v10341_v11 = vsel %vm10340_vm1, %v15459_v12, %v10339_v39  ;;  %v15768_v62 = vpop.permute.xlu0 %6779 }
 0x3ed   :  { %17088 = vst [vmem:[#allocation51_spill] sm:$0xff] %v15741_v8  ;;  %v5619_v20 = vcombine.low %v5611_v15, %v5618_v33  ;;  %v5395_v5 = vrot.slane %v5387_v58, %v12200_v31  ;;  %v2890_v40 = vrot.slane %v17089_v54, %v12153_v52  ;;  %v10895_v28 = vpop.eup %10894  ;;  %v6617_v26 = vunpack.c.l.b16 %v5362_v37  ;;  %17091 = vst [vmem:[#allocation52_spill] sm:$0xff] %v15768_v62  ;;  %v17093_v62 = vld [vmem:[#allocation20_spill] sm:$0xff] }
 0x3ee   :  { %v5402_v2 = vrot.slane %v5388_v45, %v12200_v31  ;;  %v5651_v7 = vcombine.low %v2878_v43, %v2886_v59  ;;  %v2734_v51 = vrot.slane %v17070_v17, %v12270_v55  ;;  %vm10330_vm7 = vcmp.eq.f32.partialorder %v15459_v12, 0.0  ;;  %v15774_v58 = vpop.eup %10896 }
 0x3ef   :  { %v10373_v6 = vmul.f32 0.33333334, %v10893_v50  ;;  %v5626_v39 = vrot.slane %v5619_v20, %v12200_v31  ;;  %v5652_v15 = vcombine.low %v2882_v61, %v2890_v40  ;;  %v2738_v33 = vrot.slane %v17070_v17, %v12273_v60  ;;  %6902 = vperm.xlu1 %10389, %v6617_v26  }
 0x3f0   :  { %v5403_v37 = vcombine.low %v5395_v5, %v5402_v2  ;;  %v5659_v43 = vrot.slane %v5651_v7, %v12200_v31  ;;  %v2742_v45 = vrot.slane %v17070_v17, %v12290_v0  ;;  %v2746_v59 = vrot.slane %v17070_v17, %v12293_v22  ;;  %v15788_v5 = vpop.permute.xlu1 %6776 }
 0x3f1   :  { %v17092_v50 = vand.u32 2147483648, %v15459_v12  ;;  %v6628_v20 = vunpack.c.l.b16 %v5626_v39  ;;  %v5666_v40 = vrot.slane %v5652_v15, %v12200_v31  ;;  %v2910_v26 = vrot.slane %v17093_v62, %v12139_v14  ;;  %17094 = vst [vmem:[#allocation20_spill] sm:$0xff] %v15788_v5 }
 0x3f2   :  { %v5410_v2 = vrot.slane %v5403_v37, %v12200_v31  ;;  %v5435_v7 = vcombine.low %v2734_v51, %v2742_v45  ;;  %v5436_v42 = vcombine.low %v2738_v33, %v2746_v59  ;;  %v2914_v17 = vrot.slane %v17093_v62, %v12142_v41  ;;  %v15803_v45 = vpop.permute.xlu0 %6785 }
 0x3f3   :  { %v10344_v61 = vsel %vm10342_vm2, %v17092_v50, %v10341_v11  ;;  %v7057_v47 = vadd.s32 4294967288, %v15741_v8  ;;  %6935 = vperm.xlu0 %10388, %v6628_v20   ;;  %v5667_v9 = vcombine.low %v5659_v43, %v5666_v40  ;;  %v2918_v11 = vrot.slane %v17093_v62, %v12145_v46  ;;  %17095 = vst [vmem:[#allocation53_spill] sm:$0xff] %v15803_v45 }
 0x3f4   :  { %v2922_v39 = vrot.slane %v17093_v62, %v12153_v52  ;;  %vm10333_vm9 = vcmp.eq.f32.partialorder %v15495_v32, inf  ;;  %v10345_v15 = vsel %vm10331_vm4, nan, %v10344_v61  ;;  %v6619_v51 = vunpack.c.l.b16 %v5410_v2 }
 0x3f5   :  { %v5443_v33 = vrot.slane %v5435_v7, %v12200_v31  ;;  %v5450_v37 = vrot.slane %v5436_v42, %v12200_v31  ;;  %vm10322_vm8 = vweird.f32 %v15569_v35  ;;  %v5674_v43 = vrot.slane %v5667_v9, %v12200_v31 }
 0x3f6   :  { %v5699_v59 = vcombine.low %v2910_v26, %v2918_v11  ;;  %v5700_v50 = vcombine.low %v2914_v17, %v2922_v39  ;;  %v2766_v20 = vrot.slane %v17075_v44, %v12270_v55  ;;  %10898 = vpow2.f32 %v10373_v6  ;;  %6908 = vperm.xlu1 %10389, %v6619_v51   ;;  %v15817_v26 = vpop.permute.xlu1 %6782  ;;  %v17097_v39 = vld [vmem:[#allocation21_spill] sm:$0xff] }
 0x3f7   :  { %v5451_v40 = vcombine.low %v5443_v33, %v5450_v37  ;;  %v2770_v61 = vrot.slane %v17075_v44, %v12273_v60  ;;  %v2774_v42 = vrot.slane %v17075_v44, %v12290_v0  ;;  %v6630_v2 = vunpack.c.l.b16 %v5674_v43  ;;  %17096 = vst [vmem:[#allocation54_spill] sm:$0xff] %v15817_v26 }
 0x3f8   :  { %v5707_v7 = vrot.slane %v5699_v59, %v12200_v31  ;;  %v5714_v45 = vrot.slane %v5700_v50, %v12200_v31  ;;  %v2778_v9 = vrot.slane %v17075_v44, %v12293_v22  ;;  %v10346_v6 = vsel %vm10330_vm7, 0.0, %v10345_v15 }
 0x3f9   :  { %v5458_v17 = vrot.slane %v5451_v40, %v12200_v31  ;;  %v5483_v11 = vcombine.low %v2766_v20, %v2774_v42  ;;  %v2942_v51 = vrot.slane %v17097_v39, %v12139_v14  ;;  %6941 = vperm.xlu0 %10388, %v6630_v2   ;;  %v2946_v43 = vrot.slane %v17097_v39, %v12142_v41  ;;  %v15834_v40 = vpop.permute.xlu0 %6791 }
 0x3fa   :  { %v5715_v33 = vcombine.low %v5707_v7, %v5714_v45  ;;  %v5484_v37 = vcombine.low %v2770_v61, %v2778_v9  ;;  %v2950_v44 = vrot.slane %v17097_v39, %v12145_v46  ;;  %v17098_v59 = vand.u32 2147483648, %v15545_v29  ;;  %17099 = vst [vmem:[#allocation21_spill] sm:$0xff] %v15834_v40  ;;  %v17100_v45 = vld [vmem:[#allocation6_spill] sm:$0xff] }
 0x3fb   :  { %vm10324_vm10 = vcmp.eq.f32.partialorder %v15569_v35, 0.0  ;;  %v6621_v12 = vunpack.c.l.b16 %v5458_v17  ;;  %v5491_v15 = vrot.slane %v5483_v11, %v12200_v31  ;;  %v2954_v20 = vrot.slane %v17097_v39, %v12153_v52 }
 0x3fc   :  { %v10321_v50 = vor.u32 %v10895_v28, %v17098_v59  ;;  %v15837_v61 = vsub.s32 %v7057_v47, %v17100_v45  ;;  %v5722_v42 = vrot.slane %v5715_v33, %v12200_v31  ;;  %v5498_v2 = vrot.slane %v5484_v37, %v12200_v31 }
 0x3fd   :  { %v5747_v7 = vcombine.low %v2942_v51, %v2950_v44  ;;  %6914 = vperm.xlu1 %10389, %v6621_v12   ;;  %v5748_v28 = vcombine.low %v2946_v43, %v2954_v20  ;;  %v2798_v9 = vrot.slane %v17080_v48, %v12270_v55  ;;  %v2802_v17 = vrot.slane %v17080_v48, %v12273_v60  ;;  %v15852_v51 = vpop.permute.xlu1 %6788 }
 0x3fe   :  { %v2806_v11 = vrot.slane %v17080_v48, %v12290_v0  ;;  %v15849_v47 = vsel %vm10333_vm9, inf, %v10346_v6  ;;  %v6632_v59 = vunpack.c.l.b16 %v5722_v42  ;;  %v5499_v33 = vcombine.low %v5491_v15, %v5498_v2  ;;  %17101 = vst [vmem:[#allocation55_spill] sm:$0xff] %v15852_v51  ;;  %v17102_v15 = vld [vmem:[#allocation22_spill] sm:$0xff] }
 0x3ff   :  { %v5755_v37 = vrot.slane %v5747_v7, %v12200_v31  ;;  %vm10313_vm5 = vcmp.lt.f32.partialorder %v15545_v29, 0.0  ;;  %v10323_v43 = vsel %vm10322_vm8, %v15545_v29, %v10321_v50  ;;  %v5762_v44 = vrot.slane %v5748_v28, %v12200_v31 }
 0x400   :  { %v2810_v12 = vrot.slane %v17080_v48, %v12293_v22  ;;  %v5531_v32 = vcombine.low %v2798_v9, %v2806_v11  ;;  %6947 = vperm.xlu0 %10388, %v6632_v59   ;;  %v5506_v6 = vrot.slane %v5499_v33, %v12200_v31  ;;  %v2974_v20 = vrot.slane %v17102_v15, %v12139_v14  ;;  %v10899_v7 = vpop.eup %10898  ;;  %v15871_v9 = vpop.permute.xlu0 %6797 }
 0x401   :  { %v2978_v42 = vrot.slane %v17102_v15, %v12142_v41  ;;  %v2982_v2 = vrot.slane %v17102_v15, %v12145_v46  ;;  %v5763_v50 = vcombine.low %v5755_v37, %v5762_v44  ;;  %v2986_v48 = vrot.slane %v17102_v15, %v12153_v52  ;;  %17103 = vst [vmem:[#allocation22_spill] sm:$0xff] %v15871_v9 }
 0x402   :  { %v5532_v40 = vcombine.low %v2802_v17, %v2810_v12  ;;  %v5539_v28 = vrot.slane %v5531_v32, %v12200_v31  ;;  %v10355_v11 = vmul.f32 0.33333334, %v15774_v58  ;;  %v7064_v59 = vadd.s32 4294967280, %v15741_v8 }
 0x403   :  { %v6623_v33 = vunpack.c.l.b16 %v5506_v6  ;;  %v5795_v51 = vcombine.low %v2974_v20, %v2982_v2  ;;  %vm10312_vm11 = vcmp.eq.f32.partialorder %v15545_v29, 0.0  ;;  %v5770_v26 = vrot.slane %v5763_v50, %v12200_v31  ;;  %v15889_v2 = vpop.permute.xlu1 %6794 }
 0x404   :  { %v5546_v37 = vrot.slane %v5532_v40, %v12200_v31  ;;  %v5796_v17 = vcombine.low %v2978_v42, %v2986_v48  ;;  %v2830_v44 = vrot.slane %v17083_v19, %v12270_v55  ;;  %v17104_v12 = vand.u32 2147483648, %v15545_v29  ;;  %17105 = vst [vmem:[#allocation56_spill] sm:$0xff] %v15889_v2 }
 0x405   :  { %6920 = vperm.xlu1 %10389, %v6623_v33   ;;  %v5803_v58 = vrot.slane %v5795_v51, %v12200_v31  ;;  %v2834_v6 = vrot.slane %v17083_v19, %v12273_v60  ;;  %v2838_v20 = vrot.slane %v17083_v19, %v12290_v0  ;;  %v6634_v40 = vunpack.c.l.b16 %v5770_v26  ;;  %v17106_v33 = vld [vmem:[#allocation23_spill] sm:$0xff] }
 0x406   :  { %v10326_v32 = vsel %vm10324_vm10, %v17104_v12, %v10323_v43  ;;  %v5547_v42 = vcombine.low %v5539_v28, %v5546_v37  ;;  %v5810_v50 = vrot.slane %v5796_v17, %v12200_v31  ;;  %v2842_v48 = vrot.slane %v17083_v19, %v12293_v22  ;;  %v15905_v17 = vpop.permute.xlu0 %6803 }
 0x407   :  { %vm10376_vm0 = vweird.f32 %v15645_v1  ;;  %v15896_v43 = vsub.s32 %v7064_v59, %v17100_v45  ;;  %v5579_v51 = vcombine.low %v2830_v44, %v2838_v20  ;;  %v3006_v12 = vrot.slane %v17106_v33, %v12139_v14  ;;  %6953 = vperm.xlu0 %10388, %v6634_v40   ;;  %17107 = vst [vmem:[#allocation23_spill] sm:$0xff] %v15905_v17 }
 0x408   :  { %v3010_v9 = vrot.slane %v17106_v33, %v12142_v41  ;;  %v5554_v26 = vrot.slane %v5547_v42, %v12200_v31  ;;  %v5811_v28 = vcombine.low %v5803_v58, %v5810_v50  ;;  %v5580_v37 = vcombine.low %v2834_v6, %v2842_v48 }
 0x409   :  { %v3014_v19 = vrot.slane %v17106_v33, %v12145_v46  ;;  %vm10315_vm13 = vcmp.eq.f32.partialorder %v15569_v35, inf  ;;  %v10327_v59 = vsel %vm10313_vm5, nan, %v10326_v32  ;;  %10900 = vpow2.f32 %v10355_v11 }
 0x40a   :  { %v5587_v44 = vrot.slane %v5579_v51, %v12200_v31  ;;  %v3018_v20 = vrot.slane %v17106_v33, %v12153_v52  ;;  %v6625_v40 = vunpack.c.l.b16 %v5554_v26  ;;  %v5818_v58 = vrot.slane %v5811_v28, %v12200_v31  ;;  %v15922_v51 = vpop.permute.xlu1 %6800  ;;  %v15939_v29 = vpop.permute.xlu0 %6809 }
 0x40b   :  { %v5594_v6 = vrot.slane %v5580_v37, %v12200_v31  ;;  %v5843_v42 = vcombine.low %v3006_v12, %v3014_v19  ;;  %v17108_v50 = vand.u32 2147483648, %v15606_v30  ;;  %vm10378_vm3 = vcmp.eq.f32.partialorder %v15645_v1, 0.0  ;;  %17109 = vst [vmem:[#allocation57_spill] sm:$0xff] %v15922_v51 }
 0x40c   :  { %v5844_v17 = vcombine.low %v3010_v9, %v3018_v20  ;;  %v2862_v11 = vrot.slane %v17089_v54, %v12270_v55  ;;  %v2866_v32 = vrot.slane %v17089_v54, %v12273_v60  ;;  %6926 = vperm.xlu1 %10389, %v6625_v40   ;;  %v6636_v26 = vunpack.c.l.b16 %v5818_v58  ;;  %v17110_v20 = vld [vmem:[#allocation24_spill] sm:$0xff] }
 0x40d   :  { %v10375_v48 = vor.u32 %v10899_v7, %v17108_v50  ;;  %v5595_v28 = vcombine.low %v5587_v44, %v5594_v6  ;;  %v5851_v37 = vrot.slane %v5843_v42, %v12200_v31  ;;  %v2870_v12 = vrot.slane %v17089_v54, %v12290_v0  ;;  %17111 = vst [vmem:[#allocation24_spill] sm:$0xff] %v15939_v29 }
 0x40e   :  { %v10328_v7 = vsel %vm10312_vm11, 0.0, %v10327_v59  ;;  %v5858_v9 = vrot.slane %v5844_v17, %v12200_v31  ;;  %v2874_v19 = vrot.slane %v17089_v54, %v12293_v22  ;;  %v3038_v50 = vrot.slane %v17110_v20, %v12139_v14  ;;  %6959 = vperm.xlu0 %10388, %v6636_v26  }
 0x40f   :  { %v5602_v40 = vrot.slane %v5595_v28, %v12200_v31  ;;  %v5627_v44 = vcombine.low %v2862_v11, %v2870_v12  ;;  %v3042_v58 = vrot.slane %v17110_v20, %v12142_v41  ;;  %v3046_v6 = vrot.slane %v17110_v20, %v12145_v46 }
 0x410   :  { %vm10367_vm12 = vcmp.lt.f32.partialorder %v15606_v30, 0.0  ;;  %v15944_v54 = vsub.s32 %v15741_v8, %v17100_v45  ;;  %v5859_v17 = vcombine.low %v5851_v37, %v5858_v9  ;;  %v5628_v59 = vcombine.low %v2866_v32, %v2874_v19  ;;  %v15957_v37 = vpop.permute.xlu1 %6806 }
 0x411   :  { %v3050_v42 = vrot.slane %v17110_v20, %v12153_v52  ;;  %v10377_v11 = vsel %vm10376_vm0, %v15606_v30, %v10375_v48  ;;  %v6627_v26 = vunpack.c.l.b16 %v5602_v40  ;;  %v5635_v28 = vrot.slane %v5627_v44, %v12200_v31  ;;  %17112 = vst [vmem:[#allocation58_spill] sm:$0xff] %v15957_v37 }
 0x412   :  { %v5891_v12 = vcombine.low %v3038_v50, %v3046_v6  ;;  %vm10358_vm14 = vweird.f32 %v15694_v10  ;;  %v5866_v29 = vrot.slane %v5859_v17, %v12200_v31  ;;  %v5642_v51 = vrot.slane %v5628_v59, %v12200_v31 }
 0x413   :  { %v5892_v2 = vcombine.low %v3042_v58, %v3050_v42  ;;  %v2894_v32 = vrot.slane %v17093_v62, %v12270_v55  ;;  %v10329_v9 = vsel %vm10315_vm13, inf, %v10328_v7  ;;  %6932 = vperm.xlu1 %10389, %v6627_v26   ;;  %v2898_v19 = vrot.slane %v17093_v62, %v12273_v60  ;;  %v10901_v40 = vpop.eup %10900  ;;  %v17114_v42 = vld [vmem:[#allocation5_spill] sm:$0xff] }
 0x414   :  { %v5899_v48 = vrot.slane %v5891_v12, %v12200_v31  ;;  %v2902_v50 = vrot.slane %v17093_v62, %v12290_v0  ;;  %v6638_v44 = vunpack.c.l.b16 %v5866_v29  ;;  %v5643_v58 = vcombine.low %v5635_v28, %v5642_v51  ;;  %v15978_v51 = vpop.permute.xlu0 %6815 }
 0x415   :  { %v5906_v6 = vrot.slane %v5892_v2, %v12200_v31  ;;  %v2906_v17 = vrot.slane %v17093_v62, %v12293_v22  ;;  %vm10366_vm6 = vcmp.eq.f32.partialorder %v15606_v30, 0.0  ;;  %v17113_v35 = vand.u32 2147483648, %v15606_v30 }
 0x416   :  { %v5675_v59 = vcombine.low %v2894_v32, %v2902_v50  ;;  %v3070_v26 = vrot.slane %v17114_v42, %v12139_v14  ;;  %v3074_v29 = vrot.slane %v17114_v42, %v12142_v41  ;;  %6965 = vperm.xlu0 %10388, %v6638_v44   ;;  %v5650_v2 = vrot.slane %v5643_v58, %v12200_v31 }
 0x417   :  { %v10380_v7 = vsel %vm10378_vm3, %v17113_v35, %v10377_v11  ;;  %v5907_v62 = vcombine.low %v5899_v48, %v5906_v6  ;;  %v5676_v28 = vcombine.low %v2898_v19, %v2906_v17  ;;  %v3078_v12 = vrot.slane %v17114_v42, %v12145_v46  ;;  %v15994_v6 = vpop.permute.xlu1 %6812 }
 0x418   :  { %v15984_v37 = vpack.c.bf16 %v15849_v47, %v10329_v9  ;;  %v17115_v11 = vand.u32 2147483648, %v15660_v16  ;;  %vm10360_vm15 = vcmp.eq.f32.partialorder %v15694_v10, 0.0  ;;  %v5683_v50 = vrot.slane %v5675_v59, %v12200_v31 }
 0x419   :  { %v3082_v44 = vrot.slane %v17114_v42, %v12153_v52  ;;  %v6629_v35 = vunpack.c.l.b16 %v5650_v2  ;;  %v5914_v48 = vrot.slane %v5907_v62, %v12200_v31  ;;  %v5690_v19 = vrot.slane %v5676_v28, %v12200_v31 }
 0x41a   :  { %v10357_v32 = vor.u32 %v10901_v40, %v17115_v11  ;;  %v5939_v58 = vcombine.low %v3070_v26, %v3078_v12  ;;  %vm10369_vm1 = vcmp.eq.f32.partialorder %v15645_v1, inf  ;;  %v10381_v47 = vsel %vm10367_vm12, nan, %v10380_v7  ;;  %v16016_v11 = vpop.permute.xlu0 %6821 }
 0x41b   :  { %v5940_v9 = vcombine.low %v3074_v29, %v3082_v44  ;;  %v2926_v40 = vrot.slane %v17097_v39, %v12270_v55  ;;  %v2930_v17 = vrot.slane %v17097_v39, %v12273_v60  ;;  %v16004_v59 = vadd.s32 4294967272, %v15741_v8  ;;  %6938 = vperm.xlu1 %10389, %v6629_v35   ;;  %v17116_v44 = vld [vmem:[#allocation7_spill] sm:$0xff]  ;;  %v16031_v57 = vpop.permute.xlu1 %6818 }
 0x41c   :  { %v6640_v2 = vunpack.c.l.b16 %v5914_v48  ;;  %v5691_v26 = vcombine.low %v5683_v50, %v5690_v19  ;;  %v5947_v62 = vrot.slane %v5939_v58, %v12200_v31  ;;  %vm10349_vm2 = vcmp.lt.f32.partialorder %v15660_v16, 0.0 }
 0x41d   :  { %v10359_v7 = vsel %vm10358_vm14, %v15660_v16, %v10357_v32  ;;  %v5954_v29 = vrot.slane %v5940_v9, %v12200_v31  ;;  %v2934_v28 = vrot.slane %v17097_v39, %v12290_v0  ;;  %v2938_v12 = vrot.slane %v17097_v39, %v12293_v22 }
 0x41e   :  { %6971 = vperm.xlu0 %10388, %v6640_v2   ;;  %v5698_v50 = vrot.slane %v5691_v26, %v12200_v31  ;;  %v3102_v35 = vrot.slane %v17116_v44, %v12139_v14  ;;  %v3106_v48 = vrot.slane %v17116_v44, %v12142_v41  ;;  %v3110_v32 = vrot.slane %v17116_v44, %v12145_v46 }
 0x41f   :  { %v5955_v19 = vcombine.low %v5947_v62, %v5954_v29  ;;  %v5723_v58 = vcombine.low %v2926_v40, %v2934_v28  ;;  %v5724_v9 = vcombine.low %v2930_v17, %v2938_v12  ;;  %v3114_v39 = vrot.slane %v17116_v44, %v12153_v52 }
 0x420   :  { %v10382_v2 = vsel %vm10366_vm6, 0.0, %v10381_v47  ;;  %v6631_v5 = vunpack.c.l.b16 %v5698_v50  ;;  %v5987_v26 = vcombine.low %v3102_v35, %v3110_v32  ;;  %v2958_v21 = vrot.slane %v17102_v15, %v12270_v55 }
 0x421   :  { %vm10348_vm4 = vcmp.eq.f32.partialorder %v15660_v16, 0.0  ;;  %v5962_v53 = vrot.slane %v5955_v19, %v12200_v31  ;;  %v5731_v40 = vrot.slane %v5723_v58, %v12200_v31  ;;  %v5738_v17 = vrot.slane %v5724_v9, %v12200_v31  ;;  %v16049_v19 = vpop.permute.xlu0 %6827 }
 0x422   :  { %v5988_v62 = vcombine.low %v3106_v48, %v3114_v39  ;;  %v17117_v29 = vand.u32 2147483648, %v15660_v16  ;;  %6944 = vperm.xlu1 %10389, %v6631_v5   ;;  %v5995_v47 = vrot.slane %v5987_v26, %v12200_v31  ;;  %v2962_v28 = vrot.slane %v17102_v15, %v12273_v60 }
 0x423   :  { %v2966_v12 = vrot.slane %v17102_v15, %v12290_v0  ;;  %v6642_v50 = vunpack.c.l.b16 %v5962_v53  ;;  %v5739_v35 = vcombine.low %v5731_v40, %v5738_v17  ;;  %v2970_v48 = vrot.slane %v17102_v15, %v12293_v22  ;;  %v16068_v17 = vpop.permute.xlu1 %6824 }
 0x424   :  { %v10362_v30 = vsel %vm10360_vm15, %v17117_v29, %v10359_v7  ;;  %v6002_v32 = vrot.slane %v5988_v62, %v12200_v31  ;;  %v10383_v5 = vsel %vm10369_vm1, inf, %v10382_v2  ;;  %vm10351_vm7 = vcmp.eq.f32.partialorder %v15694_v10, inf }
 0x425   :  { %v5771_v7 = vcombine.low %v2958_v21, %v2966_v12  ;;  %v3230_v58 = vrot.slane %v15193_v4, %v12139_v14  ;;  %v3234_v53 = vrot.slane %v15193_v4, %v12142_v41  ;;  %6977 = vperm.xlu0 %10388, %v6642_v50   ;;  %v5746_v9 = vrot.slane %v5739_v35, %v12200_v31 }
 0x426   :  { %v6003_v39 = vcombine.low %v5995_v47, %v6002_v32  ;;  %v5772_v26 = vcombine.low %v2962_v28, %v2970_v48  ;;  %v3238_v15 = vrot.slane %v15193_v4, %v12145_v46  ;;  %v10363_v1 = vsel %vm10349_vm2, nan, %v10362_v30 }
 0x427   :  { %v5779_v2 = vrot.slane %v5771_v7, %v12200_v31  ;;  %v3242_v21 = vrot.slane %v15193_v4, %v12153_v52  ;;  %v2990_v40 = vrot.slane %v17106_v33, %v12270_v55  ;;  %v6633_v62 = vunpack.c.l.b16 %v5746_v9 }
 0x428   :  { %v6010_v29 = vrot.slane %v6003_v39, %v12200_v31  ;;  %v5786_v47 = vrot.slane %v5772_v26, %v12200_v31  ;;  %v6179_v28 = vcombine.low %v3230_v58, %v3238_v15  ;;  %v7113_v12 = vadd.s32 4294967224, %v15741_v8  ;;  %v16080_v39 = vpop.permute.xlu0 %6833 }
 0x429   :  { %v6180_v50 = vcombine.low %v3234_v53, %v3242_v21  ;;  %v2994_v30 = vrot.slane %v17106_v33, %v12273_v60  ;;  %v2998_v35 = vrot.slane %v17106_v33, %v12290_v0  ;;  %6950 = vperm.xlu1 %10389, %v6633_v62   ;;  %v3002_v9 = vrot.slane %v17106_v33, %v12293_v22 }
 0x42a   :  { %v6644_v32 = vunpack.c.l.b16 %v6010_v29  ;;  %v5787_v48 = vcombine.low %v5779_v2, %v5786_v47  ;;  %v6187_v7 = vrot.slane %v6179_v28, %v12200_v31  ;;  %v10364_v58 = vsel %vm10348_vm4, 0.0, %v10363_v1  ;;  %v16099_v47 = vpop.permute.xlu1 %6830 }
 0x42b   :  { %v6194_v53 = vrot.slane %v6180_v50, %v12200_v31  ;;  %v5819_v26 = vcombine.low %v2990_v40, %v2998_v35  ;;  %v3262_v15 = vrot.slane %v15299_v38, %v12139_v14  ;;  %v5820_v2 = vcombine.low %v2994_v30, %v3002_v9 }
 0x42c   :  { %6983 = vperm.xlu0 %10388, %v6644_v32   ;;  %v5794_v21 = vrot.slane %v5787_v48, %v12200_v31  ;;  %v3266_v62 = vrot.slane %v15299_v38, %v12142_v41  ;;  %v3270_v33 = vrot.slane %v15299_v38, %v12145_v46  ;;  %v16094_v16 = vsub.s32 %v16004_v59, %v17100_v45 }
 0x42d   :  { %v6195_v1 = vcombine.low %v6187_v7, %v6194_v53  ;;  %v5827_v40 = vrot.slane %v5819_v26, %v12200_v31  ;;  %v3274_v29 = vrot.slane %v15299_v38, %v12153_v52  ;;  %v10365_v28 = vsel %vm10351_vm7, inf, %v10364_v58  ;;  %v16115_v26 = vpop.permute.xlu0 %6839 }
 0x42e   :  { %v6635_v50 = vunpack.c.l.b16 %v5794_v21  ;;  %v5834_v30 = vrot.slane %v5820_v2, %v12200_v31  ;;  %v6227_v35 = vcombine.low %v3262_v15, %v3270_v33  ;;  %v3022_v59 = vrot.slane %v17110_v20, %v12270_v55 }
 0x42f   :  { %v6202_v32 = vrot.slane %v6195_v1, %v12200_v31  ;;  %v6228_v48 = vcombine.low %v3266_v62, %v3274_v29  ;;  %v3026_v7 = vrot.slane %v17110_v20, %v12273_v60  ;;  %v16110_v9 = vsub.s32 %v7113_v12, %v17100_v45 }
 0x430   :  { %6956 = vperm.xlu1 %10389, %v6635_v50   ;;  %v5835_v53 = vcombine.low %v5827_v40, %v5834_v30  ;;  %v6235_v10 = vrot.slane %v6227_v35, %v12200_v31  ;;  %v3030_v58 = vrot.slane %v17110_v20, %v12290_v0  ;;  %v16117_v15 = vpack.c.bf16 %v10383_v5, %v10365_v28  ;;  %v16131_v30 = vpop.permute.xlu1 %6836 }
 0x431   :  { %v6652_v21 = vunpack.c.l.b16 %v6202_v32  ;;  %v6242_v2 = vrot.slane %v6228_v48, %v12200_v31  ;;  %v3034_v62 = vrot.slane %v17110_v20, %v12293_v22  ;;  %v3294_v1 = vrot.slane %v15369_v13, %v12139_v14 }
 0x432   :  { %v5842_v12 = vrot.slane %v5835_v53, %v12200_v31  ;;  %v5867_v33 = vcombine.low %v3022_v59, %v3030_v58  ;;  %v3298_v40 = vrot.slane %v15369_v13, %v12142_v41  ;;  %v3302_v5 = vrot.slane %v15369_v13, %v12145_v46 }
 0x433   :  { %7007 = vperm.xlu0 %10388, %v6652_v21   ;;  %v6243_v29 = vcombine.low %v6235_v10, %v6242_v2  ;;  %v5868_v50 = vcombine.low %v3026_v7, %v3034_v62  ;;  %v3306_v28 = vrot.slane %v15369_v13, %v12153_v52  ;;  %v7078_v20 = vadd.s32 4294967264, %v15741_v8 }
 0x434   :  { %v7127_v35 = vadd.s32 4294967208, %v15741_v8  ;;  %v6637_v32 = vunpack.c.l.b16 %v5842_v12  ;;  %v5875_v48 = vrot.slane %v5867_v33, %v12200_v31  ;;  %v6275_v7 = vcombine.low %v3294_v1, %v3302_v5  ;;  %v16145_v12 = vpop.permute.xlu0 %6845 }
 0x435   :  { %v6250_v59 = vrot.slane %v6243_v29, %v12200_v31  ;;  %v5882_v53 = vrot.slane %v5868_v50, %v12200_v31  ;;  %v6276_v10 = vcombine.low %v3298_v40, %v3306_v28  ;;  %v7085_v58 = vadd.s32 4294967256, %v15741_v8 }
 0x436   :  { %6962 = vperm.xlu1 %10389, %v6637_v32   ;;  %v3054_v21 = vrot.slane %v17114_v42, %v12270_v55  ;;  %v3058_v2 = vrot.slane %v17114_v42, %v12273_v60  ;;  %v3062_v62 = vrot.slane %v17114_v42, %v12290_v0  ;;  %v6283_v50 = vrot.slane %v6275_v7, %v12200_v31 }
 0x437   :  { %v6654_v33 = vunpack.c.l.b16 %v6250_v59  ;;  %v5883_v29 = vcombine.low %v5875_v48, %v5882_v53  ;;  %v6290_v1 = vrot.slane %v6276_v10, %v12200_v31  ;;  %v16150_v40 = vsub.s32 %v7078_v20, %v17100_v45  ;;  %v16161_v53 = vpop.permute.xlu1 %6842 }
 0x438   :  { %v3066_v5 = vrot.slane %v17114_v42, %v12293_v22  ;;  %v5915_v28 = vcombine.low %v3054_v21, %v3062_v62  ;;  %v3326_v32 = vrot.slane %v15482_v49, %v12139_v14  ;;  %v3330_v48 = vrot.slane %v15482_v49, %v12142_v41 }
 0x439   :  { %7013 = vperm.xlu0 %10388, %v6654_v33   ;;  %v5890_v3 = vrot.slane %v5883_v29, %v12200_v31  ;;  %v6291_v56 = vcombine.low %v6283_v50, %v6290_v1  ;;  %v3334_v59 = vrot.slane %v15482_v49, %v12145_v46  ;;  %v16164_v20 = vsub.s32 %v7127_v35, %v17100_v45 }
 0x43a   :  { %v5916_v42 = vcombine.low %v3058_v2, %v3066_v5  ;;  %v5923_v7 = vrot.slane %v5915_v28, %v12200_v31  ;;  %v3338_v10 = vrot.slane %v15482_v49, %v12153_v52  ;;  %v16170_v21 = vsub.s32 %v7085_v58, %v17100_v45  ;;  %v16178_v5 = vpop.permute.xlu0 %6851 }
 0x43b   :  { %v6639_v62 = vunpack.c.l.b16 %v5890_v3  ;;  %v6298_v33 = vrot.slane %v6291_v56, %v12200_v31  ;;  %v6323_v29 = vcombine.low %v3326_v32, %v3334_v59  ;;  %v3086_v35 = vrot.slane %v17116_v44, %v12270_v55 }
 0x43c   :  { %v5930_v50 = vrot.slane %v5916_v42, %v12200_v31  ;;  %v6324_v1 = vcombine.low %v3330_v48, %v3338_v10  ;;  %v3090_v2 = vrot.slane %v17116_v44, %v12273_v60  ;;  %v7141_v28 = vadd.s32 4294967192, %v15741_v8 }
 0x43d   :  { %6968 = vperm.xlu1 %10389, %v6639_v62   ;;  %v6656_v58 = vunpack.c.l.b16 %v6298_v33  ;;  %v6331_v3 = vrot.slane %v6323_v29, %v12200_v31  ;;  %v3094_v56 = vrot.slane %v17116_v44, %v12290_v0  ;;  %v7092_v32 = vadd.s32 4294967248, %v15741_v8  ;;  %v16194_v29 = vpop.permute.xlu1 %6848 }
 0x43e   :  { %v5931_v48 = vcombine.low %v5923_v7, %v5930_v50  ;;  %v6338_v59 = vrot.slane %v6324_v1, %v12200_v31  ;;  %v3098_v42 = vrot.slane %v17116_v44, %v12293_v22  ;;  %v3358_v24 = vrot.slane %v15636_v36, %v12139_v14  ;;  %17118 = vst [vmem:[#allocation5_spill] sm:$0xff] %v16194_v29 }
 0x43f   :  { %7019 = vperm.xlu0 %10388, %v6656_v58   ;;  %v5963_v10 = vcombine.low %v3086_v35, %v3094_v56  ;;  %v3362_v62 = vrot.slane %v15636_v36, %v12142_v41  ;;  %v3366_v33 = vrot.slane %v15636_v36, %v12145_v46  ;;  %v3370_v44 = vrot.slane %v15636_v36, %v12153_v52 }
 0x440   :  { %v5938_v7 = vrot.slane %v5931_v48, %v12200_v31  ;;  %v6339_v50 = vcombine.low %v6331_v3, %v6338_v59  ;;  %v5964_v1 = vcombine.low %v3090_v2, %v3098_v42  ;;  %v16200_v35 = vsub.s32 %v7141_v28, %v17100_v45  ;;  %v16206_v48 = vpop.permute.xlu0 %6857 }
 0x441   :  { %v7099_v58 = vadd.s32 4294967240, %v15741_v8  ;;  %v5971_v56 = vrot.slane %v5963_v10, %v12200_v31  ;;  %v6371_v27 = vcombine.low %v3358_v24, %v3366_v33  ;;  %v6372_v29 = vcombine.low %v3362_v62, %v3370_v44  ;;  %17119 = vst [vmem:[#allocation7_spill] sm:$0xff] %v16206_v48 }
 0x442   :  { %v6641_v34 = vunpack.c.l.b16 %v5938_v7  ;;  %v6346_v23 = vrot.slane %v6339_v50, %v12200_v31  ;;  %v5978_v25 = vrot.slane %v5964_v1, %v12200_v31  ;;  %v16209_v2 = vsub.s32 %v7092_v32, %v17100_v45 }
 0x443   :  { %v6379_v3 = vrot.slane %v6371_v27, %v12200_v31  ;;  %v3214_v28 = vrot.slane %v15193_v4, %v12270_v55  ;;  %v3218_v59 = vrot.slane %v15193_v4, %v12273_v60  ;;  %v6386_v10 = vrot.slane %v6372_v29, %v12200_v31 }
 0x444   :  { %6974 = vperm.xlu1 %10389, %v6641_v34   ;;  %v6658_v24 = vunpack.c.l.b16 %v6346_v23  ;;  %v5979_v42 = vcombine.low %v5971_v56, %v5978_v25  ;;  %v3222_v62 = vrot.slane %v15193_v4, %v12290_v0  ;;  %v16220_v33 = vsub.s32 %v7099_v58, %v17100_v45  ;;  %v16228_v34 = vpop.permute.xlu1 %6854 }
 0x445   :  { %v3226_v27 = vrot.slane %v15193_v4, %v12293_v22  ;;  %v3374_v32 = vrot.slane %v15746_v18, %v12270_v55  ;;  %v3378_v7 = vrot.slane %v15746_v18, %v12273_v60  ;;  %17120 = vst [vmem:[#allocation59_spill] sm:$0xff] %v16228_v34  ;;  %v6387_v23 = vcombine.low %v6379_v3, %v6386_v10 }
 0x446   :  { %7025 = vperm.xlu0 %10388, %v6658_v24   ;;  %v5986_v25 = vrot.slane %v5979_v42, %v12200_v31  ;;  %v6155_v29 = vcombine.low %v3214_v28, %v3222_v62  ;;  %v3382_v50 = vrot.slane %v15746_v18, %v12290_v0  ;;  %v7106_v1 = vadd.s32 4294967232, %v15741_v8  ;;  %v16239_v42 = vpop.permute.xlu0 %6863 }
 0x447   :  { %v7120_v4 = vadd.s32 4294967216, %v15741_v8  ;;  %v6156_v44 = vcombine.low %v3218_v59, %v3226_v27  ;;  %v3386_v58 = vrot.slane %v15746_v18, %v12293_v22  ;;  %v6394_v48 = vrot.slane %v6387_v23, %v12200_v31  ;;  %17121 = vst [vmem:[#allocation60_spill] sm:$0xff] %v16239_v42 }
 0x448   :  { %v6643_v56 = vunpack.c.l.b16 %v5986_v25  ;;  %v6163_v24 = vrot.slane %v6155_v29, %v12200_v31  ;;  %v6395_v34 = vcombine.low %v3374_v32, %v3382_v50  ;;  %v7134_v3 = vadd.s32 4294967200, %v15741_v8 }
 0x449   :  { %v6170_v28 = vrot.slane %v6156_v44, %v12200_v31  ;;  %v6396_v10 = vcombine.low %v3378_v7, %v3386_v58  ;;  %v3246_v62 = vrot.slane %v15299_v38, %v12270_v55  ;;  %v6660_v59 = vunpack.c.l.b16 %v6394_v48  ;;  %v16254_v44 = vpop.permute.xlu1 %6860 }
 0x44a   :  { %6980 = vperm.xlu1 %10389, %v6643_v56   ;;  %v6403_v27 = vrot.slane %v6395_v34, %v12200_v31  ;;  %v3250_v25 = vrot.slane %v15299_v38, %v12273_v60  ;;  %v3254_v32 = vrot.slane %v15299_v38, %v12290_v0  ;;  %v7148_v23 = vadd.s32 4294967184, %v15741_v8  ;;  %17122 = vst [vmem:[#allocation61_spill] sm:$0xff] %v16254_v44  ;;  %v16272_v44 = vpop.permute.xlu0 %6869 }
 0x44b   :  { %v6171_v29 = vcombine.low %v6163_v24, %v6170_v28  ;;  %v6410_v50 = vrot.slane %v6396_v10, %v12200_v31  ;;  %v3258_v7 = vrot.slane %v15299_v38, %v12293_v22  ;;  %7031 = vperm.xlu0 %10388, %v6660_v59   ;;  %v3390_v34 = vrot.slane %v15746_v18, %v12139_v14 }
 0x44c   :  { %v6203_v48 = vcombine.low %v3246_v62, %v3254_v32  ;;  %v3394_v58 = vrot.slane %v15746_v18, %v12142_v41  ;;  %v3398_v56 = vrot.slane %v15746_v18, %v12145_v46  ;;  %v3402_v38 = vrot.slane %v15746_v18, %v12153_v52 }
 0x44d   :  { %v6178_v24 = vrot.slane %v6171_v29, %v12200_v31  ;;  %v6411_v28 = vcombine.low %v6403_v27, %v6410_v50  ;;  %v6204_v10 = vcombine.low %v3250_v25, %v3258_v7  ;;  %v16266_v8 = vsub.s32 %v7106_v1, %v17100_v45 }
 0x44e   :  { %v16269_v62 = vsub.s32 %v7120_v4, %v17100_v45  ;;  %v6211_v59 = vrot.slane %v6203_v48, %v12200_v31  ;;  %v6419_v32 = vcombine.low %v3390_v34, %v3398_v56  ;;  %vm7062_vm9 = vcmask 130112  }
 0x44f   :  { %v6651_v42 = vunpack.c.l.b16 %v6178_v24  ;;  %v6418_v29 = vrot.slane %v6411_v28, %v12200_v31  ;;  %v6218_v27 = vrot.slane %v6204_v10, %v12200_v31  ;;  %v6420_v25 = vcombine.low %v3394_v58, %v3402_v38  ;;  %v16288_v58 = vpop.permute.xlu1 %6866 }
 0x450   :  { %v16277_v18 = vsub.s32 %v7134_v3, %v17100_v45  ;;  %v6427_v1 = vrot.slane %v6419_v32, %v12200_v31  ;;  %v3278_v4 = vrot.slane %v15369_v13, %v12270_v55  ;;  %v3282_v50 = vrot.slane %v15369_v13, %v12273_v60 }
 0x451   :  { %v16285_v7 = vsub.s32 %v7148_v23, %v17100_v45  ;;  %7004 = vperm.xlu1 %10389, %v6651_v42   ;;  %v6661_v48 = vunpack.c.l.b16 %v6418_v29  ;;  %v6219_v34 = vcombine.low %v6211_v59, %v6218_v27  ;;  %v6434_v56 = vrot.slane %v6420_v25, %v12200_v31  ;;  %v16307_v27 = vpop.permute.xlu0 %6875 }
 0x452   :  { %v7327_v3 = vrot.slane %v15978_v51, %v15837_v61  ;;  %v3286_v24 = vrot.slane %v15369_v13, %v12290_v0  ;;  %v3290_v28 = vrot.slane %v15369_v13, %v12293_v22  ;;  %v3406_v23 = vrot.slane %v15984_v37, %v12270_v55 }
 0x453   :  { %7034 = vperm.xlu0 %10388, %v6661_v48   ;;  %v6226_v42 = vrot.slane %v6219_v34, %v12200_v31  ;;  %v6435_v10 = vcombine.low %v6427_v1, %v6434_v56  ;;  %v3410_v38 = vrot.slane %v15984_v37, %v12273_v60  ;;  %v3414_v59 = vrot.slane %v15984_v37, %v12290_v0 }
 0x454   :  { %vm7069_vm8 = vcmask 195712   ;;  %v6251_v51 = vcombine.low %v3278_v4, %v3286_v24  ;;  %v6252_v32 = vcombine.low %v3282_v50, %v3290_v28  ;;  %v3418_v29 = vrot.slane %v15984_v37, %v12293_v22 }
 0x455   :  { %v7323_v13 = vrot.slane %v15994_v6, %v15944_v54  ;;  %v6653_v25 = vunpack.c.l.b16 %v6226_v42  ;;  %v6442_v1 = vrot.slane %v6435_v10, %v12200_v31  ;;  %v6443_v48 = vcombine.low %v3406_v23, %v3414_v59  ;;  %v16321_v10 = vpop.permute.xlu1 %6872 }
 0x456   :  { %v3310_v34 = vrot.slane %v15482_v49, %v12270_v55  ;;  %v7337_v56 = vrot.slane %v16016_v11, %v16094_v16  ;;  %v6259_v4 = vrot.slane %v6251_v51, %v12200_v31  ;;  %v6266_v50 = vrot.slane %v6252_v32, %v12200_v31 }
 0x457   :  { %v6444_v24 = vcombine.low %v3410_v38, %v3418_v29  ;;  %7010 = vperm.xlu1 %10389, %v6653_v25   ;;  %v6662_v28 = vunpack.c.l.b16 %v6442_v1  ;;  %v6451_v6 = vrot.slane %v6443_v48, %v12200_v31  ;;  %v3314_v42 = vrot.slane %v15482_v49, %v12273_v60 }
 0x458   :  { %v3318_v23 = vrot.slane %v15482_v49, %v12290_v0  ;;  %vm7076_vm10 = vcmask 261312   ;;  %v6267_v59 = vcombine.low %v6259_v4, %v6266_v50  ;;  %v7328_v51 = vsel %vm7062_vm9, %v7327_v3, %v7323_v13 }
 0x459   :  { %v6458_v11 = vrot.slane %v6444_v24, %v12200_v31  ;;  %v3322_v38 = vrot.slane %v15482_v49, %v12293_v22  ;;  %7037 = vperm.xlu0 %10388, %v6662_v28   ;;  %v3422_v29 = vrot.slane %v15984_v37, %v12139_v14  ;;  %v3426_v25 = vrot.slane %v15984_v37, %v12142_v41  ;;  %v16336_v49 = vpop.permute.xlu0 %6881 }
 0x45a   :  { %v6299_v32 = vcombine.low %v3310_v34, %v3318_v23  ;;  %v3430_v1 = vrot.slane %v15984_v37, %v12145_v46  ;;  %vm7083_vm5 = vcmask 326912   ;;  %v6274_v48 = vrot.slane %v6267_v59, %v12200_v31 }
 0x45b   :  { %v6459_v4 = vcombine.low %v6451_v6, %v6458_v11  ;;  %v6300_v50 = vcombine.low %v3314_v42, %v3322_v38  ;;  %v3434_v3 = vrot.slane %v15984_v37, %v12153_v52  ;;  %v7332_v24 = vrot.slane %v16031_v57, %v15896_v43  ;;  %v16351_v57 = vpop.permute.xlu1 %6878 }
 0x45c   :  { %v6307_v13 = vrot.slane %v6299_v32, %v12200_v31  ;;  %v6467_v34 = vcombine.low %v3422_v29, %v3430_v1  ;;  %v3342_v28 = vrot.slane %v15636_v36, %v12270_v55  ;;  %v6655_v23 = vunpack.c.l.b16 %v6274_v48 }
 0x45d   :  { %v6466_v45 = vrot.slane %v6459_v4, %v12200_v31  ;;  %v6314_v6 = vrot.slane %v6300_v50, %v12200_v31  ;;  %v6468_v42 = vcombine.low %v3426_v25, %v3434_v3  ;;  %v7333_v37 = vsel %vm7069_vm8, %v7332_v24, %v7328_v51  ;;  %v16365_v24 = vpop.permute.xlu0 %6887 }
 0x45e   :  { %v6475_v59 = vrot.slane %v6467_v34, %v12200_v31  ;;  %v3346_v11 = vrot.slane %v15636_v36, %v12273_v60  ;;  %v3350_v38 = vrot.slane %v15636_v36, %v12290_v0  ;;  %vm7090_vm11 = vcmask 392512   ;;  %7016 = vperm.xlu1 %10389, %v6655_v23  }
 0x45f   :  { %v6663_v32 = vunpack.c.l.b16 %v6466_v45  ;;  %v6315_v29 = vcombine.low %v6307_v13, %v6314_v6  ;;  %v6482_v1 = vrot.slane %v6468_v42, %v12200_v31  ;;  %v3354_v25 = vrot.slane %v15636_v36, %v12293_v22 }
 0x460   :  { %v7347_v51 = vrot.slane %v16049_v19, %v16170_v21  ;;  %v6347_v48 = vcombine.low %v3342_v28, %v3350_v38  ;;  %v3438_v4 = vrot.slane %v16117_v15, %v12270_v55  ;;  %v3442_v50 = vrot.slane %v16117_v15, %v12273_v60 }
 0x461   :  { %7040 = vperm.xlu0 %10388, %v6663_v32   ;;  %v6322_v3 = vrot.slane %v6315_v29, %v12200_v31  ;;  %v6483_v45 = vcombine.low %v6475_v59, %v6482_v1  ;;  %v6348_v13 = vcombine.low %v3346_v11, %v3354_v25  ;;  %v3446_v34 = vrot.slane %v16117_v15, %v12290_v0  ;;  %v17123_v29 = vld [vmem:[#allocation26_spill] sm:$0xff] }
 0x462   :  { %vm7097_vm0 = vcmask 458112   ;;  %v6355_v36 = vrot.slane %v6347_v48, %v12200_v31  ;;  %v3450_v19 = vrot.slane %v16117_v15, %v12293_v22  ;;  %v7338_v28 = vsel %vm7076_vm10, %v7337_v56, %v7333_v37  ;;  %v16380_v56 = vpop.permute.xlu1 %6884 }
 0x463   :  { %v7342_v23 = vrot.slane %v16068_v17, %v16150_v40  ;;  %v6657_v6 = vunpack.c.l.b16 %v6322_v3  ;;  %v6490_v42 = vrot.slane %v6483_v45, %v12200_v31  ;;  %v6362_v59 = vrot.slane %v6348_v13, %v12200_v31 }
 0x464   :  { %v6491_v11 = vcombine.low %v3438_v4, %v3446_v34  ;;  %vm7104_vm13 = vcmask 523712   ;;  %v6492_v38 = vcombine.low %v3442_v50, %v3450_v19  ;;  %v3118_v1 = vrot.slane %v17123_v29, %v12270_v55 }
 0x465   :  { %v7343_v32 = vsel %vm7083_vm5, %v7342_v23, %v7338_v28  ;;  %v3122_v25 = vrot.slane %v17123_v29, %v12273_v60  ;;  %7022 = vperm.xlu1 %10389, %v6657_v6   ;;  %v6664_v17 = vunpack.c.l.b16 %v6490_v42  ;;  %v6363_v37 = vcombine.low %v6355_v36, %v6362_v59  ;;  %v16397_v23 = vpop.permute.xlu0 %6893 }
 0x466   :  { %v6499_v48 = vrot.slane %v6491_v11, %v12200_v31  ;;  %v3126_v4 = vrot.slane %v17123_v29, %v12290_v0  ;;  %vm7111_vm3 = vcmask 589312   ;;  %v7357_v50 = vrot.slane %v16080_v39, %v16220_v33  ;;  %17124 = vst [vmem:[#allocation26_spill] sm:$0xff] %v16397_v23 }
 0x467   :  { %v6506_v3 = vrot.slane %v6492_v38, %v12200_v31  ;;  %v3130_v45 = vrot.slane %v17123_v29, %v12293_v22  ;;  %v3454_v13 = vrot.slane %v16117_v15, %v12139_v14  ;;  %7043 = vperm.xlu0 %10388, %v6664_v17   ;;  %v6370_v34 = vrot.slane %v6363_v37, %v12200_v31 }
 0x468   :  { %v6011_v36 = vcombine.low %v3118_v1, %v3126_v4  ;;  %v3458_v19 = vrot.slane %v16117_v15, %v12142_v41  ;;  %v3462_v28 = vrot.slane %v16117_v15, %v12145_v46  ;;  %vm7118_vm12 = vcmask 654912  }
 0x469   :  { %v6507_v39 = vcombine.low %v6499_v48, %v6506_v3  ;;  %v6012_v6 = vcombine.low %v3122_v25, %v3130_v45  ;;  %v3466_v42 = vrot.slane %v16117_v15, %v12153_v52  ;;  %v7348_v59 = vsel %vm7090_vm11, %v7347_v51, %v7343_v32  ;;  %v16409_v48 = vpop.permute.xlu1 %6890 }
 0x46a   :  { %v6659_v11 = vunpack.c.l.b16 %v6370_v34  ;;  %v6019_v38 = vrot.slane %v6011_v36, %v12200_v31  ;;  %v6515_v1 = vcombine.low %v3454_v13, %v3462_v28  ;;  %v7352_v17 = vrot.slane %v16099_v47, %v16209_v2 }
 0x46b   :  { %vm7125_vm14 = vcmask 720512   ;;  %v6514_v37 = vrot.slane %v6507_v39, %v12200_v31  ;;  %v6026_v4 = vrot.slane %v6012_v6, %v12200_v31  ;;  %v6516_v23 = vcombine.low %v3458_v19, %v3466_v42  ;;  %v16425_v6 = vpop.permute.xlu0 %6899 }
 0x46c   :  { %v3134_v25 = vrot.slane %v17123_v29, %v12139_v14  ;;  %7028 = vperm.xlu1 %10389, %v6659_v11   ;;  %v6523_v15 = vrot.slane %v6515_v1, %v12200_v31  ;;  %v7353_v51 = vsel %vm7097_vm0, %v7352_v17, %v7348_v59  ;;  %v3138_v32 = vrot.slane %v17123_v29, %v12142_v41 }
 0x46d   :  { %v3142_v47 = vrot.slane %v17123_v29, %v12145_v46  ;;  %vm7132_vm6 = vcmask 786112   ;;  %v6665_v3 = vunpack.c.l.b16 %v6514_v37  ;;  %v6027_v45 = vcombine.low %v6019_v38, %v6026_v4  ;;  %v16440_v4 = vpop.permute.xlu1 %6896 }
 0x46e   :  { %v6530_v13 = vrot.slane %v6516_v23, %v12200_v31  ;;  %v3146_v34 = vrot.slane %v17123_v29, %v12153_v52  ;;  %v7367_v36 = vrot.slane %v16115_v26, %v16110_v9  ;;  %v7358_v28 = vsel %vm7104_vm13, %v7357_v50, %v7353_v51 }
 0x46f   :  { %v6035_v19 = vcombine.low %v3134_v25, %v3142_v47  ;;  %v7362_v39 = vrot.slane %v16131_v30, %v16266_v8  ;;  %vm7139_vm15 = vcmask 851712   ;;  %7046 = vperm.xlu0 %10388, %v6665_v3   ;;  %v6034_v42 = vrot.slane %v6027_v45, %v12200_v31 }
 0x470   :  { %v6531_v59 = vcombine.low %v6523_v15, %v6530_v13  ;;  %v6036_v23 = vcombine.low %v3138_v32, %v3146_v34  ;;  %v3150_v29 = vrot.slane %v15076_v63, %v12270_v55  ;;  %vm7146_vm1 = vcmask 917312  }
 0x471   :  { %v6043_v26 = vrot.slane %v6035_v19, %v12200_v31  ;;  %v7363_v11 = vsel %vm7111_vm3, %v7362_v39, %v7358_v28  ;;  %v3154_v50 = vrot.slane %v15076_v63, %v12273_v60  ;;  %v3158_v30 = vrot.slane %v15076_v63, %v12290_v0  ;;  %v16455_v28 = vpop.permute.xlu0 %6905 }
 0x472   :  { %v6645_v38 = vunpack.c.l.b16 %v6034_v42  ;;  %v6538_v1 = vrot.slane %v6531_v59, %v12200_v31  ;;  %v6050_v17 = vrot.slane %v6036_v23, %v12200_v31  ;;  %v3162_v37 = vrot.slane %v15076_v63, %v12293_v22 }
 0x473   :  { %v7377_v25 = vrot.slane %v16145_v12, %v16164_v20  ;;  %v6059_v15 = vcombine.low %v3150_v29, %v3158_v30  ;;  %v7368_v51 = vsel %vm7118_vm12, %v7367_v36, %v7363_v11  ;;  %v7372_v32 = vrot.slane %v16161_v53, %v16269_v62 }
 0x474   :  { %6986 = vperm.xlu1 %10389, %v6645_v38   ;;  %v6666_v47 = vunpack.c.l.b16 %v6538_v1  ;;  %v6051_v3 = vcombine.low %v6043_v26, %v6050_v17  ;;  %v6060_v45 = vcombine.low %v3154_v50, %v3162_v37  ;;  %v3166_v13 = vrot.slane %v15076_v63, %v12139_v14  ;;  %v17125_v26 = vld [vmem:[#allocation5_spill] sm:$0xff]  ;;  %v16470_v37 = vpop.permute.xlu1 %6902 }
 0x475   :  { %v6067_v34 = vrot.slane %v6059_v15, %v12200_v31  ;;  %v7373_v19 = vsel %vm7125_vm14, %v7372_v32, %v7368_v51  ;;  %v3170_v12 = vrot.slane %v15076_v63, %v12142_v41  ;;  %v3174_v36 = vrot.slane %v15076_v63, %v12145_v46  ;;  %v17126_v50 = vld [vmem:[#allocation29_spill] sm:$0xff] }
 0x476   :  { %v7387_v53 = vrot.slane %v16178_v5, %v16200_v35  ;;  %7049 = vperm.xlu0 %10388, %v6666_v47   ;;  %v6058_v39 = vrot.slane %v6051_v3, %v12200_v31  ;;  %v6074_v42 = vrot.slane %v6060_v45, %v12200_v31  ;;  %v3178_v59 = vrot.slane %v15076_v63, %v12153_v52  ;;  %v17127_v45 = vld [vmem:[#allocation59_spill] sm:$0xff] }
 0x477   :  { %v6083_v23 = vcombine.low %v3166_v13, %v3174_v36  ;;  %v7378_v29 = vsel %vm7132_vm6, %v7377_v25, %v7373_v19  ;;  %v7382_v11 = vrot.slane %v17125_v26, %v16277_v18  ;;  %v3182_v30 = vrot.slane %v17126_v50, %v12270_v55 }
 0x478   :  { %v6646_v38 = vunpack.c.l.b16 %v6058_v39  ;;  %v6075_v1 = vcombine.low %v6067_v34, %v6074_v42  ;;  %v6084_v5 = vcombine.low %v3170_v12, %v3178_v59  ;;  %v3186_v17 = vrot.slane %v17126_v50, %v12273_v60 }
 0x479   :  { %v6091_v15 = vrot.slane %v6083_v23, %v12200_v31  ;;  %v7383_v63 = vsel %vm7139_vm15, %v7382_v11, %v7378_v29  ;;  %v3190_v25 = vrot.slane %v17126_v50, %v12290_v0  ;;  %v3194_v51 = vrot.slane %v17126_v50, %v12293_v22  ;;  %v6912_v0 = vpop.permute.xlu0 %6911  ;;  %v6909_v29 = vpop.permute.xlu1 %6908 }
 0x47a   :  { %vm7153_vm2 = vcmask 982912   ;;  %6989 = vperm.xlu1 %10389, %v6646_v38   ;;  %v6082_v55 = vrot.slane %v6075_v1, %v12200_v31  ;;  %v6098_v32 = vrot.slane %v6084_v5, %v12200_v31  ;;  %v7388_v60 = vsel %vm7146_vm1, %v7387_v53, %v7383_v63 }
 0x47b   :  { %v6107_v47 = vcombine.low %v3182_v30, %v3190_v25  ;;  %v6108_v3 = vcombine.low %v3186_v17, %v3194_v51  ;;  %v7392_v13 = vrot.slane %v17127_v45, %v16285_v7  ;;  %v3198_v34 = vrot.slane %v17126_v50, %v12139_v14  ;;  %v17129_v30 = vld [vmem:[#allocation61_spill] sm:$0xff] }
 0x47c   :  { %v6647_v19 = vunpack.c.l.b16 %v6082_v55  ;;  %v6099_v12 = vcombine.low %v6091_v15, %v6098_v32  ;;  %v3202_v22 = vrot.slane %v17126_v50, %v12142_v41  ;;  %v3206_v36 = vrot.slane %v17126_v50, %v12145_v46  ;;  %v17128_v41 = vld [vmem:[#allocation60_spill] sm:$0xff] }
 0x47d   :  { %v6115_v39 = vrot.slane %v6107_v47, %v12200_v31  ;;  %v6122_v53 = vrot.slane %v6108_v3, %v12200_v31  ;;  %v16492_v42 = vsel %vm7153_vm2, %v7392_v13, %v7388_v60  ;;  %v3210_v59 = vrot.slane %v17126_v50, %v12153_v52  ;;  %v6918_v51 = vpop.permute.xlu0 %6917  ;;  %v17130_v13 = vld [vmem:[#allocation51_spill] sm:$0xff] }
 0x47e   :  { %6992 = vperm.xlu1 %10389, %v6647_v19   ;;  %v6106_v14 = vrot.slane %v6099_v12, %v12200_v31  ;;  %v6131_v23 = vcombine.low %v3198_v34, %v3206_v36  ;;  %v7406_v26 = vrot.slane %v17128_v41, %v15837_v61  ;;  %v7402_v38 = vrot.slane %v17129_v30, %v15944_v54 }
 0x47f   :  { %v6123_v11 = vcombine.low %v6115_v39, %v6122_v53  ;;  %v6132_v46 = vcombine.low %v3202_v22, %v3210_v59  ;;  %v7416_v1 = vrot.slane %v16272_v44, %v16094_v16  ;;  %v7411_v52 = vrot.slane %v16288_v58, %v15896_v43 }
 0x480   :  { %v6648_v5 = vunpack.c.l.b16 %v6106_v14  ;;  %v6139_v17 = vrot.slane %v6131_v23, %v12200_v31  ;;  %v7407_v63 = vsel %vm7062_vm9, %v7406_v26, %v7402_v38  ;;  %v7421_v25 = vrot.slane %v16321_v10, %v16150_v40  ;;  %v6915_v10 = vpop.permute.xlu1 %6914  ;;  %v17132_v38 = vld [vmem:[#allocation6_spill] sm:$0xff] }
 0x481   :  { %v6130_v50 = vrot.slane %v6123_v11, %v12200_v31  ;;  %v6146_v15 = vrot.slane %v6132_v46, %v12200_v31  ;;  %v7412_v55 = vsel %vm7069_vm8, %v7411_v52, %v7407_v63  ;;  %v7431_v44 = vrot.slane %v16351_v57, %v16209_v2 }
 0x482   :  { %6995 = vperm.xlu1 %10389, %v6648_v5   ;;  %v7426_v32 = vrot.slane %v16307_v27, %v16170_v21  ;;  %v7417_v60 = vsel %vm7076_vm10, %v7416_v1, %v7412_v55  ;;  %v7441_v45 = vrot.slane %v16380_v56, %v16266_v8  ;;  %v7155_v34 = vadd.s32 4294967176, %v17130_v13 }
 0x483   :  { %v6147_v58 = vcombine.low %v6139_v17, %v6146_v15  ;;  %v6649_v47 = vunpack.c.l.b16 %v6130_v50  ;;  %v7422_v3 = vsel %vm7083_vm5, %v7421_v25, %v7417_v60  ;;  %v7436_v19 = vrot.slane %v16336_v49, %v16220_v33 }
 0x484   :  { %v7427_v12 = vsel %vm7090_vm11, %v7426_v32, %v7422_v3  ;;  %v7485_v22 = vrot.slane %v6912_v0, %v15837_v61  ;;  %v7451_v36 = vrot.slane %v16409_v48, %v16269_v62  ;;  %v7481_v56 = vrot.slane %v6909_v29, %v15944_v54  ;;  %v17131_v29 = vld [vmem:[#allocation26_spill] sm:$0xff]  ;;  %v6921_v17 = vpop.permute.xlu1 %6920  ;;  %v17133_v32 = vld [vmem:[#allocation40_spill] sm:$0xff] }
 0x485   :  { %v6154_v57 = vrot.slane %v6147_v58, %v12200_v31  ;;  %v7432_v27 = vsel %vm7097_vm0, %v7431_v44, %v7427_v12  ;;  %v7446_v39 = vrot.slane %v16365_v24, %v16110_v9  ;;  %v7495_v49 = vrot.slane %v6918_v51, %v16094_v16  ;;  %v6924_v31 = vpop.permute.xlu0 %6923 }
 0x486   :  { %6998 = vperm.xlu1 %10389, %v6649_v47   ;;  %v7437_v53 = vsel %vm7104_vm13, %v7436_v19, %v7432_v27  ;;  %v7490_v59 = vrot.slane %v6915_v10, %v15896_v43  ;;  %v7461_v0 = vrot.slane %v16440_v4, %v16277_v18  ;;  %v7486_v48 = vsel %vm7062_vm9, %v7485_v22, %v7481_v56  ;;  %v17135_v47 = vld [vmem:[#allocation11_spill] sm:$0xff]  ;;  %v17137_v27 = vld [vmem:[#allocation25_spill] sm:$0xff] }
 0x487   :  { %v6650_v14 = vunpack.c.l.b16 %v6154_v57  ;;  %v7442_v23 = vsel %vm7111_vm3, %v7441_v45, %v7437_v53  ;;  %v7456_v41 = vrot.slane %v17131_v29, %v16164_v20  ;;  %v7471_v46 = vrot.slane %v16470_v37, %v16285_v7  ;;  %v17136_v10 = vld [vmem:[#allocation31_spill] sm:$0xff]  ;;  %v17138_v56 = vld [vmem:[#allocation17_spill] sm:$0xff] }
 0x488   :  { %v7447_v24 = vsel %vm7118_vm12, %v7446_v39, %v7442_v23  ;;  %v7491_v26 = vsel %vm7069_vm8, %v7490_v59, %v7486_v48  ;;  %v16548_v1 = vsub.s32 %v7155_v34, %v17132_v38  ;;  %v7466_v4 = vrot.slane %v16425_v6, %v16200_v35  ;;  %v17140_v59 = vld [vmem:[#allocation12_spill] sm:$0xff] }
 0x489   :  { %v7452_v11 = vsel %vm7125_vm14, %v7451_v36, %v7447_v24  ;;  %v7496_v30 = vsel %vm7076_vm10, %v7495_v49, %v7491_v26  ;;  %v7500_v50 = vrot.slane %v6921_v17, %v16150_v40  ;;  %v7505_v37 = vrot.slane %v6924_v31, %v16170_v21  ;;  %v6930_v63 = vpop.permute.xlu0 %6929  ;;  %v17139_v49 = vld [vmem:[#allocation27_spill] sm:$0xff]  ;;  %v17141_v48 = vld [vmem:[#allocation8_spill] sm:$0xff] }
 0x48a   :  { %7001 = vperm.xlu1 %10389, %v6650_v14   ;;  %v7457_v5 = vsel %vm7132_vm6, %v7456_v41, %v7452_v11  ;;  %v7476_v15 = vrot.slane %v16455_v28, %v16548_v1  ;;  %vm7160_vm4 = vcmask 1048512   ;;  %v7165_v58 = vrot.slane %v17133_v32, %v15944_v54  ;;  %v17134_v28 = vld [vmem:[#allocation41_spill] sm:$0xff]  ;;  %v17142_v41 = vld [vmem:[#allocation28_spill] sm:$0xff] }
 0x48b   :  { %v7462_v52 = vsel %vm7139_vm15, %v7461_v0, %v7457_v5  ;;  %v7501_v6 = vsel %vm7083_vm5, %v7500_v50, %v7496_v30  ;;  %v7174_v60 = vrot.slane %v17134_v28, %v15896_v43  ;;  %v7169_v3 = vrot.slane %v17135_v47, %v15837_v61  ;;  %v6927_v45 = vpop.permute.xlu1 %6926  ;;  %v17144_v5 = vld [vmem:[#allocation18_spill] sm:$0xff]  ;;  %v17147_v32 = vld [vmem:[#allocation32_spill] sm:$0xff] }
 0x48c   :  { %v7467_v25 = vsel %vm7146_vm1, %v7466_v4, %v7462_v52  ;;  %v7506_v44 = vsel %vm7090_vm11, %v7505_v37, %v7501_v6  ;;  %v7056_v13 = vrot.slane %v17136_v10, %v15944_v54  ;;  %v7510_v19 = vrot.slane %v6927_v45, %v16209_v2  ;;  %v17145_v37 = vld [vmem:[#allocation30_spill] sm:$0xff] }
 0x48d   :  { %v7472_v51 = vsel %vm7153_vm2, %v7471_v46, %v7467_v25  ;;  %v6936_v34 = vpop.permute.xlu0 %6935  ;;  %v7170_v57 = vsel %vm7062_vm9, %v7169_v3, %v7165_v58  ;;  %v7515_v12 = vrot.slane %v6930_v63, %v16220_v33  ;;  %v7061_v22 = vrot.slane %v17137_v27, %v15837_v61  ;;  %v17143_v46 = vld [vmem:[#allocation9_spill] sm:$0xff]  ;;  %v17146_v25 = vld [vmem:[#allocation42_spill] sm:$0xff]  ;;  %v17150_v27 = vld [vmem:[#allocation43_spill] sm:$0xff] }
 0x48e   :  { %v16562_v55 = vsel %vm7160_vm4, %v7476_v15, %v7472_v51  ;;  %v7175_v36 = vsel %vm7069_vm8, %v7174_v60, %v7170_v57  ;;  %v7184_v39 = vrot.slane %v17138_v56, %v16150_v40  ;;  %v7511_v53 = vsel %vm7097_vm0, %v7510_v19, %v7506_v44  ;;  %v17148_v47 = vld [vmem:[#allocation34_spill] sm:$0xff]  ;;  %v17149_v19 = vld [vmem:[#allocation45_spill] sm:$0xff] }
 0x48f   :  { %v7068_v31 = vrot.slane %v17139_v49, %v15896_v43  ;;  %v7179_v14 = vrot.slane %v17140_v59, %v16094_v16  ;;  %v7516_v23 = vsel %vm7104_vm13, %v7515_v12, %v7511_v53  ;;  %v7063_v0 = vsel %vm7062_vm9, %v7061_v22, %v7056_v13  ;;  %v17151_v49 = vld [vmem:[#allocation36_spill] sm:$0xff] }
 0x490   :  { %v7075_v29 = vrot.slane %v17141_v48, %v16094_v16  ;;  %v7082_v24 = vrot.slane %v17142_v41, %v16150_v40  ;;  %v7089_v30 = vrot.slane %v17143_v46, %v16170_v21  ;;  %v7194_v17 = vrot.slane %v17144_v5, %v16209_v2 }
 0x491   :  { %v7180_v26 = vsel %vm7076_vm10, %v7179_v14, %v7175_v36  ;;  %v6942_v52 = vpop.permute.xlu0 %6941  ;;  %v7070_v15 = vsel %vm7069_vm8, %v7068_v31, %v7063_v0  ;;  %v7096_v63 = vrot.slane %v17145_v37, %v16209_v2  ;;  %v7189_v51 = vrot.slane %v17146_v25, %v16170_v21  ;;  %v17156_v37 = vld [vmem:[#allocation35_spill] sm:$0xff] }
 0x492   :  { %v6933_v11 = vpop.permute.xlu1 %6932  ;;  %v7185_v4 = vsel %vm7083_vm5, %v7184_v39, %v7180_v26  ;;  %v7525_v6 = vrot.slane %v6936_v34, %v16110_v9  ;;  %v7077_v44 = vsel %vm7076_vm10, %v7075_v29, %v7070_v15  ;;  %v7103_v58 = vrot.slane %v17147_v32, %v16220_v33  ;;  %v17153_v29 = vld [vmem:[#allocation46_spill] sm:$0xff]  ;;  %v17154_v26 = vld [vmem:[#allocation44_spill] sm:$0xff]  ;;  %v17157_v25 = vld [vmem:[#allocation47_spill] sm:$0xff] }
 0x493   :  { %v7520_v50 = vrot.slane %v6933_v11, %v16266_v8  ;;  %v7084_v60 = vsel %vm7083_vm5, %v7082_v24, %v7077_v44  ;;  %v7110_v3 = vrot.slane %v17148_v47, %v16266_v8  ;;  %v7190_v45 = vsel %vm7090_vm11, %v7189_v51, %v7185_v4  ;;  %v17158_v32 = vld [vmem:[#allocation13_spill] sm:$0xff] }
 0x494   :  { %v7091_v13 = vsel %vm7090_vm11, %v7089_v30, %v7084_v60  ;;  %v7195_v34 = vsel %vm7097_vm0, %v7194_v17, %v7190_v45  ;;  %v7204_v57 = vrot.slane %v17149_v19, %v16266_v8  ;;  %v7199_v22 = vrot.slane %v17150_v27, %v16220_v33  ;;  %v17155_v17 = vld [vmem:[#allocation10_spill] sm:$0xff] }
 0x495   :  { %v7521_v28 = vsel %vm7111_vm3, %v7520_v50, %v7516_v23  ;;  %v7098_v12 = vsel %vm7097_vm0, %v7096_v63, %v7091_v13  ;;  %v6948_v56 = vpop.permute.xlu0 %6947  ;;  %v7124_v31 = vrot.slane %v17151_v49, %v16269_v62  ;;  %v17152_v23 = vld [vmem:[#allocation33_spill] sm:$0xff]  ;;  %v7214_v41 = vrot.slane %v17153_v29, %v16269_v62  ;;  %v17159_v13 = vld [vmem:[#allocation39_spill] sm:$0xff] }
 0x496   :  { %v7526_v10 = vsel %vm7118_vm12, %v7525_v6, %v7521_v28  ;;  %v7105_v36 = vsel %vm7104_vm13, %v7103_v58, %v7098_v12  ;;  %v7200_v59 = vsel %vm7104_vm13, %v7199_v22, %v7195_v34  ;;  %v7117_v0 = vrot.slane %v17152_v23, %v16110_v9  ;;  %v17161_v22 = vld [vmem:[#allocation37_spill] sm:$0xff] }
 0x497   :  { %v7112_v53 = vsel %vm7111_vm3, %v7110_v3, %v7105_v36  ;;  %v7205_v48 = vsel %vm7111_vm3, %v7204_v57, %v7200_v59  ;;  %v7535_v24 = vrot.slane %v6942_v52, %v16164_v20  ;;  %v7209_v11 = vrot.slane %v17154_v26, %v16110_v9  ;;  %v17160_v57 = vld [vmem:[#allocation14_spill] sm:$0xff] }
 0x498   :  { %v7119_v30 = vsel %vm7118_vm12, %v7117_v0, %v7112_v53  ;;  %v7138_v50 = vrot.slane %v17155_v17, %v16277_v18  ;;  %v7131_v63 = vrot.slane %v17156_v37, %v16164_v20  ;;  %v7224_v51 = vrot.slane %v17157_v25, %v16277_v18 }
 0x499   :  { %v7126_v5 = vsel %vm7125_vm14, %v7124_v31, %v7119_v30  ;;  %v7210_v15 = vsel %vm7118_vm12, %v7209_v11, %v7205_v48  ;;  %v6954_v6 = vpop.permute.xlu0 %6953  ;;  %v7219_v58 = vrot.slane %v17158_v32, %v16164_v20  ;;  %v7545_v47 = vrot.slane %v6948_v56, %v16200_v35  ;;  %v17162_v56 = vld [vmem:[#allocation19_spill] sm:$0xff]  ;;  %v17163_v48 = vld [vmem:[#allocation38_spill] sm:$0xff] }
 0x49a   :  { %v6939_v39 = vpop.permute.xlu1 %6938  ;;  %v7215_v52 = vsel %vm7125_vm14, %v7214_v41, %v7210_v15  ;;  %v7133_v60 = vsel %vm7132_vm6, %v7131_v63, %v7126_v5  ;;  %v7152_v34 = vrot.slane %v17159_v13, %v16285_v7  ;;  %v7234_v12 = vrot.slane %v17160_v57, %v16285_v7  ;;  %v17164_v41 = vld [vmem:[#allocation48_spill] sm:$0xff] }
 0x49b   :  { %v7530_v14 = vrot.slane %v6939_v39, %v16269_v62  ;;  %v7140_v3 = vsel %vm7139_vm15, %v7138_v50, %v7133_v60  ;;  %v7220_v45 = vsel %vm7132_vm6, %v7219_v58, %v7215_v52  ;;  %v7145_v36 = vrot.slane %v17161_v22, %v16200_v35 }
 0x49c   :  { %v7225_v19 = vsel %vm7139_vm15, %v7224_v51, %v7220_v45  ;;  %v7229_v39 = vrot.slane %v17162_v56, %v16200_v35  ;;  %v7159_v29 = vrot.slane %v17163_v48, %v16548_v1  ;;  %v7555_v26 = vrot.slane %v6954_v6, %v16548_v1 }
 0x49d   :  { %v7531_v46 = vsel %vm7125_vm14, %v7530_v14, %v7526_v10  ;;  %v16665_v53 = vpop.permute.xlu0 %6959  ;;  %v7147_v49 = vsel %vm7146_vm1, %v7145_v36, %v7140_v3  ;;  %vm7715_vm7 = vcmask 1041409  }
 0x49e   :  { %v7536_v4 = vsel %vm7132_vm6, %v7535_v24, %v7531_v46  ;;  %v7230_v31 = vsel %vm7146_vm1, %v7229_v39, %v7225_v19  ;;  %v7154_v14 = vsel %vm7153_vm2, %v7152_v34, %v7147_v49  ;;  %v7239_v24 = vrot.slane %v17164_v41, %v16548_v1  ;;  %v17165_v39 = vld [vmem:[#allocation15_spill] sm:$0xff] }
 0x49f   :  { %v7235_v23 = vsel %vm7153_vm2, %v7234_v12, %v7230_v31  ;;  %v7161_v46 = vsel %vm7160_vm4, %v7159_v29, %v7154_v14  ;;  %v7244_v49 = vrot.slane %v17165_v39, %v15944_v54  ;;  %v17166_v31 = vld [vmem:[#allocation16_spill] sm:$0xff]  ;;  %v7564_v39 = vrot.slane %v16665_v53, %v15837_v61  ;;  %v17172_v53 = vld [vmem:[#allocation55_spill] sm:$0xff] }
 0x4a0   :  { %v7240_v30 = vsel %vm7160_vm4, %v7239_v24, %v7235_v23  ;;  %v16685_v17 = vsel %vm7715_vm7, %v16562_v55, %v7161_v46  ;;  %v17167_v23 = vld [vmem:[#allocation49_spill] sm:$0xff] }
 0x4a1   :  { %v6945_v44 = vpop.permute.xlu1 %6944  ;;  %v16681_v5 = vpop.permute.xlu0 %6965 }
 0x4a2   :  { %v7540_v28 = vrot.slane %v6945_v44, %v16277_v18 }
 0x4a4   :  { %v7541_v10 = vsel %vm7139_vm15, %v7540_v28, %v7536_v4 }
 0x4a5   :  { %v7546_v27 = vsel %vm7146_vm1, %v7545_v47, %v7541_v10  ;;  %v16692_v37 = vpop.permute.xlu0 %6971 }
 0x4a8   :  { %v6951_v59 = vpop.permute.xlu1 %6950 }
 0x4a9   :  { %v7550_v0 = vrot.slane %v6951_v59, %v16285_v7  ;;  %v16694_v52 = vpop.permute.xlu0 %6977  ;;  %v7253_v59 = vrot.slane %v17166_v31, %v15896_v43 }
 0x4ab   :  { %v7551_v11 = vsel %vm7153_vm2, %v7550_v0, %v7546_v27  ;;  %v7248_v0 = vrot.slane %v17167_v23, %v15837_v61  ;;  %v7283_v23 = vrot.slane %v17172_v53, %v16266_v8 }
 0x4ac   :  { %v7556_v4 = vsel %vm7160_vm4, %v7555_v26, %v7551_v11 }
 0x4ad   :  { %v16688_v50 = vsel %vm7715_vm7, %v7556_v4, %v7240_v30  ;;  %v16696_v51 = vpop.permute.xlu0 %6983  ;;  %v7249_v11 = vsel %vm7062_vm9, %v7248_v0, %v7244_v49  ;;  %v17168_v30 = vld [vmem:[#allocation20_spill] sm:$0xff]  ;;  %v7574_v0 = vrot.slane %v16681_v5, %v16094_v16 }
 0x4ae   :  { %v7720_v15 = vpack.c.b16 %v16688_v50, %v16685_v17  ;;  %v7254_v46 = vsel %vm7069_vm8, %v7253_v59, %v7249_v11  ;;  %v7263_v4 = vrot.slane %v17168_v30, %v16150_v40 }
 0x4af   :  { %v6957_v63 = vpop.permute.xlu1 %6956 }
 0x4b2   :  { %v7008_v44 = vpop.permute.xlu0 %7007 }
 0x4b3   :  { %v7643_v19 = vrot.slane %v7008_v44, %v15837_v61 }
 0x4b5   :  { %v6963_v25 = vpop.permute.xlu1 %6962 }
 0x4b8   :  { %v7014_v55 = vpop.permute.xlu0 %7013 }
 0x4b9   :  { %v7653_v56 = vrot.slane %v7014_v55, %v16094_v16  ;;  %v17169_v55 = vld [vmem:[#allocation50_spill] sm:$0xff] }
 0x4bc   :  { %v16698_v6 = vpop.permute.xlu1 %6968 }
 0x4be   :  { %v7020_v28 = vpop.permute.xlu0 %7019 }
 0x4bf   :  { %v7663_v26 = vrot.slane %v7020_v28, %v16170_v21 }
 0x4c3   :  { %v16700_v32 = vpop.permute.xlu1 %6974 }
 0x4c4   :  { %v7589_v30 = vrot.slane %v16700_v32, %v16209_v2 }
 0x4c5   :  { %v7026_v47 = vpop.permute.xlu0 %7025 }
 0x4c6   :  { %v7673_v28 = vrot.slane %v7026_v47, %v16220_v33 }
 0x4c9   :  { %v16702_v58 = vpop.permute.xlu1 %6980 }
 0x4ca   :  { %v7032_v45 = vpop.permute.xlu0 %7031 }
 0x4d0   :  { %v7005_v60 = vpop.permute.xlu1 %7004 }
 0x4d1   :  { %v7639_v13 = vrot.slane %v7005_v60, %v15944_v54  ;;  %v7258_v60 = vrot.slane %v17169_v55, %v16094_v16 }
 0x4d2   :  { %v7035_v57 = vpop.permute.xlu0 %7034 }
 0x4d3   :  { %v7644_v27 = vsel %vm7062_vm9, %v7643_v19, %v7639_v13  ;;  %v7560_v13 = vrot.slane %v6957_v63, %v15944_v54  ;;  %v7569_v19 = vrot.slane %v6963_v25, %v15896_v43  ;;  %v17171_v54 = vld [vmem:[#allocation52_spill] sm:$0xff]  ;;  %v7683_v25 = vrot.slane %v7032_v45, %v16110_v9 }
 0x4d4   :  { %v7268_v63 = vrot.slane %v17171_v54, %v16170_v21 }
 0x4d6   :  { %v7011_v3 = vpop.permute.xlu1 %7010 }
 0x4d7   :  { %v7648_v34 = vrot.slane %v7011_v3, %v15896_v43  ;;  %v7565_v43 = vsel %vm7062_vm9, %v7564_v39, %v7560_v13 }
 0x4d8   :  { %v7038_v48 = vpop.permute.xlu0 %7037  ;;  %v7570_v59 = vsel %vm7069_vm8, %v7569_v19, %v7565_v43 }
 0x4d9   :  { %v7649_v22 = vsel %vm7069_vm8, %v7648_v34, %v7644_v27  ;;  %v7259_v34 = vsel %vm7076_vm10, %v7258_v60, %v7254_v46  ;;  %v7575_v46 = vsel %vm7076_vm10, %v7574_v0, %v7570_v59  ;;  %v7693_v55 = vrot.slane %v7038_v48, %v16164_v20  ;;  %v17175_v60 = vld [vmem:[#allocation21_spill] sm:$0xff] }
 0x4da   :  { %v7654_v14 = vsel %vm7076_vm10, %v7653_v56, %v7649_v22  ;;  %v7264_v22 = vsel %vm7083_vm5, %v7263_v4, %v7259_v34  ;;  %v17174_v4 = vld [vmem:[#allocation56_spill] sm:$0xff]  ;;  %v7599_v34 = vrot.slane %v16702_v58, %v16266_v8  ;;  %v7594_v48 = vrot.slane %v16694_v52, %v16220_v33 }
 0x4db   :  { %v7269_v31 = vsel %vm7090_vm11, %v7268_v63, %v7264_v22  ;;  %v17176_v22 = vld [vmem:[#allocation22_spill] sm:$0xff]  ;;  %v7604_v52 = vrot.slane %v16696_v51, %v16110_v9 }
 0x4dd   :  { %v7017_v10 = vpop.permute.xlu1 %7016 }
 0x4de   :  { %v7658_v36 = vrot.slane %v7017_v10, %v16150_v40 }
 0x4e0   :  { %v7659_v29 = vsel %vm7083_vm5, %v7658_v36, %v7654_v14  ;;  %v17170_v36 = vld [vmem:[#allocation54_spill] sm:$0xff]  ;;  %v7579_v14 = vrot.slane %v16698_v6, %v16150_v40 }
 0x4e1   :  { %v7664_v44 = vsel %vm7090_vm11, %v7663_v26, %v7659_v29  ;;  %v7273_v56 = vrot.slane %v17170_v36, %v16209_v2  ;;  %v7298_v36 = vrot.slane %v17176_v22, %v16164_v20 }
 0x4e2   :  { %v7580_v6 = vsel %vm7083_vm5, %v7579_v14, %v7575_v46  ;;  %v17178_v14 = vld [vmem:[#allocation58_spill] sm:$0xff]  ;;  %v17180_v46 = vld [vmem:[#allocation24_spill] sm:$0xff] }
 0x4e3   :  { %v7274_v61 = vsel %vm7097_vm0, %v7273_v56, %v7269_v31  ;;  %v17177_v56 = vld [vmem:[#allocation57_spill] sm:$0xff] }
 0x4e4   :  { %v7023_v12 = vpop.permute.xlu1 %7022  ;;  %v7303_v39 = vrot.slane %v17177_v56, %v16277_v18 }
 0x4e5   :  { %v7668_v41 = vrot.slane %v7023_v12, %v16209_v2  ;;  %v7041_v12 = vpop.permute.xlu0 %7040 }
 0x4e6   :  { %v7698_v19 = vrot.slane %v7041_v12, %v16277_v18 }
 0x4e7   :  { %v7669_v3 = vsel %vm7097_vm0, %v7668_v41, %v7664_v44  ;;  %v17173_v41 = vld [vmem:[#allocation53_spill] sm:$0xff]  ;;  %v7293_v44 = vrot.slane %v17174_v4, %v16269_v62 }
 0x4e8   :  { %v7674_v49 = vsel %vm7104_vm13, %v7673_v28, %v7669_v3  ;;  %v7278_v45 = vrot.slane %v17173_v41, %v16220_v33  ;;  %v7288_v3 = vrot.slane %v17175_v60, %v16110_v9 }
 0x4e9   :  { %v7044_v26 = vpop.permute.xlu0 %7043 }
 0x4ea   :  { %v7279_v40 = vsel %vm7104_vm13, %v7278_v45, %v7274_v61  ;;  %v7313_v61 = vrot.slane %v17178_v14, %v16285_v7 }
 0x4eb   :  { %v7029_v24 = vpop.permute.xlu1 %7028  ;;  %v7284_v5 = vsel %vm7111_vm3, %v7283_v23, %v7279_v40  ;;  %v7318_v40 = vrot.slane %v17180_v46, %v16548_v1 }
 0x4ec   :  { %v7678_v10 = vrot.slane %v7029_v24, %v16266_v8  ;;  %v7688_v24 = vrot.slane %v7035_v57, %v16269_v62  ;;  %v7584_v57 = vrot.slane %v16692_v37, %v16170_v21  ;;  %v7289_v32 = vsel %vm7118_vm12, %v7288_v3, %v7284_v5 }
 0x4ed   :  { %v7294_v37 = vsel %vm7125_vm14, %v7293_v44, %v7289_v32  ;;  %v7703_v8 = vrot.slane %v7044_v26, %v16200_v35 }
 0x4ee   :  { %v7679_v47 = vsel %vm7111_vm3, %v7678_v10, %v7674_v49  ;;  %v7585_v13 = vsel %vm7090_vm11, %v7584_v57, %v7580_v6  ;;  %v7047_v21 = vpop.permute.xlu0 %7046  ;;  %v7299_v58 = vsel %vm7132_vm6, %v7298_v36, %v7294_v37 }
 0x4ef   :  { %v7684_v29 = vsel %vm7118_vm12, %v7683_v25, %v7679_v47  ;;  %v7590_v28 = vsel %vm7097_vm0, %v7589_v30, %v7585_v13  ;;  %v10928_v25 = vmov 1966171168   ;;  %v7304_v59 = vsel %vm7139_vm15, %v7303_v39, %v7299_v58 }
 0x4f0   :  { %v7689_v16 = vsel %vm7125_vm14, %v7688_v24, %v7684_v29  ;;  %v7595_v63 = vsel %vm7104_vm13, %v7594_v48, %v7590_v28  ;;  %v7723_v31 = vunpack.c.l.s4 %v10928_v25  ;;  %v7708_v53 = vrot.slane %v7047_v21, %v16285_v7 }
 0x4f1   :  { %v7694_v2 = vsel %vm7132_vm6, %v7693_v55, %v7689_v16  ;;  %v7600_v12 = vsel %vm7111_vm3, %v7599_v34, %v7595_v63  ;;  %v17181_v16 = vld [vmem:[#allocation7_spill] sm:$0xff] }
 0x4f2   :  { %v7699_v49 = vsel %vm7139_vm15, %v7698_v19, %v7694_v2  ;;  %v7605_v51 = vsel %vm7118_vm12, %v7604_v52, %v7600_v12  ;;  %v7397_v5 = vrot.slane %v17181_v16, %v16548_v1 }
 0x4f3   :  { %v16734_v27 = vpop.permute.xlu1 %6986  ;;  %v7704_v47 = vsel %vm7146_vm1, %v7703_v8, %v7699_v49 }
 0x4f4   :  { %v7609_v33 = vrot.slane %v16734_v27, %v16269_v62  ;;  %v17179_v27 = vld [vmem:[#allocation23_spill] sm:$0xff]  ;;  %v7709_v29 = vsel %vm7153_vm2, %v7708_v53, %v7704_v47  ;;  %v7398_v60 = vsel %vm7160_vm4, %v7397_v5, %v16492_v42 }
 0x4f5   :  { %v7050_v23 = vpop.permute.xlu0 %7049  ;;  %v7308_v9 = vrot.slane %v17179_v27, %v16200_v35 }
 0x4f6   :  { %v7610_v41 = vsel %vm7125_vm14, %v7609_v33, %v7605_v51  ;;  %v7713_v26 = vrot.slane %v7050_v23, %v16548_v1 }
 0x4f7   :  { %v7309_v24 = vsel %vm7146_vm1, %v7308_v9, %v7304_v59 }
 0x4f8   :  { %v7314_v6 = vsel %vm7153_vm2, %v7313_v61, %v7309_v24 }
 0x4f9   :  { %v6990_v11 = vpop.permute.xlu1 %6989  ;;  %v7319_v55 = vsel %vm7160_vm4, %v7318_v40, %v7314_v6 }
 0x4fa   :  { %v7614_v43 = vrot.slane %v6990_v11, %v16164_v20  ;;  %v7724_v11 = vunpack.c.0.s8 %v7723_v31 }
 0x4fd   :  { %v6993_v10 = vpop.permute.xlu1 %6992 }
 0x4fe   :  { %v7619_v0 = vrot.slane %v6993_v10, %v16277_v18  ;;  %v7615_v18 = vsel %vm7132_vm6, %v7614_v43, %v7610_v41  ;;  %v7727_v10 = vsub.s32 %v7724_v11, %v17132_v38 }
 0x501   :  { %v6996_v54 = vpop.permute.xlu1 %6995 }
 0x502   :  { %v7624_v20 = vrot.slane %v6996_v54, %v16200_v35  ;;  %v7620_v35 = vsel %vm7139_vm15, %v7619_v0, %v7615_v18 }
 0x504   :  { %v7625_v4 = vsel %vm7146_vm1, %v7624_v20, %v7620_v35 }
 0x505   :  { %v6999_v62 = vpop.permute.xlu1 %6998 }
 0x506   :  { %v7629_v45 = vrot.slane %v6999_v62, %v16285_v7  ;;  %v7714_v7 = vsel %vm7160_vm4, %v7713_v26, %v7709_v29 }
 0x507   :  { %v7719_v2 = vsel %vm7715_vm7, %v7714_v7, %v7398_v60 }
 0x508   :  { %v7630_v57 = vsel %vm7153_vm2, %v7629_v45, %v7625_v4 }
 0x509   :  { %v7002_v30 = vpop.permute.xlu1 %7001 }
 0x50a   :  { %v7634_v44 = vrot.slane %v7002_v30, %v16548_v1  ;;  %v7728_v1 = vrot.slane %v7720_v15, %v7727_v10 }
 0x50c   :  { %v7635_v3 = vsel %vm7160_vm4, %v7634_v44, %v7630_v57 }
 0x50d   :  { %v7718_v13 = vsel %vm7715_vm7, %v7635_v3, %v7319_v55 }
 0x50e   :  { %v7721_v32 = vpack.c.b16 %v7719_v2, %v7718_v13 }
 0x510   :  { %v7735_v28 = vrot.slane %v7721_v32, %v7727_v10 }
 0x512   :  { %v7736_v34 = vcombine.low %v7728_v1, %v7735_v28 }
 0x514   :  { %7760 = vst.sshfl [vmem:[#allocation2] sm:$0x55 pattern:$0x73625140] %v7736_v34 }
 0x515   :  { %10913 = shalt.err (!%p10910_p4)
}
 0x516   :  { %s10914_s22 = scalar_lea.hbm %s16847_s1, 64 }
 0x517   :  { %p10915_p5 = scmp.ne.s32.totalorder %s16847_s1, %s10914_s22  ;;  %p10918_p6 = scmp.lt.u32.totalorder %s10914_s22, %s16847_s1 }
 0x519   :  { %p10920_p7 = pnand %p10918_p6, %p10915_p5 }
 0x51b   :  { %10923 = shalt.err (!%p10920_p7)
}
 0x51c   :  { %7755 = dma.vmem_to_hbm [thread:$0]  %s7753_s18, 64, %s16847_s1, [#allocation3]  }
 0x51d   :  { %10924 = dma.done.wait [#allocation3], 64  }
 0x51e   :  { %10925 = vsyncadd [#allocation3], 4294967232 }
 0x51f   :  { %7759 = vsyncpa [#allocation3], 1 }

</bundles_post_ra>
